<compile_context>
chip_gen: v7x
topology: tpu7x:2x2x1
jax: 0.10.0
libtpu: 0.0.40
codegen_flags: <defaults>
</compile_context>

<pallas_src>
import functools

import numpy as np

import jax
import jax.numpy as jnp
from jax import lax
from jax.experimental import pallas as pl
from jax.experimental.pallas import tpu as pltpu


# ------------------------------ kernel helpers --------------------------------

def _dot(a, b):
    return jnp.dot(a, b, preferred_element_type=jnp.float32,
                   precision=jax.lax.Precision.HIGHEST)


def _parity_selectors(half, full):
    """Exact 0/1 selection matrices (half, full): even picks rows 2j, odd 2j+1."""
    r = lax.broadcasted_iota(jnp.int32, (half, full), 0)
    c = lax.broadcasted_iota(jnp.int32, (half, full), 1)
    even = (c == 2 * r).astype(jnp.float32)
    odd = (c == 2 * r + 1).astype(jnp.float32)
    return even, odd


# --------------------------------- the kernel ---------------------------------

def _lenet_kernel(x_ref, w1e_ref, w1o_ref, b1_ref, w2e_ref, w2o_ref, b2_ref,
                  wf1_ref, bf1_ref, wf2_ref, bf2_ref, wf3_ref, bf3_ref,
                  o_ref, p1_ref, p2_ref):
    """One image (NCHW 3x32x32) end-to-end; everything stays in VMEM."""
    f32 = jnp.float32

    # ---- conv1 (3->6, 5x5, VALID) + 2x2 max-pool ----------------------------
    # Row-shift matmuls over the raw NCHW input; kw taps and the output-column
    # parity are folded into the prepared (32, 6*14) weight slabs.
    acc_e = jnp.zeros((28, 84), f32)   # [oh, oc*14 + j] == conv1[oc, oh, 2j]
    acc_o = jnp.zeros((28, 84), f32)   # [oh, oc*14 + j] == conv1[oc, oh, 2j+1]
    for c in range(3):
        for kh in range(5):
            rows = x_ref[0, c, pl.ds(kh, 28), :]            # (28, 32)
            acc_e = acc_e + _dot(rows, w1e_ref[c * 5 + kh])
            acc_o = acc_o + _dot(rows, w1o_ref[c * 5 + kh])
    wpool = jnp.maximum(acc_e, acc_o)                       # pool over W: (28, 84)
    se, so = _parity_selectors(14, 28)
    hpool = jnp.maximum(_dot(se, wpool), _dot(so, wpool))   # pool over H: (14, 84)
    p1_ref[...] = jnp.maximum(hpool + b1_ref[...], 0.0)     # layout [h, ic*14 + w]

    # ---- conv2 (6->16, 5x5, VALID) + 2x2 max-pool ----------------------------
    acc_e = jnp.zeros((10, 80), f32)   # [oh, oc*5 + j] == conv2[oc, oh, 2j]
    acc_o = jnp.zeros((10, 80), f32)
    for kh in range(5):
        rows = p1_ref[pl.ds(kh, 10), :]                     # (10, 84)
        acc_e = acc_e + _dot(rows, w2e_ref[kh])
        acc_o = acc_o + _dot(rows, w2o_ref[kh])
    wpool = jnp.maximum(acc_e, acc_o)                       # (10, 80)
    se, so = _parity_selectors(5, 10)
    hpool = jnp.maximum(_dot(se, wpool), _dot(so, wpool))   # (5, 80)
    p2_ref[...] = jnp.maximum(hpool + b2_ref[...], 0.0)     # layout [h, oc*5 + w]

    # ---- fc1 -> fc2 -> fc3 (flatten folded into fc1's per-row weight slabs) --
    h = jnp.zeros((1, 120), f32)
    for r in range(5):
        h = h + _dot(p2_ref[pl.ds(r, 1), :], wf1_ref[r])    # (1,80)@(80,120)
    h = jnp.maximum(h + bf1_ref[...], 0.0)
    h = jnp.maximum(_dot(h, wf2_ref[...]) + bf2_ref[...], 0.0)
    out = _dot(h, wf3_ref[...]) + bf3_ref[...]              # (1, 10)
    o_ref[...] = out.reshape(o_ref.shape)


# ------------------------------- wrapper / call --------------------------------

def net_forward(prep, x_nchw):
    """x_nchw: (N, 3, 32, 32) f32 -> logits (N, 10)."""
    N = x_nchw.shape[0]
    out = pl.pallas_call(
        _lenet_kernel,
        out_shape=jax.ShapeDtypeStruct((N, 1, 10), jnp.float32),
        grid=(N,),
        in_specs=[
            pl.BlockSpec((1, 3, 32, 32), lambda n: (n, 0, 0, 0)),   # image n
            pl.BlockSpec((15, 32, 84), lambda n: (0, 0, 0)),        # w1 even-cols
            pl.BlockSpec((15, 32, 84), lambda n: (0, 0, 0)),        # w1 odd-cols
            pl.BlockSpec((1, 84), lambda n: (0, 0)),                # b1 (tiled)
            pl.BlockSpec((5, 84, 80), lambda n: (0, 0, 0)),         # w2 even-cols
            pl.BlockSpec((5, 84, 80), lambda n: (0, 0, 0)),         # w2 odd-cols
            pl.BlockSpec((1, 80), lambda n: (0, 0)),                # b2 (tiled)
            pl.BlockSpec((5, 80, 120), lambda n: (0, 0, 0)),        # fc1 row slabs
            pl.BlockSpec((1, 120), lambda n: (0, 0)),               # fc1 bias
            pl.BlockSpec((120, 84), lambda n: (0, 0)),              # fc2 weight
            pl.BlockSpec((1, 84), lambda n: (0, 0)),                # fc2 bias
            pl.BlockSpec((84, 10), lambda n: (0, 0)),               # fc3 weight
            pl.BlockSpec((1, 10), lambda n: (0, 0)),                # fc3 bias
        ],
        out_specs=pl.BlockSpec((1, 1, 10), lambda n: (n, 0, 0)),
        scratch_shapes=[
            pltpu.VMEM((14, 84), jnp.float32),   # pool1 output (re-sliced by conv2)
            pltpu.VMEM((5, 80), jnp.float32),    # pool2 output (re-sliced by fc1)
        ],
        compiler_params=pltpu.CompilerParams(
            dimension_semantics=("arbitrary",)),
    )(x_nchw, prep["w1e"], prep["w1o"], prep["b1"],
      prep["w2e"], prep["w2o"], prep["b2"],
      prep["wf1"], prep["bf1"], prep["wf2"], prep["bf2"],
      prep["wf3"], prep["bf3"])
    return out.reshape(N, 10)


# -------------------- one-time host-side parameter re-layout -------------------

def _conv_row_slabs_per_cin(w, in_w):
    """w: (OC, IC, K, K) torch layout.  Returns (We, Wo), each (IC*K, in_w,
    OC*half): row-matmul slabs with kw taps and even/odd output-column parity
    folded in; the kernel feeds one input-channel plane per matmul."""
    w = np.asarray(w, np.float32)
    OC, IC, K, _ = w.shape
    half = (in_w - K + 1) // 2
    We = np.zeros((IC, K, in_w, OC * half), np.float32)
    Wo = np.zeros_like(We)
    for ic in range(IC):
        for kh in range(K):
            for oc in range(OC):
                for j in range(half):
                    for kw in range(K):
                        We[ic, kh, 2 * j + kw, oc * half + j] = w[oc, ic, kh, kw]
                        Wo[ic, kh, 2 * j + 1 + kw, oc * half + j] = w[oc, ic, kh, kw]
    return (We.reshape(IC * K, in_w, OC * half),
            Wo.reshape(IC * K, in_w, OC * half))


def _conv_row_slabs_packed_cin(w, in_w):
    """w: (OC, IC, K, K).  Returns (We, Wo), each (K, IC*in_w, OC*half), for an
    input whose rows pack all channels as [ic*in_w + w]."""
    w = np.asarray(w, np.float32)
    OC, IC, K, _ = w.shape
    half = (in_w - K + 1) // 2
    We = np.zeros((K, IC * in_w, OC * half), np.float32)
    Wo = np.zeros_like(We)
    for kh in range(K):
        for oc in range(OC):
            for ic in range(IC):
                for j in range(half):
                    for kw in range(K):
                        We[kh, ic * in_w + 2 * j + kw, oc * half + j] = w[oc, ic, kh, kw]
                        Wo[kh, ic * in_w + 2 * j + 1 + kw, oc * half + j] = w[oc, ic, kh, kw]
    return We, Wo


def _fc1_row_slabs(fc1_w):
    """fc1_w: (120, 400), torch NCHW flatten (idx = c*25 + h*5 + w).  Returns
    (5, 80, 120) per-spatial-row slabs matching the kernel's [h, oc*5 + w]
    pool2 layout, so the flatten never materializes."""
    f = np.asarray(fc1_w, np.float32)
    out = np.zeros((5, 80, 120), np.float32)
    for h in range(5):
        for c in range(16):
            for w_ in range(5):
                out[h, c * 5 + w_, :] = f[:, c * 25 + h * 5 + w_]
    return out


def prepare_params(params):
    """One-time re-layout of torch-convention params into the kernel layouts."""
    w1e, w1o = _conv_row_slabs_per_cin(params["conv1_w"], in_w=32)
    w2e, w2o = _conv_row_slabs_packed_cin(params["conv2_w"], in_w=14)
    b1 = np.repeat(np.asarray(params["conv1_b"], np.float32), 14).reshape(1, 84)
    b2 = np.repeat(np.asarray(params["conv2_b"], np.float32), 5).reshape(1, 80)
    return {
        "w1e": jnp.asarray(w1e), "w1o": jnp.asarray(w1o), "b1": jnp.asarray(b1),
        "w2e": jnp.asarray(w2e), "w2o": jnp.asarray(w2o), "b2": jnp.asarray(b2),
        "wf1": jnp.asarray(_fc1_row_slabs(params["fc1_w"])),
        "bf1": jnp.asarray(np.asarray(params["fc1_b"], np.float32).reshape(1, 120)),
        "wf2": jnp.asarray(np.asarray(params["fc2_w"], np.float32).T.copy()),
        "bf2": jnp.asarray(np.asarray(params["fc2_b"], np.float32).reshape(1, 84)),
        "wf3": jnp.asarray(np.asarray(params["fc3_w"], np.float32).T.copy()),
        "bf3": jnp.asarray(np.asarray(params["fc3_b"], np.float32).reshape(1, 10)),
    }


# ---------------------- deterministic parameter init --------------------------

def init_params(key):
    def uniform(k, shape, fan_in):
        bound = 1.0 / float(fan_in) ** 0.5
        return jax.random.uniform(k, shape, jnp.float32, -bound, bound)

    ks = jax.random.split(key, 10)
    return {
        "conv1_w": uniform(ks[0], (6, 3, 5, 5), 3 * 5 * 5),
        "conv1_b": uniform(ks[1], (6,), 3 * 5 * 5),
        "conv2_w": uniform(ks[2], (16, 6, 5, 5), 6 * 5 * 5),
        "conv2_b": uniform(ks[3], (16,), 6 * 5 * 5),
        "fc1_w": uniform(ks[4], (120, 400), 400),
        "fc1_b": uniform(ks[5], (120,), 400),
        "fc2_w": uniform(ks[6], (84, 120), 120),
        "fc2_b": uniform(ks[7], (84,), 120),
        "fc3_w": uniform(ks[8], (10, 84), 84),
        "fc3_b": uniform(ks[9], (10,), 84),
    }


# ----------------------------- pure-JAX reference ------------------------------

def net_forward_ref(params, x):
    dn = ("NCHW", "OIHW", "NCHW")
    prec = jax.lax.Precision.HIGHEST

    def conv(x, w, b):
        y = lax.conv_general_dilated(x, w, (1, 1), "VALID",
                                     dimension_numbers=dn, precision=prec)
        return jax.nn.relu(y + b[None, :, None, None])

    def pool(x):
        return lax.reduce_window(x, -jnp.inf, lax.max,
                                 (1, 1, 2, 2), (1, 1, 2, 2), "VALID")

    x = pool(conv(x, params["conv1_w"], params["conv1_b"]))
    x = pool(conv(x, params["conv2_w"], params["conv2_b"]))
    x = x.reshape(x.shape[0], -1)
    x = jax.nn.relu(jnp.dot(x, params["fc1_w"].T, precision=prec) + params["fc1_b"])
    x = jax.nn.relu(jnp.dot(x, params["fc2_w"].T, precision=prec) + params["fc2_b"])
    return jnp.dot(x, params["fc3_w"].T, precision=prec) + params["fc3_b"]


if __name__ == "__main__":
    key = jax.random.PRNGKey(0)
    pkey, xkey = jax.random.split(key)
    params = init_params(pkey)
    prep = prepare_params(params)
    # The 16*5*5 flatten in the module forces 32x32 inputs (CIFAR-10 style).
    x = jax.random.normal(xkey, (2, 3, 32, 32), jnp.float32)

    out = jax.block_until_ready(jax.jit(net_forward)(prep, x))
    assert out.shape == (2, 10), out.shape

    ref = jax.block_until_ready(jax.jit(net_forward_ref)(params, x))
    # Both the kernel and the reference run their contractions at fp32
    # (precision=HIGHEST), so the observed error is ~1e-5; 1e-2 is a guard band.
    err = float(jnp.max(jnp.abs(out - ref)))
    assert err < 1e-2, ("max abs err", err)

    print("KERNEL_OK")
</pallas_src>

<mosaic_0001>
module attributes {stable_mosaic.version = 11 : i64} {
  func.func @_lenet_kernel(%arg0: i32, %arg1: memref<1x3x32x32xf32, #tpu.memory_space<vmem>>, %arg2: memref<15x32x84xf32, #tpu.memory_space<vmem>>, %arg3: memref<15x32x84xf32, #tpu.memory_space<vmem>>, %arg4: memref<1x84xf32, #tpu.memory_space<vmem>>, %arg5: memref<5x84x80xf32, #tpu.memory_space<vmem>>, %arg6: memref<5x84x80xf32, #tpu.memory_space<vmem>>, %arg7: memref<1x80xf32, #tpu.memory_space<vmem>>, %arg8: memref<5x80x120xf32, #tpu.memory_space<vmem>>, %arg9: memref<1x120xf32, #tpu.memory_space<vmem>>, %arg10: memref<120x84xf32, #tpu.memory_space<vmem>>, %arg11: memref<1x84xf32, #tpu.memory_space<vmem>>, %arg12: memref<84x10xf32, #tpu.memory_space<vmem>>, %arg13: memref<1x10xf32, #tpu.memory_space<vmem>>, %arg14: memref<1x1x10xf32, #tpu.memory_space<vmem>>, %arg15: memref<14x84xf32, #tpu.memory_space<vmem>>, %arg16: memref<5x80xf32, #tpu.memory_space<vmem>>) attributes {dimension_semantics = [#tpu.dimension_semantics<arbitrary>], iteration_bounds = array<i64: 2>, scalar_prefetch = 0 : i64, scratch_operands = 2 : i64, tpu.core_type = #tpu.core_type<tc>, window_params = [{transform_indices = @transform_0, window_bounds = array<i64: 1, 3, 32, 32>}, {pipeline_mode = #tpu.pipeline_mode<synchronous>, transform_indices = @transform_1, window_bounds = array<i64: 15, 32, 84>}, {pipeline_mode = #tpu.pipeline_mode<synchronous>, transform_indices = @transform_2, window_bounds = array<i64: 15, 32, 84>}, {pipeline_mode = #tpu.pipeline_mode<synchronous>, transform_indices = @transform_3, window_bounds = array<i64: 1, 84>}, {pipeline_mode = #tpu.pipeline_mode<synchronous>, transform_indices = @transform_4, window_bounds = array<i64: 5, 84, 80>}, {pipeline_mode = #tpu.pipeline_mode<synchronous>, transform_indices = @transform_5, window_bounds = array<i64: 5, 84, 80>}, {pipeline_mode = #tpu.pipeline_mode<synchronous>, transform_indices = @transform_6, window_bounds = array<i64: 1, 80>}, {pipeline_mode = #tpu.pipeline_mode<synchronous>, transform_indices = @transform_7, window_bounds = array<i64: 5, 80, 120>}, {pipeline_mode = #tpu.pipeline_mode<synchronous>, transform_indices = @transform_8, window_bounds = array<i64: 1, 120>}, {pipeline_mode = #tpu.pipeline_mode<synchronous>, transform_indices = @transform_9, window_bounds = array<i64: 120, 84>}, {pipeline_mode = #tpu.pipeline_mode<synchronous>, transform_indices = @transform_10, window_bounds = array<i64: 1, 84>}, {pipeline_mode = #tpu.pipeline_mode<synchronous>, transform_indices = @transform_11, window_bounds = array<i64: 84, 10>}, {pipeline_mode = #tpu.pipeline_mode<synchronous>, transform_indices = @transform_12, window_bounds = array<i64: 1, 10>}, {transform_indices = @transform_13, window_bounds = array<i64: 1, 1, 10>}]} {
    %cst = arith.constant 0.000000e+00 : f32
    %0 = vector.broadcast %cst : f32 to vector<28x84xf32>
    %cst_0 = arith.constant 0.000000e+00 : f32
    %1 = vector.broadcast %cst_0 : f32 to vector<28x84xf32>
    %c0 = arith.constant 0 : index
    %c0_1 = arith.constant 0 : index
    %c0_2 = arith.constant 0 : index
    %c0_3 = arith.constant 0 : index
    %2 = vector.load %arg1[%c0, %c0_1, %c0_2, %c0_3] : memref<1x3x32x32xf32, #tpu.memory_space<vmem>>, vector<1x1x28x32xf32>
    %3 = vector.shape_cast %2 : vector<1x1x28x32xf32> to vector<28x32xf32>
    %c0_4 = arith.constant 0 : index
    %c0_5 = arith.constant 0 : index
    %c0_6 = arith.constant 0 : index
    %4 = vector.load %arg2[%c0_4, %c0_5, %c0_6] : memref<15x32x84xf32, #tpu.memory_space<vmem>>, vector<1x32x84xf32>
    %5 = vector.shape_cast %4 : vector<1x32x84xf32> to vector<32x84xf32>
    %cst_7 = arith.constant dense<0.000000e+00> : vector<28x84xf32>
    %6 = tpu.matmul %3, %5, %cst_7 {dimension_numbers = #tpu.dot_dimension_numbers<[1], [0], [0], [1], [0, 0, 1, 1], [], []>, precision = #tpu.contract_precision<fp32>} : vector<28x32xf32>, vector<32x84xf32>, vector<28x84xf32> -> vector<28x84xf32>
    %7 = arith.addf %0, %6 : vector<28x84xf32>
    %c0_8 = arith.constant 0 : index
    %c0_9 = arith.constant 0 : index
    %c0_10 = arith.constant 0 : index
    %8 = vector.load %arg3[%c0_8, %c0_9, %c0_10] : memref<15x32x84xf32, #tpu.memory_space<vmem>>, vector<1x32x84xf32>
    %9 = vector.shape_cast %8 : vector<1x32x84xf32> to vector<32x84xf32>
    %cst_11 = arith.constant dense<0.000000e+00> : vector<28x84xf32>
    %10 = tpu.matmul %3, %9, %cst_11 {dimension_numbers = #tpu.dot_dimension_numbers<[1], [0], [0], [1], [0, 0, 1, 1], [], []>, precision = #tpu.contract_precision<fp32>} : vector<28x32xf32>, vector<32x84xf32>, vector<28x84xf32> -> vector<28x84xf32>
    %11 = arith.addf %1, %10 : vector<28x84xf32>
    %c0_12 = arith.constant 0 : index
    %c0_13 = arith.constant 0 : index
    %c1 = arith.constant 1 : index
    %c0_14 = arith.constant 0 : index
    %12 = vector.load %arg1[%c0_12, %c0_13, %c1, %c0_14] : memref<1x3x32x32xf32, #tpu.memory_space<vmem>>, vector<1x1x28x32xf32>
    %13 = vector.shape_cast %12 : vector<1x1x28x32xf32> to vector<28x32xf32>
    %c1_15 = arith.constant 1 : index
    %c0_16 = arith.constant 0 : index
    %c0_17 = arith.constant 0 : index
    %14 = vector.load %arg2[%c1_15, %c0_16, %c0_17] : memref<15x32x84xf32, #tpu.memory_space<vmem>>, vector<1x32x84xf32>
    %15 = vector.shape_cast %14 : vector<1x32x84xf32> to vector<32x84xf32>
    %cst_18 = arith.constant dense<0.000000e+00> : vector<28x84xf32>
    %16 = tpu.matmul %13, %15, %cst_18 {dimension_numbers = #tpu.dot_dimension_numbers<[1], [0], [0], [1], [0, 0, 1, 1], [], []>, precision = #tpu.contract_precision<fp32>} : vector<28x32xf32>, vector<32x84xf32>, vector<28x84xf32> -> vector<28x84xf32>
    %17 = arith.addf %7, %16 : vector<28x84xf32>
    %c1_19 = arith.constant 1 : index
    %c0_20 = arith.constant 0 : index
    %c0_21 = arith.constant 0 : index
    %18 = vector.load %arg3[%c1_19, %c0_20, %c0_21] : memref<15x32x84xf32, #tpu.memory_space<vmem>>, vector<1x32x84xf32>
    %19 = vector.shape_cast %18 : vector<1x32x84xf32> to vector<32x84xf32>
    %cst_22 = arith.constant dense<0.000000e+00> : vector<28x84xf32>
    %20 = tpu.matmul %13, %19, %cst_22 {dimension_numbers = #tpu.dot_dimension_numbers<[1], [0], [0], [1], [0, 0, 1, 1], [], []>, precision = #tpu.contract_precision<fp32>} : vector<28x32xf32>, vector<32x84xf32>, vector<28x84xf32> -> vector<28x84xf32>
    %21 = arith.addf %11, %20 : vector<28x84xf32>
    %c0_23 = arith.constant 0 : index
    %c0_24 = arith.constant 0 : index
    %c2 = arith.constant 2 : index
    %c0_25 = arith.constant 0 : index
    %22 = vector.load %arg1[%c0_23, %c0_24, %c2, %c0_25] : memref<1x3x32x32xf32, #tpu.memory_space<vmem>>, vector<1x1x28x32xf32>
    %23 = vector.shape_cast %22 : vector<1x1x28x32xf32> to vector<28x32xf32>
    %c2_26 = arith.constant 2 : index
    %c0_27 = arith.constant 0 : index
    %c0_28 = arith.constant 0 : index
    %24 = vector.load %arg2[%c2_26, %c0_27, %c0_28] : memref<15x32x84xf32, #tpu.memory_space<vmem>>, vector<1x32x84xf32>
    %25 = vector.shape_cast %24 : vector<1x32x84xf32> to vector<32x84xf32>
    %cst_29 = arith.constant dense<0.000000e+00> : vector<28x84xf32>
    %26 = tpu.matmul %23, %25, %cst_29 {dimension_numbers = #tpu.dot_dimension_numbers<[1], [0], [0], [1], [0, 0, 1, 1], [], []>, precision = #tpu.contract_precision<fp32>} : vector<28x32xf32>, vector<32x84xf32>, vector<28x84xf32> -> vector<28x84xf32>
    %27 = arith.addf %17, %26 : vector<28x84xf32>
    %c2_30 = arith.constant 2 : index
    %c0_31 = arith.constant 0 : index
    %c0_32 = arith.constant 0 : index
    %28 = vector.load %arg3[%c2_30, %c0_31, %c0_32] : memref<15x32x84xf32, #tpu.memory_space<vmem>>, vector<1x32x84xf32>
    %29 = vector.shape_cast %28 : vector<1x32x84xf32> to vector<32x84xf32>
    %cst_33 = arith.constant dense<0.000000e+00> : vector<28x84xf32>
    %30 = tpu.matmul %23, %29, %cst_33 {dimension_numbers = #tpu.dot_dimension_numbers<[1], [0], [0], [1], [0, 0, 1, 1], [], []>, precision = #tpu.contract_precision<fp32>} : vector<28x32xf32>, vector<32x84xf32>, vector<28x84xf32> -> vector<28x84xf32>
    %31 = arith.addf %21, %30 : vector<28x84xf32>
    %c0_34 = arith.constant 0 : index
    %c0_35 = arith.constant 0 : index
    %c3 = arith.constant 3 : index
    %c0_36 = arith.constant 0 : index
    %32 = vector.load %arg1[%c0_34, %c0_35, %c3, %c0_36] : memref<1x3x32x32xf32, #tpu.memory_space<vmem>>, vector<1x1x28x32xf32>
    %33 = vector.shape_cast %32 : vector<1x1x28x32xf32> to vector<28x32xf32>
    %c3_37 = arith.constant 3 : index
    %c0_38 = arith.constant 0 : index
    %c0_39 = arith.constant 0 : index
    %34 = vector.load %arg2[%c3_37, %c0_38, %c0_39] : memref<15x32x84xf32, #tpu.memory_space<vmem>>, vector<1x32x84xf32>
    %35 = vector.shape_cast %34 : vector<1x32x84xf32> to vector<32x84xf32>
    %cst_40 = arith.constant dense<0.000000e+00> : vector<28x84xf32>
    %36 = tpu.matmul %33, %35, %cst_40 {dimension_numbers = #tpu.dot_dimension_numbers<[1], [0], [0], [1], [0, 0, 1, 1], [], []>, precision = #tpu.contract_precision<fp32>} : vector<28x32xf32>, vector<32x84xf32>, vector<28x84xf32> -> vector<28x84xf32>
    %37 = arith.addf %27, %36 : vector<28x84xf32>
    %c3_41 = arith.constant 3 : index
    %c0_42 = arith.constant 0 : index
    %c0_43 = arith.constant 0 : index
    %38 = vector.load %arg3[%c3_41, %c0_42, %c0_43] : memref<15x32x84xf32, #tpu.memory_space<vmem>>, vector<1x32x84xf32>
    %39 = vector.shape_cast %38 : vector<1x32x84xf32> to vector<32x84xf32>
    %cst_44 = arith.constant dense<0.000000e+00> : vector<28x84xf32>
    %40 = tpu.matmul %33, %39, %cst_44 {dimension_numbers = #tpu.dot_dimension_numbers<[1], [0], [0], [1], [0, 0, 1, 1], [], []>, precision = #tpu.contract_precision<fp32>} : vector<28x32xf32>, vector<32x84xf32>, vector<28x84xf32> -> vector<28x84xf32>
    %41 = arith.addf %31, %40 : vector<28x84xf32>
    %c0_45 = arith.constant 0 : index
    %c0_46 = arith.constant 0 : index
    %c4 = arith.constant 4 : index
    %c0_47 = arith.constant 0 : index
    %42 = vector.load %arg1[%c0_45, %c0_46, %c4, %c0_47] : memref<1x3x32x32xf32, #tpu.memory_space<vmem>>, vector<1x1x28x32xf32>
    %43 = vector.shape_cast %42 : vector<1x1x28x32xf32> to vector<28x32xf32>
    %c4_48 = arith.constant 4 : index
    %c0_49 = arith.constant 0 : index
    %c0_50 = arith.constant 0 : index
    %44 = vector.load %arg2[%c4_48, %c0_49, %c0_50] : memref<15x32x84xf32, #tpu.memory_space<vmem>>, vector<1x32x84xf32>
    %45 = vector.shape_cast %44 : vector<1x32x84xf32> to vector<32x84xf32>
    %cst_51 = arith.constant dense<0.000000e+00> : vector<28x84xf32>
    %46 = tpu.matmul %43, %45, %cst_51 {dimension_numbers = #tpu.dot_dimension_numbers<[1], [0], [0], [1], [0, 0, 1, 1], [], []>, precision = #tpu.contract_precision<fp32>} : vector<28x32xf32>, vector<32x84xf32>, vector<28x84xf32> -> vector<28x84xf32>
    %47 = arith.addf %37, %46 : vector<28x84xf32>
    %c4_52 = arith.constant 4 : index
    %c0_53 = arith.constant 0 : index
    %c0_54 = arith.constant 0 : index
    %48 = vector.load %arg3[%c4_52, %c0_53, %c0_54] : memref<15x32x84xf32, #tpu.memory_space<vmem>>, vector<1x32x84xf32>
    %49 = vector.shape_cast %48 : vector<1x32x84xf32> to vector<32x84xf32>
    %cst_55 = arith.constant dense<0.000000e+00> : vector<28x84xf32>
    %50 = tpu.matmul %43, %49, %cst_55 {dimension_numbers = #tpu.dot_dimension_numbers<[1], [0], [0], [1], [0, 0, 1, 1], [], []>, precision = #tpu.contract_precision<fp32>} : vector<28x32xf32>, vector<32x84xf32>, vector<28x84xf32> -> vector<28x84xf32>
    %51 = arith.addf %41, %50 : vector<28x84xf32>
    %c0_56 = arith.constant 0 : index
    %c1_57 = arith.constant 1 : index
    %c0_58 = arith.constant 0 : index
    %c0_59 = arith.constant 0 : index
    %52 = vector.load %arg1[%c0_56, %c1_57, %c0_58, %c0_59] : memref<1x3x32x32xf32, #tpu.memory_space<vmem>>, vector<1x1x28x32xf32>
    %53 = vector.shape_cast %52 : vector<1x1x28x32xf32> to vector<28x32xf32>
    %c5 = arith.constant 5 : index
    %c0_60 = arith.constant 0 : index
    %c0_61 = arith.constant 0 : index
    %54 = vector.load %arg2[%c5, %c0_60, %c0_61] : memref<15x32x84xf32, #tpu.memory_space<vmem>>, vector<1x32x84xf32>
    %55 = vector.shape_cast %54 : vector<1x32x84xf32> to vector<32x84xf32>
    %cst_62 = arith.constant dense<0.000000e+00> : vector<28x84xf32>
    %56 = tpu.matmul %53, %55, %cst_62 {dimension_numbers = #tpu.dot_dimension_numbers<[1], [0], [0], [1], [0, 0, 1, 1], [], []>, precision = #tpu.contract_precision<fp32>} : vector<28x32xf32>, vector<32x84xf32>, vector<28x84xf32> -> vector<28x84xf32>
    %57 = arith.addf %47, %56 : vector<28x84xf32>
    %c5_63 = arith.constant 5 : index
    %c0_64 = arith.constant 0 : index
    %c0_65 = arith.constant 0 : index
    %58 = vector.load %arg3[%c5_63, %c0_64, %c0_65] : memref<15x32x84xf32, #tpu.memory_space<vmem>>, vector<1x32x84xf32>
    %59 = vector.shape_cast %58 : vector<1x32x84xf32> to vector<32x84xf32>
    %cst_66 = arith.constant dense<0.000000e+00> : vector<28x84xf32>
    %60 = tpu.matmul %53, %59, %cst_66 {dimension_numbers = #tpu.dot_dimension_numbers<[1], [0], [0], [1], [0, 0, 1, 1], [], []>, precision = #tpu.contract_precision<fp32>} : vector<28x32xf32>, vector<32x84xf32>, vector<28x84xf32> -> vector<28x84xf32>
    %61 = arith.addf %51, %60 : vector<28x84xf32>
    %c0_67 = arith.constant 0 : index
    %c1_68 = arith.constant 1 : index
    %c1_69 = arith.constant 1 : index
    %c0_70 = arith.constant 0 : index
    %62 = vector.load %arg1[%c0_67, %c1_68, %c1_69, %c0_70] : memref<1x3x32x32xf32, #tpu.memory_space<vmem>>, vector<1x1x28x32xf32>
    %63 = vector.shape_cast %62 : vector<1x1x28x32xf32> to vector<28x32xf32>
    %c6 = arith.constant 6 : index
    %c0_71 = arith.constant 0 : index
    %c0_72 = arith.constant 0 : index
    %64 = vector.load %arg2[%c6, %c0_71, %c0_72] : memref<15x32x84xf32, #tpu.memory_space<vmem>>, vector<1x32x84xf32>
    %65 = vector.shape_cast %64 : vector<1x32x84xf32> to vector<32x84xf32>
    %cst_73 = arith.constant dense<0.000000e+00> : vector<28x84xf32>
    %66 = tpu.matmul %63, %65, %cst_73 {dimension_numbers = #tpu.dot_dimension_numbers<[1], [0], [0], [1], [0, 0, 1, 1], [], []>, precision = #tpu.contract_precision<fp32>} : vector<28x32xf32>, vector<32x84xf32>, vector<28x84xf32> -> vector<28x84xf32>
    %67 = arith.addf %57, %66 : vector<28x84xf32>
    %c6_74 = arith.constant 6 : index
    %c0_75 = arith.constant 0 : index
    %c0_76 = arith.constant 0 : index
    %68 = vector.load %arg3[%c6_74, %c0_75, %c0_76] : memref<15x32x84xf32, #tpu.memory_space<vmem>>, vector<1x32x84xf32>
    %69 = vector.shape_cast %68 : vector<1x32x84xf32> to vector<32x84xf32>
    %cst_77 = arith.constant dense<0.000000e+00> : vector<28x84xf32>
    %70 = tpu.matmul %63, %69, %cst_77 {dimension_numbers = #tpu.dot_dimension_numbers<[1], [0], [0], [1], [0, 0, 1, 1], [], []>, precision = #tpu.contract_precision<fp32>} : vector<28x32xf32>, vector<32x84xf32>, vector<28x84xf32> -> vector<28x84xf32>
    %71 = arith.addf %61, %70 : vector<28x84xf32>
    %c0_78 = arith.constant 0 : index
    %c1_79 = arith.constant 1 : index
    %c2_80 = arith.constant 2 : index
    %c0_81 = arith.constant 0 : index
    %72 = vector.load %arg1[%c0_78, %c1_79, %c2_80, %c0_81] : memref<1x3x32x32xf32, #tpu.memory_space<vmem>>, vector<1x1x28x32xf32>
    %73 = vector.shape_cast %72 : vector<1x1x28x32xf32> to vector<28x32xf32>
    %c7 = arith.constant 7 : index
    %c0_82 = arith.constant 0 : index
    %c0_83 = arith.constant 0 : index
    %74 = vector.load %arg2[%c7, %c0_82, %c0_83] : memref<15x32x84xf32, #tpu.memory_space<vmem>>, vector<1x32x84xf32>
    %75 = vector.shape_cast %74 : vector<1x32x84xf32> to vector<32x84xf32>
    %cst_84 = arith.constant dense<0.000000e+00> : vector<28x84xf32>
    %76 = tpu.matmul %73, %75, %cst_84 {dimension_numbers = #tpu.dot_dimension_numbers<[1], [0], [0], [1], [0, 0, 1, 1], [], []>, precision = #tpu.contract_precision<fp32>} : vector<28x32xf32>, vector<32x84xf32>, vector<28x84xf32> -> vector<28x84xf32>
    %77 = arith.addf %67, %76 : vector<28x84xf32>
    %c7_85 = arith.constant 7 : index
    %c0_86 = arith.constant 0 : index
    %c0_87 = arith.constant 0 : index
    %78 = vector.load %arg3[%c7_85, %c0_86, %c0_87] : memref<15x32x84xf32, #tpu.memory_space<vmem>>, vector<1x32x84xf32>
    %79 = vector.shape_cast %78 : vector<1x32x84xf32> to vector<32x84xf32>
    %cst_88 = arith.constant dense<0.000000e+00> : vector<28x84xf32>
    %80 = tpu.matmul %73, %79, %cst_88 {dimension_numbers = #tpu.dot_dimension_numbers<[1], [0], [0], [1], [0, 0, 1, 1], [], []>, precision = #tpu.contract_precision<fp32>} : vector<28x32xf32>, vector<32x84xf32>, vector<28x84xf32> -> vector<28x84xf32>
    %81 = arith.addf %71, %80 : vector<28x84xf32>
    %c0_89 = arith.constant 0 : index
    %c1_90 = arith.constant 1 : index
    %c3_91 = arith.constant 3 : index
    %c0_92 = arith.constant 0 : index
    %82 = vector.load %arg1[%c0_89, %c1_90, %c3_91, %c0_92] : memref<1x3x32x32xf32, #tpu.memory_space<vmem>>, vector<1x1x28x32xf32>
    %83 = vector.shape_cast %82 : vector<1x1x28x32xf32> to vector<28x32xf32>
    %c8 = arith.constant 8 : index
    %c0_93 = arith.constant 0 : index
    %c0_94 = arith.constant 0 : index
    %84 = vector.load %arg2[%c8, %c0_93, %c0_94] : memref<15x32x84xf32, #tpu.memory_space<vmem>>, vector<1x32x84xf32>
    %85 = vector.shape_cast %84 : vector<1x32x84xf32> to vector<32x84xf32>
    %cst_95 = arith.constant dense<0.000000e+00> : vector<28x84xf32>
    %86 = tpu.matmul %83, %85, %cst_95 {dimension_numbers = #tpu.dot_dimension_numbers<[1], [0], [0], [1], [0, 0, 1, 1], [], []>, precision = #tpu.contract_precision<fp32>} : vector<28x32xf32>, vector<32x84xf32>, vector<28x84xf32> -> vector<28x84xf32>
    %87 = arith.addf %77, %86 : vector<28x84xf32>
    %c8_96 = arith.constant 8 : index
    %c0_97 = arith.constant 0 : index
    %c0_98 = arith.constant 0 : index
    %88 = vector.load %arg3[%c8_96, %c0_97, %c0_98] : memref<15x32x84xf32, #tpu.memory_space<vmem>>, vector<1x32x84xf32>
    %89 = vector.shape_cast %88 : vector<1x32x84xf32> to vector<32x84xf32>
    %cst_99 = arith.constant dense<0.000000e+00> : vector<28x84xf32>
    %90 = tpu.matmul %83, %89, %cst_99 {dimension_numbers = #tpu.dot_dimension_numbers<[1], [0], [0], [1], [0, 0, 1, 1], [], []>, precision = #tpu.contract_precision<fp32>} : vector<28x32xf32>, vector<32x84xf32>, vector<28x84xf32> -> vector<28x84xf32>
    %91 = arith.addf %81, %90 : vector<28x84xf32>
    %c0_100 = arith.constant 0 : index
    %c1_101 = arith.constant 1 : index
    %c4_102 = arith.constant 4 : index
    %c0_103 = arith.constant 0 : index
    %92 = vector.load %arg1[%c0_100, %c1_101, %c4_102, %c0_103] : memref<1x3x32x32xf32, #tpu.memory_space<vmem>>, vector<1x1x28x32xf32>
    %93 = vector.shape_cast %92 : vector<1x1x28x32xf32> to vector<28x32xf32>
    %c9 = arith.constant 9 : index
    %c0_104 = arith.constant 0 : index
    %c0_105 = arith.constant 0 : index
    %94 = vector.load %arg2[%c9, %c0_104, %c0_105] : memref<15x32x84xf32, #tpu.memory_space<vmem>>, vector<1x32x84xf32>
    %95 = vector.shape_cast %94 : vector<1x32x84xf32> to vector<32x84xf32>
    %cst_106 = arith.constant dense<0.000000e+00> : vector<28x84xf32>
    %96 = tpu.matmul %93, %95, %cst_106 {dimension_numbers = #tpu.dot_dimension_numbers<[1], [0], [0], [1], [0, 0, 1, 1], [], []>, precision = #tpu.contract_precision<fp32>} : vector<28x32xf32>, vector<32x84xf32>, vector<28x84xf32> -> vector<28x84xf32>
    %97 = arith.addf %87, %96 : vector<28x84xf32>
    %c9_107 = arith.constant 9 : index
    %c0_108 = arith.constant 0 : index
    %c0_109 = arith.constant 0 : index
    %98 = vector.load %arg3[%c9_107, %c0_108, %c0_109] : memref<15x32x84xf32, #tpu.memory_space<vmem>>, vector<1x32x84xf32>
    %99 = vector.shape_cast %98 : vector<1x32x84xf32> to vector<32x84xf32>
    %cst_110 = arith.constant dense<0.000000e+00> : vector<28x84xf32>
    %100 = tpu.matmul %93, %99, %cst_110 {dimension_numbers = #tpu.dot_dimension_numbers<[1], [0], [0], [1], [0, 0, 1, 1], [], []>, precision = #tpu.contract_precision<fp32>} : vector<28x32xf32>, vector<32x84xf32>, vector<28x84xf32> -> vector<28x84xf32>
    %101 = arith.addf %91, %100 : vector<28x84xf32>
    %c0_111 = arith.constant 0 : index
    %c2_112 = arith.constant 2 : index
    %c0_113 = arith.constant 0 : index
    %c0_114 = arith.constant 0 : index
    %102 = vector.load %arg1[%c0_111, %c2_112, %c0_113, %c0_114] : memref<1x3x32x32xf32, #tpu.memory_space<vmem>>, vector<1x1x28x32xf32>
    %103 = vector.shape_cast %102 : vector<1x1x28x32xf32> to vector<28x32xf32>
    %c10 = arith.constant 10 : index
    %c0_115 = arith.constant 0 : index
    %c0_116 = arith.constant 0 : index
    %104 = vector.load %arg2[%c10, %c0_115, %c0_116] : memref<15x32x84xf32, #tpu.memory_space<vmem>>, vector<1x32x84xf32>
    %105 = vector.shape_cast %104 : vector<1x32x84xf32> to vector<32x84xf32>
    %cst_117 = arith.constant dense<0.000000e+00> : vector<28x84xf32>
    %106 = tpu.matmul %103, %105, %cst_117 {dimension_numbers = #tpu.dot_dimension_numbers<[1], [0], [0], [1], [0, 0, 1, 1], [], []>, precision = #tpu.contract_precision<fp32>} : vector<28x32xf32>, vector<32x84xf32>, vector<28x84xf32> -> vector<28x84xf32>
    %107 = arith.addf %97, %106 : vector<28x84xf32>
    %c10_118 = arith.constant 10 : index
    %c0_119 = arith.constant 0 : index
    %c0_120 = arith.constant 0 : index
    %108 = vector.load %arg3[%c10_118, %c0_119, %c0_120] : memref<15x32x84xf32, #tpu.memory_space<vmem>>, vector<1x32x84xf32>
    %109 = vector.shape_cast %108 : vector<1x32x84xf32> to vector<32x84xf32>
    %cst_121 = arith.constant dense<0.000000e+00> : vector<28x84xf32>
    %110 = tpu.matmul %103, %109, %cst_121 {dimension_numbers = #tpu.dot_dimension_numbers<[1], [0], [0], [1], [0, 0, 1, 1], [], []>, precision = #tpu.contract_precision<fp32>} : vector<28x32xf32>, vector<32x84xf32>, vector<28x84xf32> -> vector<28x84xf32>
    %111 = arith.addf %101, %110 : vector<28x84xf32>
    %c0_122 = arith.constant 0 : index
    %c2_123 = arith.constant 2 : index
    %c1_124 = arith.constant 1 : index
    %c0_125 = arith.constant 0 : index
    %112 = vector.load %arg1[%c0_122, %c2_123, %c1_124, %c0_125] : memref<1x3x32x32xf32, #tpu.memory_space<vmem>>, vector<1x1x28x32xf32>
    %113 = vector.shape_cast %112 : vector<1x1x28x32xf32> to vector<28x32xf32>
    %c11 = arith.constant 11 : index
    %c0_126 = arith.constant 0 : index
    %c0_127 = arith.constant 0 : index
    %114 = vector.load %arg2[%c11, %c0_126, %c0_127] : memref<15x32x84xf32, #tpu.memory_space<vmem>>, vector<1x32x84xf32>
    %115 = vector.shape_cast %114 : vector<1x32x84xf32> to vector<32x84xf32>
    %cst_128 = arith.constant dense<0.000000e+00> : vector<28x84xf32>
    %116 = tpu.matmul %113, %115, %cst_128 {dimension_numbers = #tpu.dot_dimension_numbers<[1], [0], [0], [1], [0, 0, 1, 1], [], []>, precision = #tpu.contract_precision<fp32>} : vector<28x32xf32>, vector<32x84xf32>, vector<28x84xf32> -> vector<28x84xf32>
    %117 = arith.addf %107, %116 : vector<28x84xf32>
    %c11_129 = arith.constant 11 : index
    %c0_130 = arith.constant 0 : index
    %c0_131 = arith.constant 0 : index
    %118 = vector.load %arg3[%c11_129, %c0_130, %c0_131] : memref<15x32x84xf32, #tpu.memory_space<vmem>>, vector<1x32x84xf32>
    %119 = vector.shape_cast %118 : vector<1x32x84xf32> to vector<32x84xf32>
    %cst_132 = arith.constant dense<0.000000e+00> : vector<28x84xf32>
    %120 = tpu.matmul %113, %119, %cst_132 {dimension_numbers = #tpu.dot_dimension_numbers<[1], [0], [0], [1], [0, 0, 1, 1], [], []>, precision = #tpu.contract_precision<fp32>} : vector<28x32xf32>, vector<32x84xf32>, vector<28x84xf32> -> vector<28x84xf32>
    %121 = arith.addf %111, %120 : vector<28x84xf32>
    %c0_133 = arith.constant 0 : index
    %c2_134 = arith.constant 2 : index
    %c2_135 = arith.constant 2 : index
    %c0_136 = arith.constant 0 : index
    %122 = vector.load %arg1[%c0_133, %c2_134, %c2_135, %c0_136] : memref<1x3x32x32xf32, #tpu.memory_space<vmem>>, vector<1x1x28x32xf32>
    %123 = vector.shape_cast %122 : vector<1x1x28x32xf32> to vector<28x32xf32>
    %c12 = arith.constant 12 : index
    %c0_137 = arith.constant 0 : index
    %c0_138 = arith.constant 0 : index
    %124 = vector.load %arg2[%c12, %c0_137, %c0_138] : memref<15x32x84xf32, #tpu.memory_space<vmem>>, vector<1x32x84xf32>
    %125 = vector.shape_cast %124 : vector<1x32x84xf32> to vector<32x84xf32>
    %cst_139 = arith.constant dense<0.000000e+00> : vector<28x84xf32>
    %126 = tpu.matmul %123, %125, %cst_139 {dimension_numbers = #tpu.dot_dimension_numbers<[1], [0], [0], [1], [0, 0, 1, 1], [], []>, precision = #tpu.contract_precision<fp32>} : vector<28x32xf32>, vector<32x84xf32>, vector<28x84xf32> -> vector<28x84xf32>
    %127 = arith.addf %117, %126 : vector<28x84xf32>
    %c12_140 = arith.constant 12 : index
    %c0_141 = arith.constant 0 : index
    %c0_142 = arith.constant 0 : index
    %128 = vector.load %arg3[%c12_140, %c0_141, %c0_142] : memref<15x32x84xf32, #tpu.memory_space<vmem>>, vector<1x32x84xf32>
    %129 = vector.shape_cast %128 : vector<1x32x84xf32> to vector<32x84xf32>
    %cst_143 = arith.constant dense<0.000000e+00> : vector<28x84xf32>
    %130 = tpu.matmul %123, %129, %cst_143 {dimension_numbers = #tpu.dot_dimension_numbers<[1], [0], [0], [1], [0, 0, 1, 1], [], []>, precision = #tpu.contract_precision<fp32>} : vector<28x32xf32>, vector<32x84xf32>, vector<28x84xf32> -> vector<28x84xf32>
    %131 = arith.addf %121, %130 : vector<28x84xf32>
    %c0_144 = arith.constant 0 : index
    %c2_145 = arith.constant 2 : index
    %c3_146 = arith.constant 3 : index
    %c0_147 = arith.constant 0 : index
    %132 = vector.load %arg1[%c0_144, %c2_145, %c3_146, %c0_147] : memref<1x3x32x32xf32, #tpu.memory_space<vmem>>, vector<1x1x28x32xf32>
    %133 = vector.shape_cast %132 : vector<1x1x28x32xf32> to vector<28x32xf32>
    %c13 = arith.constant 13 : index
    %c0_148 = arith.constant 0 : index
    %c0_149 = arith.constant 0 : index
    %134 = vector.load %arg2[%c13, %c0_148, %c0_149] : memref<15x32x84xf32, #tpu.memory_space<vmem>>, vector<1x32x84xf32>
    %135 = vector.shape_cast %134 : vector<1x32x84xf32> to vector<32x84xf32>
    %cst_150 = arith.constant dense<0.000000e+00> : vector<28x84xf32>
    %136 = tpu.matmul %133, %135, %cst_150 {dimension_numbers = #tpu.dot_dimension_numbers<[1], [0], [0], [1], [0, 0, 1, 1], [], []>, precision = #tpu.contract_precision<fp32>} : vector<28x32xf32>, vector<32x84xf32>, vector<28x84xf32> -> vector<28x84xf32>
    %137 = arith.addf %127, %136 : vector<28x84xf32>
    %c13_151 = arith.constant 13 : index
    %c0_152 = arith.constant 0 : index
    %c0_153 = arith.constant 0 : index
    %138 = vector.load %arg3[%c13_151, %c0_152, %c0_153] : memref<15x32x84xf32, #tpu.memory_space<vmem>>, vector<1x32x84xf32>
    %139 = vector.shape_cast %138 : vector<1x32x84xf32> to vector<32x84xf32>
    %cst_154 = arith.constant dense<0.000000e+00> : vector<28x84xf32>
    %140 = tpu.matmul %133, %139, %cst_154 {dimension_numbers = #tpu.dot_dimension_numbers<[1], [0], [0], [1], [0, 0, 1, 1], [], []>, precision = #tpu.contract_precision<fp32>} : vector<28x32xf32>, vector<32x84xf32>, vector<28x84xf32> -> vector<28x84xf32>
    %141 = arith.addf %131, %140 : vector<28x84xf32>
    %c0_155 = arith.constant 0 : index
    %c2_156 = arith.constant 2 : index
    %c4_157 = arith.constant 4 : index
    %c0_158 = arith.constant 0 : index
    %142 = vector.load %arg1[%c0_155, %c2_156, %c4_157, %c0_158] : memref<1x3x32x32xf32, #tpu.memory_space<vmem>>, vector<1x1x28x32xf32>
    %143 = vector.shape_cast %142 : vector<1x1x28x32xf32> to vector<28x32xf32>
    %c14 = arith.constant 14 : index
    %c0_159 = arith.constant 0 : index
    %c0_160 = arith.constant 0 : index
    %144 = vector.load %arg2[%c14, %c0_159, %c0_160] : memref<15x32x84xf32, #tpu.memory_space<vmem>>, vector<1x32x84xf32>
    %145 = vector.shape_cast %144 : vector<1x32x84xf32> to vector<32x84xf32>
    %cst_161 = arith.constant dense<0.000000e+00> : vector<28x84xf32>
    %146 = tpu.matmul %143, %145, %cst_161 {dimension_numbers = #tpu.dot_dimension_numbers<[1], [0], [0], [1], [0, 0, 1, 1], [], []>, precision = #tpu.contract_precision<fp32>} : vector<28x32xf32>, vector<32x84xf32>, vector<28x84xf32> -> vector<28x84xf32>
    %147 = arith.addf %137, %146 : vector<28x84xf32>
    %c14_162 = arith.constant 14 : index
    %c0_163 = arith.constant 0 : index
    %c0_164 = arith.constant 0 : index
    %148 = vector.load %arg3[%c14_162, %c0_163, %c0_164] : memref<15x32x84xf32, #tpu.memory_space<vmem>>, vector<1x32x84xf32>
    %149 = vector.shape_cast %148 : vector<1x32x84xf32> to vector<32x84xf32>
    %cst_165 = arith.constant dense<0.000000e+00> : vector<28x84xf32>
    %150 = tpu.matmul %143, %149, %cst_165 {dimension_numbers = #tpu.dot_dimension_numbers<[1], [0], [0], [1], [0, 0, 1, 1], [], []>, precision = #tpu.contract_precision<fp32>} : vector<28x32xf32>, vector<32x84xf32>, vector<28x84xf32> -> vector<28x84xf32>
    %151 = arith.addf %141, %150 : vector<28x84xf32>
    %152 = arith.maximumf %147, %151 : vector<28x84xf32>
    %153 = tpu.iota {dimensions = array<i32: 0>} : vector<14x28xi32>
    %154 = tpu.iota {dimensions = array<i32: 1>} : vector<14x28xi32>
    %c2_i32 = arith.constant 2 : i32
    %155 = vector.broadcast %c2_i32 : i32 to vector<14x28xi32>
    %156 = arith.muli %155, %153 : vector<14x28xi32>
    %157 = arith.cmpi eq, %154, %156 : vector<14x28xi32>
    %158 = arith.extui %157 : vector<14x28xi1> to vector<14x28xi32>
    %159 = arith.sitofp %158 : vector<14x28xi32> to vector<14x28xf32>
    %c2_i32_166 = arith.constant 2 : i32
    %160 = vector.broadcast %c2_i32_166 : i32 to vector<14x28xi32>
    %161 = arith.muli %160, %153 : vector<14x28xi32>
    %c1_i32 = arith.constant 1 : i32
    %162 = vector.broadcast %c1_i32 : i32 to vector<14x28xi32>
    %163 = arith.addi %161, %162 : vector<14x28xi32>
    %164 = arith.cmpi eq, %154, %163 : vector<14x28xi32>
    %165 = arith.extui %164 : vector<14x28xi1> to vector<14x28xi32>
    %166 = arith.sitofp %165 : vector<14x28xi32> to vector<14x28xf32>
    %cst_167 = arith.constant dense<0.000000e+00> : vector<14x84xf32>
    %167 = tpu.matmul %159, %152, %cst_167 {dimension_numbers = #tpu.dot_dimension_numbers<[1], [0], [0], [1], [0, 0, 1, 1], [], []>, precision = #tpu.contract_precision<fp32>} : vector<14x28xf32>, vector<28x84xf32>, vector<14x84xf32> -> vector<14x84xf32>
    %cst_168 = arith.constant dense<0.000000e+00> : vector<14x84xf32>
    %168 = tpu.matmul %166, %152, %cst_168 {dimension_numbers = #tpu.dot_dimension_numbers<[1], [0], [0], [1], [0, 0, 1, 1], [], []>, precision = #tpu.contract_precision<fp32>} : vector<14x28xf32>, vector<28x84xf32>, vector<14x84xf32> -> vector<14x84xf32>
    %169 = arith.maximumf %167, %168 : vector<14x84xf32>
    %c0_169 = arith.constant 0 : index
    %c0_170 = arith.constant 0 : index
    %170 = vector.load %arg4[%c0_169, %c0_170] : memref<1x84xf32, #tpu.memory_space<vmem>>, vector<1x84xf32>
    %171 = vector.broadcast %170 : vector<1x84xf32> to vector<14x84xf32>
    %172 = arith.addf %169, %171 : vector<14x84xf32>
    %cst_171 = arith.constant 0.000000e+00 : f32
    %173 = vector.broadcast %cst_171 : f32 to vector<14x84xf32>
    %174 = arith.maximumf %172, %173 : vector<14x84xf32>
    %c0_172 = arith.constant 0 : index
    %c0_173 = arith.constant 0 : index
    %175 = vector.load %arg15[%c0_172, %c0_173] : memref<14x84xf32, #tpu.memory_space<vmem>>, vector<14x84xf32>
    tpu.vector_store %arg15[%c0_172, %c0_173], %174 {strides = array<i32>} : memref<14x84xf32, #tpu.memory_space<vmem>>, vector<14x84xf32>,
    %cst_174 = arith.constant 0.000000e+00 : f32
    %176 = vector.broadcast %cst_174 : f32 to vector<10x80xf32>
    %cst_175 = arith.constant 0.000000e+00 : f32
    %177 = vector.broadcast %cst_175 : f32 to vector<10x80xf32>
    %c0_176 = arith.constant 0 : index
    %c0_177 = arith.constant 0 : index
    %178 = vector.load %arg15[%c0_176, %c0_177] : memref<14x84xf32, #tpu.memory_space<vmem>>, vector<10x84xf32>
    %c0_178 = arith.constant 0 : index
    %c0_179 = arith.constant 0 : index
    %c0_180 = arith.constant 0 : index
    %179 = vector.load %arg5[%c0_178, %c0_179, %c0_180] : memref<5x84x80xf32, #tpu.memory_space<vmem>>, vector<1x84x80xf32>
    %180 = vector.shape_cast %179 : vector<1x84x80xf32> to vector<84x80xf32>
    %cst_181 = arith.constant dense<0.000000e+00> : vector<10x80xf32>
    %181 = tpu.matmul %178, %180, %cst_181 {dimension_numbers = #tpu.dot_dimension_numbers<[1], [0], [0], [1], [0, 0, 1, 1], [], []>, precision = #tpu.contract_precision<fp32>} : vector<10x84xf32>, vector<84x80xf32>, vector<10x80xf32> -> vector<10x80xf32>
    %182 = arith.addf %176, %181 : vector<10x80xf32>
    %c0_182 = arith.constant 0 : index
    %c0_183 = arith.constant 0 : index
    %c0_184 = arith.constant 0 : index
    %183 = vector.load %arg6[%c0_182, %c0_183, %c0_184] : memref<5x84x80xf32, #tpu.memory_space<vmem>>, vector<1x84x80xf32>
    %184 = vector.shape_cast %183 : vector<1x84x80xf32> to vector<84x80xf32>
    %cst_185 = arith.constant dense<0.000000e+00> : vector<10x80xf32>
    %185 = tpu.matmul %178, %184, %cst_185 {dimension_numbers = #tpu.dot_dimension_numbers<[1], [0], [0], [1], [0, 0, 1, 1], [], []>, precision = #tpu.contract_precision<fp32>} : vector<10x84xf32>, vector<84x80xf32>, vector<10x80xf32> -> vector<10x80xf32>
    %186 = arith.addf %177, %185 : vector<10x80xf32>
    %c1_186 = arith.constant 1 : index
    %c0_187 = arith.constant 0 : index
    %187 = vector.load %arg15[%c1_186, %c0_187] : memref<14x84xf32, #tpu.memory_space<vmem>>, vector<10x84xf32>
    %c1_188 = arith.constant 1 : index
    %c0_189 = arith.constant 0 : index
    %c0_190 = arith.constant 0 : index
    %188 = vector.load %arg5[%c1_188, %c0_189, %c0_190] : memref<5x84x80xf32, #tpu.memory_space<vmem>>, vector<1x84x80xf32>
    %189 = vector.shape_cast %188 : vector<1x84x80xf32> to vector<84x80xf32>
    %cst_191 = arith.constant dense<0.000000e+00> : vector<10x80xf32>
    %190 = tpu.matmul %187, %189, %cst_191 {dimension_numbers = #tpu.dot_dimension_numbers<[1], [0], [0], [1], [0, 0, 1, 1], [], []>, precision = #tpu.contract_precision<fp32>} : vector<10x84xf32>, vector<84x80xf32>, vector<10x80xf32> -> vector<10x80xf32>
    %191 = arith.addf %182, %190 : vector<10x80xf32>
    %c1_192 = arith.constant 1 : index
    %c0_193 = arith.constant 0 : index
    %c0_194 = arith.constant 0 : index
    %192 = vector.load %arg6[%c1_192, %c0_193, %c0_194] : memref<5x84x80xf32, #tpu.memory_space<vmem>>, vector<1x84x80xf32>
    %193 = vector.shape_cast %192 : vector<1x84x80xf32> to vector<84x80xf32>
    %cst_195 = arith.constant dense<0.000000e+00> : vector<10x80xf32>
    %194 = tpu.matmul %187, %193, %cst_195 {dimension_numbers = #tpu.dot_dimension_numbers<[1], [0], [0], [1], [0, 0, 1, 1], [], []>, precision = #tpu.contract_precision<fp32>} : vector<10x84xf32>, vector<84x80xf32>, vector<10x80xf32> -> vector<10x80xf32>
    %195 = arith.addf %186, %194 : vector<10x80xf32>
    %c2_196 = arith.constant 2 : index
    %c0_197 = arith.constant 0 : index
    %196 = vector.load %arg15[%c2_196, %c0_197] : memref<14x84xf32, #tpu.memory_space<vmem>>, vector<10x84xf32>
    %c2_198 = arith.constant 2 : index
    %c0_199 = arith.constant 0 : index
    %c0_200 = arith.constant 0 : index
    %197 = vector.load %arg5[%c2_198, %c0_199, %c0_200] : memref<5x84x80xf32, #tpu.memory_space<vmem>>, vector<1x84x80xf32>
    %198 = vector.shape_cast %197 : vector<1x84x80xf32> to vector<84x80xf32>
    %cst_201 = arith.constant dense<0.000000e+00> : vector<10x80xf32>
    %199 = tpu.matmul %196, %198, %cst_201 {dimension_numbers = #tpu.dot_dimension_numbers<[1], [0], [0], [1], [0, 0, 1, 1], [], []>, precision = #tpu.contract_precision<fp32>} : vector<10x84xf32>, vector<84x80xf32>, vector<10x80xf32> -> vector<10x80xf32>
    %200 = arith.addf %191, %199 : vector<10x80xf32>
    %c2_202 = arith.constant 2 : index
    %c0_203 = arith.constant 0 : index
    %c0_204 = arith.constant 0 : index
    %201 = vector.load %arg6[%c2_202, %c0_203, %c0_204] : memref<5x84x80xf32, #tpu.memory_space<vmem>>, vector<1x84x80xf32>
    %202 = vector.shape_cast %201 : vector<1x84x80xf32> to vector<84x80xf32>
    %cst_205 = arith.constant dense<0.000000e+00> : vector<10x80xf32>
    %203 = tpu.matmul %196, %202, %cst_205 {dimension_numbers = #tpu.dot_dimension_numbers<[1], [0], [0], [1], [0, 0, 1, 1], [], []>, precision = #tpu.contract_precision<fp32>} : vector<10x84xf32>, vector<84x80xf32>, vector<10x80xf32> -> vector<10x80xf32>
    %204 = arith.addf %195, %203 : vector<10x80xf32>
    %c3_206 = arith.constant 3 : index
    %c0_207 = arith.constant 0 : index
    %205 = vector.load %arg15[%c3_206, %c0_207] : memref<14x84xf32, #tpu.memory_space<vmem>>, vector<10x84xf32>
    %c3_208 = arith.constant 3 : index
    %c0_209 = arith.constant 0 : index
    %c0_210 = arith.constant 0 : index
    %206 = vector.load %arg5[%c3_208, %c0_209, %c0_210] : memref<5x84x80xf32, #tpu.memory_space<vmem>>, vector<1x84x80xf32>
    %207 = vector.shape_cast %206 : vector<1x84x80xf32> to vector<84x80xf32>
    %cst_211 = arith.constant dense<0.000000e+00> : vector<10x80xf32>
    %208 = tpu.matmul %205, %207, %cst_211 {dimension_numbers = #tpu.dot_dimension_numbers<[1], [0], [0], [1], [0, 0, 1, 1], [], []>, precision = #tpu.contract_precision<fp32>} : vector<10x84xf32>, vector<84x80xf32>, vector<10x80xf32> -> vector<10x80xf32>
    %209 = arith.addf %200, %208 : vector<10x80xf32>
    %c3_212 = arith.constant 3 : index
    %c0_213 = arith.constant 0 : index
    %c0_214 = arith.constant 0 : index
    %210 = vector.load %arg6[%c3_212, %c0_213, %c0_214] : memref<5x84x80xf32, #tpu.memory_space<vmem>>, vector<1x84x80xf32>
    %211 = vector.shape_cast %210 : vector<1x84x80xf32> to vector<84x80xf32>
    %cst_215 = arith.constant dense<0.000000e+00> : vector<10x80xf32>
    %212 = tpu.matmul %205, %211, %cst_215 {dimension_numbers = #tpu.dot_dimension_numbers<[1], [0], [0], [1], [0, 0, 1, 1], [], []>, precision = #tpu.contract_precision<fp32>} : vector<10x84xf32>, vector<84x80xf32>, vector<10x80xf32> -> vector<10x80xf32>
    %213 = arith.addf %204, %212 : vector<10x80xf32>
    %c4_216 = arith.constant 4 : index
    %c0_217 = arith.constant 0 : index
    %214 = vector.load %arg15[%c4_216, %c0_217] : memref<14x84xf32, #tpu.memory_space<vmem>>, vector<10x84xf32>
    %c4_218 = arith.constant 4 : index
    %c0_219 = arith.constant 0 : index
    %c0_220 = arith.constant 0 : index
    %215 = vector.load %arg5[%c4_218, %c0_219, %c0_220] : memref<5x84x80xf32, #tpu.memory_space<vmem>>, vector<1x84x80xf32>
    %216 = vector.shape_cast %215 : vector<1x84x80xf32> to vector<84x80xf32>
    %cst_221 = arith.constant dense<0.000000e+00> : vector<10x80xf32>
    %217 = tpu.matmul %214, %216, %cst_221 {dimension_numbers = #tpu.dot_dimension_numbers<[1], [0], [0], [1], [0, 0, 1, 1], [], []>, precision = #tpu.contract_precision<fp32>} : vector<10x84xf32>, vector<84x80xf32>, vector<10x80xf32> -> vector<10x80xf32>
    %218 = arith.addf %209, %217 : vector<10x80xf32>
    %c4_222 = arith.constant 4 : index
    %c0_223 = arith.constant 0 : index
    %c0_224 = arith.constant 0 : index
    %219 = vector.load %arg6[%c4_222, %c0_223, %c0_224] : memref<5x84x80xf32, #tpu.memory_space<vmem>>, vector<1x84x80xf32>
    %220 = vector.shape_cast %219 : vector<1x84x80xf32> to vector<84x80xf32>
    %cst_225 = arith.constant dense<0.000000e+00> : vector<10x80xf32>
    %221 = tpu.matmul %214, %220, %cst_225 {dimension_numbers = #tpu.dot_dimension_numbers<[1], [0], [0], [1], [0, 0, 1, 1], [], []>, precision = #tpu.contract_precision<fp32>} : vector<10x84xf32>, vector<84x80xf32>, vector<10x80xf32> -> vector<10x80xf32>
    %222 = arith.addf %213, %221 : vector<10x80xf32>
    %223 = arith.maximumf %218, %222 : vector<10x80xf32>
    %224 = tpu.iota {dimensions = array<i32: 0>} : vector<5x10xi32>
    %225 = tpu.iota {dimensions = array<i32: 1>} : vector<5x10xi32>
    %c2_i32_226 = arith.constant 2 : i32
    %226 = vector.broadcast %c2_i32_226 : i32 to vector<5x10xi32>
    %227 = arith.muli %226, %224 : vector<5x10xi32>
    %228 = arith.cmpi eq, %225, %227 : vector<5x10xi32>
    %229 = arith.extui %228 : vector<5x10xi1> to vector<5x10xi32>
    %230 = arith.sitofp %229 : vector<5x10xi32> to vector<5x10xf32>
    %c2_i32_227 = arith.constant 2 : i32
    %231 = vector.broadcast %c2_i32_227 : i32 to vector<5x10xi32>
    %232 = arith.muli %231, %224 : vector<5x10xi32>
    %c1_i32_228 = arith.constant 1 : i32
    %233 = vector.broadcast %c1_i32_228 : i32 to vector<5x10xi32>
    %234 = arith.addi %232, %233 : vector<5x10xi32>
    %235 = arith.cmpi eq, %225, %234 : vector<5x10xi32>
    %236 = arith.extui %235 : vector<5x10xi1> to vector<5x10xi32>
    %237 = arith.sitofp %236 : vector<5x10xi32> to vector<5x10xf32>
    %cst_229 = arith.constant dense<0.000000e+00> : vector<5x80xf32>
    %238 = tpu.matmul %230, %223, %cst_229 {dimension_numbers = #tpu.dot_dimension_numbers<[1], [0], [0], [1], [0, 0, 1, 1], [], []>, precision = #tpu.contract_precision<fp32>} : vector<5x10xf32>, vector<10x80xf32>, vector<5x80xf32> -> vector<5x80xf32>
    %cst_230 = arith.constant dense<0.000000e+00> : vector<5x80xf32>
    %239 = tpu.matmul %237, %223, %cst_230 {dimension_numbers = #tpu.dot_dimension_numbers<[1], [0], [0], [1], [0, 0, 1, 1], [], []>, precision = #tpu.contract_precision<fp32>} : vector<5x10xf32>, vector<10x80xf32>, vector<5x80xf32> -> vector<5x80xf32>
    %240 = arith.maximumf %238, %239 : vector<5x80xf32>
    %c0_231 = arith.constant 0 : index
    %c0_232 = arith.constant 0 : index
    %241 = vector.load %arg7[%c0_231, %c0_232] : memref<1x80xf32, #tpu.memory_space<vmem>>, vector<1x80xf32>
    %242 = vector.broadcast %241 : vector<1x80xf32> to vector<5x80xf32>
    %243 = arith.addf %240, %242 : vector<5x80xf32>
    %cst_233 = arith.constant 0.000000e+00 : f32
    %244 = vector.broadcast %cst_233 : f32 to vector<5x80xf32>
    %245 = arith.maximumf %243, %244 : vector<5x80xf32>
    %c0_234 = arith.constant 0 : index
    %c0_235 = arith.constant 0 : index
    %246 = vector.load %arg16[%c0_234, %c0_235] : memref<5x80xf32, #tpu.memory_space<vmem>>, vector<5x80xf32>
    tpu.vector_store %arg16[%c0_234, %c0_235], %245 {strides = array<i32>} : memref<5x80xf32, #tpu.memory_space<vmem>>, vector<5x80xf32>,
    %cst_236 = arith.constant 0.000000e+00 : f32
    %247 = vector.broadcast %cst_236 : f32 to vector<1x120xf32>
    %c0_237 = arith.constant 0 : index
    %c0_238 = arith.constant 0 : index
    %248 = vector.load %arg16[%c0_237, %c0_238] : memref<5x80xf32, #tpu.memory_space<vmem>>, vector<1x80xf32>
    %c0_239 = arith.constant 0 : index
    %c0_240 = arith.constant 0 : index
    %c0_241 = arith.constant 0 : index
    %249 = vector.load %arg8[%c0_239, %c0_240, %c0_241] : memref<5x80x120xf32, #tpu.memory_space<vmem>>, vector<1x80x120xf32>
    %250 = vector.shape_cast %249 : vector<1x80x120xf32> to vector<80x120xf32>
    %cst_242 = arith.constant dense<0.000000e+00> : vector<1x120xf32>
    %251 = tpu.matmul %248, %250, %cst_242 {dimension_numbers = #tpu.dot_dimension_numbers<[1], [0], [0], [1], [0, 0, 1, 1], [], []>, precision = #tpu.contract_precision<fp32>} : vector<1x80xf32>, vector<80x120xf32>, vector<1x120xf32> -> vector<1x120xf32>
    %252 = arith.addf %247, %251 : vector<1x120xf32>
    %c1_243 = arith.constant 1 : index
    %c0_244 = arith.constant 0 : index
    %253 = vector.load %arg16[%c1_243, %c0_244] : memref<5x80xf32, #tpu.memory_space<vmem>>, vector<1x80xf32>
    %c1_245 = arith.constant 1 : index
    %c0_246 = arith.constant 0 : index
    %c0_247 = arith.constant 0 : index
    %254 = vector.load %arg8[%c1_245, %c0_246, %c0_247] : memref<5x80x120xf32, #tpu.memory_space<vmem>>, vector<1x80x120xf32>
    %255 = vector.shape_cast %254 : vector<1x80x120xf32> to vector<80x120xf32>
    %cst_248 = arith.constant dense<0.000000e+00> : vector<1x120xf32>
    %256 = tpu.matmul %253, %255, %cst_248 {dimension_numbers = #tpu.dot_dimension_numbers<[1], [0], [0], [1], [0, 0, 1, 1], [], []>, precision = #tpu.contract_precision<fp32>} : vector<1x80xf32>, vector<80x120xf32>, vector<1x120xf32> -> vector<1x120xf32>
    %257 = arith.addf %252, %256 : vector<1x120xf32>
    %c2_249 = arith.constant 2 : index
    %c0_250 = arith.constant 0 : index
    %258 = vector.load %arg16[%c2_249, %c0_250] : memref<5x80xf32, #tpu.memory_space<vmem>>, vector<1x80xf32>
    %c2_251 = arith.constant 2 : index
    %c0_252 = arith.constant 0 : index
    %c0_253 = arith.constant 0 : index
    %259 = vector.load %arg8[%c2_251, %c0_252, %c0_253] : memref<5x80x120xf32, #tpu.memory_space<vmem>>, vector<1x80x120xf32>
    %260 = vector.shape_cast %259 : vector<1x80x120xf32> to vector<80x120xf32>
    %cst_254 = arith.constant dense<0.000000e+00> : vector<1x120xf32>
    %261 = tpu.matmul %258, %260, %cst_254 {dimension_numbers = #tpu.dot_dimension_numbers<[1], [0], [0], [1], [0, 0, 1, 1], [], []>, precision = #tpu.contract_precision<fp32>} : vector<1x80xf32>, vector<80x120xf32>, vector<1x120xf32> -> vector<1x120xf32>
    %262 = arith.addf %257, %261 : vector<1x120xf32>
    %c3_255 = arith.constant 3 : index
    %c0_256 = arith.constant 0 : index
    %263 = vector.load %arg16[%c3_255, %c0_256] : memref<5x80xf32, #tpu.memory_space<vmem>>, vector<1x80xf32>
    %c3_257 = arith.constant 3 : index
    %c0_258 = arith.constant 0 : index
    %c0_259 = arith.constant 0 : index
    %264 = vector.load %arg8[%c3_257, %c0_258, %c0_259] : memref<5x80x120xf32, #tpu.memory_space<vmem>>, vector<1x80x120xf32>
    %265 = vector.shape_cast %264 : vector<1x80x120xf32> to vector<80x120xf32>
    %cst_260 = arith.constant dense<0.000000e+00> : vector<1x120xf32>
    %266 = tpu.matmul %263, %265, %cst_260 {dimension_numbers = #tpu.dot_dimension_numbers<[1], [0], [0], [1], [0, 0, 1, 1], [], []>, precision = #tpu.contract_precision<fp32>} : vector<1x80xf32>, vector<80x120xf32>, vector<1x120xf32> -> vector<1x120xf32>
    %267 = arith.addf %262, %266 : vector<1x120xf32>
    %c4_261 = arith.constant 4 : index
    %c0_262 = arith.constant 0 : index
    %268 = vector.load %arg16[%c4_261, %c0_262] : memref<5x80xf32, #tpu.memory_space<vmem>>, vector<1x80xf32>
    %c4_263 = arith.constant 4 : index
    %c0_264 = arith.constant 0 : index
    %c0_265 = arith.constant 0 : index
    %269 = vector.load %arg8[%c4_263, %c0_264, %c0_265] : memref<5x80x120xf32, #tpu.memory_space<vmem>>, vector<1x80x120xf32>
    %270 = vector.shape_cast %269 : vector<1x80x120xf32> to vector<80x120xf32>
    %cst_266 = arith.constant dense<0.000000e+00> : vector<1x120xf32>
    %271 = tpu.matmul %268, %270, %cst_266 {dimension_numbers = #tpu.dot_dimension_numbers<[1], [0], [0], [1], [0, 0, 1, 1], [], []>, precision = #tpu.contract_precision<fp32>} : vector<1x80xf32>, vector<80x120xf32>, vector<1x120xf32> -> vector<1x120xf32>
    %272 = arith.addf %267, %271 : vector<1x120xf32>
    %c0_267 = arith.constant 0 : index
    %c0_268 = arith.constant 0 : index
    %273 = vector.load %arg9[%c0_267, %c0_268] : memref<1x120xf32, #tpu.memory_space<vmem>>, vector<1x120xf32>
    %274 = arith.addf %272, %273 : vector<1x120xf32>
    %cst_269 = arith.constant 0.000000e+00 : f32
    %275 = vector.broadcast %cst_269 : f32 to vector<1x120xf32>
    %276 = arith.maximumf %274, %275 : vector<1x120xf32>
    %c0_270 = arith.constant 0 : index
    %c0_271 = arith.constant 0 : index
    %277 = vector.load %arg10[%c0_270, %c0_271] : memref<120x84xf32, #tpu.memory_space<vmem>>, vector<120x84xf32>
    %cst_272 = arith.constant dense<0.000000e+00> : vector<1x84xf32>
    %278 = tpu.matmul %276, %277, %cst_272 {dimension_numbers = #tpu.dot_dimension_numbers<[1], [0], [0], [1], [0, 0, 1, 1], [], []>, precision = #tpu.contract_precision<fp32>} : vector<1x120xf32>, vector<120x84xf32>, vector<1x84xf32> -> vector<1x84xf32>
    %c0_273 = arith.constant 0 : index
    %c0_274 = arith.constant 0 : index
    %279 = vector.load %arg11[%c0_273, %c0_274] : memref<1x84xf32, #tpu.memory_space<vmem>>, vector<1x84xf32>
    %280 = arith.addf %278, %279 : vector<1x84xf32>
    %cst_275 = arith.constant 0.000000e+00 : f32
    %281 = vector.broadcast %cst_275 : f32 to vector<1x84xf32>
    %282 = arith.maximumf %280, %281 : vector<1x84xf32>
    %c0_276 = arith.constant 0 : index
    %c0_277 = arith.constant 0 : index
    %283 = vector.load %arg12[%c0_276, %c0_277] : memref<84x10xf32, #tpu.memory_space<vmem>>, vector<84x10xf32>
    %cst_278 = arith.constant dense<0.000000e+00> : vector<1x10xf32>
    %284 = tpu.matmul %282, %283, %cst_278 {dimension_numbers = #tpu.dot_dimension_numbers<[1], [0], [0], [1], [0, 0, 1, 1], [], []>, precision = #tpu.contract_precision<fp32>} : vector<1x84xf32>, vector<84x10xf32>, vector<1x10xf32> -> vector<1x10xf32>
    %c0_279 = arith.constant 0 : index
    %c0_280 = arith.constant 0 : index
    %285 = vector.load %arg13[%c0_279, %c0_280] : memref<1x10xf32, #tpu.memory_space<vmem>>, vector<1x10xf32>
    %286 = arith.addf %284, %285 : vector<1x10xf32>
    %287 = vector.shape_cast %286 : vector<1x10xf32> to vector<1x1x10xf32>
    %c0_281 = arith.constant 0 : index
    %c0_282 = arith.constant 0 : index
    %c0_283 = arith.constant 0 : index
    %288 = vector.load %arg14[%c0_281, %c0_282, %c0_283] : memref<1x1x10xf32, #tpu.memory_space<vmem>>, vector<1x1x10xf32>
    tpu.vector_store %arg14[%c0_281, %c0_282, %c0_283], %287 {strides = array<i32>} : memref<1x1x10xf32, #tpu.memory_space<vmem>>, vector<1x1x10xf32>,
    return
  }
  func.func @transform_0(%arg0: i32) -> (i32, i32, i32, i32) {
    %c0_i32 = arith.constant 0 : i32
    %c0_i32_0 = arith.constant 0 : i32
    %c0_i32_1 = arith.constant 0 : i32
    %c0_i32_2 = arith.constant 0 : i32
    return %arg0, %c0_i32, %c0_i32_0, %c0_i32_1 : i32, i32, i32, i32
  }
  func.func @transform_1(%arg0: i32) -> (i32, i32, i32) {
    %c0_i32 = arith.constant 0 : i32
    %c0_i32_0 = arith.constant 0 : i32
    %c0_i32_1 = arith.constant 0 : i32
    %c0_i32_2 = arith.constant 0 : i32
    return %c0_i32, %c0_i32_0, %c0_i32_1 : i32, i32, i32
  }
  func.func @transform_2(%arg0: i32) -> (i32, i32, i32) {
    %c0_i32 = arith.constant 0 : i32
    %c0_i32_0 = arith.constant 0 : i32
    %c0_i32_1 = arith.constant 0 : i32
    %c0_i32_2 = arith.constant 0 : i32
    return %c0_i32, %c0_i32_0, %c0_i32_1 : i32, i32, i32
  }
  func.func @transform_3(%arg0: i32) -> (i32, i32) {
    %c0_i32 = arith.constant 0 : i32
    %c0_i32_0 = arith.constant 0 : i32
    %c0_i32_1 = arith.constant 0 : i32
    return %c0_i32, %c0_i32_0 : i32, i32
  }
  func.func @transform_4(%arg0: i32) -> (i32, i32, i32) {
    %c0_i32 = arith.constant 0 : i32
    %c0_i32_0 = arith.constant 0 : i32
    %c0_i32_1 = arith.constant 0 : i32
    %c0_i32_2 = arith.constant 0 : i32
    return %c0_i32, %c0_i32_0, %c0_i32_1 : i32, i32, i32
  }
  func.func @transform_5(%arg0: i32) -> (i32, i32, i32) {
    %c0_i32 = arith.constant 0 : i32
    %c0_i32_0 = arith.constant 0 : i32
    %c0_i32_1 = arith.constant 0 : i32
    %c0_i32_2 = arith.constant 0 : i32
    return %c0_i32, %c0_i32_0, %c0_i32_1 : i32, i32, i32
  }
  func.func @transform_6(%arg0: i32) -> (i32, i32) {
    %c0_i32 = arith.constant 0 : i32
    %c0_i32_0 = arith.constant 0 : i32
    %c0_i32_1 = arith.constant 0 : i32
    return %c0_i32, %c0_i32_0 : i32, i32
  }
  func.func @transform_7(%arg0: i32) -> (i32, i32, i32) {
    %c0_i32 = arith.constant 0 : i32
    %c0_i32_0 = arith.constant 0 : i32
    %c0_i32_1 = arith.constant 0 : i32
    %c0_i32_2 = arith.constant 0 : i32
    return %c0_i32, %c0_i32_0, %c0_i32_1 : i32, i32, i32
  }
  func.func @transform_8(%arg0: i32) -> (i32, i32) {
    %c0_i32 = arith.constant 0 : i32
    %c0_i32_0 = arith.constant 0 : i32
    %c0_i32_1 = arith.constant 0 : i32
    return %c0_i32, %c0_i32_0 : i32, i32
  }
  func.func @transform_9(%arg0: i32) -> (i32, i32) {
    %c0_i32 = arith.constant 0 : i32
    %c0_i32_0 = arith.constant 0 : i32
    %c0_i32_1 = arith.constant 0 : i32
    return %c0_i32, %c0_i32_0 : i32, i32
  }
  func.func @transform_10(%arg0: i32) -> (i32, i32) {
    %c0_i32 = arith.constant 0 : i32
    %c0_i32_0 = arith.constant 0 : i32
    %c0_i32_1 = arith.constant 0 : i32
    return %c0_i32, %c0_i32_0 : i32, i32
  }
  func.func @transform_11(%arg0: i32) -> (i32, i32) {
    %c0_i32 = arith.constant 0 : i32
    %c0_i32_0 = arith.constant 0 : i32
    %c0_i32_1 = arith.constant 0 : i32
    return %c0_i32, %c0_i32_0 : i32, i32
  }
  func.func @transform_12(%arg0: i32) -> (i32, i32) {
    %c0_i32 = arith.constant 0 : i32
    %c0_i32_0 = arith.constant 0 : i32
    %c0_i32_1 = arith.constant 0 : i32
    return %c0_i32, %c0_i32_0 : i32, i32
  }
  func.func @transform_13(%arg0: i32) -> (i32, i32, i32) {
    %c0_i32 = arith.constant 0 : i32
    %c0_i32_0 = arith.constant 0 : i32
    %c0_i32_1 = arith.constant 0 : i32
    return %arg0, %c0_i32, %c0_i32_0 : i32, i32, i32
  }
}

</mosaic_0001>

<bundles_post_ra>
// kernel: net_forward.1
= control target key start
LH: loop header
LB: loop body
LE: loop exit
PB: predicated region body
PF: predicated region fallthrough
CT: control target
= control target key end

     0   :  { %s53406_s0 = inlined_call_operand.vmem [shape: f32[2,3,32,32], index: 0, kind: input, shape index: {}]   ;;  %s53407_s1 = inlined_call_operand.vmem [shape: f32[15,32,84], index: 1, kind: input, shape index: {}]   ;;  %s53408_s2 = inlined_call_operand.vmem [shape: f32[15,32,84], index: 2, kind: input, shape index: {}]   ;;  %s53409_s3 = inlined_call_operand.vmem [shape: f32[1,84], index: 3, kind: input, shape index: {}]   ;;  %s53410_s4 = inlined_call_operand.vmem [shape: f32[5,84,80], index: 4, kind: input, shape index: {}]   ;;  %s53411_s5 = inlined_call_operand.vmem [shape: f32[5,84,80], index: 5, kind: input, shape index: {}]   ;;  %s53412_s6 = inlined_call_operand.vmem [shape: f32[1,80], index: 6, kind: input, shape index: {}]   ;;  %s53413_s7 = inlined_call_operand.vmem [shape: f32[5,80,120], index: 7, kind: input, shape index: {}]   ;;  %s53414_s8 = inlined_call_operand.vmem [shape: f32[1,120], index: 8, kind: input, shape index: {}]   ;;  %s53415_s9 = inlined_call_operand.vmem [shape: f32[120,84], index: 9, kind: input, shape index: {}]   ;;  %s53416_s10 = inlined_call_operand.vmem [shape: f32[1,84], index: 10, kind: input, shape index: {}]   ;;  %s53417_s11 = inlined_call_operand.vmem [shape: f32[84,10], index: 11, kind: input, shape index: {}]   ;;  %s53418_s12 = inlined_call_operand.vmem [shape: f32[1,10], index: 12, kind: input, shape index: {}]   ;;  %s53419_s13 = inlined_call_operand.hbm [shape: f32[2,1,10], index: 13, kind: output, shape index: {}]  }
   0x1   :  { %53578 = sst [smem:[#allocation29_spill]] %s53406_s0 }
   0x2   :  { %18 = vsyncpa [#allocation5], 0 }
   0x3   :  { %20 = vsyncpa [#allocation5 + $0x1], 0  ;;  %s44929_s25 = smov 0   ;;  %s44931_s26 = smov 0  }
   0x4   :  { %s44933_s27 = smov 0   ;;  %s44935_s28 = smov 0  }
   0x5 LB: > { %53579 = sst [smem:[#allocation7_spill]] %s44849_s27  ;;  %s44950_s29 = sadd.s32 4294967295, %s44853_s28   ;;  %s44853_s28 = sphi %s44935_s28, %s53799_s28   ;;  %s44849_s27 = sphi %s44933_s27, %s53796_s27   ;;  %s44845_s26 = sphi %s44931_s26, %s53798_s26   ;;  %s44841_s25 = sphi %s44929_s25, %s53797_s25  }
   0x6   : > { %s32008_s30 = sadd.s32 4294967294, %s44853_s28   ;;  %s44954_s14 = sadd.s32 1, %s44853_s28  }
   0x7   : > { %s311_s15 = sadd.s32 1, %s44849_s27  ;;  %s308_s16 = ssub.s32 %s44853_s28, %s44954_s14 }
   0x8   : > { %p321_p0 = scmp.ne.s32.totalorder %s44849_s27, %s44845_s26  ;;  %p309_p1 = scmp.eq.s32.totalorder %s308_s16, 0 }
   0x9   : > { %p322_p2 = scmp.eq.s32.totalorder %s44950_s29, 1  ;;  %p327_p3 = scmp.ne.s32.totalorder %s44845_s26, %s44841_s25 }
   0xa   : > { %p328_p4 = scmp.eq.s32.totalorder %s32008_s30, 1  ;;  %p32011_p7 = scmp.ge.s32.totalorder %s44853_s28, 1 }
   0xb   : > { %s44965_s17 = scalar_select %p309_p1, %s44849_s27, %s311_s15  }
   0xc   : > { %p44967_p5 = por %p322_p2, %p321_p0  ;;  %p44971_p6 = por %p328_p4, %p327_p3 }
   0xd   : > { %53580 = sst [smem:[#allocation8_spill]] %s44965_s17  ;;  %p390_p8 = scmp.lt.s32.totalorder %s44853_s28, 3 }
   0xf   : > { %p391_p9 = pnand %p32011_p7, %p390_p8 }
  0x11   : > { %394 = sbr.rel (%p391_p9) target bundleno = 3650 (0xe42), region = 72 }
  0x18   : > { %v32013_v0 = vld [vmem:[%s53407_s1 + $0x20] sm:$0xff]  ;;  %v32014_v1 = vld [vmem:[%s53407_s1 + $0x28] sm:$0xff]  ;;  %p433_p10 = scmp.lt.s32.totalorder %s44950_s29, 1  ;;  %vm459_vm0 = vcmask 261120   ;;  %v32015_v7 = vld [vmem:[%s53407_s1 + $0x30] sm:$0xff]  ;;  %s53583_s0 = sld [smem:[#allocation29_spill]] }
  0x19   : > { %v32017_v2 = vld [vmem:[%s53408_s2 + $0x20] sm:$0xff]  ;;  %v473_v3 = vand.u32 4294901760, %v32013_v0  ;;  %v476_v4 = vand.u32 4294901760, %v32014_v1  ;;  %v32018_v5 = vld [vmem:[%s53408_s2 + $0x28] sm:$0xff]  ;;  %v32016_v8 = vld [vmem:[%s53407_s1 + $0x38] sm:$0xff]  ;;  %v479_v10 = vand.u32 4294901760, %v32015_v7 }
  0x1a   : > { %v1718_v6 = vand.u32 4294901760, %v32017_v2  ;;  %v1721_v9 = vand.u32 4294901760, %v32018_v5  ;;  %v482_v11 = vand.u32 4294901760, %v32016_v8  ;;  %v32019_v12 = vld [vmem:[%s53408_s2 + $0x30] sm:$0xff]  ;;  %v32020_v13 = vld [vmem:[%s53408_s2 + $0x38] sm:$0xff]  ;;  %s434_s15 = scalar_select %p433_p10, %s44950_s29, 1 }
  0x1b   : > { %v45003_v14 = vpack.c.bf16 %v476_v4, %v473_v3  ;;  %v1724_v15 = vand.u32 4294901760, %v32019_v12  ;;  %v1727_v16 = vand.u32 4294901760, %v32020_v13  ;;  %v45005_v17 = vsub.f32 %v32013_v0, %v473_v3  ;;  %s32317_s22 = sshll.u32 %s44950_s29, 4  ;;  %s44858_s29 = smov [#allocation4]  }
  0x1c   : > { %v45007_v18 = vpack.c.bf16 %v1721_v9, %v1718_v6  ;;  %v45009_v19 = vpack.c.bf16 %v482_v11, %v479_v10  ;;  %s44748_s16 = smul.u32 96, %s434_s15  ;;  %v45011_v20 = vsub.f32 %v32014_v1, %v476_v4  ;;  %v45013_v21 = vsub.f32 %v32017_v2, %v1718_v6  ;;  %s44795_s21 = sshll.u32 %s44858_s29, 4  ;;  %s44796_s21 = int_to_ptr.vmem [resolvable:$false] %s44795_s21 }
  0x1d   : > { %40421 = vmatprep.subr.bf16.mxu0 %v45003_v14  ;;  %v45016_v22 = vpack.c.bf16 %v1727_v16, %v1724_v15  ;;  %v584_v23 = vand.u32 4294901760, %v45005_v17  ;;  %v45019_v24 = vsub.f32 %v32018_v5, %v1721_v9  ;;  %v45021_v25 = vsub.f32 %v32015_v7, %v479_v10 }
  0x1e   : > { %40517 = vmatprep.subr.bf16.mxu1 %v45007_v18  ;;  %40423 = vmatpush3.bf16.msra.mxu0 %v45003_v14  ;;  %s45028_s20 = scalar_lea.vmem %s53583_s0, %s44748_s16  ;;  %v591_v26 = vand.u32 4294901760, %v45011_v20  ;;  %v1829_v27 = vand.u32 4294901760, %v45013_v21  ;;  %v45032_v28 = vsub.f32 %v32016_v8, %v482_v11  ;;  %v45034_v29 = vsub.f32 %v32019_v12, %v1724_v15  ;;  %s53364_s16 = scalar_lea.hbm %s53419_s13, %s32317_s22 }
  0x1f   : > { %40519 = vmatpush3.bf16.msra.mxu1 %v45007_v18  ;;  %40425 = vmatprep.subr.bf16.mxu0 %v45009_v19  ;;  %v450_v30 = vld [vmem:[%s45028_s20 + $0x1] sm:$0xff]  ;;  %v451_v31 = vld [vmem:[%s45028_s20 + $0x9] sm:$0xff]  ;;  %v585_v32 = vsub.f32 %v45005_v17, %v584_v23  ;;  %v1836_v33 = vand.u32 4294901760, %v45019_v24  ;;  %v452_v34 = vld [vmem:[%s45028_s20 + $0x11] sm:$0xff]  ;;  %v598_v35 = vand.u32 4294901760, %v45021_v25  ;;  %v45046_v36 = vsub.f32 %v32020_v13, %v1727_v16  ;;  %s44797_s0 = scalar_lea.vmem %s44796_s21, 32 }
  0x20   : > { %40521 = vmatprep.subr.bf16.mxu1 %v45016_v22  ;;  %v461_v37 = vsel %vm459_vm0, %v450_v30, 0  ;;  %v464_v38 = vsel %vm459_vm0, %v451_v31, 0  ;;  %v592_v39 = vsub.f32 %v45011_v20, %v591_v26  ;;  %v1830_v40 = vsub.f32 %v45013_v21, %v1829_v27  ;;  %v453_v41 = vld [vmem:[%s45028_s20 + $0x19] sm:$0xf] }
  0x21   : > { %v45058_v42 = vand.u32 4294901760, %v461_v37  ;;  %v45060_v43 = vand.u32 4294901760, %v464_v38  ;;  %v586_v44 = vand.u32 4294901760, %v585_v32  ;;  %v1837_v45 = vsub.f32 %v45019_v24, %v1836_v33 }
  0x22   : > { %40427 = vmatpush3.bf16.msra.mxu0 %v45009_v19  ;;  %v593_v46 = vand.u32 4294901760, %v592_v39  ;;  %v1831_v47 = vand.u32 4294901760, %v1830_v40  ;;  %v467_v48 = vsel %vm459_vm0, %v452_v34, 0  ;;  %v470_v49 = vsel %vm459_vm0, %v453_v41, 0  ;;  %v45149_v41 = vld [vmem:[%s53407_s1] sm:$0xff] }
  0x23   : > { %40523 = vmatpush3.bf16.msra.mxu1 %v45016_v22  ;;  %v45070_v50 = vsub.f32 %v461_v37, %v45058_v42  ;;  %v45073_v51 = vsub.f32 %v464_v38, %v45060_v43  ;;  %v1838_v52 = vand.u32 4294901760, %v1837_v45  ;;  %v45075_v53 = vand.u32 4294901760, %v467_v48 }
  0x24   : > { %v40428_v54 = vpack.c.bf16 %v593_v46, %v586_v44  ;;  %v45077_v55 = vand.u32 4294901760, %v470_v49  ;;  %v599_v56 = vsub.f32 %v45021_v25, %v598_v35  ;;  %v605_v57 = vand.u32 4294901760, %v45032_v28  ;;  %v45154_v44 = vld [vmem:[%s53407_s1 + $0x8] sm:$0xff] }
  0x25   : > { %v45084_v58 = vand.u32 4294901760, %v45070_v50  ;;  %v45087_v59 = vand.u32 4294901760, %v45073_v51  ;;  %v40524_v60 = vpack.c.bf16 %v1838_v52, %v1831_v47  ;;  %v45090_v61 = vsub.f32 %v467_v48, %v45075_v53  ;;  %v45169_v47 = vld [vmem:[%s53408_s2] sm:$0xff]  ;;  %v45174_v48 = vld [vmem:[%s53408_s2 + $0x8] sm:$0xff] }
  0x26   : > { %40429 = vmatprep.subr.bf16.mxu0 %v40428_v54  ;;  %v45093_v62 = vsub.f32 %v470_v49, %v45077_v55  ;;  %v600_v63 = vand.u32 4294901760, %v599_v56  ;;  %v606_v0 = vsub.f32 %v45032_v28, %v605_v57  ;;  %v1843_v1 = vand.u32 4294901760, %v45034_v29 }
  0x27   : > { %v544_v2 = vsub.f32 %v45070_v50, %v45084_v58  ;;  %v554_v3 = vsub.f32 %v45073_v51, %v45087_v59  ;;  %40525 = vmatprep.subr.bf16.mxu1 %v40524_v60  ;;  %v45104_v4 = vand.u32 4294901760, %v45090_v61  ;;  %v1850_v5 = vand.u32 4294901760, %v45046_v36 }
  0x28   : > { %v45108_v6 = vand.u32 4294901760, %v45093_v62  ;;  %v607_v7 = vand.u32 4294901760, %v606_v0  ;;  %v1844_v8 = vsub.f32 %v45034_v29, %v1843_v1  ;;  %v40436_v37 = vpack.c.bf16 %v45011_v20, %v45005_v17  ;;  %v438_v17 = vld [vmem:[%s45028_s20] sm:$0xff] }
  0x29   : > { %v545_v9 = vand.u32 4294901760, %v544_v2  ;;  %v555_v10 = vand.u32 4294901760, %v554_v3  ;;  %v564_v11 = vsub.f32 %v45090_v61, %v45104_v4  ;;  %v1851_v12 = vsub.f32 %v45046_v36, %v1850_v5 }
  0x2a   : > { %v574_v13 = vsub.f32 %v45093_v62, %v45108_v6  ;;  %v1845_v15 = vand.u32 4294901760, %v1844_v8  ;;  %v40432_v30 = vpack.c.bf16 %v607_v7, %v600_v63  ;;  %v40532_v38 = vpack.c.bf16 %v45019_v24, %v45013_v21 }
  0x2b   : > { %35154 = vmatprep.mubr.f32.mxu0 %v545_v9  ;;  %35322 = vmatprep.mubr.f32.mxu1 %v545_v9  ;;  %v565_v16 = vand.u32 4294901760, %v564_v11  ;;  %v1852_v31 = vand.u32 4294901760, %v1851_v12  ;;  %v40440_v39 = vpack.c.bf16 %v45032_v28, %v45021_v25  ;;  %v40536_v40 = vpack.c.bf16 %v45046_v36, %v45034_v29  ;;  %v45212_v25 = vld [vmem:[%s53408_s2 + $0x10] sm:$0xff]  ;;  %v45217_v28 = vld [vmem:[%s53408_s2 + $0x18] sm:$0xff] }
  0x2c   : > { %35155 = vmatmul.mubr.f32.vlgmr.msra.gmra.mrb[0].mxu0 %v555_v10  ;;  %35323 = vmatmul.mubr.f32.vlgmr.msra.gmra.mrb[0].mxu1 %v555_v10  ;;  %v575_v32 = vand.u32 4294901760, %v574_v13  ;;  %v40452_v45 = vpack.c.bf16 %v591_v26, %v584_v23  ;;  %v40548_v46 = vpack.c.bf16 %v1836_v33, %v1829_v27  ;;  %v1099_v20 = vand.u32 4294901760, %v45149_v41  ;;  %v439_v27 = vld [vmem:[%s45028_s20 + $0x8] sm:$0xff]  ;;  %v440_v29 = vld [vmem:[%s45028_s20 + $0x10] sm:$0xff] }
  0x2d   : > { %40431 = vmatpush3.bf16.msra.mxu0 %v40428_v54  ;;  %40527 = vmatpush3.bf16.msra.mxu1 %v40524_v60  ;;  %v40528_v34 = vpack.c.bf16 %v1852_v31, %v1845_v15  ;;  %v1102_v21 = vand.u32 4294901760, %v45154_v44  ;;  %v2332_v23 = vand.u32 4294901760, %v45169_v47  ;;  %v2335_v24 = vand.u32 4294901760, %v45174_v48 }
  0x2e   : > { %35157 = vmatprep.mubr.f32.mxu0 %v565_v16  ;;  %35325 = vmatprep.mubr.f32.mxu1 %v565_v16  ;;  %v1087_v26 = vsel %vm459_vm0, %v438_v17, 0  ;;  %v40456_v33 = vpack.c.bf16 %v605_v57, %v598_v35  ;;  %v40552_v49 = vpack.c.bf16 %v1850_v5, %v1843_v1  ;;  %v1090_v36 = vsel %vm459_vm0, %v439_v27, 0 }
  0x2f   : > { %40433 = vmatprep.subr.bf16.mxu0 %v40432_v30  ;;  %40529 = vmatprep.subr.bf16.mxu1 %v40528_v34  ;;  %v45220_v35 = vand.u32 4294901760, %v1087_v26  ;;  %v45226_v52 = vsub.f32 %v45149_v41, %v1099_v20  ;;  %v45229_v54 = vsub.f32 %v45154_v44, %v1102_v21  ;;  %v45237_v57 = vsub.f32 %v45169_v47, %v2332_v23 }
  0x30   : > { %35158 = vmatmul.mubr.f32.gmra.mrb[2].mxu0 %v575_v32  ;;  %35326 = vmatmul.mubr.f32.gmra.mrb[2].mxu1 %v575_v32  ;;  %v1093_v63 = vsel %vm459_vm0, %v440_v29, 0  ;;  %v45251_v0 = vand.u32 4294901760, %v1090_v36  ;;  %v45290_v15 = vpack.c.bf16 %v1102_v21, %v1099_v20  ;;  %vm19378_vm3 = vcmask 228352  }
  0x31   : > { %40435 = vmatpush3.bf16.msra.mxu0 %v40432_v30  ;;  %40531 = vmatpush3.bf16.msra.mxu1 %v40528_v34  ;;  %v45254_v1 = vsub.f32 %v1087_v26, %v45220_v35  ;;  %v1210_v2 = vand.u32 4294901760, %v45226_v52  ;;  %v1217_v3 = vand.u32 4294901760, %v45229_v54  ;;  %v2443_v5 = vand.u32 4294901760, %v45237_v57 }
  0x32   : > { %35168 = vmatprep.mubr.f32.mxu0 %v45058_v42  ;;  %35336 = vmatprep.mubr.f32.mxu1 %v45058_v42  ;;  %v45263_v7 = vand.u32 4294901760, %v1093_v63  ;;  %v45282_v12 = vsub.f32 %v1090_v36, %v45251_v0  ;;  %vm19385_vm6 = vcmask 1043456   ;;  %vm20466_vm7 = vcmask 685056  }
  0x33   : > { %40437 = vmatprep.subr.bf16.mxu0 %v40436_v37  ;;  %40533 = vmatprep.subr.bf16.mxu1 %v40532_v38  ;;  %v45293_v16 = vand.u32 4294901760, %v45254_v1  ;;  %v1211_v30 = vsub.f32 %v45226_v52, %v1210_v2  ;;  %v1218_v31 = vsub.f32 %v45229_v54, %v1217_v3  ;;  %vm20464_vm8 = vcmask 687104  }
  0x34   : > { %35169 = vmatmul.mubr.f32.vlgmr.msra.gmra.mrb[0].mxu0 %v45060_v43  ;;  %35337 = vmatmul.mubr.f32.vlgmr.msra.gmra.mrb[0].mxu1 %v45060_v43  ;;  %v45310_v32 = vsub.f32 %v1093_v63, %v45263_v7  ;;  %v45329_v44 = vand.u32 4294901760, %v45282_v12  ;;  %vm44857_vm9 = vmmov 0   ;;  %vm26860_vm10 = vcmask 80896  }
  0x35   : > { %40439 = vmatpush3.bf16.msra.mxu0 %v40436_v37  ;;  %40535 = vmatpush3.bf16.msra.mxu1 %v40532_v38  ;;  %v45319_v37 = vpack.c.bf16 %v2335_v24, %v2332_v23  ;;  %v1170_v47 = vsub.f32 %v45254_v1, %v45293_v16  ;;  %v1219_v17 = vand.u32 4294901760, %v1218_v31  ;;  %vm26863_vm11 = vcmask 1041408  }
  0x36   : > { %35171 = vmatprep.mubr.f32.mxu0 %v45075_v53  ;;  %35339 = vmatprep.mubr.f32.mxu1 %v45075_v53  ;;  %v45343_v23 = vand.u32 4294901760, %v45310_v32  ;;  %v1180_v26 = vsub.f32 %v45282_v12, %v45329_v44  ;;  %vm27797_vm12 = vcmask 651264   ;;  %vm27822_vm13 = vcmask 654336  }
  0x37   : > { %40441 = vmatprep.subr.bf16.mxu0 %v40440_v39  ;;  %40537 = vmatprep.subr.bf16.mxu1 %v40536_v40  ;;  %vm30711_vm14 = vcmask 982016   ;;  %vm31938_vm15 = vcmask 73728  }
  0x38   : > { %35172 = vmatmul.mubr.f32.gmra.mrb[2].mxu0 %v45077_v55  ;;  %35340 = vmatmul.mubr.f32.gmra.mrb[2].mxu1 %v45077_v55  ;;  %v1181_v36 = vand.u32 4294901760, %v1180_v26 }
  0x39   : > { %40443 = vmatpush3.bf16.msra.mxu0 %v40440_v39  ;;  %40539 = vmatpush3.bf16.msra.mxu1 %v40536_v40 }
  0x3a   : > { %35182 = vmatprep.mubr.f32.mxu0 %v45070_v50  ;;  %35350 = vmatprep.mubr.f32.mxu1 %v45070_v50  ;;  %v45200_v50 = vld [vmem:[%s53407_s1 + $0x10] sm:$0xff] }
  0x3b   : > { %40445 = vmatprep.subr.bf16.mxu0 %v45003_v14  ;;  %40541 = vmatprep.subr.bf16.mxu1 %v45007_v18  ;;  %v1105_v56 = vand.u32 4294901760, %v45200_v50 }
  0x3c   : > { %35183 = vmatmul.mubr.f32.vlgmr.msra.gmra.mrb[0].mxu0 %v45073_v51  ;;  %35351 = vmatmul.mubr.f32.vlgmr.msra.gmra.mrb[0].mxu1 %v45073_v51  ;;  %v45205_v51 = vld [vmem:[%s53407_s1 + $0x18] sm:$0xff] }
  0x3d   : > { %40447 = vmatpush3.bf16.msra.mxu0 %v45003_v14  ;;  %40543 = vmatpush3.bf16.msra.mxu1 %v45007_v18  ;;  %v1108_v60 = vand.u32 4294901760, %v45205_v51  ;;  %v45266_v8 = vsub.f32 %v45200_v50, %v1105_v56 }
  0x3e   : > { %35185 = vmatprep.mubr.f32.mxu0 %v45090_v61  ;;  %35353 = vmatprep.mubr.f32.mxu1 %v45090_v61  ;;  %v2338_v61 = vand.u32 4294901760, %v45212_v25 }
  0x3f   : > { %40449 = vmatprep.subr.bf16.mxu0 %v45009_v19  ;;  %40545 = vmatprep.subr.bf16.mxu1 %v45016_v22  ;;  %v45271_v9 = vsub.f32 %v45205_v51, %v1108_v60  ;;  %v1224_v34 = vand.u32 4294901760, %v45266_v8  ;;  %v45326_v41 = vpack.c.bf16 %v1108_v60, %v1105_v56 }
  0x40   : > { %35186 = vmatmul.mubr.f32.gmra.mrb[2].mxu0 %v45093_v62  ;;  %35354 = vmatmul.mubr.f32.gmra.mrb[2].mxu1 %v45093_v62  ;;  %v2341_v62 = vand.u32 4294901760, %v45217_v28  ;;  %v45274_v10 = vsub.f32 %v45212_v25, %v2338_v61 }
  0x41   : > { %40451 = vmatpush3.bf16.msra.mxu0 %v45009_v19  ;;  %40547 = vmatpush3.bf16.msra.mxu1 %v45016_v22  ;;  %v1231_v38 = vand.u32 4294901760, %v45271_v9  ;;  %v40488_v63 = vpack.c.bf16 %v45271_v9, %v45266_v8 }
  0x42   : > { %35196 = vmatprep.mubr.f32.mxu0 %v45084_v58  ;;  %35364 = vmatprep.mubr.f32.mxu1 %v45084_v58  ;;  %v45242_v58 = vsub.f32 %v45174_v48, %v2335_v24  ;;  %v45277_v11 = vsub.f32 %v45217_v28, %v2341_v62  ;;  %v2457_v39 = vand.u32 4294901760, %v45274_v10  ;;  %v1212_v48 = vand.u32 4294901760, %v1211_v30  ;;  %v45414_v30 = vld [vmem:[%s53407_s1 + $0x48] sm:$0xff] }
  0x43   : > { %40453 = vmatprep.subr.bf16.mxu0 %v40452_v45  ;;  %40549 = vmatprep.subr.bf16.mxu1 %v40548_v46 }
  0x44   : > { %35197 = vmatmul.mubr.f32.vlgmr.msra.gmra.mrb[0].mxu0 %v45087_v59  ;;  %35365 = vmatmul.mubr.f32.vlgmr.msra.gmra.mrb[0].mxu1 %v45087_v59  ;;  %v441_v59 = vld [vmem:[%s45028_s20 + $0x18] sm:$0xf]  ;;  %v2464_v40 = vand.u32 4294901760, %v45277_v11 }
  0x45   : > { %40455 = vmatpush3.bf16.msra.mxu0 %v40452_v45  ;;  %40551 = vmatpush3.bf16.msra.mxu1 %v40548_v46  ;;  %v45336_v46 = vpack.c.bf16 %v2341_v62, %v2338_v61  ;;  %v40580_v62 = vpack.c.bf16 %v45242_v58, %v45237_v57 }
  0x46   : > { %35199 = vmatprep.mubr.f32.mxu0 %v45104_v4  ;;  %35367 = vmatprep.mubr.f32.mxu1 %v45104_v4  ;;  %v1096_v4 = vsel %vm459_vm0, %v441_v59, 0  ;;  %v2465_v24 = vsub.f32 %v45277_v11, %v2464_v40 }
  0x47   : > { %40457 = vmatprep.subr.bf16.mxu0 %v40456_v33  ;;  %40553 = vmatprep.subr.bf16.mxu1 %v40552_v49  ;;  %v45284_v13 = vand.u32 4294901760, %v1096_v4 }
  0x48   : > { %35200 = vmatmul.mubr.f32.gmra.mrb[2].mxu0 %v45108_v6  ;;  %35368 = vmatmul.mubr.f32.gmra.mrb[2].mxu1 %v45108_v6  ;;  %v2450_v6 = vand.u32 4294901760, %v45242_v58  ;;  %v2466_v29 = vand.u32 4294901760, %v2465_v24 }
  0x49   : > { %40459 = vmatpush3.bf16.msra.mxu0 %v40456_v33  ;;  %40555 = vmatpush3.bf16.msra.mxu1 %v40552_v49  ;;  %v45332_v45 = vsub.f32 %v1096_v4, %v45284_v13  ;;  %v1171_v33 = vand.u32 4294901760, %v1170_v47  ;;  %v40476_v49 = vpack.c.bf16 %v1219_v17, %v1212_v48  ;;  %v40584_v4 = vpack.c.bf16 %v45277_v11, %v45274_v10  ;;  %v2948_v48 = vld [vmem:[%s45028_s20 + $0x1a] sm:$0xf] }
  0x4a   : > { %35210 = vmatprep.mubr.f32.mxu0 %v45058_v42  ;;  %35378 = vmatprep.mubr.f32.mxu1 %v45058_v42  ;;  %v40596_v31 = vpack.c.bf16 %v2450_v6, %v2443_v5  ;;  %v2964_v26 = vsel %vm459_vm0, %v2948_v48, 0 }
  0x4b   : > { %40461 = vmatprep.subr.bf16.mxu0 %v45003_v14  ;;  %40557 = vmatprep.subr.bf16.mxu1 %v45007_v18  ;;  %v45364_v27 = vand.u32 4294901760, %v45332_v45 }
  0x4c   : > { %35211 = vmatmul.mubr.f32.vlgmr.msra.gmra.mrb[0].mxu0 %v45060_v43  ;;  %35379 = vmatmul.mubr.f32.vlgmr.msra.gmra.mrb[0].mxu1 %v45060_v43 }
  0x4d   : > { %40463 = vmatpush3.bf16.msra.mxu0 %v45003_v14  ;;  %40559 = vmatpush3.bf16.msra.mxu1 %v45007_v18  ;;  %v2444_v14 = vsub.f32 %v45237_v57, %v2443_v5  ;;  %v2451_v18 = vsub.f32 %v45242_v58, %v2450_v6  ;;  %v2970_v57 = vand.u32 4294901760, %v45414_v30  ;;  %v2946_v5 = vld [vmem:[%s45028_s20 + $0xa] sm:$0xff]  ;;  %v40504_v6 = vpack.c.bf16 %v1231_v38, %v1224_v34 }
  0x4e   : > { %35213 = vmatprep.mubr.f32.mxu0 %v45075_v53  ;;  %35381 = vmatprep.mubr.f32.mxu1 %v45075_v53 }
  0x4f   : > { %40465 = vmatprep.subr.bf16.mxu0 %v45009_v19  ;;  %40561 = vmatprep.subr.bf16.mxu1 %v45016_v22  ;;  %v2445_v20 = vand.u32 4294901760, %v2444_v14  ;;  %v2452_v21 = vand.u32 4294901760, %v2451_v18  ;;  %v45429_v14 = vld [vmem:[%s53408_s2 + $0x40] sm:$0xff]  ;;  %v45434_v18 = vld [vmem:[%s53408_s2 + $0x48] sm:$0xff] }
  0x50   : > { %35214 = vmatmul.mubr.f32.gmra.mrb[2].mxu0 %v45077_v55  ;;  %35382 = vmatmul.mubr.f32.gmra.mrb[2].mxu1 %v45077_v55  ;;  %v3590_v58 = vand.u32 4294901760, %v45429_v14 }
  0x51   : > { %40467 = vmatpush3.bf16.msra.mxu0 %v45009_v19  ;;  %40563 = vmatpush3.bf16.msra.mxu1 %v45016_v22  ;;  %v1225_v19 = vsub.f32 %v45266_v8, %v1224_v34  ;;  %v1232_v22 = vsub.f32 %v45271_v9, %v1231_v38  ;;  %v40572_v50 = vpack.c.bf16 %v2452_v21, %v2445_v20  ;;  %v45472_v8 = vld [vmem:[%s53408_s2 + $0x50] sm:$0xff]  ;;  %v45477_v9 = vld [vmem:[%s53408_s2 + $0x58] sm:$0xff]  ;;  %v2958_v34 = vsel %vm459_vm0, %v2946_v5, 0 }
  0x52   : > { %35224 = vmatprep.mubr.f32.mxu0 %v45058_v42  ;;  %35392 = vmatprep.mubr.f32.mxu1 %v45058_v42  ;;  %v2458_v42 = vsub.f32 %v45274_v10, %v2457_v39  ;;  %v2947_v10 = vld [vmem:[%s45028_s20 + $0x12] sm:$0xff]  ;;  %v3596_v20 = vand.u32 4294901760, %v45472_v8  ;;  %v3599_v21 = vand.u32 4294901760, %v45477_v9 }
  0x53   : > { %40469 = vmatprep.subr.bf16.mxu0 %v45290_v15  ;;  %40565 = vmatprep.subr.bf16.mxu1 %v45319_v37  ;;  %v1226_v51 = vand.u32 4294901760, %v1225_v19  ;;  %v1233_v25 = vand.u32 4294901760, %v1232_v22  ;;  %v45511_v19 = vand.u32 4294901760, %v2958_v34 }
  0x54   : > { %35225 = vmatmul.mubr.f32.vlgmr.msra.gmra.mrb[0].mxu0 %v45060_v43  ;;  %35393 = vmatmul.mubr.f32.vlgmr.msra.gmra.mrb[0].mxu1 %v45060_v43  ;;  %v1190_v43 = vsub.f32 %v45310_v32, %v45343_v23  ;;  %v2459_v28 = vand.u32 4294901760, %v2458_v42 }
  0x55   : > { %40471 = vmatpush3.bf16.msra.mxu0 %v45290_v15  ;;  %40567 = vmatpush3.bf16.msra.mxu1 %v45319_v37  ;;  %v40480_v59 = vpack.c.bf16 %v1233_v25, %v1226_v51  ;;  %v45534_v51 = vsub.f32 %v45472_v8, %v3596_v20  ;;  %v45537_v25 = vsub.f32 %v45477_v9, %v3599_v21 }
  0x56   : > { %35227 = vmatprep.mubr.f32.mxu0 %v45075_v53  ;;  %35395 = vmatprep.mubr.f32.mxu1 %v45075_v53  ;;  %v1200_v53 = vsub.f32 %v45332_v45, %v45364_v27  ;;  %v1191_v56 = vand.u32 4294901760, %v1190_v43  ;;  %v40576_v60 = vpack.c.bf16 %v2466_v29, %v2459_v28  ;;  %v45542_v28 = vsub.f32 %v2958_v34, %v45511_v19 }
  0x57   : > { %40473 = vmatprep.subr.bf16.mxu0 %v45326_v41  ;;  %40569 = vmatprep.subr.bf16.mxu1 %v45336_v46  ;;  %v45544_v29 = vand.u32 4294901760, %v2964_v26 }
  0x58   : > { %35228 = vmatmul.mubr.f32.gmra.mrb[2].mxu0 %v45077_v55  ;;  %35396 = vmatmul.mubr.f32.gmra.mrb[2].mxu1 %v45077_v55  ;;  %v1201_v61 = vand.u32 4294901760, %v1200_v53  ;;  %v40484_v55 = vpack.c.bf16 %v45229_v54, %v45226_v52  ;;  %v2945_v52 = vld [vmem:[%s45028_s20 + $0x2] sm:$0xff] }
  0x59   : > { %40475 = vmatpush3.bf16.msra.mxu0 %v45326_v41  ;;  %40571 = vmatpush3.bf16.msra.mxu1 %v45336_v46 }
  0x5a   : > { %35238 = vmatprep.mubr.f32.mxu0 %v1171_v33  ;;  %35406 = vmatprep.mubr.f32.mxu1 %v1171_v33 }
  0x5b   : > { %40477 = vmatprep.subr.bf16.mxu0 %v40476_v49  ;;  %40573 = vmatprep.subr.bf16.mxu1 %v40572_v50 }
  0x5c   : > { %35239 = vmatmul.mubr.f32.vlgmr.msra.gmra.mrb[0].mxu0 %v1181_v36  ;;  %35407 = vmatmul.mubr.f32.vlgmr.msra.gmra.mrb[0].mxu1 %v1181_v36 }
  0x5d   : > { %40479 = vmatpush3.bf16.msra.mxu0 %v40476_v49  ;;  %40575 = vmatpush3.bf16.msra.mxu1 %v40572_v50 }
  0x5e   : > { %35241 = vmatprep.mubr.f32.mxu0 %v1191_v56  ;;  %35409 = vmatprep.mubr.f32.mxu1 %v1191_v56 }
  0x5f   : > { %40481 = vmatprep.subr.bf16.mxu0 %v40480_v59  ;;  %40577 = vmatprep.subr.bf16.mxu1 %v40576_v60 }
  0x60   : > { %35242 = vmatmul.mubr.f32.gmra.mrb[2].mxu0 %v1201_v61  ;;  %35410 = vmatmul.mubr.f32.gmra.mrb[2].mxu1 %v1201_v61 }
  0x61   : > { %40483 = vmatpush3.bf16.msra.mxu0 %v40480_v59  ;;  %40579 = vmatpush3.bf16.msra.mxu1 %v40576_v60 }
  0x62   : > { %35252 = vmatprep.mubr.f32.mxu0 %v45220_v35  ;;  %35420 = vmatprep.mubr.f32.mxu1 %v45220_v35 }
  0x63   : > { %40485 = vmatprep.subr.bf16.mxu0 %v40484_v55  ;;  %40581 = vmatprep.subr.bf16.mxu1 %v40580_v62 }
  0x64   : > { %35253 = vmatmul.mubr.f32.vlgmr.msra.gmra.mrb[0].mxu0 %v45251_v0  ;;  %35421 = vmatmul.mubr.f32.vlgmr.msra.gmra.mrb[0].mxu1 %v45251_v0 }
  0x65   : > { %40487 = vmatpush3.bf16.msra.mxu0 %v40484_v55  ;;  %40583 = vmatpush3.bf16.msra.mxu1 %v40580_v62 }
  0x66   : > { %35255 = vmatprep.mubr.f32.mxu0 %v45263_v7  ;;  %35423 = vmatprep.mubr.f32.mxu1 %v45263_v7 }
  0x67   : > { %40489 = vmatprep.subr.bf16.mxu0 %v40488_v63  ;;  %40585 = vmatprep.subr.bf16.mxu1 %v40584_v4 }
  0x68   : > { %35256 = vmatmul.mubr.f32.gmra.mrb[2].mxu0 %v45284_v13  ;;  %35424 = vmatmul.mubr.f32.gmra.mrb[2].mxu1 %v45284_v13 }
  0x69   : > { %40491 = vmatpush3.bf16.msra.mxu0 %v40488_v63  ;;  %40587 = vmatpush3.bf16.msra.mxu1 %v40584_v4  ;;  %v3715_v63 = vand.u32 4294901760, %v45534_v51  ;;  %v3722_v4 = vand.u32 4294901760, %v45537_v25 }
  0x6a   : > { %35266 = vmatprep.mubr.f32.mxu0 %v45254_v1  ;;  %35434 = vmatprep.mubr.f32.mxu1 %v45254_v1  ;;  %v45409_v1 = vld [vmem:[%s53407_s1 + $0x40] sm:$0xff] }
  0x6b   : > { %40493 = vmatprep.subr.bf16.mxu0 %v45290_v15  ;;  %40589 = vmatprep.subr.bf16.mxu1 %v45319_v37  ;;  %v2967_v54 = vand.u32 4294901760, %v45409_v1 }
  0x6c   : > { %35267 = vmatmul.mubr.f32.vlgmr.msra.gmra.mrb[0].mxu0 %v45282_v12  ;;  %35435 = vmatmul.mubr.f32.vlgmr.msra.gmra.mrb[0].mxu1 %v45282_v12  ;;  %v40500_v12 = vpack.c.bf16 %v1217_v3, %v1210_v2  ;;  %v3593_v2 = vand.u32 4294901760, %v45434_v18  ;;  %v2955_v3 = vsel %vm459_vm0, %v2945_v52, 0 }
  0x6d   : > { %40495 = vmatpush3.bf16.msra.mxu0 %v45290_v15  ;;  %40591 = vmatpush3.bf16.msra.mxu1 %v45319_v37  ;;  %v45480_v11 = vand.u32 4294901760, %v2955_v3  ;;  %v45486_v38 = vsub.f32 %v45409_v1, %v2967_v54  ;;  %v45550_v36 = vpack.c.bf16 %v2970_v57, %v2967_v54 }
  0x6e   : > { %35269 = vmatprep.mubr.f32.mxu0 %v45310_v32  ;;  %35437 = vmatprep.mubr.f32.mxu1 %v45310_v32  ;;  %v40600_v32 = vpack.c.bf16 %v2464_v40, %v2457_v39  ;;  %v45489_v39 = vsub.f32 %v45414_v30, %v2970_v57  ;;  %v45502_v47 = vsub.f32 %v45434_v18, %v3593_v2  ;;  %v45589_v30 = vand.u32 4294901760, %v45542_v28 }
  0x6f   : > { %40497 = vmatprep.subr.bf16.mxu0 %v45326_v41  ;;  %40593 = vmatprep.subr.bf16.mxu1 %v45336_v46  ;;  %v45514_v22 = vsub.f32 %v2955_v3, %v45480_v11  ;;  %v3078_v42 = vand.u32 4294901760, %v45486_v38  ;;  %v45579_v55 = vpack.c.bf16 %v3593_v2, %v3590_v58  ;;  %v3723_v2 = vsub.f32 %v45537_v25, %v3722_v4 }
  0x70   : > { %35270 = vmatmul.mubr.f32.gmra.mrb[2].mxu0 %v45332_v45  ;;  %35438 = vmatmul.mubr.f32.gmra.mrb[2].mxu1 %v45332_v45  ;;  %v45465_v45 = vld [vmem:[%s53407_s1 + $0x58] sm:$0xff]  ;;  %v3085_v24 = vand.u32 4294901760, %v45489_v39  ;;  %v3048_v3 = vsub.f32 %v45542_v28, %v45589_v30 }
  0x71   : > { %40499 = vmatpush3.bf16.msra.mxu0 %v45326_v41  ;;  %40595 = vmatpush3.bf16.msra.mxu1 %v45336_v46  ;;  %v2976_v17 = vand.u32 4294901760, %v45465_v45  ;;  %v45553_v53 = vand.u32 4294901760, %v45514_v22  ;;  %v3079_v56 = vsub.f32 %v45486_v38, %v3078_v42 }
  0x72   : > { %35280 = vmatprep.mubr.f32.mxu0 %v45293_v16  ;;  %35448 = vmatprep.mubr.f32.mxu1 %v45293_v16  ;;  %v45460_v16 = vld [vmem:[%s53407_s1 + $0x50] sm:$0xff]  ;;  %v3086_v59 = vsub.f32 %v45489_v39, %v3085_v24  ;;  %v3049_v34 = vand.u32 4294901760, %v3048_v3 }
  0x73   : > { %40501 = vmatprep.subr.bf16.mxu0 %v40500_v12  ;;  %40597 = vmatprep.subr.bf16.mxu1 %v40596_v31  ;;  %v2973_v40 = vand.u32 4294901760, %v45460_v16  ;;  %v45531_v43 = vsub.f32 %v45465_v45, %v2976_v17  ;;  %v3080_v18 = vand.u32 4294901760, %v3079_v56  ;;  %v45674_v56 = vld [vmem:[%s53407_s1 + $0x68] sm:$0xff] }
  0x74   : > { %35281 = vmatmul.mubr.f32.vlgmr.msra.gmra.mrb[0].mxu0 %v45329_v44  ;;  %35449 = vmatmul.mubr.f32.vlgmr.msra.gmra.mrb[0].mxu1 %v45329_v44  ;;  %v45497_v44 = vsub.f32 %v45429_v14, %v3590_v58  ;;  %v3038_v14 = vsub.f32 %v45514_v22, %v45553_v53  ;;  %v3087_v52 = vand.u32 4294901760, %v3086_v59 }
  0x75   : > { %40503 = vmatpush3.bf16.msra.mxu0 %v40500_v12  ;;  %40599 = vmatpush3.bf16.msra.mxu1 %v40596_v31  ;;  %v45526_v50 = vsub.f32 %v45460_v16, %v2973_v40  ;;  %v3099_v62 = vand.u32 4294901760, %v45531_v43  ;;  %v45586_v1 = vpack.c.bf16 %v2976_v17, %v2973_v40  ;;  %v45592_v12 = vsub.f32 %v2964_v26, %v45544_v29 }
  0x76   : > { %35283 = vmatprep.mubr.f32.mxu0 %v45343_v23  ;;  %35451 = vmatprep.mubr.f32.mxu1 %v45343_v23  ;;  %v2961_v23 = vsel %vm459_vm0, %v2947_v10, 0  ;;  %v3701_v33 = vand.u32 4294901760, %v45497_v44  ;;  %v45596_v31 = vpack.c.bf16 %v3599_v21, %v3596_v20  ;;  %v3724_v10 = vand.u32 4294901760, %v3723_v2 }
  0x77   : > { %40505 = vmatprep.subr.bf16.mxu0 %v40504_v6  ;;  %40601 = vmatprep.subr.bf16.mxu1 %v40600_v32  ;;  %v45523_v49 = vand.u32 4294901760, %v2961_v23  ;;  %v3092_v61 = vand.u32 4294901760, %v45526_v50  ;;  %v45624_v5 = vand.u32 4294901760, %v45592_v12  ;;  %v40676_v21 = vpack.c.bf16 %v45502_v47, %v45497_v44 }
  0x78   : > { %35284 = vmatmul.mubr.f32.gmra.mrb[2].mxu0 %v45364_v27  ;;  %35452 = vmatmul.mubr.f32.gmra.mrb[2].mxu1 %v45364_v27  ;;  %v3708_v27 = vand.u32 4294901760, %v45502_v47  ;;  %v40680_v26 = vpack.c.bf16 %v45537_v25, %v45534_v51 }
  0x79   : > { %40507 = vmatpush3.bf16.msra.mxu0 %v40504_v6  ;;  %40603 = vmatpush3.bf16.msra.mxu1 %v40600_v32  ;;  %v45570_v60 = vsub.f32 %v2961_v23, %v45523_v49  ;;  %v3039_v6 = vand.u32 4294901760, %v3038_v14  ;;  %v40620_v32 = vpack.c.bf16 %v3087_v52, %v3080_v18  ;;  %v40632_v23 = vpack.c.bf16 %v45531_v43, %v45526_v50  ;;  %v4210_v18 = vld [vmem:[%s45028_s20 + $0x1b] sm:$0xf] }
  0x7a   : > { %35294 = vmatprep.mubr.f32.mxu0 %v45220_v35  ;;  %35462 = vmatprep.mubr.f32.mxu1 %v45220_v35  ;;  %v40692_v59 = vpack.c.bf16 %v3708_v27, %v3701_v33  ;;  %v4226_v3 = vsel %vm459_vm0, %v4210_v18, 0 }
  0x7b   : > { %40509 = vmatprep.subr.bf16.mxu0 %v45290_v15  ;;  %40605 = vmatprep.subr.bf16.mxu1 %v45319_v37  ;;  %v45603_v58 = vand.u32 4294901760, %v45570_v60 }
  0x7c   : > { %35295 = vmatmul.mubr.f32.vlgmr.msra.gmra.mrb[0].mxu0 %v45251_v0  ;;  %35463 = vmatmul.mubr.f32.vlgmr.msra.gmra.mrb[0].mxu1 %v45251_v0 }
  0x7d   : > { %40511 = vmatpush3.bf16.msra.mxu0 %v45290_v15  ;;  %40607 = vmatpush3.bf16.msra.mxu1 %v45319_v37  ;;  %v3702_v15 = vsub.f32 %v45497_v44, %v3701_v33  ;;  %v3709_v37 = vsub.f32 %v45502_v47, %v3708_v27  ;;  %v4232_v44 = vand.u32 4294901760, %v45674_v56  ;;  %v4208_v33 = vld [vmem:[%s45028_s20 + $0xb] sm:$0xff]  ;;  %v40648_v27 = vpack.c.bf16 %v3099_v62, %v3092_v61 }
  0x7e   : > { %35297 = vmatprep.mubr.f32.mxu0 %v45263_v7  ;;  %35465 = vmatprep.mubr.f32.mxu1 %v45263_v7 }
  0x7f   : > { %40513 = vmatprep.subr.bf16.mxu0 %v45326_v41  ;;  %40609 = vmatprep.subr.bf16.mxu1 %v45336_v46  ;;  %v3703_v54 = vand.u32 4294901760, %v3702_v15  ;;  %v3710_v57 = vand.u32 4294901760, %v3709_v37  ;;  %v45689_v15 = vld [vmem:[%s53408_s2 + $0x60] sm:$0xff]  ;;  %v45694_v37 = vld [vmem:[%s53408_s2 + $0x68] sm:$0xff] }
  0x80   : > { %35298 = vmatmul.mubr.f32.gmra.mrb[2].mxu0 %v45284_v13  ;;  %35466 = vmatmul.mubr.f32.gmra.mrb[2].mxu1 %v45284_v13  ;;  %v4852_v47 = vand.u32 4294901760, %v45689_v15 }
  0x81   : > { %40515 = vmatpush3.bf16.msra.mxu0 %v45326_v41  ;;  %40611 = vmatpush3.bf16.msra.mxu1 %v45336_v46  ;;  %v3093_v41 = vsub.f32 %v45526_v50, %v3092_v61  ;;  %v3100_v46 = vsub.f32 %v45531_v43, %v3099_v62  ;;  %v40668_v16 = vpack.c.bf16 %v3710_v57, %v3703_v54  ;;  %v45732_v50 = vld [vmem:[%s53408_s2 + $0x70] sm:$0xff]  ;;  %v45737_v43 = vld [vmem:[%s53408_s2 + $0x78] sm:$0xff]  ;;  %v4220_v61 = vsel %vm459_vm0, %v4208_v33, 0 }
  0x82   : > { %35308 = vmatprep.mubr.f32.mxu0 %v45220_v35  ;;  %35476 = vmatprep.mubr.f32.mxu1 %v45220_v35  ;;  %v3716_v35 = vsub.f32 %v45534_v51, %v3715_v63  ;;  %v4209_v51 = vld [vmem:[%s45028_s20 + $0x13] sm:$0xff]  ;;  %v4858_v54 = vand.u32 4294901760, %v45732_v50  ;;  %v4861_v57 = vand.u32 4294901760, %v45737_v43 }
  0x83   : > { %40613 = vmatprep.subr.bf16.mxu0 %v45550_v36  ;;  %40661 = vmatprep.subr.bf16.mxu1 %v45579_v55  ;;  %v3094_v45 = vand.u32 4294901760, %v3093_v41  ;;  %v3101_v8 = vand.u32 4294901760, %v3100_v46  ;;  %v45771_v41 = vand.u32 4294901760, %v4220_v61 }
  0x84   : > { %35309 = vmatmul.mubr.f32.vlgmr.msra.gmra.mrb[0].mxu0 %v45251_v0  ;;  %35477 = vmatmul.mubr.f32.vlgmr.msra.gmra.mrb[0].mxu1 %v45251_v0  ;;  %v3058_v0 = vsub.f32 %v45570_v60, %v45603_v58  ;;  %v3717_v9 = vand.u32 4294901760, %v3716_v35 }
  0x85   : > { %40615 = vmatpush3.bf16.msra.mxu0 %v45550_v36  ;;  %40663 = vmatpush3.bf16.msra.mxu1 %v45579_v55  ;;  %v40624_v48 = vpack.c.bf16 %v3101_v8, %v3094_v45  ;;  %v45794_v45 = vsub.f32 %v45732_v50, %v4858_v54  ;;  %v45797_v8 = vsub.f32 %v45737_v43, %v4861_v57 }
  0x86   : > { %35311 = vmatprep.mubr.f32.mxu0 %v45263_v7  ;;  %35479 = vmatprep.mubr.f32.mxu1 %v45263_v7  ;;  %v3068_v7 = vsub.f32 %v45592_v12, %v45624_v5  ;;  %v3059_v40 = vand.u32 4294901760, %v3058_v0  ;;  %v40672_v17 = vpack.c.bf16 %v3724_v10, %v3717_v9  ;;  %v45802_v9 = vsub.f32 %v4220_v61, %v45771_v41 }
  0x87   : > { %40617 = vmatprep.subr.bf16.mxu0 %v45586_v1  ;;  %40665 = vmatprep.subr.bf16.mxu1 %v45596_v31  ;;  %v45804_v10 = vand.u32 4294901760, %v4226_v3 }
  0x88   : > { %35312 = vmatmul.mubr.f32.gmra.mrb[2].mxu0 %v45284_v13  ;;  %35480 = vmatmul.mubr.f32.gmra.mrb[2].mxu1 %v45284_v13  ;;  %v3069_v20 = vand.u32 4294901760, %v3068_v7  ;;  %v40628_v13 = vpack.c.bf16 %v45489_v39, %v45486_v38  ;;  %v4207_v38 = vld [vmem:[%s45028_s20 + $0x3] sm:$0xff] }
  0x89   : > { %40619 = vmatpush3.bf16.msra.mxu0 %v45586_v1  ;;  %40667 = vmatpush3.bf16.msra.mxu1 %v45596_v31 }
  0x8a   : > { %35490 = vmatprep.mubr.f32.mxu0 %v3039_v6  ;;  %35574 = vmatprep.mubr.f32.mxu1 %v3039_v6 }
  0x8b   : > { %40621 = vmatprep.subr.bf16.mxu0 %v40620_v32  ;;  %40669 = vmatprep.subr.bf16.mxu1 %v40668_v16 }
  0x8c   : > { %35491 = vmatmul.mubr.f32.vlgmr.msra.gmra.mrb[0].mxu0 %v3049_v34  ;;  %35575 = vmatmul.mubr.f32.vlgmr.msra.gmra.mrb[0].mxu1 %v3049_v34 }
  0x8d   : > { %40623 = vmatpush3.bf16.msra.mxu0 %v40620_v32  ;;  %40671 = vmatpush3.bf16.msra.mxu1 %v40668_v16 }
  0x8e   : > { %35493 = vmatprep.mubr.f32.mxu0 %v3059_v40  ;;  %35577 = vmatprep.mubr.f32.mxu1 %v3059_v40 }
  0x8f   : > { %40625 = vmatprep.subr.bf16.mxu0 %v40624_v48  ;;  %40673 = vmatprep.subr.bf16.mxu1 %v40672_v17 }
  0x90   : > { %35494 = vmatmul.mubr.f32.gmra.mrb[2].mxu0 %v3069_v20  ;;  %35578 = vmatmul.mubr.f32.gmra.mrb[2].mxu1 %v3069_v20 }
  0x91   : > { %40627 = vmatpush3.bf16.msra.mxu0 %v40624_v48  ;;  %40675 = vmatpush3.bf16.msra.mxu1 %v40672_v17 }
  0x92   : > { %35504 = vmatprep.mubr.f32.mxu0 %v45480_v11  ;;  %35588 = vmatprep.mubr.f32.mxu1 %v45480_v11 }
  0x93   : > { %40629 = vmatprep.subr.bf16.mxu0 %v40628_v13  ;;  %40677 = vmatprep.subr.bf16.mxu1 %v40676_v21 }
  0x94   : > { %35505 = vmatmul.mubr.f32.vlgmr.msra.gmra.mrb[0].mxu0 %v45511_v19  ;;  %35589 = vmatmul.mubr.f32.vlgmr.msra.gmra.mrb[0].mxu1 %v45511_v19 }
  0x95   : > { %40631 = vmatpush3.bf16.msra.mxu0 %v40628_v13  ;;  %40679 = vmatpush3.bf16.msra.mxu1 %v40676_v21 }
  0x96   : > { %35507 = vmatprep.mubr.f32.mxu0 %v45523_v49  ;;  %35591 = vmatprep.mubr.f32.mxu1 %v45523_v49 }
  0x97   : > { %40633 = vmatprep.subr.bf16.mxu0 %v40632_v23  ;;  %40681 = vmatprep.subr.bf16.mxu1 %v40680_v26 }
  0x98   : > { %35508 = vmatmul.mubr.f32.gmra.mrb[2].mxu0 %v45544_v29  ;;  %35592 = vmatmul.mubr.f32.gmra.mrb[2].mxu1 %v45544_v29 }
  0x99   : > { %40635 = vmatpush3.bf16.msra.mxu0 %v40632_v23  ;;  %40683 = vmatpush3.bf16.msra.mxu1 %v40680_v26  ;;  %v4977_v23 = vand.u32 4294901760, %v45794_v45  ;;  %v4984_v26 = vand.u32 4294901760, %v45797_v8 }
  0x9a   : > { %35518 = vmatprep.mubr.f32.mxu0 %v45514_v22  ;;  %35602 = vmatprep.mubr.f32.mxu1 %v45514_v22  ;;  %v45669_v22 = vld [vmem:[%s53407_s1 + $0x60] sm:$0xff] }
  0x9b   : > { %40637 = vmatprep.subr.bf16.mxu0 %v45550_v36  ;;  %40685 = vmatprep.subr.bf16.mxu1 %v45579_v55  ;;  %v4229_v39 = vand.u32 4294901760, %v45669_v22 }
  0x9c   : > { %35519 = vmatmul.mubr.f32.vlgmr.msra.gmra.mrb[0].mxu0 %v45542_v28  ;;  %35603 = vmatmul.mubr.f32.vlgmr.msra.gmra.mrb[0].mxu1 %v45542_v28  ;;  %v40644_v28 = vpack.c.bf16 %v3085_v24, %v3078_v42  ;;  %v4855_v42 = vand.u32 4294901760, %v45694_v37  ;;  %v4217_v24 = vsel %vm459_vm0, %v4207_v38, 0 }
  0x9d   : > { %40639 = vmatpush3.bf16.msra.mxu0 %v45550_v36  ;;  %40687 = vmatpush3.bf16.msra.mxu1 %v45579_v55  ;;  %v45740_v25 = vand.u32 4294901760, %v4217_v24  ;;  %v45746_v62 = vsub.f32 %v45669_v22, %v4229_v39  ;;  %v45810_v34 = vpack.c.bf16 %v4232_v44, %v4229_v39 }
  0x9e   : > { %35521 = vmatprep.mubr.f32.mxu0 %v45570_v60  ;;  %35605 = vmatprep.mubr.f32.mxu1 %v45570_v60  ;;  %v40696_v60 = vpack.c.bf16 %v3722_v4, %v3715_v63  ;;  %v45749_v63 = vsub.f32 %v45674_v56, %v4232_v44  ;;  %v45762_v14 = vsub.f32 %v45694_v37, %v4855_v42  ;;  %v45849_v56 = vand.u32 4294901760, %v45802_v9 }
  0x9f   : > { %40641 = vmatprep.subr.bf16.mxu0 %v45586_v1  ;;  %40689 = vmatprep.subr.bf16.mxu1 %v45596_v31  ;;  %v45774_v46 = vsub.f32 %v4217_v24, %v45740_v25  ;;  %v4340_v35 = vand.u32 4294901760, %v45746_v62  ;;  %v45839_v13 = vpack.c.bf16 %v4855_v42, %v4852_v47  ;;  %v4985_v42 = vsub.f32 %v45797_v8, %v4984_v26 }
  0xa0   : > { %35522 = vmatmul.mubr.f32.gmra.mrb[2].mxu0 %v45592_v12  ;;  %35606 = vmatmul.mubr.f32.gmra.mrb[2].mxu1 %v45592_v12  ;;  %v45725_v12 = vld [vmem:[%s53407_s1 + $0x78] sm:$0xff]  ;;  %v4347_v2 = vand.u32 4294901760, %v45749_v63  ;;  %v4310_v24 = vsub.f32 %v45802_v9, %v45849_v56 }
  0xa1   : > { %40643 = vmatpush3.bf16.msra.mxu0 %v45586_v1  ;;  %40691 = vmatpush3.bf16.msra.mxu1 %v45596_v31  ;;  %v4238_v52 = vand.u32 4294901760, %v45725_v12  ;;  %v45813_v7 = vand.u32 4294901760, %v45774_v46  ;;  %v4341_v40 = vsub.f32 %v45746_v62, %v4340_v35 }
  0xa2   : > { %35532 = vmatprep.mubr.f32.mxu0 %v45553_v53  ;;  %35616 = vmatprep.mubr.f32.mxu1 %v45553_v53  ;;  %v45720_v53 = vld [vmem:[%s53407_s1 + $0x70] sm:$0xff]  ;;  %v4348_v48 = vsub.f32 %v45749_v63, %v4347_v2  ;;  %v4311_v61 = vand.u32 4294901760, %v4310_v24 }
  0xa3   : > { %40645 = vmatprep.subr.bf16.mxu0 %v40644_v28  ;;  %40693 = vmatprep.subr.bf16.mxu1 %v40692_v59  ;;  %v4235_v4 = vand.u32 4294901760, %v45720_v53  ;;  %v45791_v0 = vsub.f32 %v45725_v12, %v4238_v52  ;;  %v4342_v37 = vand.u32 4294901760, %v4341_v40  ;;  %v45934_v40 = vld [vmem:[%s53407_s1 + $0x88] sm:$0xff] }
  0xa4   : > { %35533 = vmatmul.mubr.f32.vlgmr.msra.gmra.mrb[0].mxu0 %v45589_v30  ;;  %35617 = vmatmul.mubr.f32.vlgmr.msra.gmra.mrb[0].mxu1 %v45589_v30  ;;  %v45757_v30 = vsub.f32 %v45689_v15, %v4852_v47  ;;  %v4300_v15 = vsub.f32 %v45774_v46, %v45813_v7  ;;  %v4349_v38 = vand.u32 4294901760, %v4348_v48 }
  0xa5   : > { %40647 = vmatpush3.bf16.msra.mxu0 %v40644_v28  ;;  %40695 = vmatpush3.bf16.msra.mxu1 %v40692_v59  ;;  %v45786_v16 = vsub.f32 %v45720_v53, %v4235_v4  ;;  %v4361_v21 = vand.u32 4294901760, %v45791_v0  ;;  %v45846_v22 = vpack.c.bf16 %v4238_v52, %v4235_v4  ;;  %v45852_v28 = vsub.f32 %v4226_v3, %v45804_v10 }
  0xa6   : > { %35535 = vmatprep.mubr.f32.mxu0 %v45603_v58  ;;  %35619 = vmatprep.mubr.f32.mxu1 %v45603_v58  ;;  %v4223_v58 = vsel %vm459_vm0, %v4209_v51, 0  ;;  %v4963_v6 = vand.u32 4294901760, %v45757_v30  ;;  %v45856_v59 = vpack.c.bf16 %v4861_v57, %v4858_v54  ;;  %v4986_v51 = vand.u32 4294901760, %v4985_v42 }
  0xa7   : > { %40649 = vmatprep.subr.bf16.mxu0 %v40648_v27  ;;  %40697 = vmatprep.subr.bf16.mxu1 %v40696_v60  ;;  %v45783_v32 = vand.u32 4294901760, %v4223_v58  ;;  %v4354_v20 = vand.u32 4294901760, %v45786_v16  ;;  %v45884_v33 = vand.u32 4294901760, %v45852_v28  ;;  %v40772_v57 = vpack.c.bf16 %v45762_v14, %v45757_v30 }
  0xa8   : > { %35536 = vmatmul.mubr.f32.gmra.mrb[2].mxu0 %v45624_v5  ;;  %35620 = vmatmul.mubr.f32.gmra.mrb[2].mxu1 %v45624_v5  ;;  %v4970_v5 = vand.u32 4294901760, %v45762_v14  ;;  %v40776_v3 = vpack.c.bf16 %v45797_v8, %v45794_v45 }
  0xa9   : > { %40651 = vmatpush3.bf16.msra.mxu0 %v40648_v27  ;;  %40699 = vmatpush3.bf16.msra.mxu1 %v40696_v60  ;;  %v45830_v17 = vsub.f32 %v4223_v58, %v45783_v32  ;;  %v4301_v27 = vand.u32 4294901760, %v4300_v15  ;;  %v40716_v60 = vpack.c.bf16 %v4349_v38, %v4342_v37  ;;  %v40728_v58 = vpack.c.bf16 %v45791_v0, %v45786_v16  ;;  %v5472_v37 = vld [vmem:[%s45028_s20 + $0x1c] sm:$0xf] }
  0xaa   : > { %35546 = vmatprep.mubr.f32.mxu0 %v45480_v11  ;;  %35630 = vmatprep.mubr.f32.mxu1 %v45480_v11  ;;  %v40788_v48 = vpack.c.bf16 %v4970_v5, %v4963_v6  ;;  %v5488_v24 = vsel %vm459_vm0, %v5472_v37, 0 }
  0xab   : > { %40653 = vmatprep.subr.bf16.mxu0 %v45550_v36  ;;  %40701 = vmatprep.subr.bf16.mxu1 %v45579_v55  ;;  %v45863_v47 = vand.u32 4294901760, %v45830_v17 }
  0xac   : > { %35547 = vmatmul.mubr.f32.vlgmr.msra.gmra.mrb[0].mxu0 %v45511_v19  ;;  %35631 = vmatmul.mubr.f32.vlgmr.msra.gmra.mrb[0].mxu1 %v45511_v19 }
  0xad   : > { %40655 = vmatpush3.bf16.msra.mxu0 %v45550_v36  ;;  %40703 = vmatpush3.bf16.msra.mxu1 %v45579_v55  ;;  %v4964_v36 = vsub.f32 %v45757_v30, %v4963_v6  ;;  %v4971_v55 = vsub.f32 %v45762_v14, %v4970_v5  ;;  %v5494_v30 = vand.u32 4294901760, %v45934_v40  ;;  %v5470_v6 = vld [vmem:[%s45028_s20 + $0xc] sm:$0xff]  ;;  %v40744_v5 = vpack.c.bf16 %v4361_v21, %v4354_v20 }
  0xae   : > { %35549 = vmatprep.mubr.f32.mxu0 %v45523_v49  ;;  %35633 = vmatprep.mubr.f32.mxu1 %v45523_v49 }
  0xaf   : > { %40657 = vmatprep.subr.bf16.mxu0 %v45586_v1  ;;  %40705 = vmatprep.subr.bf16.mxu1 %v45596_v31  ;;  %v4965_v39 = vand.u32 4294901760, %v4964_v36  ;;  %v4972_v44 = vand.u32 4294901760, %v4971_v55  ;;  %v45949_v36 = vld [vmem:[%s53408_s2 + $0x80] sm:$0xff]  ;;  %v45954_v55 = vld [vmem:[%s53408_s2 + $0x88] sm:$0xff] }
  0xb0   : > { %35550 = vmatmul.mubr.f32.gmra.mrb[2].mxu0 %v45544_v29  ;;  %35634 = vmatmul.mubr.f32.gmra.mrb[2].mxu1 %v45544_v29  ;;  %v6114_v14 = vand.u32 4294901760, %v45949_v36 }
  0xb1   : > { %40659 = vmatpush3.bf16.msra.mxu0 %v45586_v1  ;;  %40707 = vmatpush3.bf16.msra.mxu1 %v45596_v31  ;;  %v4355_v1 = vsub.f32 %v45786_v16, %v4354_v20  ;;  %v4362_v31 = vsub.f32 %v45791_v0, %v4361_v21  ;;  %v40764_v53 = vpack.c.bf16 %v4972_v44, %v4965_v39  ;;  %v45992_v16 = vld [vmem:[%s53408_s2 + $0x90] sm:$0xff]  ;;  %v45997_v0 = vld [vmem:[%s53408_s2 + $0x98] sm:$0xff]  ;;  %v5482_v20 = vsel %vm459_vm0, %v5470_v6, 0 }
  0xb2   : > { %35560 = vmatprep.mubr.f32.mxu0 %v45480_v11  ;;  %35644 = vmatprep.mubr.f32.mxu1 %v45480_v11  ;;  %v4978_v11 = vsub.f32 %v45794_v45, %v4977_v23  ;;  %v5471_v45 = vld [vmem:[%s45028_s20 + $0x14] sm:$0xff]  ;;  %v6120_v39 = vand.u32 4294901760, %v45992_v16  ;;  %v6123_v44 = vand.u32 4294901760, %v45997_v0 }
  0xb3   : > { %40709 = vmatprep.subr.bf16.mxu0 %v45810_v34  ;;  %40757 = vmatprep.subr.bf16.mxu1 %v45839_v13  ;;  %v4356_v12 = vand.u32 4294901760, %v4355_v1  ;;  %v4363_v50 = vand.u32 4294901760, %v4362_v31  ;;  %v46031_v1 = vand.u32 4294901760, %v5482_v20 }
  0xb4   : > { %35561 = vmatmul.mubr.f32.vlgmr.msra.gmra.mrb[0].mxu0 %v45511_v19  ;;  %35645 = vmatmul.mubr.f32.vlgmr.msra.gmra.mrb[0].mxu1 %v45511_v19  ;;  %v4320_v19 = vsub.f32 %v45830_v17, %v45863_v47  ;;  %v4979_v43 = vand.u32 4294901760, %v4978_v11 }
  0xb5   : > { %40711 = vmatpush3.bf16.msra.mxu0 %v45810_v34  ;;  %40759 = vmatpush3.bf16.msra.mxu1 %v45839_v13  ;;  %v40720_v18 = vpack.c.bf16 %v4363_v50, %v4356_v12  ;;  %v46054_v12 = vsub.f32 %v45992_v16, %v6120_v39  ;;  %v46057_v50 = vsub.f32 %v45997_v0, %v6123_v44 }
  0xb6   : > { %35563 = vmatprep.mubr.f32.mxu0 %v45523_v49  ;;  %35647 = vmatprep.mubr.f32.mxu1 %v45523_v49  ;;  %v4330_v49 = vsub.f32 %v45852_v28, %v45884_v33  ;;  %v4321_v4 = vand.u32 4294901760, %v4320_v19  ;;  %v40768_v52 = vpack.c.bf16 %v4986_v51, %v4979_v43  ;;  %v46062_v43 = vsub.f32 %v5482_v20, %v46031_v1 }
  0xb7   : > { %40713 = vmatprep.subr.bf16.mxu0 %v45846_v22  ;;  %40761 = vmatprep.subr.bf16.mxu1 %v45856_v59  ;;  %v46064_v51 = vand.u32 4294901760, %v5488_v24 }
  0xb8   : > { %35564 = vmatmul.mubr.f32.gmra.mrb[2].mxu0 %v45544_v29  ;;  %35648 = vmatmul.mubr.f32.gmra.mrb[2].mxu1 %v45544_v29  ;;  %v4331_v54 = vand.u32 4294901760, %v4330_v49  ;;  %v40724_v29 = vpack.c.bf16 %v45749_v63, %v45746_v62  ;;  %v5469_v62 = vld [vmem:[%s45028_s20 + $0x4] sm:$0xff] }
  0xb9   : > { %40715 = vmatpush3.bf16.msra.mxu0 %v45846_v22  ;;  %40763 = vmatpush3.bf16.msra.mxu1 %v45856_v59 }
  0xba   : > { %35658 = vmatprep.mubr.f32.mxu0 %v4301_v27  ;;  %35742 = vmatprep.mubr.f32.mxu1 %v4301_v27 }
  0xbb   : > { %40717 = vmatprep.subr.bf16.mxu0 %v40716_v60  ;;  %40765 = vmatprep.subr.bf16.mxu1 %v40764_v53 }
  0xbc   : > { %35659 = vmatmul.mubr.f32.vlgmr.msra.gmra.mrb[0].mxu0 %v4311_v61  ;;  %35743 = vmatmul.mubr.f32.vlgmr.msra.gmra.mrb[0].mxu1 %v4311_v61 }
  0xbd   : > { %40719 = vmatpush3.bf16.msra.mxu0 %v40716_v60  ;;  %40767 = vmatpush3.bf16.msra.mxu1 %v40764_v53 }
  0xbe   : > { %35661 = vmatprep.mubr.f32.mxu0 %v4321_v4  ;;  %35745 = vmatprep.mubr.f32.mxu1 %v4321_v4 }
  0xbf   : > { %40721 = vmatprep.subr.bf16.mxu0 %v40720_v18  ;;  %40769 = vmatprep.subr.bf16.mxu1 %v40768_v52 }
  0xc0   : > { %35662 = vmatmul.mubr.f32.gmra.mrb[2].mxu0 %v4331_v54  ;;  %35746 = vmatmul.mubr.f32.gmra.mrb[2].mxu1 %v4331_v54 }
  0xc1   : > { %40723 = vmatpush3.bf16.msra.mxu0 %v40720_v18  ;;  %40771 = vmatpush3.bf16.msra.mxu1 %v40768_v52 }
  0xc2   : > { %35672 = vmatprep.mubr.f32.mxu0 %v45740_v25  ;;  %35756 = vmatprep.mubr.f32.mxu1 %v45740_v25 }
  0xc3   : > { %40725 = vmatprep.subr.bf16.mxu0 %v40724_v29  ;;  %40773 = vmatprep.subr.bf16.mxu1 %v40772_v57 }
  0xc4   : > { %35673 = vmatmul.mubr.f32.vlgmr.msra.gmra.mrb[0].mxu0 %v45771_v41  ;;  %35757 = vmatmul.mubr.f32.vlgmr.msra.gmra.mrb[0].mxu1 %v45771_v41 }
  0xc5   : > { %40727 = vmatpush3.bf16.msra.mxu0 %v40724_v29  ;;  %40775 = vmatpush3.bf16.msra.mxu1 %v40772_v57 }
  0xc6   : > { %35675 = vmatprep.mubr.f32.mxu0 %v45783_v32  ;;  %35759 = vmatprep.mubr.f32.mxu1 %v45783_v32 }
  0xc7   : > { %40729 = vmatprep.subr.bf16.mxu0 %v40728_v58  ;;  %40777 = vmatprep.subr.bf16.mxu1 %v40776_v3 }
  0xc8   : > { %35676 = vmatmul.mubr.f32.gmra.mrb[2].mxu0 %v45804_v10  ;;  %35760 = vmatmul.mubr.f32.gmra.mrb[2].mxu1 %v45804_v10 }
  0xc9   : > { %40731 = vmatpush3.bf16.msra.mxu0 %v40728_v58  ;;  %40779 = vmatpush3.bf16.msra.mxu1 %v40776_v3  ;;  %v6239_v58 = vand.u32 4294901760, %v46054_v12  ;;  %v6246_v3 = vand.u32 4294901760, %v46057_v50 }
  0xca   : > { %35686 = vmatprep.mubr.f32.mxu0 %v45774_v46  ;;  %35770 = vmatprep.mubr.f32.mxu1 %v45774_v46  ;;  %v45929_v46 = vld [vmem:[%s53407_s1 + $0x80] sm:$0xff] }
  0xcb   : > { %40733 = vmatprep.subr.bf16.mxu0 %v45810_v34  ;;  %40781 = vmatprep.subr.bf16.mxu1 %v45839_v13  ;;  %v5491_v63 = vand.u32 4294901760, %v45929_v46 }
  0xcc   : > { %35687 = vmatmul.mubr.f32.vlgmr.msra.gmra.mrb[0].mxu0 %v45802_v9  ;;  %35771 = vmatmul.mubr.f32.vlgmr.msra.gmra.mrb[0].mxu1 %v45802_v9  ;;  %v40740_v9 = vpack.c.bf16 %v4347_v2, %v4340_v35  ;;  %v6117_v35 = vand.u32 4294901760, %v45954_v55  ;;  %v5479_v2 = vsel %vm459_vm0, %v5469_v62, 0 }
  0xcd   : > { %40735 = vmatpush3.bf16.msra.mxu0 %v45810_v34  ;;  %40783 = vmatpush3.bf16.msra.mxu1 %v45839_v13  ;;  %v46000_v8 = vand.u32 4294901760, %v5479_v2  ;;  %v46006_v21 = vsub.f32 %v45929_v46, %v5491_v63  ;;  %v46070_v61 = vpack.c.bf16 %v5494_v30, %v5491_v63 }
  0xce   : > { %35689 = vmatprep.mubr.f32.mxu0 %v45830_v17  ;;  %35773 = vmatprep.mubr.f32.mxu1 %v45830_v17  ;;  %v40792_v17 = vpack.c.bf16 %v4984_v26, %v4977_v23  ;;  %v46009_v23 = vsub.f32 %v45934_v40, %v5494_v30  ;;  %v46022_v15 = vsub.f32 %v45954_v55, %v6117_v35  ;;  %v46109_v40 = vand.u32 4294901760, %v46062_v43 }
  0xcf   : > { %40737 = vmatprep.subr.bf16.mxu0 %v45846_v22  ;;  %40785 = vmatprep.subr.bf16.mxu1 %v45856_v59  ;;  %v46034_v31 = vsub.f32 %v5479_v2, %v46000_v8  ;;  %v5602_v11 = vand.u32 4294901760, %v46006_v21  ;;  %v46099_v29 = vpack.c.bf16 %v6117_v35, %v6114_v14  ;;  %v6247_v35 = vsub.f32 %v46057_v50, %v6246_v3 }
  0xd0   : > { %35690 = vmatmul.mubr.f32.gmra.mrb[2].mxu0 %v45852_v28  ;;  %35774 = vmatmul.mubr.f32.gmra.mrb[2].mxu1 %v45852_v28  ;;  %v45985_v28 = vld [vmem:[%s53407_s1 + $0x98] sm:$0xff]  ;;  %v5609_v42 = vand.u32 4294901760, %v46009_v23  ;;  %v5572_v2 = vsub.f32 %v46062_v43, %v46109_v40 }
  0xd1   : > { %40739 = vmatpush3.bf16.msra.mxu0 %v45846_v22  ;;  %40787 = vmatpush3.bf16.msra.mxu1 %v45856_v59  ;;  %v5500_v38 = vand.u32 4294901760, %v45985_v28  ;;  %v46073_v49 = vand.u32 4294901760, %v46034_v31  ;;  %v5603_v4 = vsub.f32 %v46006_v21, %v5602_v11 }
  0xd2   : > { %35700 = vmatprep.mubr.f32.mxu0 %v45813_v7  ;;  %35784 = vmatprep.mubr.f32.mxu1 %v45813_v7  ;;  %v45980_v7 = vld [vmem:[%s53407_s1 + $0x90] sm:$0xff]  ;;  %v5610_v18 = vsub.f32 %v46009_v23, %v5609_v42  ;;  %v5573_v20 = vand.u32 4294901760, %v5572_v2 }
  0xd3   : > { %40741 = vmatprep.subr.bf16.mxu0 %v40740_v9  ;;  %40789 = vmatprep.subr.bf16.mxu1 %v40788_v48  ;;  %v5497_v26 = vand.u32 4294901760, %v45980_v7  ;;  %v46051_v19 = vsub.f32 %v45985_v28, %v5500_v38  ;;  %v5604_v55 = vand.u32 4294901760, %v5603_v4  ;;  %v46194_v4 = vld [vmem:[%s53407_s1 + $0xa8] sm:$0xff] }
  0xd4   : > { %35701 = vmatmul.mubr.f32.vlgmr.msra.gmra.mrb[0].mxu0 %v45849_v56  ;;  %35785 = vmatmul.mubr.f32.vlgmr.msra.gmra.mrb[0].mxu1 %v45849_v56  ;;  %v46017_v56 = vsub.f32 %v45949_v36, %v6114_v14  ;;  %v5562_v36 = vsub.f32 %v46034_v31, %v46073_v49  ;;  %v5611_v62 = vand.u32 4294901760, %v5610_v18 }
  0xd5   : > { %40743 = vmatpush3.bf16.msra.mxu0 %v40740_v9  ;;  %40791 = vmatpush3.bf16.msra.mxu1 %v40788_v48  ;;  %v46046_v53 = vsub.f32 %v45980_v7, %v5497_v26  ;;  %v5623_v57 = vand.u32 4294901760, %v46051_v19  ;;  %v46106_v46 = vpack.c.bf16 %v5500_v38, %v5497_v26  ;;  %v46112_v9 = vsub.f32 %v5488_v24, %v46064_v51 }
  0xd6   : > { %35703 = vmatprep.mubr.f32.mxu0 %v45863_v47  ;;  %35787 = vmatprep.mubr.f32.mxu1 %v45863_v47  ;;  %v5485_v47 = vsel %vm459_vm0, %v5471_v45, 0  ;;  %v6225_v27 = vand.u32 4294901760, %v46017_v56  ;;  %v46116_v48 = vpack.c.bf16 %v6123_v44, %v6120_v39  ;;  %v6248_v45 = vand.u32 4294901760, %v6247_v35 }
  0xd7   : > { %40745 = vmatprep.subr.bf16.mxu0 %v40744_v5  ;;  %40793 = vmatprep.subr.bf16.mxu1 %v40792_v17  ;;  %v46043_v60 = vand.u32 4294901760, %v5485_v47  ;;  %v5616_v54 = vand.u32 4294901760, %v46046_v53  ;;  %v46144_v6 = vand.u32 4294901760, %v46112_v9  ;;  %v40868_v44 = vpack.c.bf16 %v46022_v15, %v46017_v56 }
  0xd8   : > { %35704 = vmatmul.mubr.f32.gmra.mrb[2].mxu0 %v45884_v33  ;;  %35788 = vmatmul.mubr.f32.gmra.mrb[2].mxu1 %v45884_v33  ;;  %v6232_v33 = vand.u32 4294901760, %v46022_v15  ;;  %v40872_v24 = vpack.c.bf16 %v46057_v50, %v46054_v12 }
  0xd9   : > { %40747 = vmatpush3.bf16.msra.mxu0 %v40744_v5  ;;  %40795 = vmatpush3.bf16.msra.mxu1 %v40792_v17  ;;  %v46090_v52 = vsub.f32 %v5485_v47, %v46043_v60  ;;  %v5563_v5 = vand.u32 4294901760, %v5562_v36  ;;  %v40812_v17 = vpack.c.bf16 %v5611_v62, %v5604_v55  ;;  %v40824_v47 = vpack.c.bf16 %v46051_v19, %v46046_v53  ;;  %v32048_v55 = vld [vmem:[%s45028_s20 + $0x38] sm:$0xf] }
  0xda   : > { %35714 = vmatprep.mubr.f32.mxu0 %v45740_v25  ;;  %35798 = vmatprep.mubr.f32.mxu1 %v45740_v25  ;;  %v40884_v18 = vpack.c.bf16 %v6232_v33, %v6225_v27  ;;  %v6751_v2 = vsel %vm459_vm0, %v32048_v55, 0 }
  0xdb   : > { %40749 = vmatprep.subr.bf16.mxu0 %v45810_v34  ;;  %40797 = vmatprep.subr.bf16.mxu1 %v45839_v13  ;;  %v46123_v14 = vand.u32 4294901760, %v46090_v52 }
  0xdc   : > { %35715 = vmatmul.mubr.f32.vlgmr.msra.gmra.mrb[0].mxu0 %v45771_v41  ;;  %35799 = vmatmul.mubr.f32.vlgmr.msra.gmra.mrb[0].mxu1 %v45771_v41 }
  0xdd   : > { %40751 = vmatpush3.bf16.msra.mxu0 %v45810_v34  ;;  %40799 = vmatpush3.bf16.msra.mxu1 %v45839_v13  ;;  %v6226_v34 = vsub.f32 %v46017_v56, %v6225_v27  ;;  %v6233_v13 = vsub.f32 %v46022_v15, %v6232_v33  ;;  %v6757_v56 = vand.u32 4294901760, %v46194_v4  ;;  %v32046_v27 = vld [vmem:[%s45028_s20 + $0x28] sm:$0xff]  ;;  %v40840_v33 = vpack.c.bf16 %v5623_v57, %v5616_v54 }
  0xde   : > { %35717 = vmatprep.mubr.f32.mxu0 %v45783_v32  ;;  %35801 = vmatprep.mubr.f32.mxu1 %v45783_v32 }
  0xdf   : > { %40753 = vmatprep.subr.bf16.mxu0 %v45846_v22  ;;  %40801 = vmatprep.subr.bf16.mxu1 %v45856_v59  ;;  %v6227_v63 = vand.u32 4294901760, %v6226_v34  ;;  %v6234_v30 = vand.u32 4294901760, %v6233_v13  ;;  %v46209_v34 = vld [vmem:[%s53408_s2 + $0xa0] sm:$0xff]  ;;  %v46214_v13 = vld [vmem:[%s53408_s2 + $0xa8] sm:$0xff] }
  0xe0   : > { %35718 = vmatmul.mubr.f32.gmra.mrb[2].mxu0 %v45804_v10  ;;  %35802 = vmatmul.mubr.f32.gmra.mrb[2].mxu1 %v45804_v10  ;;  %v7377_v15 = vand.u32 4294901760, %v46209_v34 }
  0xe1   : > { %40755 = vmatpush3.bf16.msra.mxu0 %v45846_v22  ;;  %40803 = vmatpush3.bf16.msra.mxu1 %v45856_v59  ;;  %v5617_v22 = vsub.f32 %v46046_v53, %v5616_v54  ;;  %v5624_v59 = vsub.f32 %v46051_v19, %v5623_v57  ;;  %v40860_v7 = vpack.c.bf16 %v6234_v30, %v6227_v63  ;;  %v46252_v53 = vld [vmem:[%s53408_s2 + $0xb0] sm:$0xff]  ;;  %v46257_v19 = vld [vmem:[%s53408_s2 + $0xb8] sm:$0xff]  ;;  %v6745_v54 = vsel %vm459_vm0, %v32046_v27, 0 }
  0xe2   : > { %35728 = vmatprep.mubr.f32.mxu0 %v45740_v25  ;;  %35812 = vmatprep.mubr.f32.mxu1 %v45740_v25  ;;  %v6240_v25 = vsub.f32 %v46054_v12, %v6239_v58  ;;  %v32047_v12 = vld [vmem:[%s45028_s20 + $0x30] sm:$0xff]  ;;  %v7383_v63 = vand.u32 4294901760, %v46252_v53  ;;  %v7386_v30 = vand.u32 4294901760, %v46257_v19 }
  0xe3   : > { %40805 = vmatprep.subr.bf16.mxu0 %v46070_v61  ;;  %40853 = vmatprep.subr.bf16.mxu1 %v46099_v29  ;;  %v5618_v28 = vand.u32 4294901760, %v5617_v22  ;;  %v5625_v16 = vand.u32 4294901760, %v5624_v59  ;;  %v46291_v22 = vand.u32 4294901760, %v6745_v54 }
  0xe4   : > { %35729 = vmatmul.mubr.f32.vlgmr.msra.gmra.mrb[0].mxu0 %v45771_v41  ;;  %35813 = vmatmul.mubr.f32.vlgmr.msra.gmra.mrb[0].mxu1 %v45771_v41  ;;  %v5582_v41 = vsub.f32 %v46090_v52, %v46123_v14  ;;  %v6241_v0 = vand.u32 4294901760, %v6240_v25 }
  0xe5   : > { %40807 = vmatpush3.bf16.msra.mxu0 %v46070_v61  ;;  %40855 = vmatpush3.bf16.msra.mxu1 %v46099_v29  ;;  %v40816_v37 = vpack.c.bf16 %v5625_v16, %v5618_v28  ;;  %v46314_v28 = vsub.f32 %v46252_v53, %v7383_v63  ;;  %v46317_v16 = vsub.f32 %v46257_v19, %v7386_v30 }
  0xe6   : > { %35731 = vmatprep.mubr.f32.mxu0 %v45783_v32  ;;  %35815 = vmatprep.mubr.f32.mxu1 %v45783_v32  ;;  %v5592_v32 = vsub.f32 %v46112_v9, %v46144_v6  ;;  %v5583_v26 = vand.u32 4294901760, %v5582_v41  ;;  %v40864_v38 = vpack.c.bf16 %v6248_v45, %v6241_v0  ;;  %v46322_v0 = vsub.f32 %v6745_v54, %v46291_v22 }
  0xe7   : > { %40809 = vmatprep.subr.bf16.mxu0 %v46106_v46  ;;  %40857 = vmatprep.subr.bf16.mxu1 %v46116_v48  ;;  %v46324_v45 = vand.u32 4294901760, %v6751_v2 }
  0xe8   : > { %35732 = vmatmul.mubr.f32.gmra.mrb[2].mxu0 %v45804_v10  ;;  %35816 = vmatmul.mubr.f32.gmra.mrb[2].mxu1 %v45804_v10  ;;  %v5593_v39 = vand.u32 4294901760, %v5592_v32  ;;  %v40820_v10 = vpack.c.bf16 %v46009_v23, %v46006_v21  ;;  %v32045_v21 = vld [vmem:[%s45028_s20 + $0x20] sm:$0xff] }
  0xe9   : > { %40811 = vmatpush3.bf16.msra.mxu0 %v46106_v46  ;;  %40859 = vmatpush3.bf16.msra.mxu1 %v46116_v48 }
  0xea   : > { %35826 = vmatprep.mubr.f32.mxu0 %v5563_v5  ;;  %35910 = vmatprep.mubr.f32.mxu1 %v5563_v5 }
  0xeb   : > { %40813 = vmatprep.subr.bf16.mxu0 %v40812_v17  ;;  %40861 = vmatprep.subr.bf16.mxu1 %v40860_v7 }
  0xec   : > { %35827 = vmatmul.mubr.f32.vlgmr.msra.gmra.mrb[0].mxu0 %v5573_v20  ;;  %35911 = vmatmul.mubr.f32.vlgmr.msra.gmra.mrb[0].mxu1 %v5573_v20 }
  0xed   : > { %40815 = vmatpush3.bf16.msra.mxu0 %v40812_v17  ;;  %40863 = vmatpush3.bf16.msra.mxu1 %v40860_v7 }
  0xee   : > { %35829 = vmatprep.mubr.f32.mxu0 %v5583_v26  ;;  %35913 = vmatprep.mubr.f32.mxu1 %v5583_v26 }
  0xef   : > { %40817 = vmatprep.subr.bf16.mxu0 %v40816_v37  ;;  %40865 = vmatprep.subr.bf16.mxu1 %v40864_v38 }
  0xf0   : > { %35830 = vmatmul.mubr.f32.gmra.mrb[2].mxu0 %v5593_v39  ;;  %35914 = vmatmul.mubr.f32.gmra.mrb[2].mxu1 %v5593_v39 }
  0xf1   : > { %40819 = vmatpush3.bf16.msra.mxu0 %v40816_v37  ;;  %40867 = vmatpush3.bf16.msra.mxu1 %v40864_v38 }
  0xf2   : > { %35840 = vmatprep.mubr.f32.mxu0 %v46000_v8  ;;  %35924 = vmatprep.mubr.f32.mxu1 %v46000_v8 }
  0xf3   : > { %40821 = vmatprep.subr.bf16.mxu0 %v40820_v10  ;;  %40869 = vmatprep.subr.bf16.mxu1 %v40868_v44 }
  0xf4   : > { %35841 = vmatmul.mubr.f32.vlgmr.msra.gmra.mrb[0].mxu0 %v46031_v1  ;;  %35925 = vmatmul.mubr.f32.vlgmr.msra.gmra.mrb[0].mxu1 %v46031_v1 }
  0xf5   : > { %40823 = vmatpush3.bf16.msra.mxu0 %v40820_v10  ;;  %40871 = vmatpush3.bf16.msra.mxu1 %v40868_v44 }
  0xf6   : > { %35843 = vmatprep.mubr.f32.mxu0 %v46043_v60  ;;  %35927 = vmatprep.mubr.f32.mxu1 %v46043_v60 }
  0xf7   : > { %40825 = vmatprep.subr.bf16.mxu0 %v40824_v47  ;;  %40873 = vmatprep.subr.bf16.mxu1 %v40872_v24 }
  0xf8   : > { %35844 = vmatmul.mubr.f32.gmra.mrb[2].mxu0 %v46064_v51  ;;  %35928 = vmatmul.mubr.f32.gmra.mrb[2].mxu1 %v46064_v51 }
  0xf9   : > { %40827 = vmatpush3.bf16.msra.mxu0 %v40824_v47  ;;  %40875 = vmatpush3.bf16.msra.mxu1 %v40872_v24  ;;  %v7502_v47 = vand.u32 4294901760, %v46314_v28  ;;  %v7509_v24 = vand.u32 4294901760, %v46317_v16 }
  0xfa   : > { %35854 = vmatprep.mubr.f32.mxu0 %v46034_v31  ;;  %35938 = vmatprep.mubr.f32.mxu1 %v46034_v31  ;;  %v46189_v31 = vld [vmem:[%s53407_s1 + $0xa0] sm:$0xff] }
  0xfb   : > { %40829 = vmatprep.subr.bf16.mxu0 %v46070_v61  ;;  %40877 = vmatprep.subr.bf16.mxu1 %v46099_v29  ;;  %v6754_v23 = vand.u32 4294901760, %v46189_v31 }
  0xfc   : > { %35855 = vmatmul.mubr.f32.vlgmr.msra.gmra.mrb[0].mxu0 %v46062_v43  ;;  %35939 = vmatmul.mubr.f32.vlgmr.msra.gmra.mrb[0].mxu1 %v46062_v43  ;;  %v40836_v43 = vpack.c.bf16 %v5609_v42, %v5602_v11  ;;  %v7380_v11 = vand.u32 4294901760, %v46214_v13  ;;  %v6742_v42 = vsel %vm459_vm0, %v32045_v21, 0 }
  0xfd   : > { %40831 = vmatpush3.bf16.msra.mxu0 %v46070_v61  ;;  %40879 = vmatpush3.bf16.msra.mxu1 %v46099_v29  ;;  %v46260_v50 = vand.u32 4294901760, %v6742_v42  ;;  %v46266_v57 = vsub.f32 %v46189_v31, %v6754_v23  ;;  %v46330_v20 = vpack.c.bf16 %v6757_v56, %v6754_v23 }
  0xfe   : > { %35857 = vmatprep.mubr.f32.mxu0 %v46090_v52  ;;  %35941 = vmatprep.mubr.f32.mxu1 %v46090_v52  ;;  %v40888_v52 = vpack.c.bf16 %v6246_v3, %v6239_v58  ;;  %v46269_v58 = vsub.f32 %v46194_v4, %v6757_v56  ;;  %v46282_v36 = vsub.f32 %v46214_v13, %v7380_v11  ;;  %v46369_v4 = vand.u32 4294901760, %v46322_v0 }
  0xff   : > { %40833 = vmatprep.subr.bf16.mxu0 %v46106_v46  ;;  %40881 = vmatprep.subr.bf16.mxu1 %v46116_v48  ;;  %v46294_v59 = vsub.f32 %v6742_v42, %v46260_v50  ;;  %v6865_v25 = vand.u32 4294901760, %v46266_v57  ;;  %v46359_v10 = vpack.c.bf16 %v7380_v11, %v7377_v15  ;;  %v7510_v11 = vsub.f32 %v46317_v16, %v7509_v24 }
 0x100   : > { %35858 = vmatmul.mubr.f32.gmra.mrb[2].mxu0 %v46112_v9  ;;  %35942 = vmatmul.mubr.f32.gmra.mrb[2].mxu1 %v46112_v9  ;;  %v46245_v9 = vld [vmem:[%s53407_s1 + $0xb8] sm:$0xff]  ;;  %v6872_v35 = vand.u32 4294901760, %v46269_v58  ;;  %v6835_v42 = vsub.f32 %v46322_v0, %v46369_v4 }
 0x101   : > { %40835 = vmatpush3.bf16.msra.mxu0 %v46106_v46  ;;  %40883 = vmatpush3.bf16.msra.mxu1 %v46116_v48  ;;  %v6763_v62 = vand.u32 4294901760, %v46245_v9  ;;  %v46333_v32 = vand.u32 4294901760, %v46294_v59  ;;  %v6866_v26 = vsub.f32 %v46266_v57, %v6865_v25 }
 0x102   : > { %35868 = vmatprep.mubr.f32.mxu0 %v46073_v49  ;;  %35952 = vmatprep.mubr.f32.mxu1 %v46073_v49  ;;  %v46240_v49 = vld [vmem:[%s53407_s1 + $0xb0] sm:$0xff]  ;;  %v6873_v37 = vsub.f32 %v46269_v58, %v6872_v35  ;;  %v6836_v54 = vand.u32 4294901760, %v6835_v42 }
 0x103   : > { %40837 = vmatprep.subr.bf16.mxu0 %v40836_v43  ;;  %40885 = vmatprep.subr.bf16.mxu1 %v40884_v18  ;;  %v6760_v3 = vand.u32 4294901760, %v46240_v49  ;;  %v46311_v41 = vsub.f32 %v46245_v9, %v6763_v62  ;;  %v6867_v13 = vand.u32 4294901760, %v6866_v26  ;;  %v46454_v26 = vld [vmem:[%s53407_s1 + $0xc8] sm:$0xff] }
 0x104   : > { %35869 = vmatmul.mubr.f32.vlgmr.msra.gmra.mrb[0].mxu0 %v46109_v40  ;;  %35953 = vmatmul.mubr.f32.vlgmr.msra.gmra.mrb[0].mxu1 %v46109_v40  ;;  %v46277_v40 = vsub.f32 %v46209_v34, %v7377_v15  ;;  %v6825_v34 = vsub.f32 %v46294_v59, %v46333_v32  ;;  %v6874_v21 = vand.u32 4294901760, %v6873_v37 }
 0x105   : > { %40839 = vmatpush3.bf16.msra.mxu0 %v40836_v43  ;;  %40887 = vmatpush3.bf16.msra.mxu1 %v40884_v18  ;;  %v46306_v7 = vsub.f32 %v46240_v49, %v6760_v3  ;;  %v6886_v44 = vand.u32 4294901760, %v46311_v41  ;;  %v46366_v31 = vpack.c.bf16 %v6763_v62, %v6760_v3  ;;  %v46372_v43 = vsub.f32 %v6751_v2, %v46324_v45 }
 0x106   : > { %35871 = vmatprep.mubr.f32.mxu0 %v46123_v14  ;;  %35955 = vmatprep.mubr.f32.mxu1 %v46123_v14  ;;  %v6748_v14 = vsel %vm459_vm0, %v32047_v12, 0  ;;  %v7488_v5 = vand.u32 4294901760, %v46277_v40  ;;  %v46376_v18 = vpack.c.bf16 %v7386_v30, %v7383_v63  ;;  %v7511_v12 = vand.u32 4294901760, %v7510_v11 }
 0x107   : > { %40841 = vmatprep.subr.bf16.mxu0 %v40840_v33  ;;  %40889 = vmatprep.subr.bf16.mxu1 %v40888_v52  ;;  %v46303_v17 = vand.u32 4294901760, %v6748_v14  ;;  %v6879_v39 = vand.u32 4294901760, %v46306_v7  ;;  %v46404_v27 = vand.u32 4294901760, %v46372_v43  ;;  %v40964_v30 = vpack.c.bf16 %v46282_v36, %v46277_v40 }
 0x108   : > { %35872 = vmatmul.mubr.f32.gmra.mrb[2].mxu0 %v46144_v6  ;;  %35956 = vmatmul.mubr.f32.gmra.mrb[2].mxu1 %v46144_v6  ;;  %v7495_v6 = vand.u32 4294901760, %v46282_v36  ;;  %v40968_v2 = vpack.c.bf16 %v46317_v16, %v46314_v28 }
 0x109   : > { %40843 = vmatpush3.bf16.msra.mxu0 %v40840_v33  ;;  %40891 = vmatpush3.bf16.msra.mxu1 %v40888_v52  ;;  %v46350_v38 = vsub.f32 %v6748_v14, %v46303_v17  ;;  %v6826_v33 = vand.u32 4294901760, %v6825_v34  ;;  %v40908_v52 = vpack.c.bf16 %v6874_v21, %v6867_v13  ;;  %v40920_v14 = vpack.c.bf16 %v46311_v41, %v46306_v7  ;;  %v32060_v13 = vld [vmem:[%s45028_s20 + $0x39] sm:$0xf] }
 0x10a   : > { %35882 = vmatprep.mubr.f32.mxu0 %v46000_v8  ;;  %35966 = vmatprep.mubr.f32.mxu1 %v46000_v8  ;;  %v40980_v37 = vpack.c.bf16 %v7495_v6, %v7488_v5  ;;  %v8013_v42 = vsel %vm459_vm0, %v32060_v13, 0 }
 0x10b   : > { %40845 = vmatprep.subr.bf16.mxu0 %v46070_v61  ;;  %40893 = vmatprep.subr.bf16.mxu1 %v46099_v29  ;;  %v46383_v15 = vand.u32 4294901760, %v46350_v38 }
 0x10c   : > { %35883 = vmatmul.mubr.f32.vlgmr.msra.gmra.mrb[0].mxu0 %v46031_v1  ;;  %35967 = vmatmul.mubr.f32.vlgmr.msra.gmra.mrb[0].mxu1 %v46031_v1 }
 0x10d   : > { %40847 = vmatpush3.bf16.msra.mxu0 %v46070_v61  ;;  %40895 = vmatpush3.bf16.msra.mxu1 %v46099_v29  ;;  %v7489_v61 = vsub.f32 %v46277_v40, %v7488_v5  ;;  %v7496_v29 = vsub.f32 %v46282_v36, %v7495_v6  ;;  %v8019_v40 = vand.u32 4294901760, %v46454_v26  ;;  %v32058_v5 = vld [vmem:[%s45028_s20 + $0x29] sm:$0xff]  ;;  %v40936_v6 = vpack.c.bf16 %v6886_v44, %v6879_v39 }
 0x10e   : > { %35885 = vmatprep.mubr.f32.mxu0 %v46043_v60  ;;  %35969 = vmatprep.mubr.f32.mxu1 %v46043_v60 }
 0x10f   : > { %40849 = vmatprep.subr.bf16.mxu0 %v46106_v46  ;;  %40897 = vmatprep.subr.bf16.mxu1 %v46116_v48  ;;  %v7490_v23 = vand.u32 4294901760, %v7489_v61  ;;  %v7497_v56 = vand.u32 4294901760, %v7496_v29  ;;  %v46469_v61 = vld [vmem:[%s53408_s2 + $0xc0] sm:$0xff]  ;;  %v46474_v29 = vld [vmem:[%s53408_s2 + $0xc8] sm:$0xff] }
 0x110   : > { %35886 = vmatmul.mubr.f32.gmra.mrb[2].mxu0 %v46064_v51  ;;  %35970 = vmatmul.mubr.f32.gmra.mrb[2].mxu1 %v46064_v51  ;;  %v8639_v36 = vand.u32 4294901760, %v46469_v61 }
 0x111   : > { %40851 = vmatpush3.bf16.msra.mxu0 %v46106_v46  ;;  %40899 = vmatpush3.bf16.msra.mxu1 %v46116_v48  ;;  %v6880_v46 = vsub.f32 %v46306_v7, %v6879_v39  ;;  %v6887_v48 = vsub.f32 %v46311_v41, %v6886_v44  ;;  %v40956_v49 = vpack.c.bf16 %v7497_v56, %v7490_v23  ;;  %v46512_v7 = vld [vmem:[%s53408_s2 + $0xd0] sm:$0xff]  ;;  %v46517_v41 = vld [vmem:[%s53408_s2 + $0xd8] sm:$0xff]  ;;  %v8007_v39 = vsel %vm459_vm0, %v32058_v5, 0 }
 0x112   : > { %35896 = vmatprep.mubr.f32.mxu0 %v46000_v8  ;;  %35980 = vmatprep.mubr.f32.mxu1 %v46000_v8  ;;  %v7503_v8 = vsub.f32 %v46314_v28, %v7502_v47  ;;  %v32059_v28 = vld [vmem:[%s45028_s20 + $0x31] sm:$0xff]  ;;  %v8645_v23 = vand.u32 4294901760, %v46512_v7  ;;  %v8648_v56 = vand.u32 4294901760, %v46517_v41 }
 0x113   : > { %40901 = vmatprep.subr.bf16.mxu0 %v46330_v20  ;;  %40949 = vmatprep.subr.bf16.mxu1 %v46359_v10  ;;  %v6881_v9 = vand.u32 4294901760, %v6880_v46  ;;  %v6888_v53 = vand.u32 4294901760, %v6887_v48  ;;  %v46551_v46 = vand.u32 4294901760, %v8007_v39 }
 0x114   : > { %35897 = vmatmul.mubr.f32.vlgmr.msra.gmra.mrb[0].mxu0 %v46031_v1  ;;  %35981 = vmatmul.mubr.f32.vlgmr.msra.gmra.mrb[0].mxu1 %v46031_v1  ;;  %v6845_v1 = vsub.f32 %v46350_v38, %v46383_v15  ;;  %v7504_v19 = vand.u32 4294901760, %v7503_v8 }
 0x115   : > { %40903 = vmatpush3.bf16.msra.mxu0 %v46330_v20  ;;  %40951 = vmatpush3.bf16.msra.mxu1 %v46359_v10  ;;  %v40912_v55 = vpack.c.bf16 %v6888_v53, %v6881_v9  ;;  %v46574_v9 = vsub.f32 %v46512_v7, %v8645_v23  ;;  %v46577_v53 = vsub.f32 %v46517_v41, %v8648_v56 }
 0x116   : > { %35899 = vmatprep.mubr.f32.mxu0 %v46043_v60  ;;  %35983 = vmatprep.mubr.f32.mxu1 %v46043_v60  ;;  %v6855_v60 = vsub.f32 %v46372_v43, %v46404_v27  ;;  %v6846_v3 = vand.u32 4294901760, %v6845_v1  ;;  %v40960_v62 = vpack.c.bf16 %v7511_v12, %v7504_v19  ;;  %v46582_v19 = vsub.f32 %v8007_v39, %v46551_v46 }
 0x117   : > { %40905 = vmatprep.subr.bf16.mxu0 %v46366_v31  ;;  %40953 = vmatprep.subr.bf16.mxu1 %v46376_v18  ;;  %v46584_v12 = vand.u32 4294901760, %v8013_v42 }
 0x118   : > { %35900 = vmatmul.mubr.f32.gmra.mrb[2].mxu0 %v46064_v51  ;;  %35984 = vmatmul.mubr.f32.gmra.mrb[2].mxu1 %v46064_v51  ;;  %v6856_v63 = vand.u32 4294901760, %v6855_v60  ;;  %v40916_v51 = vpack.c.bf16 %v46269_v58, %v46266_v57  ;;  %v32057_v57 = vld [vmem:[%s45028_s20 + $0x21] sm:$0xff] }
 0x119   : > { %40907 = vmatpush3.bf16.msra.mxu0 %v46366_v31  ;;  %40955 = vmatpush3.bf16.msra.mxu1 %v46376_v18 }
 0x11a   : > { %35994 = vmatprep.mubr.f32.mxu0 %v6826_v33  ;;  %36078 = vmatprep.mubr.f32.mxu1 %v6826_v33 }
 0x11b   : > { %40909 = vmatprep.subr.bf16.mxu0 %v40908_v52  ;;  %40957 = vmatprep.subr.bf16.mxu1 %v40956_v49 }
 0x11c   : > { %35995 = vmatmul.mubr.f32.vlgmr.msra.gmra.mrb[0].mxu0 %v6836_v54  ;;  %36079 = vmatmul.mubr.f32.vlgmr.msra.gmra.mrb[0].mxu1 %v6836_v54 }
 0x11d   : > { %40911 = vmatpush3.bf16.msra.mxu0 %v40908_v52  ;;  %40959 = vmatpush3.bf16.msra.mxu1 %v40956_v49 }
 0x11e   : > { %35997 = vmatprep.mubr.f32.mxu0 %v6846_v3  ;;  %36081 = vmatprep.mubr.f32.mxu1 %v6846_v3 }
 0x11f   : > { %40913 = vmatprep.subr.bf16.mxu0 %v40912_v55  ;;  %40961 = vmatprep.subr.bf16.mxu1 %v40960_v62 }
 0x120   : > { %35998 = vmatmul.mubr.f32.gmra.mrb[2].mxu0 %v6856_v63  ;;  %36082 = vmatmul.mubr.f32.gmra.mrb[2].mxu1 %v6856_v63 }
 0x121   : > { %40915 = vmatpush3.bf16.msra.mxu0 %v40912_v55  ;;  %40963 = vmatpush3.bf16.msra.mxu1 %v40960_v62 }
 0x122   : > { %36008 = vmatprep.mubr.f32.mxu0 %v46260_v50  ;;  %36092 = vmatprep.mubr.f32.mxu1 %v46260_v50 }
 0x123   : > { %40917 = vmatprep.subr.bf16.mxu0 %v40916_v51  ;;  %40965 = vmatprep.subr.bf16.mxu1 %v40964_v30 }
 0x124   : > { %36009 = vmatmul.mubr.f32.vlgmr.msra.gmra.mrb[0].mxu0 %v46291_v22  ;;  %36093 = vmatmul.mubr.f32.vlgmr.msra.gmra.mrb[0].mxu1 %v46291_v22 }
 0x125   : > { %40919 = vmatpush3.bf16.msra.mxu0 %v40916_v51  ;;  %40967 = vmatpush3.bf16.msra.mxu1 %v40964_v30 }
 0x126   : > { %36011 = vmatprep.mubr.f32.mxu0 %v46303_v17  ;;  %36095 = vmatprep.mubr.f32.mxu1 %v46303_v17 }
 0x127   : > { %40921 = vmatprep.subr.bf16.mxu0 %v40920_v14  ;;  %40969 = vmatprep.subr.bf16.mxu1 %v40968_v2 }
 0x128   : > { %36012 = vmatmul.mubr.f32.gmra.mrb[2].mxu0 %v46324_v45  ;;  %36096 = vmatmul.mubr.f32.gmra.mrb[2].mxu1 %v46324_v45 }
 0x129   : > { %40923 = vmatpush3.bf16.msra.mxu0 %v40920_v14  ;;  %40971 = vmatpush3.bf16.msra.mxu1 %v40968_v2  ;;  %v8764_v14 = vand.u32 4294901760, %v46574_v9  ;;  %v8771_v2 = vand.u32 4294901760, %v46577_v53 }
 0x12a   : > { %36022 = vmatprep.mubr.f32.mxu0 %v46294_v59  ;;  %36106 = vmatprep.mubr.f32.mxu1 %v46294_v59  ;;  %v46449_v59 = vld [vmem:[%s53407_s1 + $0xc0] sm:$0xff] }
 0x12b   : > { %40925 = vmatprep.subr.bf16.mxu0 %v46330_v20  ;;  %40973 = vmatprep.subr.bf16.mxu1 %v46359_v10  ;;  %v8016_v58 = vand.u32 4294901760, %v46449_v59 }
 0x12c   : > { %36023 = vmatmul.mubr.f32.vlgmr.msra.gmra.mrb[0].mxu0 %v46322_v0  ;;  %36107 = vmatmul.mubr.f32.vlgmr.msra.gmra.mrb[0].mxu1 %v46322_v0  ;;  %v40932_v0 = vpack.c.bf16 %v6872_v35, %v6865_v25  ;;  %v8642_v25 = vand.u32 4294901760, %v46474_v29  ;;  %v8004_v35 = vsel %vm459_vm0, %v32057_v57, 0 }
 0x12d   : > { %40927 = vmatpush3.bf16.msra.mxu0 %v46330_v20  ;;  %40975 = vmatpush3.bf16.msra.mxu1 %v46359_v10  ;;  %v46520_v16 = vand.u32 4294901760, %v8004_v35  ;;  %v46526_v44 = vsub.f32 %v46449_v59, %v8016_v58  ;;  %v46590_v54 = vpack.c.bf16 %v8019_v40, %v8016_v58 }
 0x12e   : > { %36025 = vmatprep.mubr.f32.mxu0 %v46350_v38  ;;  %36109 = vmatprep.mubr.f32.mxu1 %v46350_v38  ;;  %v40984_v38 = vpack.c.bf16 %v7509_v24, %v7502_v47  ;;  %v46529_v47 = vsub.f32 %v46454_v26, %v8019_v40  ;;  %v46542_v34 = vsub.f32 %v46474_v29, %v8642_v25  ;;  %v46629_v26 = vand.u32 4294901760, %v46582_v19 }
 0x12f   : > { %40929 = vmatprep.subr.bf16.mxu0 %v46366_v31  ;;  %40977 = vmatprep.subr.bf16.mxu1 %v46376_v18  ;;  %v46554_v48 = vsub.f32 %v8004_v35, %v46520_v16  ;;  %v8127_v8 = vand.u32 4294901760, %v46526_v44  ;;  %v46619_v51 = vpack.c.bf16 %v8642_v25, %v8639_v36  ;;  %v8772_v25 = vsub.f32 %v46577_v53, %v8771_v2 }
 0x130   : > { %36026 = vmatmul.mubr.f32.gmra.mrb[2].mxu0 %v46372_v43  ;;  %36110 = vmatmul.mubr.f32.gmra.mrb[2].mxu1 %v46372_v43  ;;  %v46505_v43 = vld [vmem:[%s53407_s1 + $0xd8] sm:$0xff]  ;;  %v8134_v11 = vand.u32 4294901760, %v46529_v47  ;;  %v8097_v35 = vsub.f32 %v46582_v19, %v46629_v26 }
 0x131   : > { %40931 = vmatpush3.bf16.msra.mxu0 %v46366_v31  ;;  %40979 = vmatpush3.bf16.msra.mxu1 %v46376_v18  ;;  %v8025_v21 = vand.u32 4294901760, %v46505_v43  ;;  %v46593_v60 = vand.u32 4294901760, %v46554_v48  ;;  %v8128_v3 = vsub.f32 %v46526_v44, %v8127_v8 }
 0x132   : > { %36036 = vmatprep.mubr.f32.mxu0 %v46333_v32  ;;  %36120 = vmatprep.mubr.f32.mxu1 %v46333_v32  ;;  %v46500_v32 = vld [vmem:[%s53407_s1 + $0xd0] sm:$0xff]  ;;  %v8135_v55 = vsub.f32 %v46529_v47, %v8134_v11  ;;  %v8098_v39 = vand.u32 4294901760, %v8097_v35 }
 0x133   : > { %40933 = vmatprep.subr.bf16.mxu0 %v40932_v0  ;;  %40981 = vmatprep.subr.bf16.mxu1 %v40980_v37  ;;  %v8022_v24 = vand.u32 4294901760, %v46500_v32  ;;  %v46571_v1 = vsub.f32 %v46505_v43, %v8025_v21  ;;  %v8129_v29 = vand.u32 4294901760, %v8128_v3  ;;  %v46714_v3 = vld [vmem:[%s53407_s1 + $0xe8] sm:$0xff] }
 0x134   : > { %36037 = vmatmul.mubr.f32.vlgmr.msra.gmra.mrb[0].mxu0 %v46369_v4  ;;  %36121 = vmatmul.mubr.f32.vlgmr.msra.gmra.mrb[0].mxu1 %v46369_v4  ;;  %v46537_v4 = vsub.f32 %v46469_v61, %v8639_v36  ;;  %v8087_v61 = vsub.f32 %v46554_v48, %v46593_v60  ;;  %v8136_v57 = vand.u32 4294901760, %v8135_v55 }
 0x135   : > { %40935 = vmatpush3.bf16.msra.mxu0 %v40932_v0  ;;  %40983 = vmatpush3.bf16.msra.mxu1 %v40980_v37  ;;  %v46566_v49 = vsub.f32 %v46500_v32, %v8022_v24  ;;  %v8148_v30 = vand.u32 4294901760, %v46571_v1  ;;  %v46626_v59 = vpack.c.bf16 %v8025_v21, %v8022_v24  ;;  %v46632_v0 = vsub.f32 %v8013_v42, %v46584_v12 }
 0x136   : > { %36039 = vmatprep.mubr.f32.mxu0 %v46383_v15  ;;  %36123 = vmatprep.mubr.f32.mxu1 %v46383_v15  ;;  %v8010_v15 = vsel %vm459_vm0, %v32059_v28, 0  ;;  %v8750_v33 = vand.u32 4294901760, %v46537_v4  ;;  %v46636_v37 = vpack.c.bf16 %v8648_v56, %v8645_v23  ;;  %v8773_v28 = vand.u32 4294901760, %v8772_v25 }
 0x137   : > { %40937 = vmatprep.subr.bf16.mxu0 %v40936_v6  ;;  %40985 = vmatprep.subr.bf16.mxu1 %v40984_v38  ;;  %v46563_v52 = vand.u32 4294901760, %v8010_v15  ;;  %v8141_v63 = vand.u32 4294901760, %v46566_v49  ;;  %v46664_v5 = vand.u32 4294901760, %v46632_v0  ;;  %v41060_v56 = vpack.c.bf16 %v46542_v34, %v46537_v4 }
 0x138   : > { %36040 = vmatmul.mubr.f32.gmra.mrb[2].mxu0 %v46404_v27  ;;  %36124 = vmatmul.mubr.f32.gmra.mrb[2].mxu1 %v46404_v27  ;;  %v8757_v27 = vand.u32 4294901760, %v46542_v34  ;;  %v41064_v42 = vpack.c.bf16 %v46577_v53, %v46574_v9 }
 0x139   : > { %40939 = vmatpush3.bf16.msra.mxu0 %v40936_v6  ;;  %40987 = vmatpush3.bf16.msra.mxu1 %v40984_v38  ;;  %v46610_v62 = vsub.f32 %v8010_v15, %v46563_v52  ;;  %v8088_v6 = vand.u32 4294901760, %v8087_v61  ;;  %v41004_v38 = vpack.c.bf16 %v8136_v57, %v8129_v29  ;;  %v41016_v15 = vpack.c.bf16 %v46571_v1, %v46566_v49  ;;  %v32072_v29 = vld [vmem:[%s45028_s20 + $0x3a] sm:$0xf] }
 0x13a   : > { %36050 = vmatprep.mubr.f32.mxu0 %v46260_v50  ;;  %36134 = vmatprep.mubr.f32.mxu1 %v46260_v50  ;;  %v41076_v55 = vpack.c.bf16 %v8757_v27, %v8750_v33  ;;  %v9275_v35 = vsel %vm459_vm0, %v32072_v29, 0 }
 0x13b   : > { %40941 = vmatprep.subr.bf16.mxu0 %v46330_v20  ;;  %40989 = vmatprep.subr.bf16.mxu1 %v46359_v10  ;;  %v46643_v36 = vand.u32 4294901760, %v46610_v62 }
 0x13c   : > { %36051 = vmatmul.mubr.f32.vlgmr.msra.gmra.mrb[0].mxu0 %v46291_v22  ;;  %36135 = vmatmul.mubr.f32.vlgmr.msra.gmra.mrb[0].mxu1 %v46291_v22 }
 0x13d   : > { %40943 = vmatpush3.bf16.msra.mxu0 %v46330_v20  ;;  %40991 = vmatpush3.bf16.msra.mxu1 %v46359_v10  ;;  %v8751_v20 = vsub.f32 %v46537_v4, %v8750_v33  ;;  %v8758_v10 = vsub.f32 %v46542_v34, %v8757_v27  ;;  %v9281_v4 = vand.u32 4294901760, %v46714_v3  ;;  %v32070_v33 = vld [vmem:[%s45028_s20 + $0x2a] sm:$0xff]  ;;  %v41032_v27 = vpack.c.bf16 %v8148_v30, %v8141_v63 }
 0x13e   : > { %36053 = vmatprep.mubr.f32.mxu0 %v46303_v17  ;;  %36137 = vmatprep.mubr.f32.mxu1 %v46303_v17 }
 0x13f   : > { %40945 = vmatprep.subr.bf16.mxu0 %v46366_v31  ;;  %40993 = vmatprep.subr.bf16.mxu1 %v46376_v18  ;;  %v8752_v58 = vand.u32 4294901760, %v8751_v20  ;;  %v8759_v40 = vand.u32 4294901760, %v8758_v10  ;;  %v46729_v20 = vld [vmem:[%s53408_s2 + $0xe0] sm:$0xff]  ;;  %v46734_v10 = vld [vmem:[%s53408_s2 + $0xe8] sm:$0xff] }
 0x140   : > { %36054 = vmatmul.mubr.f32.gmra.mrb[2].mxu0 %v46324_v45  ;;  %36138 = vmatmul.mubr.f32.gmra.mrb[2].mxu1 %v46324_v45  ;;  %v9901_v34 = vand.u32 4294901760, %v46729_v20 }
 0x141   : > { %40947 = vmatpush3.bf16.msra.mxu0 %v46366_v31  ;;  %40995 = vmatpush3.bf16.msra.mxu1 %v46376_v18  ;;  %v8142_v31 = vsub.f32 %v46566_v49, %v8141_v63  ;;  %v8149_v18 = vsub.f32 %v46571_v1, %v8148_v30  ;;  %v41052_v32 = vpack.c.bf16 %v8759_v40, %v8752_v58  ;;  %v46772_v49 = vld [vmem:[%s53408_s2 + $0xf0] sm:$0xff]  ;;  %v46777_v1 = vld [vmem:[%s53408_s2 + $0xf8] sm:$0xff]  ;;  %v9269_v63 = vsel %vm459_vm0, %v32070_v33, 0 }
 0x142   : > { %36064 = vmatprep.mubr.f32.mxu0 %v46260_v50  ;;  %36148 = vmatprep.mubr.f32.mxu1 %v46260_v50  ;;  %v8765_v50 = vsub.f32 %v46574_v9, %v8764_v14  ;;  %v32071_v9 = vld [vmem:[%s45028_s20 + $0x32] sm:$0xff]  ;;  %v9907_v58 = vand.u32 4294901760, %v46772_v49  ;;  %v9910_v40 = vand.u32 4294901760, %v46777_v1 }
 0x143   : > { %40997 = vmatprep.subr.bf16.mxu0 %v46590_v54  ;;  %41045 = vmatprep.subr.bf16.mxu1 %v46619_v51  ;;  %v8143_v43 = vand.u32 4294901760, %v8142_v31  ;;  %v8150_v7 = vand.u32 4294901760, %v8149_v18  ;;  %v46811_v31 = vand.u32 4294901760, %v9269_v63 }
 0x144   : > { %36065 = vmatmul.mubr.f32.vlgmr.msra.gmra.mrb[0].mxu0 %v46291_v22  ;;  %36149 = vmatmul.mubr.f32.vlgmr.msra.gmra.mrb[0].mxu1 %v46291_v22  ;;  %v8107_v22 = vsub.f32 %v46610_v62, %v46643_v36  ;;  %v8766_v41 = vand.u32 4294901760, %v8765_v50 }
 0x145   : > { %40999 = vmatpush3.bf16.msra.mxu0 %v46590_v54  ;;  %41047 = vmatpush3.bf16.msra.mxu1 %v46619_v51  ;;  %v41008_v13 = vpack.c.bf16 %v8150_v7, %v8143_v43  ;;  %v46834_v43 = vsub.f32 %v46772_v49, %v9907_v58  ;;  %v46837_v7 = vsub.f32 %v46777_v1, %v9910_v40 }
 0x146   : > { %36067 = vmatprep.mubr.f32.mxu0 %v46303_v17  ;;  %36151 = vmatprep.mubr.f32.mxu1 %v46303_v17  ;;  %v8117_v17 = vsub.f32 %v46632_v0, %v46664_v5  ;;  %v8108_v24 = vand.u32 4294901760, %v8107_v22  ;;  %v41056_v21 = vpack.c.bf16 %v8773_v28, %v8766_v41  ;;  %v46842_v41 = vsub.f32 %v9269_v63, %v46811_v31 }
 0x147   : > { %41001 = vmatprep.subr.bf16.mxu0 %v46626_v59  ;;  %41049 = vmatprep.subr.bf16.mxu1 %v46636_v37  ;;  %v46844_v28 = vand.u32 4294901760, %v9275_v35 }
 0x148   : > { %36068 = vmatmul.mubr.f32.gmra.mrb[2].mxu0 %v46324_v45  ;;  %36152 = vmatmul.mubr.f32.gmra.mrb[2].mxu1 %v46324_v45  ;;  %v8118_v23 = vand.u32 4294901760, %v8117_v17  ;;  %v41012_v45 = vpack.c.bf16 %v46529_v47, %v46526_v44  ;;  %v32069_v44 = vld [vmem:[%s45028_s20 + $0x22] sm:$0xff] }
 0x149   : > { %41003 = vmatpush3.bf16.msra.mxu0 %v46626_v59  ;;  %41051 = vmatpush3.bf16.msra.mxu1 %v46636_v37 }
 0x14a   : > { %36162 = vmatprep.mubr.f32.mxu0 %v8088_v6  ;;  %36246 = vmatprep.mubr.f32.mxu1 %v8088_v6 }
 0x14b   : > { %41005 = vmatprep.subr.bf16.mxu0 %v41004_v38  ;;  %41053 = vmatprep.subr.bf16.mxu1 %v41052_v32 }
 0x14c   : > { %36163 = vmatmul.mubr.f32.vlgmr.msra.gmra.mrb[0].mxu0 %v8098_v39  ;;  %36247 = vmatmul.mubr.f32.vlgmr.msra.gmra.mrb[0].mxu1 %v8098_v39 }
 0x14d   : > { %41007 = vmatpush3.bf16.msra.mxu0 %v41004_v38  ;;  %41055 = vmatpush3.bf16.msra.mxu1 %v41052_v32 }
 0x14e   : > { %36165 = vmatprep.mubr.f32.mxu0 %v8108_v24  ;;  %36249 = vmatprep.mubr.f32.mxu1 %v8108_v24 }
 0x14f   : > { %41009 = vmatprep.subr.bf16.mxu0 %v41008_v13  ;;  %41057 = vmatprep.subr.bf16.mxu1 %v41056_v21 }
 0x150   : > { %36166 = vmatmul.mubr.f32.gmra.mrb[2].mxu0 %v8118_v23  ;;  %36250 = vmatmul.mubr.f32.gmra.mrb[2].mxu1 %v8118_v23 }
 0x151   : > { %41011 = vmatpush3.bf16.msra.mxu0 %v41008_v13  ;;  %41059 = vmatpush3.bf16.msra.mxu1 %v41056_v21 }
 0x152   : > { %36176 = vmatprep.mubr.f32.mxu0 %v46520_v16  ;;  %36260 = vmatprep.mubr.f32.mxu1 %v46520_v16 }
 0x153   : > { %41013 = vmatprep.subr.bf16.mxu0 %v41012_v45  ;;  %41061 = vmatprep.subr.bf16.mxu1 %v41060_v56 }
 0x154   : > { %36177 = vmatmul.mubr.f32.vlgmr.msra.gmra.mrb[0].mxu0 %v46551_v46  ;;  %36261 = vmatmul.mubr.f32.vlgmr.msra.gmra.mrb[0].mxu1 %v46551_v46 }
 0x155   : > { %41015 = vmatpush3.bf16.msra.mxu0 %v41012_v45  ;;  %41063 = vmatpush3.bf16.msra.mxu1 %v41060_v56 }
 0x156   : > { %36179 = vmatprep.mubr.f32.mxu0 %v46563_v52  ;;  %36263 = vmatprep.mubr.f32.mxu1 %v46563_v52 }
 0x157   : > { %41017 = vmatprep.subr.bf16.mxu0 %v41016_v15  ;;  %41065 = vmatprep.subr.bf16.mxu1 %v41064_v42 }
 0x158   : > { %36180 = vmatmul.mubr.f32.gmra.mrb[2].mxu0 %v46584_v12  ;;  %36264 = vmatmul.mubr.f32.gmra.mrb[2].mxu1 %v46584_v12 }
 0x159   : > { %41019 = vmatpush3.bf16.msra.mxu0 %v41016_v15  ;;  %41067 = vmatpush3.bf16.msra.mxu1 %v41064_v42  ;;  %v10026_v15 = vand.u32 4294901760, %v46834_v43  ;;  %v10033_v42 = vand.u32 4294901760, %v46837_v7 }
 0x15a   : > { %36190 = vmatprep.mubr.f32.mxu0 %v46554_v48  ;;  %36274 = vmatprep.mubr.f32.mxu1 %v46554_v48  ;;  %v46709_v48 = vld [vmem:[%s53407_s1 + $0xe0] sm:$0xff] }
 0x15b   : > { %41021 = vmatprep.subr.bf16.mxu0 %v46590_v54  ;;  %41069 = vmatprep.subr.bf16.mxu1 %v46619_v51  ;;  %v9278_v47 = vand.u32 4294901760, %v46709_v48 }
 0x15c   : > { %36191 = vmatmul.mubr.f32.vlgmr.msra.gmra.mrb[0].mxu0 %v46582_v19  ;;  %36275 = vmatmul.mubr.f32.vlgmr.msra.gmra.mrb[0].mxu1 %v46582_v19  ;;  %v41028_v19 = vpack.c.bf16 %v8134_v11, %v8127_v8  ;;  %v9904_v8 = vand.u32 4294901760, %v46734_v10  ;;  %v9266_v11 = vsel %vm459_vm0, %v32069_v44, 0 }
 0x15d   : > { %41023 = vmatpush3.bf16.msra.mxu0 %v46590_v54  ;;  %41071 = vmatpush3.bf16.msra.mxu1 %v46619_v51  ;;  %v46780_v53 = vand.u32 4294901760, %v9266_v11  ;;  %v46786_v30 = vsub.f32 %v46709_v48, %v9278_v47  ;;  %v46850_v39 = vpack.c.bf16 %v9281_v4, %v9278_v47 }
 0x15e   : > { %36193 = vmatprep.mubr.f32.mxu0 %v46610_v62  ;;  %36277 = vmatprep.mubr.f32.mxu1 %v46610_v62  ;;  %v41080_v62 = vpack.c.bf16 %v8771_v2, %v8764_v14  ;;  %v46789_v14 = vsub.f32 %v46714_v3, %v9281_v4  ;;  %v46802_v61 = vsub.f32 %v46734_v10, %v9904_v8  ;;  %v46889_v3 = vand.u32 4294901760, %v46842_v41 }
 0x15f   : > { %41025 = vmatprep.subr.bf16.mxu0 %v46626_v59  ;;  %41073 = vmatprep.subr.bf16.mxu1 %v46636_v37  ;;  %v46814_v18 = vsub.f32 %v9266_v11, %v46780_v53  ;;  %v9389_v50 = vand.u32 4294901760, %v46786_v30  ;;  %v46879_v45 = vpack.c.bf16 %v9904_v8, %v9901_v34  ;;  %v10034_v8 = vsub.f32 %v46837_v7, %v10033_v42 }
 0x160   : > { %36194 = vmatmul.mubr.f32.gmra.mrb[2].mxu0 %v46632_v0  ;;  %36278 = vmatmul.mubr.f32.gmra.mrb[2].mxu1 %v46632_v0  ;;  %v46765_v0 = vld [vmem:[%s53407_s1 + $0xf8] sm:$0xff]  ;;  %v9396_v25 = vand.u32 4294901760, %v46789_v14  ;;  %v9359_v11 = vsub.f32 %v46842_v41, %v46889_v3 }
 0x161   : > { %41027 = vmatpush3.bf16.msra.mxu0 %v46626_v59  ;;  %41075 = vmatpush3.bf16.msra.mxu1 %v46636_v37  ;;  %v9287_v57 = vand.u32 4294901760, %v46765_v0  ;;  %v46853_v17 = vand.u32 4294901760, %v46814_v18  ;;  %v9390_v24 = vsub.f32 %v46786_v30, %v9389_v50 }
 0x162   : > { %36204 = vmatprep.mubr.f32.mxu0 %v46593_v60  ;;  %36288 = vmatprep.mubr.f32.mxu1 %v46593_v60  ;;  %v46760_v60 = vld [vmem:[%s53407_s1 + $0xf0] sm:$0xff]  ;;  %v9397_v13 = vsub.f32 %v46789_v14, %v9396_v25  ;;  %v9360_v63 = vand.u32 4294901760, %v9359_v11 }
 0x163   : > { %41029 = vmatprep.subr.bf16.mxu0 %v41028_v19  ;;  %41077 = vmatprep.subr.bf16.mxu1 %v41076_v55  ;;  %v9284_v2 = vand.u32 4294901760, %v46760_v60  ;;  %v46831_v22 = vsub.f32 %v46765_v0, %v9287_v57  ;;  %v9391_v10 = vand.u32 4294901760, %v9390_v24  ;;  %v46974_v24 = vld [vmem:[%s53407_s1 + $0x108] sm:$0xff] }
 0x164   : > { %36205 = vmatmul.mubr.f32.vlgmr.msra.gmra.mrb[0].mxu0 %v46629_v26  ;;  %36289 = vmatmul.mubr.f32.vlgmr.msra.gmra.mrb[0].mxu1 %v46629_v26  ;;  %v46797_v26 = vsub.f32 %v46729_v20, %v9901_v34  ;;  %v9349_v20 = vsub.f32 %v46814_v18, %v46853_v17  ;;  %v9398_v44 = vand.u32 4294901760, %v9397_v13 }
 0x165   : > { %41031 = vmatpush3.bf16.msra.mxu0 %v41028_v19  ;;  %41079 = vmatpush3.bf16.msra.mxu1 %v41076_v55  ;;  %v46826_v32 = vsub.f32 %v46760_v60, %v9284_v2  ;;  %v9410_v56 = vand.u32 4294901760, %v46831_v22  ;;  %v46886_v48 = vpack.c.bf16 %v9287_v57, %v9284_v2  ;;  %v46892_v19 = vsub.f32 %v9275_v35, %v46844_v28 }
 0x166   : > { %36207 = vmatprep.mubr.f32.mxu0 %v46643_v36  ;;  %36291 = vmatprep.mubr.f32.mxu1 %v46643_v36  ;;  %v9272_v36 = vsel %vm459_vm0, %v32071_v9, 0  ;;  %v10012_v6 = vand.u32 4294901760, %v46797_v26  ;;  %v46896_v55 = vpack.c.bf16 %v9910_v40, %v9907_v58  ;;  %v10035_v9 = vand.u32 4294901760, %v10034_v8 }
 0x167   : > { %41033 = vmatprep.subr.bf16.mxu0 %v41032_v27  ;;  %41081 = vmatprep.subr.bf16.mxu1 %v41080_v62  ;;  %v46823_v38 = vand.u32 4294901760, %v9272_v36  ;;  %v9403_v23 = vand.u32 4294901760, %v46826_v32  ;;  %v46924_v33 = vand.u32 4294901760, %v46892_v19  ;;  %v41156_v40 = vpack.c.bf16 %v46802_v61, %v46797_v26 }
 0x168   : > { %36208 = vmatmul.mubr.f32.gmra.mrb[2].mxu0 %v46664_v5  ;;  %36292 = vmatmul.mubr.f32.gmra.mrb[2].mxu1 %v46664_v5  ;;  %v10019_v5 = vand.u32 4294901760, %v46802_v61  ;;  %v41160_v35 = vpack.c.bf16 %v46837_v7, %v46834_v43 }
 0x169   : > { %41035 = vmatpush3.bf16.msra.mxu0 %v41032_v27  ;;  %41083 = vmatpush3.bf16.msra.mxu1 %v41080_v62  ;;  %v46870_v21 = vsub.f32 %v9272_v36, %v46823_v38  ;;  %v9350_v27 = vand.u32 4294901760, %v9349_v20  ;;  %v41100_v62 = vpack.c.bf16 %v9398_v44, %v9391_v10  ;;  %v41112_v36 = vpack.c.bf16 %v46831_v22, %v46826_v32  ;;  %v32084_v10 = vld [vmem:[%s45028_s20 + $0x3b] sm:$0xf] }
 0x16a   : > { %36218 = vmatprep.mubr.f32.mxu0 %v46520_v16  ;;  %36302 = vmatprep.mubr.f32.mxu1 %v46520_v16  ;;  %v41172_v13 = vpack.c.bf16 %v10019_v5, %v10012_v6  ;;  %v10537_v11 = vsel %vm459_vm0, %v32084_v10, 0 }
 0x16b   : > { %41037 = vmatprep.subr.bf16.mxu0 %v46590_v54  ;;  %41085 = vmatprep.subr.bf16.mxu1 %v46619_v51  ;;  %v46903_v34 = vand.u32 4294901760, %v46870_v21 }
 0x16c   : > { %36219 = vmatmul.mubr.f32.vlgmr.msra.gmra.mrb[0].mxu0 %v46551_v46  ;;  %36303 = vmatmul.mubr.f32.vlgmr.msra.gmra.mrb[0].mxu1 %v46551_v46 }
 0x16d   : > { %41039 = vmatpush3.bf16.msra.mxu0 %v46590_v54  ;;  %41087 = vmatpush3.bf16.msra.mxu1 %v46619_v51  ;;  %v10013_v54 = vsub.f32 %v46797_v26, %v10012_v6  ;;  %v10020_v51 = vsub.f32 %v46802_v61, %v10019_v5  ;;  %v10543_v26 = vand.u32 4294901760, %v46974_v24  ;;  %v32082_v6 = vld [vmem:[%s45028_s20 + $0x2b] sm:$0xff]  ;;  %v41128_v5 = vpack.c.bf16 %v9410_v56, %v9403_v23 }
 0x16e   : > { %36221 = vmatprep.mubr.f32.mxu0 %v46563_v52  ;;  %36305 = vmatprep.mubr.f32.mxu1 %v46563_v52 }
 0x16f   : > { %41041 = vmatprep.subr.bf16.mxu0 %v46626_v59  ;;  %41089 = vmatprep.subr.bf16.mxu1 %v46636_v37  ;;  %v10014_v47 = vand.u32 4294901760, %v10013_v54  ;;  %v10021_v4 = vand.u32 4294901760, %v10020_v51  ;;  %v46989_v54 = vld [vmem:[%s53408_s2 + $0x100] sm:$0xff]  ;;  %v46994_v51 = vld [vmem:[%s53408_s2 + $0x108] sm:$0xff] }
 0x170   : > { %36222 = vmatmul.mubr.f32.gmra.mrb[2].mxu0 %v46584_v12  ;;  %36306 = vmatmul.mubr.f32.gmra.mrb[2].mxu1 %v46584_v12  ;;  %v11163_v61 = vand.u32 4294901760, %v46989_v54 }
 0x171   : > { %41043 = vmatpush3.bf16.msra.mxu0 %v46626_v59  ;;  %41091 = vmatpush3.bf16.msra.mxu1 %v46636_v37  ;;  %v9404_v59 = vsub.f32 %v46826_v32, %v9403_v23  ;;  %v9411_v37 = vsub.f32 %v46831_v22, %v9410_v56  ;;  %v41148_v60 = vpack.c.bf16 %v10021_v4, %v10014_v47  ;;  %v47032_v32 = vld [vmem:[%s53408_s2 + $0x110] sm:$0xff]  ;;  %v47037_v22 = vld [vmem:[%s53408_s2 + $0x118] sm:$0xff]  ;;  %v10531_v23 = vsel %vm459_vm0, %v32082_v6, 0 }
 0x172   : > { %36232 = vmatprep.mubr.f32.mxu0 %v46520_v16  ;;  %36316 = vmatprep.mubr.f32.mxu1 %v46520_v16  ;;  %v10027_v16 = vsub.f32 %v46834_v43, %v10026_v15  ;;  %v32083_v43 = vld [vmem:[%s45028_s20 + $0x33] sm:$0xff]  ;;  %v11169_v47 = vand.u32 4294901760, %v47032_v32  ;;  %v11172_v4 = vand.u32 4294901760, %v47037_v22 }
 0x173   : > { %41093 = vmatprep.subr.bf16.mxu0 %v46850_v39  ;;  %41141 = vmatprep.subr.bf16.mxu1 %v46879_v45  ;;  %v9405_v0 = vand.u32 4294901760, %v9404_v59  ;;  %v9412_v49 = vand.u32 4294901760, %v9411_v37  ;;  %v47071_v59 = vand.u32 4294901760, %v10531_v23 }
 0x174   : > { %36233 = vmatmul.mubr.f32.vlgmr.msra.gmra.mrb[0].mxu0 %v46551_v46  ;;  %36317 = vmatmul.mubr.f32.vlgmr.msra.gmra.mrb[0].mxu1 %v46551_v46  ;;  %v9369_v46 = vsub.f32 %v46870_v21, %v46903_v34  ;;  %v10028_v1 = vand.u32 4294901760, %v10027_v16 }
 0x175   : > { %41095 = vmatpush3.bf16.msra.mxu0 %v46850_v39  ;;  %41143 = vmatpush3.bf16.msra.mxu1 %v46879_v45  ;;  %v41104_v29 = vpack.c.bf16 %v9412_v49, %v9405_v0  ;;  %v47094_v0 = vsub.f32 %v47032_v32, %v11169_v47  ;;  %v47097_v49 = vsub.f32 %v47037_v22, %v11172_v4 }
 0x176   : > { %36235 = vmatprep.mubr.f32.mxu0 %v46563_v52  ;;  %36319 = vmatprep.mubr.f32.mxu1 %v46563_v52  ;;  %v9379_v52 = vsub.f32 %v46892_v19, %v46924_v33  ;;  %v9370_v2 = vand.u32 4294901760, %v9369_v46  ;;  %v41152_v57 = vpack.c.bf16 %v10035_v9, %v10028_v1  ;;  %v47102_v1 = vsub.f32 %v10531_v23, %v47071_v59 }
 0x177   : > { %41097 = vmatprep.subr.bf16.mxu0 %v46886_v48  ;;  %41145 = vmatprep.subr.bf16.mxu1 %v46896_v55  ;;  %v47104_v9 = vand.u32 4294901760, %v10537_v11 }
 0x178   : > { %36236 = vmatmul.mubr.f32.gmra.mrb[2].mxu0 %v46584_v12  ;;  %36320 = vmatmul.mubr.f32.gmra.mrb[2].mxu1 %v46584_v12  ;;  %v9380_v58 = vand.u32 4294901760, %v9379_v52  ;;  %v41108_v12 = vpack.c.bf16 %v46789_v14, %v46786_v30  ;;  %v32081_v30 = vld [vmem:[%s45028_s20 + $0x23] sm:$0xff] }
 0x179   : > { %41099 = vmatpush3.bf16.msra.mxu0 %v46886_v48  ;;  %41147 = vmatpush3.bf16.msra.mxu1 %v46896_v55 }
 0x17a   : > { %36330 = vmatprep.mubr.f32.mxu0 %v9350_v27  ;;  %36414 = vmatprep.mubr.f32.mxu1 %v9350_v27 }
 0x17b   : > { %41101 = vmatprep.subr.bf16.mxu0 %v41100_v62  ;;  %41149 = vmatprep.subr.bf16.mxu1 %v41148_v60 }
 0x17c   : > { %36331 = vmatmul.mubr.f32.vlgmr.msra.gmra.mrb[0].mxu0 %v9360_v63  ;;  %36415 = vmatmul.mubr.f32.vlgmr.msra.gmra.mrb[0].mxu1 %v9360_v63 }
 0x17d   : > { %41103 = vmatpush3.bf16.msra.mxu0 %v41100_v62  ;;  %41151 = vmatpush3.bf16.msra.mxu1 %v41148_v60 }
 0x17e   : > { %36333 = vmatprep.mubr.f32.mxu0 %v9370_v2  ;;  %36417 = vmatprep.mubr.f32.mxu1 %v9370_v2 }
 0x17f   : > { %41105 = vmatprep.subr.bf16.mxu0 %v41104_v29  ;;  %41153 = vmatprep.subr.bf16.mxu1 %v41152_v57 }
 0x180   : > { %36334 = vmatmul.mubr.f32.gmra.mrb[2].mxu0 %v9380_v58  ;;  %36418 = vmatmul.mubr.f32.gmra.mrb[2].mxu1 %v9380_v58 }
 0x181   : > { %41107 = vmatpush3.bf16.msra.mxu0 %v41104_v29  ;;  %41155 = vmatpush3.bf16.msra.mxu1 %v41152_v57 }
 0x182   : > { %36344 = vmatprep.mubr.f32.mxu0 %v46780_v53  ;;  %36428 = vmatprep.mubr.f32.mxu1 %v46780_v53 }
 0x183   : > { %41109 = vmatprep.subr.bf16.mxu0 %v41108_v12  ;;  %41157 = vmatprep.subr.bf16.mxu1 %v41156_v40 }
 0x184   : > { %36345 = vmatmul.mubr.f32.vlgmr.msra.gmra.mrb[0].mxu0 %v46811_v31  ;;  %36429 = vmatmul.mubr.f32.vlgmr.msra.gmra.mrb[0].mxu1 %v46811_v31 }
 0x185   : > { %41111 = vmatpush3.bf16.msra.mxu0 %v41108_v12  ;;  %41159 = vmatpush3.bf16.msra.mxu1 %v41156_v40 }
 0x186   : > { %36347 = vmatprep.mubr.f32.mxu0 %v46823_v38  ;;  %36431 = vmatprep.mubr.f32.mxu1 %v46823_v38 }
 0x187   : > { %41113 = vmatprep.subr.bf16.mxu0 %v41112_v36  ;;  %41161 = vmatprep.subr.bf16.mxu1 %v41160_v35 }
 0x188   : > { %36348 = vmatmul.mubr.f32.gmra.mrb[2].mxu0 %v46844_v28  ;;  %36432 = vmatmul.mubr.f32.gmra.mrb[2].mxu1 %v46844_v28 }
 0x189   : > { %41115 = vmatpush3.bf16.msra.mxu0 %v41112_v36  ;;  %41163 = vmatpush3.bf16.msra.mxu1 %v41160_v35  ;;  %v11288_v36 = vand.u32 4294901760, %v47094_v0  ;;  %v11295_v35 = vand.u32 4294901760, %v47097_v49 }
 0x18a   : > { %36358 = vmatprep.mubr.f32.mxu0 %v46814_v18  ;;  %36442 = vmatprep.mubr.f32.mxu1 %v46814_v18  ;;  %v46969_v18 = vld [vmem:[%s53407_s1 + $0x100] sm:$0xff] }
 0x18b   : > { %41117 = vmatprep.subr.bf16.mxu0 %v46850_v39  ;;  %41165 = vmatprep.subr.bf16.mxu1 %v46879_v45  ;;  %v10540_v14 = vand.u32 4294901760, %v46969_v18 }
 0x18c   : > { %36359 = vmatmul.mubr.f32.vlgmr.msra.gmra.mrb[0].mxu0 %v46842_v41  ;;  %36443 = vmatmul.mubr.f32.vlgmr.msra.gmra.mrb[0].mxu1 %v46842_v41  ;;  %v41124_v41 = vpack.c.bf16 %v9396_v25, %v9389_v50  ;;  %v11166_v50 = vand.u32 4294901760, %v46994_v51  ;;  %v10528_v25 = vsel %vm459_vm0, %v32081_v30, 0 }
 0x18d   : > { %41119 = vmatpush3.bf16.msra.mxu0 %v46850_v39  ;;  %41167 = vmatpush3.bf16.msra.mxu1 %v46879_v45  ;;  %v47040_v7 = vand.u32 4294901760, %v10528_v25  ;;  %v47046_v56 = vsub.f32 %v46969_v18, %v10540_v14  ;;  %v47110_v63 = vpack.c.bf16 %v10543_v26, %v10540_v14 }
 0x18e   : > { %36361 = vmatprep.mubr.f32.mxu0 %v46870_v21  ;;  %36445 = vmatprep.mubr.f32.mxu1 %v46870_v21  ;;  %v41176_v21 = vpack.c.bf16 %v10033_v42, %v10026_v15  ;;  %v47049_v15 = vsub.f32 %v46974_v24, %v10543_v26  ;;  %v47062_v20 = vsub.f32 %v46994_v51, %v11166_v50  ;;  %v47149_v24 = vand.u32 4294901760, %v47102_v1 }
 0x18f   : > { %41121 = vmatprep.subr.bf16.mxu0 %v46886_v48  ;;  %41169 = vmatprep.subr.bf16.mxu1 %v46896_v55  ;;  %v47074_v37 = vsub.f32 %v10528_v25, %v47040_v7  ;;  %v10651_v16 = vand.u32 4294901760, %v47046_v56  ;;  %v47139_v12 = vpack.c.bf16 %v11166_v50, %v11163_v61  ;;  %v11296_v50 = vsub.f32 %v47097_v49, %v11295_v35 }
 0x190   : > { %36362 = vmatmul.mubr.f32.gmra.mrb[2].mxu0 %v46892_v19  ;;  %36446 = vmatmul.mubr.f32.gmra.mrb[2].mxu1 %v46892_v19  ;;  %v47025_v19 = vld [vmem:[%s53407_s1 + $0x118] sm:$0xff]  ;;  %v10658_v8 = vand.u32 4294901760, %v47049_v15  ;;  %v10621_v25 = vsub.f32 %v47102_v1, %v47149_v24 }
 0x191   : > { %41123 = vmatpush3.bf16.msra.mxu0 %v46886_v48  ;;  %41171 = vmatpush3.bf16.msra.mxu1 %v46896_v55  ;;  %v10549_v44 = vand.u32 4294901760, %v47025_v19  ;;  %v47113_v52 = vand.u32 4294901760, %v47074_v37  ;;  %v10652_v2 = vsub.f32 %v47046_v56, %v10651_v16 }
 0x192   : > { %36372 = vmatprep.mubr.f32.mxu0 %v46853_v17  ;;  %36456 = vmatprep.mubr.f32.mxu1 %v46853_v17  ;;  %v47020_v17 = vld [vmem:[%s53407_s1 + $0x110] sm:$0xff]  ;;  %v10659_v29 = vsub.f32 %v47049_v15, %v10658_v8  ;;  %v10622_v23 = vand.u32 4294901760, %v10621_v25 }
 0x193   : > { %41125 = vmatprep.subr.bf16.mxu0 %v41124_v41  ;;  %41173 = vmatprep.subr.bf16.mxu1 %v41172_v13  ;;  %v10546_v42 = vand.u32 4294901760, %v47020_v17  ;;  %v47091_v46 = vsub.f32 %v47025_v19, %v10549_v44  ;;  %v10653_v51 = vand.u32 4294901760, %v10652_v2  ;;  %v47234_v2 = vld [vmem:[%s53407_s1 + $0x128] sm:$0xff] }
 0x194   : > { %36373 = vmatmul.mubr.f32.vlgmr.msra.gmra.mrb[0].mxu0 %v46889_v3  ;;  %36457 = vmatmul.mubr.f32.vlgmr.msra.gmra.mrb[0].mxu1 %v46889_v3  ;;  %v47057_v3 = vsub.f32 %v46989_v54, %v11163_v61  ;;  %v10611_v54 = vsub.f32 %v47074_v37, %v47113_v52  ;;  %v10660_v30 = vand.u32 4294901760, %v10659_v29 }
 0x195   : > { %41127 = vmatpush3.bf16.msra.mxu0 %v41124_v41  ;;  %41175 = vmatpush3.bf16.msra.mxu1 %v41172_v13  ;;  %v47086_v60 = vsub.f32 %v47020_v17, %v10546_v42  ;;  %v10672_v40 = vand.u32 4294901760, %v47091_v46  ;;  %v47146_v18 = vpack.c.bf16 %v10549_v44, %v10546_v42  ;;  %v47152_v41 = vsub.f32 %v10537_v11, %v47104_v9 }
 0x196   : > { %36375 = vmatprep.mubr.f32.mxu0 %v46903_v34  ;;  %36459 = vmatprep.mubr.f32.mxu1 %v46903_v34  ;;  %v10534_v34 = vsel %vm459_vm0, %v32083_v43, 0  ;;  %v11274_v27 = vand.u32 4294901760, %v47057_v3  ;;  %v47156_v13 = vpack.c.bf16 %v11172_v4, %v11169_v47  ;;  %v11297_v43 = vand.u32 4294901760, %v11296_v50 }
 0x197   : > { %41129 = vmatprep.subr.bf16.mxu0 %v41128_v5  ;;  %41177 = vmatprep.subr.bf16.mxu1 %v41176_v21  ;;  %v47083_v62 = vand.u32 4294901760, %v10534_v34  ;;  %v10665_v58 = vand.u32 4294901760, %v47086_v60  ;;  %v47184_v6 = vand.u32 4294901760, %v47152_v41  ;;  %v41252_v4 = vpack.c.bf16 %v47062_v20, %v47057_v3 }
 0x198   : > { %36376 = vmatmul.mubr.f32.gmra.mrb[2].mxu0 %v46924_v33  ;;  %36460 = vmatmul.mubr.f32.gmra.mrb[2].mxu1 %v46924_v33  ;;  %v11281_v33 = vand.u32 4294901760, %v47062_v20  ;;  %v41256_v11 = vpack.c.bf16 %v47097_v49, %v47094_v0 }
 0x199   : > { %41131 = vmatpush3.bf16.msra.mxu0 %v41128_v5  ;;  %41179 = vmatpush3.bf16.msra.mxu1 %v41176_v21  ;;  %v47130_v57 = vsub.f32 %v10534_v34, %v47083_v62  ;;  %v10612_v5 = vand.u32 4294901760, %v10611_v54  ;;  %v41196_v21 = vpack.c.bf16 %v10660_v30, %v10653_v51  ;;  %v41208_v34 = vpack.c.bf16 %v47091_v46, %v47086_v60  ;;  %v32096_v51 = vld [vmem:[%s45028_s20 + $0x3c] sm:$0xf] }
 0x19a   : > { %36386 = vmatprep.mubr.f32.mxu0 %v46780_v53  ;;  %36470 = vmatprep.mubr.f32.mxu1 %v46780_v53  ;;  %v41268_v29 = vpack.c.bf16 %v11281_v33, %v11274_v27  ;;  %v11799_v25 = vsel %vm459_vm0, %v32096_v51, 0 }
 0x19b   : > { %41133 = vmatprep.subr.bf16.mxu0 %v46850_v39  ;;  %41181 = vmatprep.subr.bf16.mxu1 %v46879_v45  ;;  %v47163_v61 = vand.u32 4294901760, %v47130_v57 }
 0x19c   : > { %36387 = vmatmul.mubr.f32.vlgmr.msra.gmra.mrb[0].mxu0 %v46811_v31  ;;  %36471 = vmatmul.mubr.f32.vlgmr.msra.gmra.mrb[0].mxu1 %v46811_v31 }
 0x19d   : > { %41135 = vmatpush3.bf16.msra.mxu0 %v46850_v39  ;;  %41183 = vmatpush3.bf16.msra.mxu1 %v46879_v45  ;;  %v11275_v39 = vsub.f32 %v47057_v3, %v11274_v27  ;;  %v11282_v45 = vsub.f32 %v47062_v20, %v11281_v33  ;;  %v11805_v3 = vand.u32 4294901760, %v47234_v2  ;;  %v32094_v27 = vld [vmem:[%s45028_s20 + $0x2c] sm:$0xff]  ;;  %v41224_v33 = vpack.c.bf16 %v10672_v40, %v10665_v58 }
 0x19e   : > { %36389 = vmatprep.mubr.f32.mxu0 %v46823_v38  ;;  %36473 = vmatprep.mubr.f32.mxu1 %v46823_v38 }
 0x19f   : > { %41137 = vmatprep.subr.bf16.mxu0 %v46886_v48  ;;  %41185 = vmatprep.subr.bf16.mxu1 %v46896_v55  ;;  %v11276_v14 = vand.u32 4294901760, %v11275_v39  ;;  %v11283_v26 = vand.u32 4294901760, %v11282_v45  ;;  %v47249_v39 = vld [vmem:[%s53408_s2 + $0x120] sm:$0xff]  ;;  %v47254_v45 = vld [vmem:[%s53408_s2 + $0x128] sm:$0xff] }
 0x1a0   : > { %36390 = vmatmul.mubr.f32.gmra.mrb[2].mxu0 %v46844_v28  ;;  %36474 = vmatmul.mubr.f32.gmra.mrb[2].mxu1 %v46844_v28  ;;  %v12425_v20 = vand.u32 4294901760, %v47249_v39 }
 0x1a1   : > { %41139 = vmatpush3.bf16.msra.mxu0 %v46886_v48  ;;  %41187 = vmatpush3.bf16.msra.mxu1 %v46896_v55  ;;  %v10666_v48 = vsub.f32 %v47086_v60, %v10665_v58  ;;  %v10673_v55 = vsub.f32 %v47091_v46, %v10672_v40  ;;  %v41244_v17 = vpack.c.bf16 %v11283_v26, %v11276_v14  ;;  %v47292_v60 = vld [vmem:[%s53408_s2 + $0x130] sm:$0xff]  ;;  %v47297_v46 = vld [vmem:[%s53408_s2 + $0x138] sm:$0xff]  ;;  %v11793_v58 = vsel %vm459_vm0, %v32094_v27, 0 }
 0x1a2   : > { %36400 = vmatprep.mubr.f32.mxu0 %v46780_v53  ;;  %36484 = vmatprep.mubr.f32.mxu1 %v46780_v53  ;;  %v11289_v53 = vsub.f32 %v47094_v0, %v11288_v36  ;;  %v32095_v0 = vld [vmem:[%s45028_s20 + $0x34] sm:$0xff]  ;;  %v12431_v14 = vand.u32 4294901760, %v47292_v60  ;;  %v12434_v26 = vand.u32 4294901760, %v47297_v46 }
 0x1a3   : > { %41189 = vmatprep.subr.bf16.mxu0 %v47110_v63  ;;  %41237 = vmatprep.subr.bf16.mxu1 %v47139_v12  ;;  %v10667_v19 = vand.u32 4294901760, %v10666_v48  ;;  %v10674_v32 = vand.u32 4294901760, %v10673_v55  ;;  %v47331_v48 = vand.u32 4294901760, %v11793_v58 }
 0x1a4   : > { %36401 = vmatmul.mubr.f32.vlgmr.msra.gmra.mrb[0].mxu0 %v46811_v31  ;;  %36485 = vmatmul.mubr.f32.vlgmr.msra.gmra.mrb[0].mxu1 %v46811_v31  ;;  %v10631_v31 = vsub.f32 %v47130_v57, %v47163_v61  ;;  %v11290_v22 = vand.u32 4294901760, %v11289_v53 }
 0x1a5   : > { %41191 = vmatpush3.bf16.msra.mxu0 %v47110_v63  ;;  %41239 = vmatpush3.bf16.msra.mxu1 %v47139_v12  ;;  %v41200_v10 = vpack.c.bf16 %v10674_v32, %v10667_v19  ;;  %v47354_v19 = vsub.f32 %v47292_v60, %v12431_v14  ;;  %v47357_v32 = vsub.f32 %v47297_v46, %v12434_v26 }
 0x1a6   : > { %36403 = vmatprep.mubr.f32.mxu0 %v46823_v38  ;;  %36487 = vmatprep.mubr.f32.mxu1 %v46823_v38  ;;  %v10641_v38 = vsub.f32 %v47152_v41, %v47184_v6  ;;  %v10632_v42 = vand.u32 4294901760, %v10631_v31  ;;  %v41248_v44 = vpack.c.bf16 %v11297_v43, %v11290_v22  ;;  %v47362_v22 = vsub.f32 %v11793_v58, %v47331_v48 }
 0x1a7   : > { %41193 = vmatprep.subr.bf16.mxu0 %v47146_v18  ;;  %41241 = vmatprep.subr.bf16.mxu1 %v47156_v13  ;;  %v47364_v43 = vand.u32 4294901760, %v11799_v25 }
 0x1a8   : > { %36404 = vmatmul.mubr.f32.gmra.mrb[2].mxu0 %v46844_v28  ;;  %36488 = vmatmul.mubr.f32.gmra.mrb[2].mxu1 %v46844_v28  ;;  %v10642_v47 = vand.u32 4294901760, %v10641_v38  ;;  %v41204_v28 = vpack.c.bf16 %v47049_v15, %v47046_v56  ;;  %v32093_v56 = vld [vmem:[%s45028_s20 + $0x24] sm:$0xff] }
 0x1a9   : > { %41195 = vmatpush3.bf16.msra.mxu0 %v47146_v18  ;;  %41243 = vmatpush3.bf16.msra.mxu1 %v47156_v13 }
 0x1aa   : > { %36498 = vmatprep.mubr.f32.mxu0 %v10612_v5  ;;  %36582 = vmatprep.mubr.f32.mxu1 %v10612_v5 }
 0x1ab   : > { %41197 = vmatprep.subr.bf16.mxu0 %v41196_v21  ;;  %41245 = vmatprep.subr.bf16.mxu1 %v41244_v17 }
 0x1ac   : > { %36499 = vmatmul.mubr.f32.vlgmr.msra.gmra.mrb[0].mxu0 %v10622_v23  ;;  %36583 = vmatmul.mubr.f32.vlgmr.msra.gmra.mrb[0].mxu1 %v10622_v23 }
 0x1ad   : > { %41199 = vmatpush3.bf16.msra.mxu0 %v41196_v21  ;;  %41247 = vmatpush3.bf16.msra.mxu1 %v41244_v17 }
 0x1ae   : > { %36501 = vmatprep.mubr.f32.mxu0 %v10632_v42  ;;  %36585 = vmatprep.mubr.f32.mxu1 %v10632_v42 }
 0x1af   : > { %41201 = vmatprep.subr.bf16.mxu0 %v41200_v10  ;;  %41249 = vmatprep.subr.bf16.mxu1 %v41248_v44 }
 0x1b0   : > { %36502 = vmatmul.mubr.f32.gmra.mrb[2].mxu0 %v10642_v47  ;;  %36586 = vmatmul.mubr.f32.gmra.mrb[2].mxu1 %v10642_v47 }
 0x1b1   : > { %41203 = vmatpush3.bf16.msra.mxu0 %v41200_v10  ;;  %41251 = vmatpush3.bf16.msra.mxu1 %v41248_v44 }
 0x1b2   : > { %36512 = vmatprep.mubr.f32.mxu0 %v47040_v7  ;;  %36596 = vmatprep.mubr.f32.mxu1 %v47040_v7 }
 0x1b3   : > { %41205 = vmatprep.subr.bf16.mxu0 %v41204_v28  ;;  %41253 = vmatprep.subr.bf16.mxu1 %v41252_v4 }
 0x1b4   : > { %36513 = vmatmul.mubr.f32.vlgmr.msra.gmra.mrb[0].mxu0 %v47071_v59  ;;  %36597 = vmatmul.mubr.f32.vlgmr.msra.gmra.mrb[0].mxu1 %v47071_v59 }
 0x1b5   : > { %41207 = vmatpush3.bf16.msra.mxu0 %v41204_v28  ;;  %41255 = vmatpush3.bf16.msra.mxu1 %v41252_v4 }
 0x1b6   : > { %36515 = vmatprep.mubr.f32.mxu0 %v47083_v62  ;;  %36599 = vmatprep.mubr.f32.mxu1 %v47083_v62 }
 0x1b7   : > { %41209 = vmatprep.subr.bf16.mxu0 %v41208_v34  ;;  %41257 = vmatprep.subr.bf16.mxu1 %v41256_v11 }
 0x1b8   : > { %36516 = vmatmul.mubr.f32.gmra.mrb[2].mxu0 %v47104_v9  ;;  %36600 = vmatmul.mubr.f32.gmra.mrb[2].mxu1 %v47104_v9 }
 0x1b9   : > { %41211 = vmatpush3.bf16.msra.mxu0 %v41208_v34  ;;  %41259 = vmatpush3.bf16.msra.mxu1 %v41256_v11  ;;  %v12550_v34 = vand.u32 4294901760, %v47354_v19  ;;  %v12557_v11 = vand.u32 4294901760, %v47357_v32 }
 0x1ba   : > { %36526 = vmatprep.mubr.f32.mxu0 %v47074_v37  ;;  %36610 = vmatprep.mubr.f32.mxu1 %v47074_v37  ;;  %v47229_v37 = vld [vmem:[%s53407_s1 + $0x120] sm:$0xff] }
 0x1bb   : > { %41213 = vmatprep.subr.bf16.mxu0 %v47110_v63  ;;  %41261 = vmatprep.subr.bf16.mxu1 %v47139_v12  ;;  %v11802_v15 = vand.u32 4294901760, %v47229_v37 }
 0x1bc   : > { %36527 = vmatmul.mubr.f32.vlgmr.msra.gmra.mrb[0].mxu0 %v47102_v1  ;;  %36611 = vmatmul.mubr.f32.vlgmr.msra.gmra.mrb[0].mxu1 %v47102_v1  ;;  %v41220_v1 = vpack.c.bf16 %v10658_v8, %v10651_v16  ;;  %v12428_v16 = vand.u32 4294901760, %v47254_v45  ;;  %v11790_v8 = vsel %vm459_vm0, %v32093_v56, 0 }
 0x1bd   : > { %41215 = vmatpush3.bf16.msra.mxu0 %v47110_v63  ;;  %41263 = vmatpush3.bf16.msra.mxu1 %v47139_v12  ;;  %v47300_v49 = vand.u32 4294901760, %v11790_v8  ;;  %v47306_v40 = vsub.f32 %v47229_v37, %v11802_v15  ;;  %v47370_v23 = vpack.c.bf16 %v11805_v3, %v11802_v15 }
 0x1be   : > { %36529 = vmatprep.mubr.f32.mxu0 %v47130_v57  ;;  %36613 = vmatprep.mubr.f32.mxu1 %v47130_v57  ;;  %v41272_v57 = vpack.c.bf16 %v11295_v35, %v11288_v36  ;;  %v47309_v36 = vsub.f32 %v47234_v2, %v11805_v3  ;;  %v47322_v54 = vsub.f32 %v47254_v45, %v12428_v16  ;;  %v47409_v2 = vand.u32 4294901760, %v47362_v22 }
 0x1bf   : > { %41217 = vmatprep.subr.bf16.mxu0 %v47146_v18  ;;  %41265 = vmatprep.subr.bf16.mxu1 %v47156_v13  ;;  %v47334_v55 = vsub.f32 %v11790_v8, %v47300_v49  ;;  %v11913_v53 = vand.u32 4294901760, %v47306_v40  ;;  %v47399_v28 = vpack.c.bf16 %v12428_v16, %v12425_v20  ;;  %v12558_v16 = vsub.f32 %v47357_v32, %v12557_v11 }
 0x1c0   : > { %36530 = vmatmul.mubr.f32.gmra.mrb[2].mxu0 %v47152_v41  ;;  %36614 = vmatmul.mubr.f32.gmra.mrb[2].mxu1 %v47152_v41  ;;  %v47285_v41 = vld [vmem:[%s53407_s1 + $0x138] sm:$0xff]  ;;  %v11920_v50 = vand.u32 4294901760, %v47309_v36  ;;  %v11883_v8 = vsub.f32 %v47362_v22, %v47409_v2 }
 0x1c1   : > { %41219 = vmatpush3.bf16.msra.mxu0 %v47146_v18  ;;  %41267 = vmatpush3.bf16.msra.mxu1 %v47156_v13  ;;  %v11811_v30 = vand.u32 4294901760, %v47285_v41  ;;  %v47373_v38 = vand.u32 4294901760, %v47334_v55  ;;  %v11914_v42 = vsub.f32 %v47306_v40, %v11913_v53 }
 0x1c2   : > { %36540 = vmatprep.mubr.f32.mxu0 %v47113_v52  ;;  %36624 = vmatprep.mubr.f32.mxu1 %v47113_v52  ;;  %v47280_v52 = vld [vmem:[%s53407_s1 + $0x130] sm:$0xff]  ;;  %v11921_v10 = vsub.f32 %v47309_v36, %v11920_v50  ;;  %v11884_v58 = vand.u32 4294901760, %v11883_v8 }
 0x1c3   : > { %41221 = vmatprep.subr.bf16.mxu0 %v41220_v1  ;;  %41269 = vmatprep.subr.bf16.mxu1 %v41268_v29  ;;  %v11808_v35 = vand.u32 4294901760, %v47280_v52  ;;  %v47351_v31 = vsub.f32 %v47285_v41, %v11811_v30  ;;  %v11915_v45 = vand.u32 4294901760, %v11914_v42  ;;  %v47494_v42 = vld [vmem:[%s53407_s1 + $0x148] sm:$0xff] }
 0x1c4   : > { %36541 = vmatmul.mubr.f32.vlgmr.msra.gmra.mrb[0].mxu0 %v47149_v24  ;;  %36625 = vmatmul.mubr.f32.vlgmr.msra.gmra.mrb[0].mxu1 %v47149_v24  ;;  %v47317_v24 = vsub.f32 %v47249_v39, %v12425_v20  ;;  %v11873_v39 = vsub.f32 %v47334_v55, %v47373_v38  ;;  %v11922_v56 = vand.u32 4294901760, %v11921_v10 }
 0x1c5   : > { %41223 = vmatpush3.bf16.msra.mxu0 %v41220_v1  ;;  %41271 = vmatpush3.bf16.msra.mxu1 %v41268_v29  ;;  %v47346_v17 = vsub.f32 %v47280_v52, %v11808_v35  ;;  %v11934_v4 = vand.u32 4294901760, %v47351_v31  ;;  %v47406_v37 = vpack.c.bf16 %v11811_v30, %v11808_v35  ;;  %v47412_v1 = vsub.f32 %v11799_v25, %v47364_v43 }
 0x1c6   : > { %36543 = vmatprep.mubr.f32.mxu0 %v47163_v61  ;;  %36627 = vmatprep.mubr.f32.mxu1 %v47163_v61  ;;  %v11796_v61 = vsel %vm459_vm0, %v32095_v0, 0  ;;  %v12536_v5 = vand.u32 4294901760, %v47317_v24  ;;  %v47416_v29 = vpack.c.bf16 %v12434_v26, %v12431_v14  ;;  %v12559_v0 = vand.u32 4294901760, %v12558_v16 }
 0x1c7   : > { %41225 = vmatprep.subr.bf16.mxu0 %v41224_v33  ;;  %41273 = vmatprep.subr.bf16.mxu1 %v41272_v57  ;;  %v47343_v21 = vand.u32 4294901760, %v11796_v61  ;;  %v11927_v47 = vand.u32 4294901760, %v47346_v17  ;;  %v47444_v27 = vand.u32 4294901760, %v47412_v1  ;;  %v41348_v26 = vpack.c.bf16 %v47322_v54, %v47317_v24 }
 0x1c8   : > { %36544 = vmatmul.mubr.f32.gmra.mrb[2].mxu0 %v47184_v6  ;;  %36628 = vmatmul.mubr.f32.gmra.mrb[2].mxu1 %v47184_v6  ;;  %v12543_v6 = vand.u32 4294901760, %v47322_v54  ;;  %v41352_v25 = vpack.c.bf16 %v47357_v32, %v47354_v19 }
 0x1c9   : > { %41227 = vmatpush3.bf16.msra.mxu0 %v41224_v33  ;;  %41275 = vmatpush3.bf16.msra.mxu1 %v41272_v57  ;;  %v47390_v44 = vsub.f32 %v11796_v61, %v47343_v21  ;;  %v11874_v33 = vand.u32 4294901760, %v11873_v39  ;;  %v41292_v57 = vpack.c.bf16 %v11922_v56, %v11915_v45  ;;  %v41304_v61 = vpack.c.bf16 %v47351_v31, %v47346_v17  ;;  %v32108_v45 = vld [vmem:[%s45028_s20 + $0x58] sm:$0xf] }
 0x1ca   : > { %36554 = vmatprep.mubr.f32.mxu0 %v47040_v7  ;;  %36638 = vmatprep.mubr.f32.mxu1 %v47040_v7  ;;  %v41364_v10 = vpack.c.bf16 %v12543_v6, %v12536_v5  ;;  %v13062_v8 = vsel %vm459_vm0, %v32108_v45, 0 }
 0x1cb   : > { %41229 = vmatprep.subr.bf16.mxu0 %v47110_v63  ;;  %41277 = vmatprep.subr.bf16.mxu1 %v47139_v12  ;;  %v47423_v20 = vand.u32 4294901760, %v47390_v44 }
 0x1cc   : > { %36555 = vmatmul.mubr.f32.vlgmr.msra.gmra.mrb[0].mxu0 %v47071_v59  ;;  %36639 = vmatmul.mubr.f32.vlgmr.msra.gmra.mrb[0].mxu1 %v47071_v59 }
 0x1cd   : > { %41231 = vmatpush3.bf16.msra.mxu0 %v47110_v63  ;;  %41279 = vmatpush3.bf16.msra.mxu1 %v47139_v12  ;;  %v12537_v63 = vsub.f32 %v47317_v24, %v12536_v5  ;;  %v12544_v12 = vsub.f32 %v47322_v54, %v12543_v6  ;;  %v13068_v24 = vand.u32 4294901760, %v47494_v42  ;;  %v32106_v5 = vld [vmem:[%s45028_s20 + $0x48] sm:$0xff]  ;;  %v41320_v6 = vpack.c.bf16 %v11934_v4, %v11927_v47 }
 0x1ce   : > { %36557 = vmatprep.mubr.f32.mxu0 %v47083_v62  ;;  %36641 = vmatprep.mubr.f32.mxu1 %v47083_v62 }
 0x1cf   : > { %41233 = vmatprep.subr.bf16.mxu0 %v47146_v18  ;;  %41281 = vmatprep.subr.bf16.mxu1 %v47156_v13  ;;  %v12538_v15 = vand.u32 4294901760, %v12537_v63  ;;  %v12545_v3 = vand.u32 4294901760, %v12544_v12  ;;  %v47509_v63 = vld [vmem:[%s53408_s2 + $0x140] sm:$0xff]  ;;  %v47514_v12 = vld [vmem:[%s53408_s2 + $0x148] sm:$0xff] }
 0x1d0   : > { %36558 = vmatmul.mubr.f32.gmra.mrb[2].mxu0 %v47104_v9  ;;  %36642 = vmatmul.mubr.f32.gmra.mrb[2].mxu1 %v47104_v9  ;;  %v13688_v54 = vand.u32 4294901760, %v47509_v63 }
 0x1d1   : > { %41235 = vmatpush3.bf16.msra.mxu0 %v47146_v18  ;;  %41283 = vmatpush3.bf16.msra.mxu1 %v47156_v13  ;;  %v11928_v18 = vsub.f32 %v47346_v17, %v11927_v47  ;;  %v11935_v13 = vsub.f32 %v47351_v31, %v11934_v4  ;;  %v41340_v52 = vpack.c.bf16 %v12545_v3, %v12538_v15  ;;  %v47552_v17 = vld [vmem:[%s53408_s2 + $0x150] sm:$0xff]  ;;  %v47557_v31 = vld [vmem:[%s53408_s2 + $0x158] sm:$0xff]  ;;  %v13056_v47 = vsel %vm459_vm0, %v32106_v5, 0 }
 0x1d2   : > { %36568 = vmatprep.mubr.f32.mxu0 %v47040_v7  ;;  %36652 = vmatprep.mubr.f32.mxu1 %v47040_v7  ;;  %v12551_v7 = vsub.f32 %v47354_v19, %v12550_v34  ;;  %v32107_v19 = vld [vmem:[%s45028_s20 + $0x50] sm:$0xff]  ;;  %v13694_v15 = vand.u32 4294901760, %v47552_v17  ;;  %v13697_v3 = vand.u32 4294901760, %v47557_v31 }
 0x1d3   : > { %41285 = vmatprep.subr.bf16.mxu0 %v47370_v23  ;;  %41333 = vmatprep.subr.bf16.mxu1 %v47399_v28  ;;  %v11929_v41 = vand.u32 4294901760, %v11928_v18  ;;  %v11936_v60 = vand.u32 4294901760, %v11935_v13  ;;  %v47591_v18 = vand.u32 4294901760, %v13056_v47 }
 0x1d4   : > { %36569 = vmatmul.mubr.f32.vlgmr.msra.gmra.mrb[0].mxu0 %v47071_v59  ;;  %36653 = vmatmul.mubr.f32.vlgmr.msra.gmra.mrb[0].mxu1 %v47071_v59  ;;  %v11893_v59 = vsub.f32 %v47390_v44, %v47423_v20  ;;  %v12552_v46 = vand.u32 4294901760, %v12551_v7 }
 0x1d5   : > { %41287 = vmatpush3.bf16.msra.mxu0 %v47370_v23  ;;  %41335 = vmatpush3.bf16.msra.mxu1 %v47399_v28  ;;  %v41296_v51 = vpack.c.bf16 %v11936_v60, %v11929_v41  ;;  %v47614_v41 = vsub.f32 %v47552_v17, %v13694_v15  ;;  %v47617_v60 = vsub.f32 %v47557_v31, %v13697_v3 }
 0x1d6   : > { %36571 = vmatprep.mubr.f32.mxu0 %v47083_v62  ;;  %36655 = vmatprep.mubr.f32.mxu1 %v47083_v62  ;;  %v11903_v62 = vsub.f32 %v47412_v1, %v47444_v27  ;;  %v11894_v35 = vand.u32 4294901760, %v11893_v59  ;;  %v41344_v30 = vpack.c.bf16 %v12559_v0, %v12552_v46  ;;  %v47622_v46 = vsub.f32 %v13056_v47, %v47591_v18 }
 0x1d7   : > { %41289 = vmatprep.subr.bf16.mxu0 %v47406_v37  ;;  %41337 = vmatprep.subr.bf16.mxu1 %v47416_v29  ;;  %v47624_v0 = vand.u32 4294901760, %v13062_v8 }
 0x1d8   : > { %36572 = vmatmul.mubr.f32.gmra.mrb[2].mxu0 %v47104_v9  ;;  %36656 = vmatmul.mubr.f32.gmra.mrb[2].mxu1 %v47104_v9  ;;  %v11904_v14 = vand.u32 4294901760, %v11903_v62  ;;  %v41300_v9 = vpack.c.bf16 %v47309_v36, %v47306_v40  ;;  %v32105_v40 = vld [vmem:[%s45028_s20 + $0x40] sm:$0xff] }
 0x1d9   : > { %41291 = vmatpush3.bf16.msra.mxu0 %v47406_v37  ;;  %41339 = vmatpush3.bf16.msra.mxu1 %v47416_v29 }
 0x1da   : > { %36666 = vmatprep.mubr.f32.mxu0 %v11874_v33  ;;  %36750 = vmatprep.mubr.f32.mxu1 %v11874_v33 }
 0x1db   : > { %41293 = vmatprep.subr.bf16.mxu0 %v41292_v57  ;;  %41341 = vmatprep.subr.bf16.mxu1 %v41340_v52 }
 0x1dc   : > { %36667 = vmatmul.mubr.f32.vlgmr.msra.gmra.mrb[0].mxu0 %v11884_v58  ;;  %36751 = vmatmul.mubr.f32.vlgmr.msra.gmra.mrb[0].mxu1 %v11884_v58 }
 0x1dd   : > { %41295 = vmatpush3.bf16.msra.mxu0 %v41292_v57  ;;  %41343 = vmatpush3.bf16.msra.mxu1 %v41340_v52 }
 0x1de   : > { %36669 = vmatprep.mubr.f32.mxu0 %v11894_v35  ;;  %36753 = vmatprep.mubr.f32.mxu1 %v11894_v35 }
 0x1df   : > { %41297 = vmatprep.subr.bf16.mxu0 %v41296_v51  ;;  %41345 = vmatprep.subr.bf16.mxu1 %v41344_v30 }
 0x1e0   : > { %36670 = vmatmul.mubr.f32.gmra.mrb[2].mxu0 %v11904_v14  ;;  %36754 = vmatmul.mubr.f32.gmra.mrb[2].mxu1 %v11904_v14 }
 0x1e1   : > { %41299 = vmatpush3.bf16.msra.mxu0 %v41296_v51  ;;  %41347 = vmatpush3.bf16.msra.mxu1 %v41344_v30 }
 0x1e2   : > { %36680 = vmatprep.mubr.f32.mxu0 %v47300_v49  ;;  %36764 = vmatprep.mubr.f32.mxu1 %v47300_v49 }
 0x1e3   : > { %41301 = vmatprep.subr.bf16.mxu0 %v41300_v9  ;;  %41349 = vmatprep.subr.bf16.mxu1 %v41348_v26 }
 0x1e4   : > { %36681 = vmatmul.mubr.f32.vlgmr.msra.gmra.mrb[0].mxu0 %v47331_v48  ;;  %36765 = vmatmul.mubr.f32.vlgmr.msra.gmra.mrb[0].mxu1 %v47331_v48 }
 0x1e5   : > { %41303 = vmatpush3.bf16.msra.mxu0 %v41300_v9  ;;  %41351 = vmatpush3.bf16.msra.mxu1 %v41348_v26 }
 0x1e6   : > { %36683 = vmatprep.mubr.f32.mxu0 %v47343_v21  ;;  %36767 = vmatprep.mubr.f32.mxu1 %v47343_v21 }
 0x1e7   : > { %41305 = vmatprep.subr.bf16.mxu0 %v41304_v61  ;;  %41353 = vmatprep.subr.bf16.mxu1 %v41352_v25 }
 0x1e8   : > { %36684 = vmatmul.mubr.f32.gmra.mrb[2].mxu0 %v47364_v43  ;;  %36768 = vmatmul.mubr.f32.gmra.mrb[2].mxu1 %v47364_v43 }
 0x1e9   : > { %41307 = vmatpush3.bf16.msra.mxu0 %v41304_v61  ;;  %41355 = vmatpush3.bf16.msra.mxu1 %v41352_v25  ;;  %v13813_v61 = vand.u32 4294901760, %v47614_v41  ;;  %v13820_v25 = vand.u32 4294901760, %v47617_v60 }
 0x1ea   : > { %36694 = vmatprep.mubr.f32.mxu0 %v47334_v55  ;;  %36778 = vmatprep.mubr.f32.mxu1 %v47334_v55  ;;  %v47489_v55 = vld [vmem:[%s53407_s1 + $0x140] sm:$0xff] }
 0x1eb   : > { %41309 = vmatprep.subr.bf16.mxu0 %v47370_v23  ;;  %41357 = vmatprep.subr.bf16.mxu1 %v47399_v28  ;;  %v13065_v36 = vand.u32 4294901760, %v47489_v55 }
 0x1ec   : > { %36695 = vmatmul.mubr.f32.vlgmr.msra.gmra.mrb[0].mxu0 %v47362_v22  ;;  %36779 = vmatmul.mubr.f32.vlgmr.msra.gmra.mrb[0].mxu1 %v47362_v22  ;;  %v41316_v22 = vpack.c.bf16 %v11920_v50, %v11913_v53  ;;  %v13691_v53 = vand.u32 4294901760, %v47514_v12  ;;  %v13053_v50 = vsel %vm459_vm0, %v32105_v40, 0 }
 0x1ed   : > { %41311 = vmatpush3.bf16.msra.mxu0 %v47370_v23  ;;  %41359 = vmatpush3.bf16.msra.mxu1 %v47399_v28  ;;  %v47560_v32 = vand.u32 4294901760, %v13053_v50  ;;  %v47566_v4 = vsub.f32 %v47489_v55, %v13065_v36  ;;  %v47630_v58 = vpack.c.bf16 %v13068_v24, %v13065_v36 }
 0x1ee   : > { %36697 = vmatprep.mubr.f32.mxu0 %v47390_v44  ;;  %36781 = vmatprep.mubr.f32.mxu1 %v47390_v44  ;;  %v41368_v44 = vpack.c.bf16 %v12557_v11, %v12550_v34  ;;  %v47569_v34 = vsub.f32 %v47494_v42, %v13068_v24  ;;  %v47582_v39 = vsub.f32 %v47514_v12, %v13691_v53  ;;  %v47669_v42 = vand.u32 4294901760, %v47622_v46 }
 0x1ef   : > { %41313 = vmatprep.subr.bf16.mxu0 %v47406_v37  ;;  %41361 = vmatprep.subr.bf16.mxu1 %v47416_v29  ;;  %v47594_v13 = vsub.f32 %v13053_v50, %v47560_v32  ;;  %v13176_v7 = vand.u32 4294901760, %v47566_v4  ;;  %v47659_v9 = vpack.c.bf16 %v13691_v53, %v13688_v54  ;;  %v13821_v53 = vsub.f32 %v47617_v60, %v13820_v25 }
 0x1f0   : > { %36698 = vmatmul.mubr.f32.gmra.mrb[2].mxu0 %v47412_v1  ;;  %36782 = vmatmul.mubr.f32.gmra.mrb[2].mxu1 %v47412_v1  ;;  %v47545_v1 = vld [vmem:[%s53407_s1 + $0x158] sm:$0xff]  ;;  %v13183_v16 = vand.u32 4294901760, %v47569_v34  ;;  %v13146_v50 = vsub.f32 %v47622_v46, %v47669_v42 }
 0x1f1   : > { %41315 = vmatpush3.bf16.msra.mxu0 %v47406_v37  ;;  %41363 = vmatpush3.bf16.msra.mxu1 %v47416_v29  ;;  %v13074_v56 = vand.u32 4294901760, %v47545_v1  ;;  %v47633_v62 = vand.u32 4294901760, %v47594_v13  ;;  %v13177_v35 = vsub.f32 %v47566_v4, %v13176_v7 }
 0x1f2   : > { %36708 = vmatprep.mubr.f32.mxu0 %v47373_v38  ;;  %36792 = vmatprep.mubr.f32.mxu1 %v47373_v38  ;;  %v47540_v38 = vld [vmem:[%s53407_s1 + $0x150] sm:$0xff]  ;;  %v13184_v51 = vsub.f32 %v47569_v34, %v13183_v16  ;;  %v13147_v47 = vand.u32 4294901760, %v13146_v50 }
 0x1f3   : > { %41317 = vmatprep.subr.bf16.mxu0 %v41316_v22  ;;  %41365 = vmatprep.subr.bf16.mxu1 %v41364_v10  ;;  %v13071_v11 = vand.u32 4294901760, %v47540_v38  ;;  %v47611_v59 = vsub.f32 %v47545_v1, %v13074_v56  ;;  %v13178_v12 = vand.u32 4294901760, %v13177_v35  ;;  %v47754_v35 = vld [vmem:[%s53407_s1 + $0x168] sm:$0xff] }
 0x1f4   : > { %36709 = vmatmul.mubr.f32.vlgmr.msra.gmra.mrb[0].mxu0 %v47409_v2  ;;  %36793 = vmatmul.mubr.f32.vlgmr.msra.gmra.mrb[0].mxu1 %v47409_v2  ;;  %v47577_v2 = vsub.f32 %v47509_v63, %v13688_v54  ;;  %v13136_v63 = vsub.f32 %v47594_v13, %v47633_v62  ;;  %v13185_v40 = vand.u32 4294901760, %v13184_v51 }
 0x1f5   : > { %41319 = vmatpush3.bf16.msra.mxu0 %v41316_v22  ;;  %41367 = vmatpush3.bf16.msra.mxu1 %v41364_v10  ;;  %v47606_v52 = vsub.f32 %v47540_v38, %v13071_v11  ;;  %v13197_v26 = vand.u32 4294901760, %v47611_v59  ;;  %v47666_v55 = vpack.c.bf16 %v13074_v56, %v13071_v11  ;;  %v47672_v22 = vsub.f32 %v13062_v8, %v47624_v0 }
 0x1f6   : > { %36711 = vmatprep.mubr.f32.mxu0 %v47423_v20  ;;  %36795 = vmatprep.mubr.f32.mxu1 %v47423_v20  ;;  %v13059_v20 = vsel %vm459_vm0, %v32107_v19, 0  ;;  %v13799_v33 = vand.u32 4294901760, %v47577_v2  ;;  %v47676_v10 = vpack.c.bf16 %v13697_v3, %v13694_v15  ;;  %v13822_v19 = vand.u32 4294901760, %v13821_v53 }
 0x1f7   : > { %41321 = vmatprep.subr.bf16.mxu0 %v41320_v6  ;;  %41369 = vmatprep.subr.bf16.mxu1 %v41368_v44  ;;  %v47603_v57 = vand.u32 4294901760, %v13059_v20  ;;  %v13190_v14 = vand.u32 4294901760, %v47606_v52  ;;  %v47704_v5 = vand.u32 4294901760, %v47672_v22  ;;  %v41444_v3 = vpack.c.bf16 %v47582_v39, %v47577_v2 }
 0x1f8   : > { %36712 = vmatmul.mubr.f32.gmra.mrb[2].mxu0 %v47444_v27  ;;  %36796 = vmatmul.mubr.f32.gmra.mrb[2].mxu1 %v47444_v27  ;;  %v13806_v27 = vand.u32 4294901760, %v47582_v39  ;;  %v41448_v8 = vpack.c.bf16 %v47617_v60, %v47614_v41 }
 0x1f9   : > { %41323 = vmatpush3.bf16.msra.mxu0 %v41320_v6  ;;  %41371 = vmatpush3.bf16.msra.mxu1 %v41368_v44  ;;  %v47650_v30 = vsub.f32 %v13059_v20, %v47603_v57  ;;  %v13137_v6 = vand.u32 4294901760, %v13136_v63  ;;  %v41388_v44 = vpack.c.bf16 %v13185_v40, %v13178_v12  ;;  %v41400_v20 = vpack.c.bf16 %v47611_v59, %v47606_v52  ;;  %v32120_v12 = vld [vmem:[%s45028_s20 + $0x59] sm:$0xf] }
 0x1fa   : > { %36722 = vmatprep.mubr.f32.mxu0 %v47300_v49  ;;  %36806 = vmatprep.mubr.f32.mxu1 %v47300_v49  ;;  %v41460_v51 = vpack.c.bf16 %v13806_v27, %v13799_v33  ;;  %v14324_v50 = vsel %vm459_vm0, %v32120_v12, 0 }
 0x1fb   : > { %41325 = vmatprep.subr.bf16.mxu0 %v47370_v23  ;;  %41373 = vmatprep.subr.bf16.mxu1 %v47399_v28  ;;  %v47683_v54 = vand.u32 4294901760, %v47650_v30 }
 0x1fc   : > { %36723 = vmatmul.mubr.f32.vlgmr.msra.gmra.mrb[0].mxu0 %v47331_v48  ;;  %36807 = vmatmul.mubr.f32.vlgmr.msra.gmra.mrb[0].mxu1 %v47331_v48 }
 0x1fd   : > { %41327 = vmatpush3.bf16.msra.mxu0 %v47370_v23  ;;  %41375 = vmatpush3.bf16.msra.mxu1 %v47399_v28  ;;  %v13800_v23 = vsub.f32 %v47577_v2, %v13799_v33  ;;  %v13807_v28 = vsub.f32 %v47582_v39, %v13806_v27  ;;  %v14330_v2 = vand.u32 4294901760, %v47754_v35  ;;  %v32118_v33 = vld [vmem:[%s45028_s20 + $0x49] sm:$0xff]  ;;  %v41416_v27 = vpack.c.bf16 %v13197_v26, %v13190_v14 }
 0x1fe   : > { %36725 = vmatprep.mubr.f32.mxu0 %v47343_v21  ;;  %36809 = vmatprep.mubr.f32.mxu1 %v47343_v21 }
 0x1ff   : > { %41329 = vmatprep.subr.bf16.mxu0 %v47406_v37  ;;  %41377 = vmatprep.subr.bf16.mxu1 %v47416_v29  ;;  %v13801_v36 = vand.u32 4294901760, %v13800_v23  ;;  %v13808_v24 = vand.u32 4294901760, %v13807_v28  ;;  %v47769_v23 = vld [vmem:[%s53408_s2 + $0x160] sm:$0xff]  ;;  %v47774_v28 = vld [vmem:[%s53408_s2 + $0x168] sm:$0xff] }
 0x200   : > { %36726 = vmatmul.mubr.f32.gmra.mrb[2].mxu0 %v47364_v43  ;;  %36810 = vmatmul.mubr.f32.gmra.mrb[2].mxu1 %v47364_v43  ;;  %v14950_v39 = vand.u32 4294901760, %v47769_v23 }
 0x201   : > { %41331 = vmatpush3.bf16.msra.mxu0 %v47406_v37  ;;  %41379 = vmatpush3.bf16.msra.mxu1 %v47416_v29  ;;  %v13191_v37 = vsub.f32 %v47606_v52, %v13190_v14  ;;  %v13198_v29 = vsub.f32 %v47611_v59, %v13197_v26  ;;  %v41436_v38 = vpack.c.bf16 %v13808_v24, %v13801_v36  ;;  %v47812_v52 = vld [vmem:[%s53408_s2 + $0x170] sm:$0xff]  ;;  %v47817_v59 = vld [vmem:[%s53408_s2 + $0x178] sm:$0xff]  ;;  %v14318_v14 = vsel %vm459_vm0, %v32118_v33, 0 }
 0x202   : > { %36736 = vmatprep.mubr.f32.mxu0 %v47300_v49  ;;  %36820 = vmatprep.mubr.f32.mxu1 %v47300_v49  ;;  %v13814_v49 = vsub.f32 %v47614_v41, %v13813_v61  ;;  %v32119_v41 = vld [vmem:[%s45028_s20 + $0x51] sm:$0xff]  ;;  %v14956_v36 = vand.u32 4294901760, %v47812_v52  ;;  %v14959_v24 = vand.u32 4294901760, %v47817_v59 }
 0x203   : > { %41381 = vmatprep.subr.bf16.mxu0 %v47630_v58  ;;  %41429 = vmatprep.subr.bf16.mxu1 %v47659_v9  ;;  %v13192_v1 = vand.u32 4294901760, %v13191_v37  ;;  %v13199_v17 = vand.u32 4294901760, %v13198_v29  ;;  %v47851_v37 = vand.u32 4294901760, %v14318_v14 }
 0x204   : > { %36737 = vmatmul.mubr.f32.vlgmr.msra.gmra.mrb[0].mxu0 %v47331_v48  ;;  %36821 = vmatmul.mubr.f32.vlgmr.msra.gmra.mrb[0].mxu1 %v47331_v48  ;;  %v13156_v48 = vsub.f32 %v47650_v30, %v47683_v54  ;;  %v13815_v31 = vand.u32 4294901760, %v13814_v49 }
 0x205   : > { %41383 = vmatpush3.bf16.msra.mxu0 %v47630_v58  ;;  %41431 = vmatpush3.bf16.msra.mxu1 %v47659_v9  ;;  %v41392_v45 = vpack.c.bf16 %v13199_v17, %v13192_v1  ;;  %v47874_v1 = vsub.f32 %v47812_v52, %v14956_v36  ;;  %v47877_v17 = vsub.f32 %v47817_v59, %v14959_v24 }
 0x206   : > { %36739 = vmatprep.mubr.f32.mxu0 %v47343_v21  ;;  %36823 = vmatprep.mubr.f32.mxu1 %v47343_v21  ;;  %v13166_v21 = vsub.f32 %v47672_v22, %v47704_v5  ;;  %v13157_v11 = vand.u32 4294901760, %v13156_v48  ;;  %v41440_v56 = vpack.c.bf16 %v13822_v19, %v13815_v31  ;;  %v47882_v31 = vsub.f32 %v14318_v14, %v47851_v37 }
 0x207   : > { %41385 = vmatprep.subr.bf16.mxu0 %v47666_v55  ;;  %41433 = vmatprep.subr.bf16.mxu1 %v47676_v10  ;;  %v47884_v19 = vand.u32 4294901760, %v14324_v50 }
 0x208   : > { %36740 = vmatmul.mubr.f32.gmra.mrb[2].mxu0 %v47364_v43  ;;  %36824 = vmatmul.mubr.f32.gmra.mrb[2].mxu1 %v47364_v43  ;;  %v13167_v15 = vand.u32 4294901760, %v13166_v21  ;;  %v41396_v43 = vpack.c.bf16 %v47569_v34, %v47566_v4  ;;  %v32117_v4 = vld [vmem:[%s45028_s20 + $0x41] sm:$0xff] }
 0x209   : > { %41387 = vmatpush3.bf16.msra.mxu0 %v47666_v55  ;;  %41435 = vmatpush3.bf16.msra.mxu1 %v47676_v10 }
 0x20a   : > { %36834 = vmatprep.mubr.f32.mxu0 %v13137_v6  ;;  %36918 = vmatprep.mubr.f32.mxu1 %v13137_v6 }
 0x20b   : > { %41389 = vmatprep.subr.bf16.mxu0 %v41388_v44  ;;  %41437 = vmatprep.subr.bf16.mxu1 %v41436_v38 }
 0x20c   : > { %36835 = vmatmul.mubr.f32.vlgmr.msra.gmra.mrb[0].mxu0 %v13147_v47  ;;  %36919 = vmatmul.mubr.f32.vlgmr.msra.gmra.mrb[0].mxu1 %v13147_v47 }
 0x20d   : > { %41391 = vmatpush3.bf16.msra.mxu0 %v41388_v44  ;;  %41439 = vmatpush3.bf16.msra.mxu1 %v41436_v38 }
 0x20e   : > { %36837 = vmatprep.mubr.f32.mxu0 %v13157_v11  ;;  %36921 = vmatprep.mubr.f32.mxu1 %v13157_v11 }
 0x20f   : > { %41393 = vmatprep.subr.bf16.mxu0 %v41392_v45  ;;  %41441 = vmatprep.subr.bf16.mxu1 %v41440_v56 }
 0x210   : > { %36838 = vmatmul.mubr.f32.gmra.mrb[2].mxu0 %v13167_v15  ;;  %36922 = vmatmul.mubr.f32.gmra.mrb[2].mxu1 %v13167_v15 }
 0x211   : > { %41395 = vmatpush3.bf16.msra.mxu0 %v41392_v45  ;;  %41443 = vmatpush3.bf16.msra.mxu1 %v41440_v56 }
 0x212   : > { %36848 = vmatprep.mubr.f32.mxu0 %v47560_v32  ;;  %36932 = vmatprep.mubr.f32.mxu1 %v47560_v32 }
 0x213   : > { %41397 = vmatprep.subr.bf16.mxu0 %v41396_v43  ;;  %41445 = vmatprep.subr.bf16.mxu1 %v41444_v3 }
 0x214   : > { %36849 = vmatmul.mubr.f32.vlgmr.msra.gmra.mrb[0].mxu0 %v47591_v18  ;;  %36933 = vmatmul.mubr.f32.vlgmr.msra.gmra.mrb[0].mxu1 %v47591_v18 }
 0x215   : > { %41399 = vmatpush3.bf16.msra.mxu0 %v41396_v43  ;;  %41447 = vmatpush3.bf16.msra.mxu1 %v41444_v3 }
 0x216   : > { %36851 = vmatprep.mubr.f32.mxu0 %v47603_v57  ;;  %36935 = vmatprep.mubr.f32.mxu1 %v47603_v57 }
 0x217   : > { %41401 = vmatprep.subr.bf16.mxu0 %v41400_v20  ;;  %41449 = vmatprep.subr.bf16.mxu1 %v41448_v8 }
 0x218   : > { %36852 = vmatmul.mubr.f32.gmra.mrb[2].mxu0 %v47624_v0  ;;  %36936 = vmatmul.mubr.f32.gmra.mrb[2].mxu1 %v47624_v0 }
 0x219   : > { %41403 = vmatpush3.bf16.msra.mxu0 %v41400_v20  ;;  %41451 = vmatpush3.bf16.msra.mxu1 %v41448_v8  ;;  %v15075_v20 = vand.u32 4294901760, %v47874_v1  ;;  %v15082_v8 = vand.u32 4294901760, %v47877_v17 }
 0x21a   : > { %36862 = vmatprep.mubr.f32.mxu0 %v47594_v13  ;;  %36946 = vmatprep.mubr.f32.mxu1 %v47594_v13  ;;  %v47749_v13 = vld [vmem:[%s53407_s1 + $0x160] sm:$0xff] }
 0x21b   : > { %41405 = vmatprep.subr.bf16.mxu0 %v47630_v58  ;;  %41453 = vmatprep.subr.bf16.mxu1 %v47659_v9  ;;  %v14327_v34 = vand.u32 4294901760, %v47749_v13 }
 0x21c   : > { %36863 = vmatmul.mubr.f32.vlgmr.msra.gmra.mrb[0].mxu0 %v47622_v46  ;;  %36947 = vmatmul.mubr.f32.vlgmr.msra.gmra.mrb[0].mxu1 %v47622_v46  ;;  %v41412_v46 = vpack.c.bf16 %v13183_v16, %v13176_v7  ;;  %v14953_v7 = vand.u32 4294901760, %v47774_v28  ;;  %v14315_v16 = vsel %vm459_vm0, %v32117_v4, 0 }
 0x21d   : > { %41407 = vmatpush3.bf16.msra.mxu0 %v47630_v58  ;;  %41455 = vmatpush3.bf16.msra.mxu1 %v47659_v9  ;;  %v47820_v60 = vand.u32 4294901760, %v14315_v16  ;;  %v47826_v26 = vsub.f32 %v47749_v13, %v14327_v34  ;;  %v47890_v47 = vpack.c.bf16 %v14330_v2, %v14327_v34 }
 0x21e   : > { %36865 = vmatprep.mubr.f32.mxu0 %v47650_v30  ;;  %36949 = vmatprep.mubr.f32.mxu1 %v47650_v30  ;;  %v41464_v30 = vpack.c.bf16 %v13820_v25, %v13813_v61  ;;  %v47829_v61 = vsub.f32 %v47754_v35, %v14330_v2  ;;  %v47842_v63 = vsub.f32 %v47774_v28, %v14953_v7  ;;  %v47929_v35 = vand.u32 4294901760, %v47882_v31 }
 0x21f   : > { %41409 = vmatprep.subr.bf16.mxu0 %v47666_v55  ;;  %41457 = vmatprep.subr.bf16.mxu1 %v47676_v10  ;;  %v47854_v29 = vsub.f32 %v14315_v16, %v47820_v60  ;;  %v14438_v49 = vand.u32 4294901760, %v47826_v26  ;;  %v47919_v43 = vpack.c.bf16 %v14953_v7, %v14950_v39  ;;  %v15083_v7 = vsub.f32 %v47877_v17, %v15082_v8 }
 0x220   : > { %36866 = vmatmul.mubr.f32.gmra.mrb[2].mxu0 %v47672_v22  ;;  %36950 = vmatmul.mubr.f32.gmra.mrb[2].mxu1 %v47672_v22  ;;  %v47805_v22 = vld [vmem:[%s53407_s1 + $0x178] sm:$0xff]  ;;  %v14445_v53 = vand.u32 4294901760, %v47829_v61  ;;  %v14408_v16 = vsub.f32 %v47882_v31, %v47929_v35 }
 0x221   : > { %41411 = vmatpush3.bf16.msra.mxu0 %v47666_v55  ;;  %41459 = vmatpush3.bf16.msra.mxu1 %v47676_v10  ;;  %v14336_v40 = vand.u32 4294901760, %v47805_v22  ;;  %v47893_v21 = vand.u32 4294901760, %v47854_v29  ;;  %v14439_v11 = vsub.f32 %v47826_v26, %v14438_v49 }
 0x222   : > { %36876 = vmatprep.mubr.f32.mxu0 %v47633_v62  ;;  %36960 = vmatprep.mubr.f32.mxu1 %v47633_v62  ;;  %v47800_v62 = vld [vmem:[%s53407_s1 + $0x170] sm:$0xff]  ;;  %v14446_v45 = vsub.f32 %v47829_v61, %v14445_v53  ;;  %v14409_v14 = vand.u32 4294901760, %v14408_v16 }
 0x223   : > { %41413 = vmatprep.subr.bf16.mxu0 %v41412_v46  ;;  %41461 = vmatprep.subr.bf16.mxu1 %v41460_v51  ;;  %v14333_v25 = vand.u32 4294901760, %v47800_v62  ;;  %v47871_v48 = vsub.f32 %v47805_v22, %v14336_v40  ;;  %v14440_v28 = vand.u32 4294901760, %v14439_v11  ;;  %v48014_v11 = vld [vmem:[%s53407_s1 + $0x188] sm:$0xff] }
 0x224   : > { %36877 = vmatmul.mubr.f32.vlgmr.msra.gmra.mrb[0].mxu0 %v47669_v42  ;;  %36961 = vmatmul.mubr.f32.vlgmr.msra.gmra.mrb[0].mxu1 %v47669_v42  ;;  %v47837_v42 = vsub.f32 %v47769_v23, %v14950_v39  ;;  %v14398_v23 = vsub.f32 %v47854_v29, %v47893_v21  ;;  %v14447_v4 = vand.u32 4294901760, %v14446_v45 }
 0x225   : > { %41415 = vmatpush3.bf16.msra.mxu0 %v41412_v46  ;;  %41463 = vmatpush3.bf16.msra.mxu1 %v41460_v51  ;;  %v47866_v38 = vsub.f32 %v47800_v62, %v14333_v25  ;;  %v14459_v3 = vand.u32 4294901760, %v47871_v48  ;;  %v47926_v13 = vpack.c.bf16 %v14336_v40, %v14333_v25  ;;  %v47932_v46 = vsub.f32 %v14324_v50, %v47884_v19 }
 0x226   : > { %36879 = vmatprep.mubr.f32.mxu0 %v47683_v54  ;;  %36963 = vmatprep.mubr.f32.mxu1 %v47683_v54  ;;  %v14321_v54 = vsel %vm459_vm0, %v32119_v41, 0  ;;  %v15061_v6 = vand.u32 4294901760, %v47837_v42  ;;  %v47936_v51 = vpack.c.bf16 %v14959_v24, %v14956_v36  ;;  %v15084_v41 = vand.u32 4294901760, %v15083_v7 }
 0x227   : > { %41417 = vmatprep.subr.bf16.mxu0 %v41416_v27  ;;  %41465 = vmatprep.subr.bf16.mxu1 %v41464_v30  ;;  %v47863_v44 = vand.u32 4294901760, %v14321_v54  ;;  %v14452_v15 = vand.u32 4294901760, %v47866_v38  ;;  %v47964_v33 = vand.u32 4294901760, %v47932_v46  ;;  %v41540_v24 = vpack.c.bf16 %v47842_v63, %v47837_v42 }
 0x228   : > { %36880 = vmatmul.mubr.f32.gmra.mrb[2].mxu0 %v47704_v5  ;;  %36964 = vmatmul.mubr.f32.gmra.mrb[2].mxu1 %v47704_v5  ;;  %v15068_v5 = vand.u32 4294901760, %v47842_v63  ;;  %v41544_v50 = vpack.c.bf16 %v47877_v17, %v47874_v1 }
 0x229   : > { %41419 = vmatpush3.bf16.msra.mxu0 %v41416_v27  ;;  %41467 = vmatpush3.bf16.msra.mxu1 %v41464_v30  ;;  %v47910_v56 = vsub.f32 %v14321_v54, %v47863_v44  ;;  %v14399_v27 = vand.u32 4294901760, %v14398_v23  ;;  %v41484_v30 = vpack.c.bf16 %v14447_v4, %v14440_v28  ;;  %v41496_v54 = vpack.c.bf16 %v47871_v48, %v47866_v38  ;;  %v32132_v28 = vld [vmem:[%s45028_s20 + $0x5a] sm:$0xf] }
 0x22a   : > { %36890 = vmatprep.mubr.f32.mxu0 %v47560_v32  ;;  %36974 = vmatprep.mubr.f32.mxu1 %v47560_v32  ;;  %v41556_v45 = vpack.c.bf16 %v15068_v5, %v15061_v6  ;;  %v15586_v16 = vsel %vm459_vm0, %v32132_v28, 0 }
 0x22b   : > { %41421 = vmatprep.subr.bf16.mxu0 %v47630_v58  ;;  %41469 = vmatprep.subr.bf16.mxu1 %v47659_v9  ;;  %v47943_v39 = vand.u32 4294901760, %v47910_v56 }
 0x22c   : > { %36891 = vmatmul.mubr.f32.vlgmr.msra.gmra.mrb[0].mxu0 %v47591_v18  ;;  %36975 = vmatmul.mubr.f32.vlgmr.msra.gmra.mrb[0].mxu1 %v47591_v18 }
 0x22d   : > { %41423 = vmatpush3.bf16.msra.mxu0 %v47630_v58  ;;  %41471 = vmatpush3.bf16.msra.mxu1 %v47659_v9  ;;  %v15062_v58 = vsub.f32 %v47837_v42, %v15061_v6  ;;  %v15069_v9 = vsub.f32 %v47842_v63, %v15068_v5  ;;  %v15592_v42 = vand.u32 4294901760, %v48014_v11  ;;  %v32130_v6 = vld [vmem:[%s45028_s20 + $0x4a] sm:$0xff]  ;;  %v41512_v5 = vpack.c.bf16 %v14459_v3, %v14452_v15 }
 0x22e   : > { %36893 = vmatprep.mubr.f32.mxu0 %v47603_v57  ;;  %36977 = vmatprep.mubr.f32.mxu1 %v47603_v57 }
 0x22f   : > { %41425 = vmatprep.subr.bf16.mxu0 %v47666_v55  ;;  %41473 = vmatprep.subr.bf16.mxu1 %v47676_v10  ;;  %v15063_v34 = vand.u32 4294901760, %v15062_v58  ;;  %v15070_v2 = vand.u32 4294901760, %v15069_v9  ;;  %v48029_v58 = vld [vmem:[%s53408_s2 + $0x180] sm:$0xff]  ;;  %v48034_v9 = vld [vmem:[%s53408_s2 + $0x188] sm:$0xff] }
 0x230   : > { %36894 = vmatmul.mubr.f32.gmra.mrb[2].mxu0 %v47624_v0  ;;  %36978 = vmatmul.mubr.f32.gmra.mrb[2].mxu1 %v47624_v0  ;;  %v16212_v63 = vand.u32 4294901760, %v48029_v58 }
 0x231   : > { %41427 = vmatpush3.bf16.msra.mxu0 %v47666_v55  ;;  %41475 = vmatpush3.bf16.msra.mxu1 %v47676_v10  ;;  %v14453_v55 = vsub.f32 %v47866_v38, %v14452_v15  ;;  %v14460_v10 = vsub.f32 %v47871_v48, %v14459_v3  ;;  %v41532_v62 = vpack.c.bf16 %v15070_v2, %v15063_v34  ;;  %v48072_v38 = vld [vmem:[%s53408_s2 + $0x190] sm:$0xff]  ;;  %v48077_v48 = vld [vmem:[%s53408_s2 + $0x198] sm:$0xff]  ;;  %v15580_v15 = vsel %vm459_vm0, %v32130_v6, 0 }
 0x232   : > { %36904 = vmatprep.mubr.f32.mxu0 %v47560_v32  ;;  %36988 = vmatprep.mubr.f32.mxu1 %v47560_v32  ;;  %v15076_v32 = vsub.f32 %v47874_v1, %v15075_v20  ;;  %v32131_v1 = vld [vmem:[%s45028_s20 + $0x52] sm:$0xff]  ;;  %v16218_v34 = vand.u32 4294901760, %v48072_v38  ;;  %v16221_v2 = vand.u32 4294901760, %v48077_v48 }
 0x233   : > { %41477 = vmatprep.subr.bf16.mxu0 %v47890_v47  ;;  %41525 = vmatprep.subr.bf16.mxu1 %v47919_v43  ;;  %v14454_v22 = vand.u32 4294901760, %v14453_v55  ;;  %v14461_v52 = vand.u32 4294901760, %v14460_v10  ;;  %v48111_v55 = vand.u32 4294901760, %v15580_v15 }
 0x234   : > { %36905 = vmatmul.mubr.f32.vlgmr.msra.gmra.mrb[0].mxu0 %v47591_v18  ;;  %36989 = vmatmul.mubr.f32.vlgmr.msra.gmra.mrb[0].mxu1 %v47591_v18  ;;  %v14418_v18 = vsub.f32 %v47910_v56, %v47943_v39  ;;  %v15077_v59 = vand.u32 4294901760, %v15076_v32 }
 0x235   : > { %41479 = vmatpush3.bf16.msra.mxu0 %v47890_v47  ;;  %41527 = vmatpush3.bf16.msra.mxu1 %v47919_v43  ;;  %v41488_v12 = vpack.c.bf16 %v14461_v52, %v14454_v22  ;;  %v48134_v22 = vsub.f32 %v48072_v38, %v16218_v34  ;;  %v48137_v52 = vsub.f32 %v48077_v48, %v16221_v2 }
 0x236   : > { %36907 = vmatprep.mubr.f32.mxu0 %v47603_v57  ;;  %36991 = vmatprep.mubr.f32.mxu1 %v47603_v57  ;;  %v14428_v57 = vsub.f32 %v47932_v46, %v47964_v33  ;;  %v14419_v25 = vand.u32 4294901760, %v14418_v18  ;;  %v41536_v40 = vpack.c.bf16 %v15084_v41, %v15077_v59  ;;  %v48142_v59 = vsub.f32 %v15580_v15, %v48111_v55 }
 0x237   : > { %41481 = vmatprep.subr.bf16.mxu0 %v47926_v13  ;;  %41529 = vmatprep.subr.bf16.mxu1 %v47936_v51  ;;  %v48144_v41 = vand.u32 4294901760, %v15586_v16 }
 0x238   : > { %36908 = vmatmul.mubr.f32.gmra.mrb[2].mxu0 %v47624_v0  ;;  %36992 = vmatmul.mubr.f32.gmra.mrb[2].mxu1 %v47624_v0  ;;  %v14429_v36 = vand.u32 4294901760, %v14428_v57  ;;  %v41492_v0 = vpack.c.bf16 %v47829_v61, %v47826_v26  ;;  %v32129_v26 = vld [vmem:[%s45028_s20 + $0x42] sm:$0xff] }
 0x239   : > { %41483 = vmatpush3.bf16.msra.mxu0 %v47926_v13  ;;  %41531 = vmatpush3.bf16.msra.mxu1 %v47936_v51 }
 0x23a   : > { %37002 = vmatprep.mubr.f32.mxu0 %v14399_v27  ;;  %37086 = vmatprep.mubr.f32.mxu1 %v14399_v27 }
 0x23b   : > { %41485 = vmatprep.subr.bf16.mxu0 %v41484_v30  ;;  %41533 = vmatprep.subr.bf16.mxu1 %v41532_v62 }
 0x23c   : > { %37003 = vmatmul.mubr.f32.vlgmr.msra.gmra.mrb[0].mxu0 %v14409_v14  ;;  %37087 = vmatmul.mubr.f32.vlgmr.msra.gmra.mrb[0].mxu1 %v14409_v14 }
 0x23d   : > { %41487 = vmatpush3.bf16.msra.mxu0 %v41484_v30  ;;  %41535 = vmatpush3.bf16.msra.mxu1 %v41532_v62 }
 0x23e   : > { %37005 = vmatprep.mubr.f32.mxu0 %v14419_v25  ;;  %37089 = vmatprep.mubr.f32.mxu1 %v14419_v25 }
 0x23f   : > { %41489 = vmatprep.subr.bf16.mxu0 %v41488_v12  ;;  %41537 = vmatprep.subr.bf16.mxu1 %v41536_v40 }
 0x240   : > { %37006 = vmatmul.mubr.f32.gmra.mrb[2].mxu0 %v14429_v36  ;;  %37090 = vmatmul.mubr.f32.gmra.mrb[2].mxu1 %v14429_v36 }
 0x241   : > { %41491 = vmatpush3.bf16.msra.mxu0 %v41488_v12  ;;  %41539 = vmatpush3.bf16.msra.mxu1 %v41536_v40 }
 0x242   : > { %37016 = vmatprep.mubr.f32.mxu0 %v47820_v60  ;;  %37100 = vmatprep.mubr.f32.mxu1 %v47820_v60 }
 0x243   : > { %41493 = vmatprep.subr.bf16.mxu0 %v41492_v0  ;;  %41541 = vmatprep.subr.bf16.mxu1 %v41540_v24 }
 0x244   : > { %37017 = vmatmul.mubr.f32.vlgmr.msra.gmra.mrb[0].mxu0 %v47851_v37  ;;  %37101 = vmatmul.mubr.f32.vlgmr.msra.gmra.mrb[0].mxu1 %v47851_v37 }
 0x245   : > { %41495 = vmatpush3.bf16.msra.mxu0 %v41492_v0  ;;  %41543 = vmatpush3.bf16.msra.mxu1 %v41540_v24 }
 0x246   : > { %37019 = vmatprep.mubr.f32.mxu0 %v47863_v44  ;;  %37103 = vmatprep.mubr.f32.mxu1 %v47863_v44 }
 0x247   : > { %41497 = vmatprep.subr.bf16.mxu0 %v41496_v54  ;;  %41545 = vmatprep.subr.bf16.mxu1 %v41544_v50 }
 0x248   : > { %37020 = vmatmul.mubr.f32.gmra.mrb[2].mxu0 %v47884_v19  ;;  %37104 = vmatmul.mubr.f32.gmra.mrb[2].mxu1 %v47884_v19 }
 0x249   : > { %41499 = vmatpush3.bf16.msra.mxu0 %v41496_v54  ;;  %41547 = vmatpush3.bf16.msra.mxu1 %v41544_v50  ;;  %v16337_v54 = vand.u32 4294901760, %v48134_v22  ;;  %v16344_v50 = vand.u32 4294901760, %v48137_v52 }
 0x24a   : > { %37030 = vmatprep.mubr.f32.mxu0 %v47854_v29  ;;  %37114 = vmatprep.mubr.f32.mxu1 %v47854_v29  ;;  %v48009_v29 = vld [vmem:[%s53407_s1 + $0x180] sm:$0xff] }
 0x24b   : > { %41501 = vmatprep.subr.bf16.mxu0 %v47890_v47  ;;  %41549 = vmatprep.subr.bf16.mxu1 %v47919_v43  ;;  %v15589_v61 = vand.u32 4294901760, %v48009_v29 }
 0x24c   : > { %37031 = vmatmul.mubr.f32.vlgmr.msra.gmra.mrb[0].mxu0 %v47882_v31  ;;  %37115 = vmatmul.mubr.f32.vlgmr.msra.gmra.mrb[0].mxu1 %v47882_v31  ;;  %v41508_v31 = vpack.c.bf16 %v14445_v53, %v14438_v49  ;;  %v16215_v49 = vand.u32 4294901760, %v48034_v9  ;;  %v15577_v53 = vsel %vm459_vm0, %v32129_v26, 0 }
 0x24d   : > { %41503 = vmatpush3.bf16.msra.mxu0 %v47890_v47  ;;  %41551 = vmatpush3.bf16.msra.mxu1 %v47919_v43  ;;  %v48080_v17 = vand.u32 4294901760, %v15577_v53  ;;  %v48086_v3 = vsub.f32 %v48009_v29, %v15589_v61  ;;  %v48150_v14 = vpack.c.bf16 %v15592_v42, %v15589_v61 }
 0x24e   : > { %37033 = vmatprep.mubr.f32.mxu0 %v47910_v56  ;;  %37117 = vmatprep.mubr.f32.mxu1 %v47910_v56  ;;  %v41560_v56 = vpack.c.bf16 %v15082_v8, %v15075_v20  ;;  %v48089_v20 = vsub.f32 %v48014_v11, %v15592_v42  ;;  %v48102_v23 = vsub.f32 %v48034_v9, %v16215_v49  ;;  %v48189_v11 = vand.u32 4294901760, %v48142_v59 }
 0x24f   : > { %41505 = vmatprep.subr.bf16.mxu0 %v47926_v13  ;;  %41553 = vmatprep.subr.bf16.mxu1 %v47936_v51  ;;  %v48114_v10 = vsub.f32 %v15577_v53, %v48080_v17  ;;  %v15700_v32 = vand.u32 4294901760, %v48086_v3  ;;  %v48179_v0 = vpack.c.bf16 %v16215_v49, %v16212_v63  ;;  %v16345_v49 = vsub.f32 %v48137_v52, %v16344_v50 }
 0x250   : > { %37034 = vmatmul.mubr.f32.gmra.mrb[2].mxu0 %v47932_v46  ;;  %37118 = vmatmul.mubr.f32.gmra.mrb[2].mxu1 %v47932_v46  ;;  %v48065_v46 = vld [vmem:[%s53407_s1 + $0x198] sm:$0xff]  ;;  %v15707_v7 = vand.u32 4294901760, %v48089_v20  ;;  %v15670_v53 = vsub.f32 %v48142_v59, %v48189_v11 }
 0x251   : > { %41507 = vmatpush3.bf16.msra.mxu0 %v47926_v13  ;;  %41555 = vmatpush3.bf16.msra.mxu1 %v47936_v51  ;;  %v15598_v4 = vand.u32 4294901760, %v48065_v46  ;;  %v48153_v57 = vand.u32 4294901760, %v48114_v10  ;;  %v15701_v25 = vsub.f32 %v48086_v3, %v15700_v32 }
 0x252   : > { %37044 = vmatprep.mubr.f32.mxu0 %v47893_v21  ;;  %37128 = vmatprep.mubr.f32.mxu1 %v47893_v21  ;;  %v48060_v21 = vld [vmem:[%s53407_s1 + $0x190] sm:$0xff]  ;;  %v15708_v12 = vsub.f32 %v48089_v20, %v15707_v7  ;;  %v15671_v15 = vand.u32 4294901760, %v15670_v53 }
 0x253   : > { %41509 = vmatprep.subr.bf16.mxu0 %v41508_v31  ;;  %41557 = vmatprep.subr.bf16.mxu1 %v41556_v45  ;;  %v15595_v8 = vand.u32 4294901760, %v48060_v21  ;;  %v48131_v18 = vsub.f32 %v48065_v46, %v15598_v4  ;;  %v15702_v9 = vand.u32 4294901760, %v15701_v25  ;;  %v48274_v25 = vld [vmem:[%s53407_s1 + $0x1a8] sm:$0xff] }
 0x254   : > { %37045 = vmatmul.mubr.f32.vlgmr.msra.gmra.mrb[0].mxu0 %v47929_v35  ;;  %37129 = vmatmul.mubr.f32.vlgmr.msra.gmra.mrb[0].mxu1 %v47929_v35  ;;  %v48097_v35 = vsub.f32 %v48029_v58, %v16212_v63  ;;  %v15660_v58 = vsub.f32 %v48114_v10, %v48153_v57  ;;  %v15709_v26 = vand.u32 4294901760, %v15708_v12 }
 0x255   : > { %41511 = vmatpush3.bf16.msra.mxu0 %v41508_v31  ;;  %41559 = vmatpush3.bf16.msra.mxu1 %v41556_v45  ;;  %v48126_v62 = vsub.f32 %v48060_v21, %v15595_v8  ;;  %v15721_v24 = vand.u32 4294901760, %v48131_v18  ;;  %v48186_v29 = vpack.c.bf16 %v15598_v4, %v15595_v8  ;;  %v48192_v31 = vsub.f32 %v15586_v16, %v48144_v41 }
 0x256   : > { %37047 = vmatprep.mubr.f32.mxu0 %v47943_v39  ;;  %37131 = vmatprep.mubr.f32.mxu1 %v47943_v39  ;;  %v15583_v39 = vsel %vm459_vm0, %v32131_v1, 0  ;;  %v16323_v27 = vand.u32 4294901760, %v48097_v35  ;;  %v48196_v45 = vpack.c.bf16 %v16221_v2, %v16218_v34  ;;  %v16346_v1 = vand.u32 4294901760, %v16345_v49 }
 0x257   : > { %41513 = vmatprep.subr.bf16.mxu0 %v41512_v5  ;;  %41561 = vmatprep.subr.bf16.mxu1 %v41560_v56  ;;  %v48123_v30 = vand.u32 4294901760, %v15583_v39  ;;  %v15714_v36 = vand.u32 4294901760, %v48126_v62  ;;  %v48224_v6 = vand.u32 4294901760, %v48192_v31  ;;  %v41636_v2 = vpack.c.bf16 %v48102_v23, %v48097_v35 }
 0x258   : > { %37048 = vmatmul.mubr.f32.gmra.mrb[2].mxu0 %v47964_v33  ;;  %37132 = vmatmul.mubr.f32.gmra.mrb[2].mxu1 %v47964_v33  ;;  %v16330_v33 = vand.u32 4294901760, %v48102_v23  ;;  %v41640_v16 = vpack.c.bf16 %v48137_v52, %v48134_v22 }
 0x259   : > { %41515 = vmatpush3.bf16.msra.mxu0 %v41512_v5  ;;  %41563 = vmatpush3.bf16.msra.mxu1 %v41560_v56  ;;  %v48170_v40 = vsub.f32 %v15583_v39, %v48123_v30  ;;  %v15661_v5 = vand.u32 4294901760, %v15660_v58  ;;  %v41580_v56 = vpack.c.bf16 %v15709_v26, %v15702_v9  ;;  %v41592_v39 = vpack.c.bf16 %v48131_v18, %v48126_v62  ;;  %v32144_v9 = vld [vmem:[%s45028_s20 + $0x5b] sm:$0xf] }
 0x25a   : > { %37058 = vmatprep.mubr.f32.mxu0 %v47820_v60  ;;  %37142 = vmatprep.mubr.f32.mxu1 %v47820_v60  ;;  %v41652_v12 = vpack.c.bf16 %v16330_v33, %v16323_v27  ;;  %v16848_v53 = vsel %vm459_vm0, %v32144_v9, 0 }
 0x25b   : > { %41517 = vmatprep.subr.bf16.mxu0 %v47890_v47  ;;  %41565 = vmatprep.subr.bf16.mxu1 %v47919_v43  ;;  %v48203_v63 = vand.u32 4294901760, %v48170_v40 }
 0x25c   : > { %37059 = vmatmul.mubr.f32.vlgmr.msra.gmra.mrb[0].mxu0 %v47851_v37  ;;  %37143 = vmatmul.mubr.f32.vlgmr.msra.gmra.mrb[0].mxu1 %v47851_v37 }
 0x25d   : > { %41519 = vmatpush3.bf16.msra.mxu0 %v47890_v47  ;;  %41567 = vmatpush3.bf16.msra.mxu1 %v47919_v43  ;;  %v16324_v47 = vsub.f32 %v48097_v35, %v16323_v27  ;;  %v16331_v43 = vsub.f32 %v48102_v23, %v16330_v33  ;;  %v16854_v35 = vand.u32 4294901760, %v48274_v25  ;;  %v32142_v27 = vld [vmem:[%s45028_s20 + $0x4b] sm:$0xff]  ;;  %v41608_v33 = vpack.c.bf16 %v15721_v24, %v15714_v36 }
 0x25e   : > { %37061 = vmatprep.mubr.f32.mxu0 %v47863_v44  ;;  %37145 = vmatprep.mubr.f32.mxu1 %v47863_v44 }
 0x25f   : > { %41521 = vmatprep.subr.bf16.mxu0 %v47926_v13  ;;  %41569 = vmatprep.subr.bf16.mxu1 %v47936_v51  ;;  %v16325_v61 = vand.u32 4294901760, %v16324_v47  ;;  %v16332_v42 = vand.u32 4294901760, %v16331_v43  ;;  %v48289_v47 = vld [vmem:[%s53408_s2 + $0x1a0] sm:$0xff]  ;;  %v48294_v43 = vld [vmem:[%s53408_s2 + $0x1a8] sm:$0xff] }
 0x260   : > { %37062 = vmatmul.mubr.f32.gmra.mrb[2].mxu0 %v47884_v19  ;;  %37146 = vmatmul.mubr.f32.gmra.mrb[2].mxu1 %v47884_v19  ;;  %v17474_v23 = vand.u32 4294901760, %v48289_v47 }
 0x261   : > { %41523 = vmatpush3.bf16.msra.mxu0 %v47926_v13  ;;  %41571 = vmatpush3.bf16.msra.mxu1 %v47936_v51  ;;  %v15715_v13 = vsub.f32 %v48126_v62, %v15714_v36  ;;  %v15722_v51 = vsub.f32 %v48131_v18, %v15721_v24  ;;  %v41628_v21 = vpack.c.bf16 %v16332_v42, %v16325_v61  ;;  %v48332_v62 = vld [vmem:[%s53408_s2 + $0x1b0] sm:$0xff]  ;;  %v48337_v18 = vld [vmem:[%s53408_s2 + $0x1b8] sm:$0xff]  ;;  %v16842_v36 = vsel %vm459_vm0, %v32142_v27, 0 }
 0x262   : > { %37072 = vmatprep.mubr.f32.mxu0 %v47820_v60  ;;  %37156 = vmatprep.mubr.f32.mxu1 %v47820_v60  ;;  %v16338_v60 = vsub.f32 %v48134_v22, %v16337_v54  ;;  %v32143_v22 = vld [vmem:[%s45028_s20 + $0x53] sm:$0xff]  ;;  %v17480_v61 = vand.u32 4294901760, %v48332_v62  ;;  %v17483_v42 = vand.u32 4294901760, %v48337_v18 }
 0x263   : > { %41573 = vmatprep.subr.bf16.mxu0 %v48150_v14  ;;  %41621 = vmatprep.subr.bf16.mxu1 %v48179_v0  ;;  %v15716_v46 = vand.u32 4294901760, %v15715_v13  ;;  %v15723_v38 = vand.u32 4294901760, %v15722_v51  ;;  %v48371_v13 = vand.u32 4294901760, %v16842_v36 }
 0x264   : > { %37073 = vmatmul.mubr.f32.vlgmr.msra.gmra.mrb[0].mxu0 %v47851_v37  ;;  %37157 = vmatmul.mubr.f32.vlgmr.msra.gmra.mrb[0].mxu1 %v47851_v37  ;;  %v15680_v37 = vsub.f32 %v48170_v40, %v48203_v63  ;;  %v16339_v48 = vand.u32 4294901760, %v16338_v60 }
 0x265   : > { %41575 = vmatpush3.bf16.msra.mxu0 %v48150_v14  ;;  %41623 = vmatpush3.bf16.msra.mxu1 %v48179_v0  ;;  %v41584_v28 = vpack.c.bf16 %v15723_v38, %v15716_v46  ;;  %v48394_v46 = vsub.f32 %v48332_v62, %v17480_v61  ;;  %v48397_v38 = vsub.f32 %v48337_v18, %v17483_v42 }
 0x266   : > { %37075 = vmatprep.mubr.f32.mxu0 %v47863_v44  ;;  %37159 = vmatprep.mubr.f32.mxu1 %v47863_v44  ;;  %v15690_v44 = vsub.f32 %v48192_v31, %v48224_v6  ;;  %v15681_v8 = vand.u32 4294901760, %v15680_v37  ;;  %v41632_v4 = vpack.c.bf16 %v16346_v1, %v16339_v48  ;;  %v48402_v48 = vsub.f32 %v16842_v36, %v48371_v13 }
 0x267   : > { %41577 = vmatprep.subr.bf16.mxu0 %v48186_v29  ;;  %41625 = vmatprep.subr.bf16.mxu1 %v48196_v45  ;;  %v48404_v1 = vand.u32 4294901760, %v16848_v53 }
 0x268   : > { %37076 = vmatmul.mubr.f32.gmra.mrb[2].mxu0 %v47884_v19  ;;  %37160 = vmatmul.mubr.f32.gmra.mrb[2].mxu1 %v47884_v19  ;;  %v15691_v34 = vand.u32 4294901760, %v15690_v44  ;;  %v41588_v19 = vpack.c.bf16 %v48089_v20, %v48086_v3  ;;  %v32141_v3 = vld [vmem:[%s45028_s20 + $0x43] sm:$0xff] }
 0x269   : > { %41579 = vmatpush3.bf16.msra.mxu0 %v48186_v29  ;;  %41627 = vmatpush3.bf16.msra.mxu1 %v48196_v45 }
 0x26a   : > { %37170 = vmatprep.mubr.f32.mxu0 %v15661_v5  ;;  %37254 = vmatprep.mubr.f32.mxu1 %v15661_v5 }
 0x26b   : > { %41581 = vmatprep.subr.bf16.mxu0 %v41580_v56  ;;  %41629 = vmatprep.subr.bf16.mxu1 %v41628_v21 }
 0x26c   : > { %37171 = vmatmul.mubr.f32.vlgmr.msra.gmra.mrb[0].mxu0 %v15671_v15  ;;  %37255 = vmatmul.mubr.f32.vlgmr.msra.gmra.mrb[0].mxu1 %v15671_v15 }
 0x26d   : > { %41583 = vmatpush3.bf16.msra.mxu0 %v41580_v56  ;;  %41631 = vmatpush3.bf16.msra.mxu1 %v41628_v21 }
 0x26e   : > { %37173 = vmatprep.mubr.f32.mxu0 %v15681_v8  ;;  %37257 = vmatprep.mubr.f32.mxu1 %v15681_v8 }
 0x26f   : > { %41585 = vmatprep.subr.bf16.mxu0 %v41584_v28  ;;  %41633 = vmatprep.subr.bf16.mxu1 %v41632_v4 }
 0x270   : > { %37174 = vmatmul.mubr.f32.gmra.mrb[2].mxu0 %v15691_v34  ;;  %37258 = vmatmul.mubr.f32.gmra.mrb[2].mxu1 %v15691_v34 }
 0x271   : > { %41587 = vmatpush3.bf16.msra.mxu0 %v41584_v28  ;;  %41635 = vmatpush3.bf16.msra.mxu1 %v41632_v4 }
 0x272   : > { %37184 = vmatprep.mubr.f32.mxu0 %v48080_v17  ;;  %37268 = vmatprep.mubr.f32.mxu1 %v48080_v17 }
 0x273   : > { %41589 = vmatprep.subr.bf16.mxu0 %v41588_v19  ;;  %41637 = vmatprep.subr.bf16.mxu1 %v41636_v2 }
 0x274   : > { %37185 = vmatmul.mubr.f32.vlgmr.msra.gmra.mrb[0].mxu0 %v48111_v55  ;;  %37269 = vmatmul.mubr.f32.vlgmr.msra.gmra.mrb[0].mxu1 %v48111_v55 }
 0x275   : > { %41591 = vmatpush3.bf16.msra.mxu0 %v41588_v19  ;;  %41639 = vmatpush3.bf16.msra.mxu1 %v41636_v2 }
 0x276   : > { %37187 = vmatprep.mubr.f32.mxu0 %v48123_v30  ;;  %37271 = vmatprep.mubr.f32.mxu1 %v48123_v30 }
 0x277   : > { %41593 = vmatprep.subr.bf16.mxu0 %v41592_v39  ;;  %41641 = vmatprep.subr.bf16.mxu1 %v41640_v16 }
 0x278   : > { %37188 = vmatmul.mubr.f32.gmra.mrb[2].mxu0 %v48144_v41  ;;  %37272 = vmatmul.mubr.f32.gmra.mrb[2].mxu1 %v48144_v41 }
 0x279   : > { %41595 = vmatpush3.bf16.msra.mxu0 %v41592_v39  ;;  %41643 = vmatpush3.bf16.msra.mxu1 %v41640_v16  ;;  %v17599_v39 = vand.u32 4294901760, %v48394_v46  ;;  %v17606_v16 = vand.u32 4294901760, %v48397_v38 }
 0x27a   : > { %37198 = vmatprep.mubr.f32.mxu0 %v48114_v10  ;;  %37282 = vmatprep.mubr.f32.mxu1 %v48114_v10  ;;  %v48269_v10 = vld [vmem:[%s53407_s1 + $0x1a0] sm:$0xff] }
 0x27b   : > { %41597 = vmatprep.subr.bf16.mxu0 %v48150_v14  ;;  %41645 = vmatprep.subr.bf16.mxu1 %v48179_v0  ;;  %v16851_v20 = vand.u32 4294901760, %v48269_v10 }
 0x27c   : > { %37199 = vmatmul.mubr.f32.vlgmr.msra.gmra.mrb[0].mxu0 %v48142_v59  ;;  %37283 = vmatmul.mubr.f32.vlgmr.msra.gmra.mrb[0].mxu1 %v48142_v59  ;;  %v41604_v59 = vpack.c.bf16 %v15707_v7, %v15700_v32  ;;  %v17477_v32 = vand.u32 4294901760, %v48294_v43  ;;  %v16839_v7 = vsel %vm459_vm0, %v32141_v3, 0 }
 0x27d   : > { %41599 = vmatpush3.bf16.msra.mxu0 %v48150_v14  ;;  %41647 = vmatpush3.bf16.msra.mxu1 %v48179_v0  ;;  %v48340_v52 = vand.u32 4294901760, %v16839_v7  ;;  %v48346_v24 = vsub.f32 %v48269_v10, %v16851_v20  ;;  %v48410_v15 = vpack.c.bf16 %v16854_v35, %v16851_v20 }
 0x27e   : > { %37201 = vmatprep.mubr.f32.mxu0 %v48170_v40  ;;  %37285 = vmatprep.mubr.f32.mxu1 %v48170_v40  ;;  %v41656_v40 = vpack.c.bf16 %v16344_v50, %v16337_v54  ;;  %v48349_v54 = vsub.f32 %v48274_v25, %v16854_v35  ;;  %v48362_v58 = vsub.f32 %v48294_v43, %v17477_v32  ;;  %v48449_v25 = vand.u32 4294901760, %v48402_v48 }
 0x27f   : > { %41601 = vmatprep.subr.bf16.mxu0 %v48186_v29  ;;  %41649 = vmatprep.subr.bf16.mxu1 %v48196_v45  ;;  %v48374_v51 = vsub.f32 %v16839_v7, %v48340_v52  ;;  %v16962_v60 = vand.u32 4294901760, %v48346_v24  ;;  %v48439_v19 = vpack.c.bf16 %v17477_v32, %v17474_v23  ;;  %v17607_v32 = vsub.f32 %v48397_v38, %v17606_v16 }
 0x280   : > { %37202 = vmatmul.mubr.f32.gmra.mrb[2].mxu0 %v48192_v31  ;;  %37286 = vmatmul.mubr.f32.gmra.mrb[2].mxu1 %v48192_v31  ;;  %v48325_v31 = vld [vmem:[%s53407_s1 + $0x1b8] sm:$0xff]  ;;  %v16969_v49 = vand.u32 4294901760, %v48349_v54  ;;  %v16932_v7 = vsub.f32 %v48402_v48, %v48449_v25 }
 0x281   : > { %41603 = vmatpush3.bf16.msra.mxu0 %v48186_v29  ;;  %41651 = vmatpush3.bf16.msra.mxu1 %v48196_v45  ;;  %v16860_v26 = vand.u32 4294901760, %v48325_v31  ;;  %v48413_v44 = vand.u32 4294901760, %v48374_v51  ;;  %v16963_v8 = vsub.f32 %v48346_v24, %v16962_v60 }
 0x282   : > { %37212 = vmatprep.mubr.f32.mxu0 %v48153_v57  ;;  %37296 = vmatprep.mubr.f32.mxu1 %v48153_v57  ;;  %v48320_v57 = vld [vmem:[%s53407_s1 + $0x1b0] sm:$0xff]  ;;  %v16970_v28 = vsub.f32 %v48349_v54, %v16969_v49  ;;  %v16933_v36 = vand.u32 4294901760, %v16932_v7 }
 0x283   : > { %41605 = vmatprep.subr.bf16.mxu0 %v41604_v59  ;;  %41653 = vmatprep.subr.bf16.mxu1 %v41652_v12  ;;  %v16857_v50 = vand.u32 4294901760, %v48320_v57  ;;  %v48391_v37 = vsub.f32 %v48325_v31, %v16860_v26  ;;  %v16964_v43 = vand.u32 4294901760, %v16963_v8  ;;  %v48534_v8 = vld [vmem:[%s53407_s1 + $0x1c8] sm:$0xff] }
 0x284   : > { %37213 = vmatmul.mubr.f32.vlgmr.msra.gmra.mrb[0].mxu0 %v48189_v11  ;;  %37297 = vmatmul.mubr.f32.vlgmr.msra.gmra.mrb[0].mxu1 %v48189_v11  ;;  %v48357_v11 = vsub.f32 %v48289_v47, %v17474_v23  ;;  %v16922_v47 = vsub.f32 %v48374_v51, %v48413_v44  ;;  %v16971_v3 = vand.u32 4294901760, %v16970_v28 }
 0x285   : > { %41607 = vmatpush3.bf16.msra.mxu0 %v41604_v59  ;;  %41655 = vmatpush3.bf16.msra.mxu1 %v41652_v12  ;;  %v48386_v21 = vsub.f32 %v48320_v57, %v16857_v50  ;;  %v16983_v2 = vand.u32 4294901760, %v48391_v37  ;;  %v48446_v10 = vpack.c.bf16 %v16860_v26, %v16857_v50  ;;  %v48452_v59 = vsub.f32 %v16848_v53, %v48404_v1 }
 0x286   : > { %37215 = vmatprep.mubr.f32.mxu0 %v48203_v63  ;;  %37299 = vmatprep.mubr.f32.mxu1 %v48203_v63  ;;  %v16845_v63 = vsel %vm459_vm0, %v32143_v22, 0  ;;  %v17585_v5 = vand.u32 4294901760, %v48357_v11  ;;  %v48456_v12 = vpack.c.bf16 %v17483_v42, %v17480_v61  ;;  %v17608_v22 = vand.u32 4294901760, %v17607_v32 }
 0x287   : > { %41609 = vmatprep.subr.bf16.mxu0 %v41608_v33  ;;  %41657 = vmatprep.subr.bf16.mxu1 %v41656_v40  ;;  %v48383_v56 = vand.u32 4294901760, %v16845_v63  ;;  %v16976_v34 = vand.u32 4294901760, %v48386_v21  ;;  %v48484_v27 = vand.u32 4294901760, %v48452_v59  ;;  %v41732_v42 = vpack.c.bf16 %v48362_v58, %v48357_v11 }
 0x288   : > { %37216 = vmatmul.mubr.f32.gmra.mrb[2].mxu0 %v48224_v6  ;;  %37300 = vmatmul.mubr.f32.gmra.mrb[2].mxu1 %v48224_v6  ;;  %v17592_v6 = vand.u32 4294901760, %v48362_v58  ;;  %v41736_v53 = vpack.c.bf16 %v48397_v38, %v48394_v46 }
 0x289   : > { %41611 = vmatpush3.bf16.msra.mxu0 %v41608_v33  ;;  %41659 = vmatpush3.bf16.msra.mxu1 %v41656_v40  ;;  %v48430_v4 = vsub.f32 %v16845_v63, %v48383_v56  ;;  %v16923_v33 = vand.u32 4294901760, %v16922_v47  ;;  %v41676_v40 = vpack.c.bf16 %v16971_v3, %v16964_v43  ;;  %v41688_v63 = vpack.c.bf16 %v48391_v37, %v48386_v21  ;;  %v32156_v43 = vld [vmem:[%s45028_s20 + $0x5c] sm:$0xf] }
 0x28a   : > { %37226 = vmatprep.mubr.f32.mxu0 %v48080_v17  ;;  %37310 = vmatprep.mubr.f32.mxu1 %v48080_v17  ;;  %v41748_v28 = vpack.c.bf16 %v17592_v6, %v17585_v5  ;;  %v18110_v7 = vsel %vm459_vm0, %v32156_v43, 0 }
 0x28b   : > { %41613 = vmatprep.subr.bf16.mxu0 %v48150_v14  ;;  %41661 = vmatprep.subr.bf16.mxu1 %v48179_v0  ;;  %v48463_v23 = vand.u32 4294901760, %v48430_v4 }
 0x28c   : > { %37227 = vmatmul.mubr.f32.vlgmr.msra.gmra.mrb[0].mxu0 %v48111_v55  ;;  %37311 = vmatmul.mubr.f32.vlgmr.msra.gmra.mrb[0].mxu1 %v48111_v55 }
 0x28d   : > { %41615 = vmatpush3.bf16.msra.mxu0 %v48150_v14  ;;  %41663 = vmatpush3.bf16.msra.mxu1 %v48179_v0  ;;  %v17586_v14 = vsub.f32 %v48357_v11, %v17585_v5  ;;  %v17593_v0 = vsub.f32 %v48362_v58, %v17592_v6  ;;  %v18116_v11 = vand.u32 4294901760, %v48534_v8  ;;  %v32154_v5 = vld [vmem:[%s45028_s20 + $0x4c] sm:$0xff]  ;;  %v41704_v6 = vpack.c.bf16 %v16983_v2, %v16976_v34 }
 0x28e   : > { %37229 = vmatprep.mubr.f32.mxu0 %v48123_v30  ;;  %37313 = vmatprep.mubr.f32.mxu1 %v48123_v30 }
 0x28f   : > { %41617 = vmatprep.subr.bf16.mxu0 %v48186_v29  ;;  %41665 = vmatprep.subr.bf16.mxu1 %v48196_v45  ;;  %v17587_v20 = vand.u32 4294901760, %v17586_v14  ;;  %v17594_v35 = vand.u32 4294901760, %v17593_v0  ;;  %v48549_v14 = vld [vmem:[%s53408_s2 + $0x1c0] sm:$0xff]  ;;  %v48554_v0 = vld [vmem:[%s53408_s2 + $0x1c8] sm:$0xff] }
 0x290   : > { %37230 = vmatmul.mubr.f32.gmra.mrb[2].mxu0 %v48144_v41  ;;  %37314 = vmatmul.mubr.f32.gmra.mrb[2].mxu1 %v48144_v41  ;;  %v18736_v58 = vand.u32 4294901760, %v48549_v14 }
 0x291   : > { %41619 = vmatpush3.bf16.msra.mxu0 %v48186_v29  ;;  %41667 = vmatpush3.bf16.msra.mxu1 %v48196_v45  ;;  %v16977_v29 = vsub.f32 %v48386_v21, %v16976_v34  ;;  %v16984_v45 = vsub.f32 %v48391_v37, %v16983_v2  ;;  %v41724_v57 = vpack.c.bf16 %v17594_v35, %v17587_v20  ;;  %v48592_v21 = vld [vmem:[%s53408_s2 + $0x1d0] sm:$0xff]  ;;  %v48597_v37 = vld [vmem:[%s53408_s2 + $0x1d8] sm:$0xff]  ;;  %v18104_v34 = vsel %vm459_vm0, %v32154_v5, 0 }
 0x292   : > { %37240 = vmatprep.mubr.f32.mxu0 %v48080_v17  ;;  %37324 = vmatprep.mubr.f32.mxu1 %v48080_v17  ;;  %v17600_v17 = vsub.f32 %v48394_v46, %v17599_v39  ;;  %v32155_v46 = vld [vmem:[%s45028_s20 + $0x54] sm:$0xff]  ;;  %v18742_v20 = vand.u32 4294901760, %v48592_v21  ;;  %v18745_v35 = vand.u32 4294901760, %v48597_v37 }
 0x293   : > { %41669 = vmatprep.subr.bf16.mxu0 %v48410_v15  ;;  %41717 = vmatprep.subr.bf16.mxu1 %v48439_v19  ;;  %v16978_v31 = vand.u32 4294901760, %v16977_v29  ;;  %v16985_v62 = vand.u32 4294901760, %v16984_v45  ;;  %v48631_v29 = vand.u32 4294901760, %v18104_v34 }
 0x294   : > { %37241 = vmatmul.mubr.f32.vlgmr.msra.gmra.mrb[0].mxu0 %v48111_v55  ;;  %37325 = vmatmul.mubr.f32.vlgmr.msra.gmra.mrb[0].mxu1 %v48111_v55  ;;  %v16942_v55 = vsub.f32 %v48430_v4, %v48463_v23  ;;  %v17601_v18 = vand.u32 4294901760, %v17600_v17 }
 0x295   : > { %41671 = vmatpush3.bf16.msra.mxu0 %v48410_v15  ;;  %41719 = vmatpush3.bf16.msra.mxu1 %v48439_v19  ;;  %v41680_v9 = vpack.c.bf16 %v16985_v62, %v16978_v31  ;;  %v48654_v31 = vsub.f32 %v48592_v21, %v18742_v20  ;;  %v48657_v62 = vsub.f32 %v48597_v37, %v18745_v35 }
 0x296   : > { %37243 = vmatprep.mubr.f32.mxu0 %v48123_v30  ;;  %37327 = vmatprep.mubr.f32.mxu1 %v48123_v30  ;;  %v16952_v30 = vsub.f32 %v48452_v59, %v48484_v27  ;;  %v16943_v50 = vand.u32 4294901760, %v16942_v55  ;;  %v41728_v26 = vpack.c.bf16 %v17608_v22, %v17601_v18  ;;  %v48662_v18 = vsub.f32 %v18104_v34, %v48631_v29 }
 0x297   : > { %41673 = vmatprep.subr.bf16.mxu0 %v48446_v10  ;;  %41721 = vmatprep.subr.bf16.mxu1 %v48456_v12  ;;  %v48664_v22 = vand.u32 4294901760, %v18110_v7 }
 0x298   : > { %37244 = vmatmul.mubr.f32.gmra.mrb[2].mxu0 %v48144_v41  ;;  %37328 = vmatmul.mubr.f32.gmra.mrb[2].mxu1 %v48144_v41  ;;  %v16953_v61 = vand.u32 4294901760, %v16952_v30  ;;  %v41684_v41 = vpack.c.bf16 %v48349_v54, %v48346_v24  ;;  %v32153_v24 = vld [vmem:[%s45028_s20 + $0x44] sm:$0xff]  ;;  %s431_s20 = sand.u32 1, %s44845_s26  }
 0x299   : > { %41675 = vmatpush3.bf16.msra.mxu0 %v48446_v10  ;;  %41723 = vmatpush3.bf16.msra.mxu1 %v48456_v12  ;;  %s432_s23 = scalar_lea.vmem [#allocation4], %s431_s20  ;;  %s31941_s27 = scalar_lea.sflag [#allocation5], %s431_s20 }
 0x29a   : > { %37338 = vmatprep.mubr.f32.mxu0 %v16923_v33  ;;  %37422 = vmatprep.mubr.f32.mxu1 %v16923_v33  ;;  %s31953_s24 = sshll.u32 %s432_s23, 4  ;;  %s53366_s24 = int_to_ptr.vmem [resolvable:$true] %s31953_s24 }
 0x29b   : > { %41677 = vmatprep.subr.bf16.mxu0 %v41676_v40  ;;  %41725 = vmatprep.subr.bf16.mxu1 %v41724_v57  ;;  %s44791_s17 = scalar_lea.vmem %s53366_s24, 16  ;;  %p44798_p0 = scmp.lt.s32.totalorder %s53366_s24, %s44796_s21 }
 0x29c   : > { %37339 = vmatmul.mubr.f32.vlgmr.msra.gmra.mrb[0].mxu0 %v16933_v36  ;;  %37423 = vmatmul.mubr.f32.vlgmr.msra.gmra.mrb[0].mxu1 %v16933_v36  ;;  %p44792_p11 = scmp.ne.s32.totalorder %s53366_s24, %s44791_s17  ;;  %p44799_p1 = scmp.lt.s32.totalorder %s44797_s0, %s44791_s17 }
 0x29d   : > { %41679 = vmatpush3.bf16.msra.mxu0 %v41676_v40  ;;  %41727 = vmatpush3.bf16.msra.mxu1 %v41724_v57 }
 0x29e   : > { %37341 = vmatprep.mubr.f32.mxu0 %v16943_v50  ;;  %37425 = vmatprep.mubr.f32.mxu1 %v16943_v50  ;;  %p44793_p12 = pnand %p44792_p11, %p44967_p5  ;;  %p44800_p2 = por %p44799_p1, %p44798_p0 }
 0x29f   : > { %41681 = vmatprep.subr.bf16.mxu0 %v41680_v9  ;;  %41729 = vmatprep.subr.bf16.mxu1 %v41728_v26 }
 0x2a0   : > { %37342 = vmatmul.mubr.f32.gmra.mrb[2].mxu0 %v16953_v61  ;;  %37426 = vmatmul.mubr.f32.gmra.mrb[2].mxu1 %v16953_v61  ;;  %p44794_p13 = pneg %p44793_p12 }
 0x2a1   : > { %41683 = vmatpush3.bf16.msra.mxu0 %v41680_v9  ;;  %41731 = vmatpush3.bf16.msra.mxu1 %v41728_v26 }
 0x2a2   : > { %37352 = vmatprep.mubr.f32.mxu0 %v48340_v52  ;;  %37436 = vmatprep.mubr.f32.mxu1 %v48340_v52  ;;  %p44801_p3 = pnand %p44800_p2, %p44794_p13 }
 0x2a3   : > { %41685 = vmatprep.subr.bf16.mxu0 %v41684_v41  ;;  %41733 = vmatprep.subr.bf16.mxu1 %v41732_v42 }
 0x2a4   : > { %37353 = vmatmul.mubr.f32.vlgmr.msra.gmra.mrb[0].mxu0 %v48371_v13  ;;  %37437 = vmatmul.mubr.f32.vlgmr.msra.gmra.mrb[0].mxu1 %v48371_v13 }
 0x2a5   : > { %41687 = vmatpush3.bf16.msra.mxu0 %v41684_v41  ;;  %41735 = vmatpush3.bf16.msra.mxu1 %v41732_v42 }
 0x2a6   : > { %37355 = vmatprep.mubr.f32.mxu0 %v48383_v56  ;;  %37439 = vmatprep.mubr.f32.mxu1 %v48383_v56 }
 0x2a7   : > { %41689 = vmatprep.subr.bf16.mxu0 %v41688_v63  ;;  %41737 = vmatprep.subr.bf16.mxu1 %v41736_v53 }
 0x2a8   : > { %37356 = vmatmul.mubr.f32.gmra.mrb[2].mxu0 %v48404_v1  ;;  %37440 = vmatmul.mubr.f32.gmra.mrb[2].mxu1 %v48404_v1 }
 0x2a9   : > { %41691 = vmatpush3.bf16.msra.mxu0 %v41688_v63  ;;  %41739 = vmatpush3.bf16.msra.mxu1 %v41736_v53  ;;  %v18861_v63 = vand.u32 4294901760, %v48654_v31  ;;  %v18868_v53 = vand.u32 4294901760, %v48657_v62 }
 0x2aa   : > { %37366 = vmatprep.mubr.f32.mxu0 %v48374_v51  ;;  %37450 = vmatprep.mubr.f32.mxu1 %v48374_v51  ;;  %v48529_v51 = vld [vmem:[%s53407_s1 + $0x1c0] sm:$0xff] }
 0x2ab   : > { %41693 = vmatprep.subr.bf16.mxu0 %v48410_v15  ;;  %41741 = vmatprep.subr.bf16.mxu1 %v48439_v19  ;;  %v18113_v54 = vand.u32 4294901760, %v48529_v51 }
 0x2ac   : > { %37367 = vmatmul.mubr.f32.vlgmr.msra.gmra.mrb[0].mxu0 %v48402_v48  ;;  %37451 = vmatmul.mubr.f32.vlgmr.msra.gmra.mrb[0].mxu1 %v48402_v48  ;;  %v41700_v48 = vpack.c.bf16 %v16969_v49, %v16962_v60  ;;  %v18739_v60 = vand.u32 4294901760, %v48554_v0  ;;  %v18101_v49 = vsel %vm459_vm0, %v32153_v24, 0 }
 0x2ad   : > { %41695 = vmatpush3.bf16.msra.mxu0 %v48410_v15  ;;  %41743 = vmatpush3.bf16.msra.mxu1 %v48439_v19  ;;  %v48600_v38 = vand.u32 4294901760, %v18101_v49  ;;  %v48606_v2 = vsub.f32 %v48529_v51, %v18113_v54  ;;  %v48670_v36 = vpack.c.bf16 %v18116_v11, %v18113_v54 }
 0x2ae   : > { %37369 = vmatprep.mubr.f32.mxu0 %v48430_v4  ;;  %37453 = vmatprep.mubr.f32.mxu1 %v48430_v4  ;;  %v41752_v4 = vpack.c.bf16 %v17606_v16, %v17599_v39  ;;  %v48609_v39 = vsub.f32 %v48534_v8, %v18116_v11  ;;  %v48622_v47 = vsub.f32 %v48554_v0, %v18739_v60  ;;  %v48709_v8 = vand.u32 4294901760, %v48662_v18 }
 0x2af   : > { %41697 = vmatprep.subr.bf16.mxu0 %v48446_v10  ;;  %41745 = vmatprep.subr.bf16.mxu1 %v48456_v12  ;;  %v48634_v45 = vsub.f32 %v18101_v49, %v48600_v38  ;;  %v18224_v17 = vand.u32 4294901760, %v48606_v2  ;;  %v48699_v41 = vpack.c.bf16 %v18739_v60, %v18736_v58  ;;  %v18869_v60 = vsub.f32 %v48657_v62, %v18868_v53 }
 0x2b0   : > { %37370 = vmatmul.mubr.f32.gmra.mrb[2].mxu0 %v48452_v59  ;;  %37454 = vmatmul.mubr.f32.gmra.mrb[2].mxu1 %v48452_v59  ;;  %v48585_v59 = vld [vmem:[%s53407_s1 + $0x1d8] sm:$0xff]  ;;  %v18231_v32 = vand.u32 4294901760, %v48609_v39  ;;  %v18194_v49 = vsub.f32 %v48662_v18, %v48709_v8 }
 0x2b1   : > { %41699 = vmatpush3.bf16.msra.mxu0 %v48446_v10  ;;  %41747 = vmatpush3.bf16.msra.mxu1 %v48456_v12  ;;  %v18122_v3 = vand.u32 4294901760, %v48585_v59  ;;  %v48673_v30 = vand.u32 4294901760, %v48634_v45  ;;  %v18225_v50 = vsub.f32 %v48606_v2, %v18224_v17 }
 0x2b2   : > { %37380 = vmatprep.mubr.f32.mxu0 %v48413_v44  ;;  %37464 = vmatprep.mubr.f32.mxu1 %v48413_v44  ;;  %v48580_v44 = vld [vmem:[%s53407_s1 + $0x1d0] sm:$0xff]  ;;  %v18232_v9 = vsub.f32 %v48609_v39, %v18231_v32  ;;  %v18195_v34 = vand.u32 4294901760, %v18194_v49 }
 0x2b3   : > { %41701 = vmatprep.subr.bf16.mxu0 %v41700_v48  ;;  %41749 = vmatprep.subr.bf16.mxu1 %v41748_v28  ;;  %v18119_v16 = vand.u32 4294901760, %v48580_v44  ;;  %v48651_v55 = vsub.f32 %v48585_v59, %v18122_v3  ;;  %v18226_v0 = vand.u32 4294901760, %v18225_v50 }
 0x2b4   : > { %37381 = vmatmul.mubr.f32.vlgmr.msra.gmra.mrb[0].mxu0 %v48449_v25  ;;  %37465 = vmatmul.mubr.f32.vlgmr.msra.gmra.mrb[0].mxu1 %v48449_v25  ;;  %v48617_v25 = vsub.f32 %v48549_v14, %v18736_v58  ;;  %v18184_v14 = vsub.f32 %v48634_v45, %v48673_v30  ;;  %v18233_v24 = vand.u32 4294901760, %v18232_v9 }
 0x2b5   : > { %41703 = vmatpush3.bf16.msra.mxu0 %v41700_v48  ;;  %41751 = vmatpush3.bf16.msra.mxu1 %v41748_v28  ;;  %v48646_v57 = vsub.f32 %v48580_v44, %v18119_v16  ;;  %v18245_v42 = vand.u32 4294901760, %v48651_v55  ;;  %v48706_v51 = vpack.c.bf16 %v18122_v3, %v18119_v16  ;;  %v48712_v48 = vsub.f32 %v18110_v7, %v48664_v22 }
 0x2b6   : > { %37383 = vmatprep.mubr.f32.mxu0 %v48463_v23  ;;  %37467 = vmatprep.mubr.f32.mxu1 %v48463_v23  ;;  %v18107_v23 = vsel %vm459_vm0, %v32155_v46, 0  ;;  %v18847_v33 = vand.u32 4294901760, %v48617_v25  ;;  %v48716_v28 = vpack.c.bf16 %v18745_v35, %v18742_v20  ;;  %v18870_v46 = vand.u32 4294901760, %v18869_v60 }
 0x2b7   : > { %41705 = vmatprep.subr.bf16.mxu0 %v41704_v6  ;;  %41753 = vmatprep.subr.bf16.mxu1 %v41752_v4  ;;  %v48643_v40 = vand.u32 4294901760, %v18107_v23  ;;  %v18238_v61 = vand.u32 4294901760, %v48646_v57  ;;  %v48744_v5 = vand.u32 4294901760, %v48712_v48  ;;  %v41828_v35 = vpack.c.bf16 %v48622_v47, %v48617_v25 }
 0x2b8   : > { %37384 = vmatmul.mubr.f32.gmra.mrb[2].mxu0 %v48484_v27  ;;  %37468 = vmatmul.mubr.f32.gmra.mrb[2].mxu1 %v48484_v27  ;;  %v18854_v27 = vand.u32 4294901760, %v48622_v47  ;;  %v41832_v7 = vpack.c.bf16 %v48657_v62, %v48654_v31 }
 0x2b9   : > { %41707 = vmatpush3.bf16.msra.mxu0 %v41704_v6  ;;  %41755 = vmatpush3.bf16.msra.mxu1 %v41752_v4  ;;  %v48690_v26 = vsub.f32 %v18107_v23, %v48643_v40  ;;  %v18185_v6 = vand.u32 4294901760, %v18184_v14  ;;  %v41772_v4 = vpack.c.bf16 %v18233_v24, %v18226_v0  ;;  %v41784_v23 = vpack.c.bf16 %v48651_v55, %v48646_v57 }
 0x2ba   : > { %37394 = vmatprep.mubr.f32.mxu0 %v48340_v52  ;;  %37478 = vmatprep.mubr.f32.mxu1 %v48340_v52 }
 0x2bb   : > { %41709 = vmatprep.subr.bf16.mxu0 %v48410_v15  ;;  %41757 = vmatprep.subr.bf16.mxu1 %v48439_v19  ;;  %v48723_v58 = vand.u32 4294901760, %v48690_v26 }
 0x2bc   : > { %37395 = vmatmul.mubr.f32.vlgmr.msra.gmra.mrb[0].mxu0 %v48371_v13  ;;  %37479 = vmatmul.mubr.f32.vlgmr.msra.gmra.mrb[0].mxu1 %v48371_v13 }
 0x2bd   : > { %41711 = vmatpush3.bf16.msra.mxu0 %v48410_v15  ;;  %41759 = vmatpush3.bf16.msra.mxu1 %v48439_v19  ;;  %v18848_v15 = vsub.f32 %v48617_v25, %v18847_v33  ;;  %v18855_v19 = vsub.f32 %v48622_v47, %v18854_v27  ;;  %v19357_v25 = vlaneseq }
 0x2be   : > { %37397 = vmatprep.mubr.f32.mxu0 %v48383_v56  ;;  %37481 = vmatprep.mubr.f32.mxu1 %v48383_v56 }
 0x2bf   : > { %41713 = vmatprep.subr.bf16.mxu0 %v48446_v10  ;;  %41761 = vmatprep.subr.bf16.mxu1 %v48456_v12  ;;  %v18849_v54 = vand.u32 4294901760, %v18848_v15  ;;  %v18856_v11 = vand.u32 4294901760, %v18855_v19  ;;  %v19358_v47 = vshrl.u32 %v19357_v25, 7 }
 0x2c0   : > { %37398 = vmatmul.mubr.f32.gmra.mrb[2].mxu0 %v48404_v1  ;;  %37482 = vmatmul.mubr.f32.gmra.mrb[2].mxu1 %v48404_v1 }
 0x2c1   : > { %41715 = vmatpush3.bf16.msra.mxu0 %v48446_v10  ;;  %41763 = vmatpush3.bf16.msra.mxu1 %v48456_v12  ;;  %v18239_v10 = vsub.f32 %v48646_v57, %v18238_v61  ;;  %v18246_v12 = vsub.f32 %v48651_v55, %v18245_v42  ;;  %v41820_v44 = vpack.c.bf16 %v18856_v11, %v18849_v54  ;;  %v53421_v55 = vmov 0.0  }
 0x2c2   : > { %37408 = vmatprep.mubr.f32.mxu0 %v48340_v52  ;;  %37492 = vmatprep.mubr.f32.mxu1 %v48340_v52  ;;  %v18862_v52 = vsub.f32 %v48654_v31, %v18861_v63 }
 0x2c3   : > { %41765 = vmatprep.subr.bf16.mxu0 %v48670_v36  ;;  %41813 = vmatprep.subr.bf16.mxu1 %v48699_v41  ;;  %v18240_v59 = vand.u32 4294901760, %v18239_v10  ;;  %v18247_v21 = vand.u32 4294901760, %v18246_v12 }
 0x2c4   : > { %37409 = vmatmul.mubr.f32.vlgmr.msra.gmra.mrb[0].mxu0 %v48371_v13  ;;  %37493 = vmatmul.mubr.f32.vlgmr.msra.gmra.mrb[0].mxu1 %v48371_v13  ;;  %v18204_v13 = vsub.f32 %v48690_v26, %v48723_v58  ;;  %v18863_v37 = vand.u32 4294901760, %v18862_v52 }
 0x2c5   : > { %41767 = vmatpush3.bf16.msra.mxu0 %v48670_v36  ;;  %41815 = vmatpush3.bf16.msra.mxu1 %v48699_v41  ;;  %v41776_v43 = vpack.c.bf16 %v18247_v21, %v18240_v59 }
 0x2c6   : > { %37411 = vmatprep.mubr.f32.mxu0 %v48383_v56  ;;  %37495 = vmatprep.mubr.f32.mxu1 %v48383_v56  ;;  %v18214_v56 = vsub.f32 %v48712_v48, %v48744_v5  ;;  %v18205_v16 = vand.u32 4294901760, %v18204_v13  ;;  %v41824_v3 = vpack.c.bf16 %v18870_v46, %v18863_v37 }
 0x2c7   : > { %41769 = vmatprep.subr.bf16.mxu0 %v48706_v51  ;;  %41817 = vmatprep.subr.bf16.mxu1 %v48716_v28 }
 0x2c8   : > { %37412 = vmatmul.mubr.f32.gmra.mrb[2].mxu0 %v48404_v1  ;;  %37496 = vmatmul.mubr.f32.gmra.mrb[2].mxu1 %v48404_v1  ;;  %v18215_v20 = vand.u32 4294901760, %v18214_v56  ;;  %v41780_v1 = vpack.c.bf16 %v48609_v39, %v48606_v2  ;;  %v41800_v2 = vpack.c.bf16 %v18245_v42, %v18238_v61  ;;  %v41848_v39 = vpack.c.bf16 %v18868_v53, %v18861_v63 }
 0x2c9   : > { %41771 = vmatpush3.bf16.msra.mxu0 %v48706_v51  ;;  %41819 = vmatpush3.bf16.msra.mxu1 %v48716_v28 }
 0x2ca   : > { %37506 = vmatprep.mubr.f32.mxu0 %v18185_v6  ;;  %37590 = vmatprep.mubr.f32.mxu1 %v18185_v6 }
 0x2cb   : > { %41773 = vmatprep.subr.bf16.mxu0 %v41772_v4  ;;  %41821 = vmatprep.subr.bf16.mxu1 %v41820_v44 }
 0x2cc   : > { %37507 = vmatmul.mubr.f32.vlgmr.msra.gmra.mrb[0].mxu0 %v18195_v34  ;;  %37591 = vmatmul.mubr.f32.vlgmr.msra.gmra.mrb[0].mxu1 %v18195_v34 }
 0x2cd   : > { %41775 = vmatpush3.bf16.msra.mxu0 %v41772_v4  ;;  %41823 = vmatpush3.bf16.msra.mxu1 %v41820_v44 }
 0x2ce   : > { %37509 = vmatprep.mubr.f32.mxu0 %v18205_v16  ;;  %37593 = vmatprep.mubr.f32.mxu1 %v18205_v16 }
 0x2cf   : > { %41777 = vmatprep.subr.bf16.mxu0 %v41776_v43  ;;  %41825 = vmatprep.subr.bf16.mxu1 %v41824_v3 }
 0x2d0   : > { %37510 = vmatmul.mubr.f32.gmra.mrb[2].mxu0 %v18215_v20  ;;  %37594 = vmatmul.mubr.f32.gmra.mrb[2].mxu1 %v18215_v20 }
 0x2d1   : > { %41779 = vmatpush3.bf16.msra.mxu0 %v41776_v43  ;;  %41827 = vmatpush3.bf16.msra.mxu1 %v41824_v3 }
 0x2d2   : > { %37520 = vmatprep.mubr.f32.mxu0 %v48600_v38  ;;  %37604 = vmatprep.mubr.f32.mxu1 %v48600_v38 }
 0x2d3   : > { %41781 = vmatprep.subr.bf16.mxu0 %v41780_v1  ;;  %41829 = vmatprep.subr.bf16.mxu1 %v41828_v35 }
 0x2d4   : > { %37521 = vmatmul.mubr.f32.vlgmr.msra.gmra.mrb[0].mxu0 %v48631_v29  ;;  %37605 = vmatmul.mubr.f32.vlgmr.msra.gmra.mrb[0].mxu1 %v48631_v29 }
 0x2d5   : > { %41783 = vmatpush3.bf16.msra.mxu0 %v41780_v1  ;;  %41831 = vmatpush3.bf16.msra.mxu1 %v41828_v35 }
 0x2d6   : > { %37523 = vmatprep.mubr.f32.mxu0 %v48643_v40  ;;  %37607 = vmatprep.mubr.f32.mxu1 %v48643_v40 }
 0x2d7   : > { %41785 = vmatprep.subr.bf16.mxu0 %v41784_v23  ;;  %41833 = vmatprep.subr.bf16.mxu1 %v41832_v7 }
 0x2d8   : > { %37524 = vmatmul.mubr.f32.gmra.mrb[2].mxu0 %v48664_v22  ;;  %37608 = vmatmul.mubr.f32.gmra.mrb[2].mxu1 %v48664_v22 }
 0x2d9   : > { %41787 = vmatpush3.bf16.msra.mxu0 %v41784_v23  ;;  %41835 = vmatpush3.bf16.msra.mxu1 %v41832_v7 }
 0x2da   : > { %37534 = vmatprep.mubr.f32.mxu0 %v48634_v45  ;;  %37618 = vmatprep.mubr.f32.mxu1 %v48634_v45  ;;  %v41796_v45 = vpack.c.bf16 %v18231_v32, %v18224_v17  ;;  %v19359_v17 = vadd.s32 8, %v19358_v47  ;;  %v19362_v32 = vmul.u32 2, %v19358_v47 }
 0x2db   : > { %41789 = vmatprep.subr.bf16.mxu0 %v48670_v36  ;;  %41837 = vmatprep.subr.bf16.mxu1 %v48699_v41 }
 0x2dc   : > { %37535 = vmatmul.mubr.f32.vlgmr.msra.gmra.mrb[0].mxu0 %v48662_v18  ;;  %37619 = vmatmul.mubr.f32.vlgmr.msra.gmra.mrb[0].mxu1 %v48662_v18  ;;  %v41844_v18 = vpack.c.bf16 %v18854_v27, %v18847_v33  ;;  %v19363_v33 = vmul.u32 2, %v19359_v17  ;;  %v19361_v27 = vand.u32 127, %v19357_v25  ;;  %v19370_v57 = vadd.s32 1, %v19362_v32 }
 0x2dd   : > { %41791 = vmatpush3.bf16.msra.mxu0 %v48670_v36  ;;  %41839 = vmatpush3.bf16.msra.mxu1 %v48699_v41 }
 0x2de   : > { %37537 = vmatprep.mubr.f32.mxu0 %v48690_v26  ;;  %37621 = vmatprep.mubr.f32.mxu1 %v48690_v26  ;;  %vm19364_vm1 = vcmp.eq.s32.totalorder %v19361_v27, %v19362_v32  ;;  %vm19372_vm2 = vcmp.eq.s32.totalorder %v19361_v27, %v19370_v57  ;;  %vm19365_vm4 = vcmp.eq.s32.totalorder %v19361_v27, %v19363_v33 }
 0x2df   : > { %41793 = vmatprep.subr.bf16.mxu0 %v48706_v51  ;;  %41841 = vmatprep.subr.bf16.mxu1 %v48716_v28  ;;  %v48863_v61 = vsel %vm19365_vm4, 1.0, %v53421_v55 }
 0x2e0   : > { %37538 = vmatmul.mubr.f32.gmra.mrb[2].mxu0 %v48712_v48  ;;  %37622 = vmatmul.mubr.f32.gmra.mrb[2].mxu1 %v48712_v48  ;;  %v19383_v42 = vsel %vm19378_vm3, %v48863_v61, 0 }
 0x2e1   : > { %41795 = vmatpush3.bf16.msra.mxu0 %v48706_v51  ;;  %41843 = vmatpush3.bf16.msra.mxu1 %v48716_v28  ;;  %v48872_v53 = vsub.f32 %v19383_v42, %v19383_v42 }
 0x2e2   : > { %37548 = vmatprep.mubr.f32.mxu0 %v48673_v30  ;;  %37632 = vmatprep.mubr.f32.mxu1 %v48673_v30 }
 0x2e3   : > { %41797 = vmatprep.subr.bf16.mxu0 %v41796_v45  ;;  %41845 = vmatprep.subr.bf16.mxu1 %v41844_v18  ;;  %v19470_v11 = vand.u32 4294901760, %v48872_v53 }
 0x2e4   : > { %37549 = vmatmul.mubr.f32.vlgmr.msra.gmra.mrb[0].mxu0 %v48709_v8  ;;  %37633 = vmatmul.mubr.f32.vlgmr.msra.gmra.mrb[0].mxu1 %v48709_v8 }
 0x2e5   : > { %41799 = vmatpush3.bf16.msra.mxu0 %v41796_v45  ;;  %41847 = vmatpush3.bf16.msra.mxu1 %v41844_v18  ;;  %v19471_v37 = vsub.f32 %v48872_v53, %v19470_v11 }
 0x2e6   : > { %37551 = vmatprep.mubr.f32.mxu0 %v48723_v58  ;;  %37635 = vmatprep.mubr.f32.mxu1 %v48723_v58 }
 0x2e7   : > { %41801 = vmatprep.subr.bf16.mxu0 %v41800_v2  ;;  %41849 = vmatprep.subr.bf16.mxu1 %v41848_v39  ;;  %v19472_v45 = vand.u32 4294901760, %v19471_v37 }
 0x2e8   : > { %37552 = vmatmul.mubr.f32.gmra.mrb[2].mxu0 %v48744_v5  ;;  %37636 = vmatmul.mubr.f32.gmra.mrb[2].mxu1 %v48744_v5 }
 0x2e9   : > { %41803 = vmatpush3.bf16.msra.mxu0 %v41800_v2  ;;  %41851 = vmatpush3.bf16.msra.mxu1 %v41848_v39 }
 0x2ea   : > { %37562 = vmatprep.mubr.f32.mxu0 %v48600_v38  ;;  %37646 = vmatprep.mubr.f32.mxu1 %v48600_v38 }
 0x2eb   : > { %41805 = vmatprep.subr.bf16.mxu0 %v48670_v36  ;;  %41853 = vmatprep.subr.bf16.mxu1 %v48699_v41 }
 0x2ec   : > { %37563 = vmatmul.mubr.f32.vlgmr.msra.gmra.mrb[0].mxu0 %v48631_v29  ;;  %37647 = vmatmul.mubr.f32.vlgmr.msra.gmra.mrb[0].mxu1 %v48631_v29 }
 0x2ed   : > { %41807 = vmatpush3.bf16.msra.mxu0 %v48670_v36  ;;  %41855 = vmatpush3.bf16.msra.mxu1 %v48699_v41 }
 0x2ee   : > { %37565 = vmatprep.mubr.f32.mxu0 %v48643_v40  ;;  %37649 = vmatprep.mubr.f32.mxu1 %v48643_v40 }
 0x2ef   : > { %41809 = vmatprep.subr.bf16.mxu0 %v48706_v51  ;;  %41857 = vmatprep.subr.bf16.mxu1 %v48716_v28 }
 0x2f0   : > { %37566 = vmatmul.mubr.f32.gmra.mrb[2].mxu0 %v48664_v22  ;;  %37650 = vmatmul.mubr.f32.gmra.mrb[2].mxu1 %v48664_v22 }
 0x2f1   : > { %41811 = vmatpush3.bf16.msra.mxu0 %v48706_v51  ;;  %41859 = vmatpush3.bf16.msra.mxu1 %v48716_v28 }
 0x2f2   : > { %37576 = vmatprep.mubr.f32.mxu0 %v48600_v38  ;;  %37660 = vmatprep.mubr.f32.mxu1 %v48600_v38  ;;  %v19371_v38 = vadd.s32 1, %v19363_v33 }
 0x2f4   : > { %37577 = vmatmul.mubr.f32.vlgmr.msra.gmra.mrb[0].mxu0 %v48631_v29  ;;  %37661 = vmatmul.mubr.f32.vlgmr.msra.gmra.mrb[0].mxu1 %v48631_v29  ;;  %v48841_v29 = vsel %vm19364_vm1, 1.0, %v53421_v55  ;;  %vm19373_vm5 = vcmp.eq.s32.totalorder %v19361_v27, %v19371_v38 }
 0x2f5   : > { %37579 = vmatprep.mubr.f32.mxu0 %v48643_v40  ;;  %37663 = vmatprep.mubr.f32.mxu1 %v48643_v40  ;;  %53584 = vst [vmem:[#allocation9_spill] sm:$0xff] %v48841_v29  ;;  %v48844_v40 = vsel %vm19372_vm2, 1.0, %v53421_v55  ;;  %v19380_v31 = vsel %vm19378_vm3, %v48841_v29, 0  ;;  %v48866_v41 = vsel %vm19373_vm5, 1.0, %v53421_v55  ;;  %v32202_v55 = vld [vmem:[%s53411_s5 + $0xa0] sm:$0xff] }
 0x2f6   : > { %53585 = vst [vmem:[#allocation10_spill] sm:$0xff] %v48844_v40  ;;  %v19918_v62 = vsel %vm19378_vm3, %v48844_v40, 0  ;;  %v19921_v63 = vsel %vm19378_vm3, %v48866_v41, 0 }
 0x2f7   : > { %v48852_v36 = vsub.f32 %v19918_v62, %v19918_v62  ;;  %v48874_v0 = vsub.f32 %v19921_v63, %v19921_v63 }
 0x2f8   : > { %37580 = vmatmul.mubr.f32.gmra.mrb[2].mxu0 %v48664_v22  ;;  %37664 = vmatmul.mubr.f32.gmra.mrb[2].mxu1 %v48664_v22  ;;  %v48850_v22 = vsub.f32 %v19380_v31, %v19380_v31 }
 0x2f9   : > { %v19994_v50 = vand.u32 4294901760, %v48852_v36  ;;  %v20004_v6 = vand.u32 4294901760, %v48874_v0 }
 0x2fa   : > { %v19460_v30 = vand.u32 4294901760, %v48850_v22 }
 0x2fb   : > { %v19995_v15 = vsub.f32 %v48852_v36, %v19994_v50  ;;  %v20005_v3 = vsub.f32 %v48874_v0, %v20004_v6 }
 0x2fc   : > { %v19461_v9 = vsub.f32 %v48850_v22, %v19460_v30 }
 0x2fd   : > { %v19996_v26 = vand.u32 4294901760, %v19995_v15  ;;  %v20006_v17 = vand.u32 4294901760, %v20005_v3  ;;  %v32183_v15 = vld [vmem:[%s53410_s4 + $0x60] sm:$0xff] }
 0x2fe   : > { %v19462_v19 = vand.u32 4294901760, %v19461_v9  ;;  %v32182_v9 = vld [vmem:[%s53410_s4 + $0x58] sm:$0xff] }
 0x2ff   : > { %37740 = vmatprep.mubr.f32.mxu1 %v19996_v26  ;;  %v20519_v26 = vand.u32 4294901760, %v32183_v15 }
 0x300   : > { %37674 = vmatprep.mubr.f32.mxu0 %v19462_v19  ;;  %v20516_v19 = vand.u32 4294901760, %v32182_v9 }
 0x301   : > { %v48925_v63 = vsub.f32 %v32183_v15, %v20519_v26 }
 0x302   : > { %v48923_v42 = vsub.f32 %v32182_v9, %v20516_v19 }
 0x3c7   : > { %v37578_v51 = vpop.f32.mrb[0].mxu0  ;;  %v37662_v8 = vpop.f32.mrb[0].mxu1 }
 0x3c8   : > { %v19354_v48 = vmax.f32 %v37578_v51, %v37662_v8  ;;  %v18704_v28 = vpop.f32.mrb[1].mxu0  ;;  %v19327_v14 = vpop.f32.mrb[1].mxu1  ;;  %v20614_v51 = vand.u32 4294901760, %v48923_v42  ;;  %v20621_v8 = vand.u32 4294901760, %v48925_v63 }
 0x3c9   : > { %v19353_v24 = vmax.f32 %v18704_v28, %v19327_v14  ;;  %v32184_v28 = vld [vmem:[%s53410_s4 + $0x68] sm:$0xff]  ;;  %v32185_v14 = vld [vmem:[%s53410_s4 + $0x70] sm:$0xff] }
 0x3ca   : > { %v19393_v54 = vand.u32 4294901760, %v19354_v48 }
 0x3cb   : > { %v19390_v58 = vand.u32 4294901760, %v19353_v24  ;;  %v37581_v10 = vpop.f32.mrb[2].mxu0  ;;  %v37665_v12 = vpop.f32.mrb[2].mxu1 }
 0x3cc   : > { %v19487_v52 = vsub.f32 %v19354_v48, %v19393_v54  ;;  %v19356_v60 = vmax.f32 %v37581_v10, %v37665_v12  ;;  %v18716_v49 = vpop.f32.mrb[3].mxu0  ;;  %v19339_v5 = vpop.f32.mrb[3].mxu1 }
 0x3cd   : > { %v48878_v4 = vpack.c.bf16 %v19393_v54, %v19390_v58  ;;  %v19480_v44 = vsub.f32 %v19353_v24, %v19390_v58  ;;  %v19355_v13 = vmax.f32 %v18716_v49, %v19339_v5  ;;  %v20525_v24 = vand.u32 4294901760, %v32185_v14 }
 0x3ce   : > { %v19488_v59 = vand.u32 4294901760, %v19487_v52  ;;  %v19387_v21 = vsel %vm19385_vm6, %v19356_v60, 0 }
 0x3cf   : > { %v19481_v46 = vand.u32 4294901760, %v19480_v44  ;;  %v41876_v34 = vpack.c.bf16 %v19487_v52, %v19480_v44  ;;  %v19399_v56 = vand.u32 4294901760, %v19387_v21  ;;  %v19396_v16 = vand.u32 4294901760, %v19355_v13  ;;  %41861 = vmatprep.subr.bf16.mxu0 %v48878_v4  ;;  %41909 = vmatprep.subr.bf16.mxu1 %v48878_v4 }
 0x3d0   : > { %v19489_v43 = vsub.f32 %v19487_v52, %v19488_v59  ;;  %41863 = vmatpush3.bf16.msra.mxu0 %v48878_v4  ;;  %41911 = vmatpush3.bf16.msra.mxu1 %v48878_v4 }
 0x3d1   : > { %v19482_v20 = vsub.f32 %v19480_v44, %v19481_v46  ;;  %v19501_v1 = vsub.f32 %v19387_v21, %v19399_v56  ;;  %v48891_v35 = vpack.c.bf16 %v19399_v56, %v19396_v16  ;;  %v19494_v23 = vsub.f32 %v19355_v13, %v19396_v16  ;;  %v32189_v44 = vld [vmem:[%s53410_s4 + $0x90] sm:$0xff] }
 0x3d2   : > { %v19490_v7 = vand.u32 4294901760, %v19489_v43  ;;  %v48893_v18 = vpack.c.bf16 %v19488_v59, %v19481_v46 }
 0x3d3   : > { %v19483_v2 = vand.u32 4294901760, %v19482_v20  ;;  %v19502_v39 = vand.u32 4294901760, %v19501_v1  ;;  %v19495_v25 = vand.u32 4294901760, %v19494_v23  ;;  %v41880_v47 = vpack.c.bf16 %v19501_v1, %v19494_v23  ;;  %41865 = vmatprep.subr.bf16.mxu0 %v48891_v35  ;;  %41913 = vmatprep.subr.bf16.mxu1 %v48891_v35 }
 0x3d4   : > { %41867 = vmatpush3.bf16.msra.mxu0 %v48891_v35  ;;  %41915 = vmatpush3.bf16.msra.mxu1 %v48891_v35 }
 0x3d5   : > { %v19503_v32 = vsub.f32 %v19501_v1, %v19502_v39  ;;  %v19496_v33 = vsub.f32 %v19494_v23, %v19495_v25  ;;  %v41868_v27 = vpack.c.bf16 %v19490_v7, %v19483_v2  ;;  %v41896_v57 = vpack.c.bf16 %v19502_v39, %v19495_v25  ;;  %v32190_v1 = vld [vmem:[%s53410_s4 + $0x98] sm:$0xff] }
 0x3d7   : > { %v19504_v38 = vand.u32 4294901760, %v19503_v32  ;;  %v19497_v31 = vand.u32 4294901760, %v19496_v33  ;;  %37675 = vmatmul.mubr.f32.vlgmr.msra.gmra.mrb[4].mxu0 %v19472_v45  ;;  %41869 = vmatprep.subr.bf16.mxu0 %v41868_v27  ;;  %v20540_v45 = vand.u32 4294901760, %v32190_v1 }
 0x3d8   : > { %37741 = vmatmul.mubr.f32.vlgmr.msra.gmra.mrb[4].mxu1 %v20006_v17  ;;  %41917 = vmatprep.subr.bf16.mxu1 %v41868_v27 }
 0x3d9   : > { %41871 = vmatpush3.bf16.msra.mxu0 %v41868_v27  ;;  %41919 = vmatpush3.bf16.msra.mxu1 %v41868_v27  ;;  %v41872_v62 = vpack.c.bf16 %v19504_v38, %v19497_v31  ;;  %v32192_v38 = vld [vmem:[%s53410_s4 + $0xa8] sm:$0xf] }
 0x3da   : > { %37685 = vmatprep.mubr.msk.f32.mxu0 %vm19378_vm3, %v48841_v29  ;;  %37751 = vmatprep.mubr.msk.f32.mxu1 %vm19378_vm3, %v48844_v40  ;;  %v20513_v9 = vsel %vm19385_vm6, %v32192_v38, 0 }
 0x3db   : > { %41873 = vmatprep.subr.bf16.mxu0 %v41872_v62  ;;  %41921 = vmatprep.subr.bf16.mxu1 %v41872_v62 }
 0x3dd   : > { %41875 = vmatpush3.bf16.msra.mxu0 %v41872_v62  ;;  %41923 = vmatpush3.bf16.msra.mxu1 %v41872_v62 }
 0x3de   : > { %41877 = vmatprep.subr.bf16.mxu0 %v41876_v34  ;;  %41925 = vmatprep.subr.bf16.mxu1 %v41876_v34 }
 0x3e0   : > { %37686 = vmatmul.mubr.msk.f32.vlgmr.msra.gmra.mrb[4].mxu0 %vm19378_vm3, %v48863_v61  ;;  %37752 = vmatmul.mubr.msk.f32.vlgmr.msra.gmra.mrb[4].mxu1 %vm19378_vm3, %v48866_v41 }
 0x3e1   : > { %41879 = vmatpush3.bf16.msra.mxu0 %v41876_v34  ;;  %41927 = vmatpush3.bf16.msra.mxu1 %v41876_v34  ;;  %v20537_v34 = vand.u32 4294901760, %v32189_v44 }
 0x3e2   : > { %41881 = vmatprep.subr.bf16.mxu0 %v41880_v47  ;;  %41929 = vmatprep.subr.bf16.mxu1 %v41880_v47 }
 0x3e3   : > { %37696 = vmatprep.mubr.f32.mxu0 %v48850_v22  ;;  %37762 = vmatprep.mubr.f32.mxu1 %v48852_v36  ;;  %v20615_v22 = vsub.f32 %v48923_v42, %v20614_v51  ;;  %v20622_v36 = vsub.f32 %v48925_v63, %v20621_v8  ;;  %v49021_v20 = vsub.f32 %v32189_v44, %v20537_v34 }
 0x3e5   : > { %41883 = vmatpush3.bf16.msra.mxu0 %v41880_v47  ;;  %41931 = vmatpush3.bf16.msra.mxu1 %v41880_v47  ;;  %v53427_v39 = vand.u32 4294901760, %v49021_v20  ;;  %v49031_v47 = vsub.f32 %v32190_v1, %v20540_v45 }
 0x3e6   : > { %41885 = vmatprep.subr.bf16.mxu0 %v48878_v4  ;;  %41933 = vmatprep.subr.bf16.mxu1 %v48878_v4 }
 0x3e7   : > { %v20664_v33 = vsub.f32 %v49021_v20, %v53427_v39  ;;  %v53426_v27 = vand.u32 4294901760, %v49031_v47 }
 0x3e8   : > { %37697 = vmatmul.mubr.f32.vlgmr.msra.gmra.mrb[4].mxu0 %v48872_v53  ;;  %37763 = vmatmul.mubr.f32.vlgmr.msra.gmra.mrb[4].mxu1 %v48874_v0  ;;  %v48963_v53 = vpack.c.bf16 %v20519_v26, %v20516_v19  ;;  %v20522_v0 = vand.u32 4294901760, %v32184_v28 }
 0x3e9   : > { %41887 = vmatpush3.bf16.msra.mxu0 %v48878_v4  ;;  %41935 = vmatpush3.bf16.msra.mxu1 %v48878_v4  ;;  %v20665_v62 = vand.u32 4294901760, %v20664_v33  ;;  %v20671_v19 = vsub.f32 %v49031_v47, %v53426_v27  ;;  %v32203_v27 = vld [vmem:[%s53411_s5 + $0xa8] sm:$0xf] }
 0x3ea   : > { %41889 = vmatprep.subr.bf16.mxu0 %v48891_v35  ;;  %41937 = vmatprep.subr.bf16.mxu1 %v48891_v35  ;;  %v48983_v54 = vsub.f32 %v32184_v28, %v20522_v0  ;;  %v49047_v15 = vpack.c.bf16 %v20525_v24, %v20522_v0 }
 0x3eb   : > { %37707 = vmatprep.mubr.f32.mxu0 %v19460_v30  ;;  %37773 = vmatprep.mubr.f32.mxu1 %v19994_v50  ;;  %v20616_v30 = vand.u32 4294901760, %v20615_v22  ;;  %v20623_v50 = vand.u32 4294901760, %v20622_v36 }
 0x3ec   : > { %v20628_v58 = vand.u32 4294901760, %v48983_v54 }
 0x3ed   : > { %41891 = vmatpush3.bf16.msra.mxu0 %v48891_v35  ;;  %41939 = vmatpush3.bf16.msra.mxu1 %v48891_v35  ;;  %v41976_v48 = vpack.c.bf16 %v20623_v50, %v20616_v30  ;;  %v20672_v30 = vand.u32 4294901760, %v20671_v19 }
 0x3ee   : > { %41893 = vmatprep.subr.bf16.mxu0 %v48893_v18  ;;  %41941 = vmatprep.subr.bf16.mxu1 %v48893_v18  ;;  %v20629_v60 = vsub.f32 %v48983_v54, %v20628_v58 }
 0x3f0   : > { %37708 = vmatmul.mubr.f32.vlgmr.msra.gmra.mrb[4].mxu0 %v19470_v11  ;;  %37774 = vmatmul.mubr.f32.vlgmr.msra.gmra.mrb[4].mxu1 %v20004_v6  ;;  %v48985_v11 = vsub.f32 %v32185_v14, %v20525_v24  ;;  %v20630_v13 = vand.u32 4294901760, %v20629_v60 }
 0x3f1   : > { %41895 = vmatpush3.bf16.msra.mxu0 %v48893_v18  ;;  %41943 = vmatpush3.bf16.msra.mxu1 %v48893_v18 }
 0x3f2   : > { %41897 = vmatprep.subr.bf16.mxu0 %v41896_v57  ;;  %41945 = vmatprep.subr.bf16.mxu1 %v41896_v57  ;;  %v20635_v10 = vand.u32 4294901760, %v48985_v11  ;;  %v42000_v60 = vpack.c.bf16 %v48985_v11, %v48983_v54  ;;  %v53589_v54 = vand.u32 4294901760, %v49021_v20 }
 0x3f3   : > { %37718 = vmatprep.mubr.msk.f32.mxu0 %vm19378_vm3, %v48841_v29  ;;  %37784 = vmatprep.mubr.msk.f32.mxu1 %vm19378_vm3, %v48844_v40 }
 0x3f4   : > { %v20636_v49 = vsub.f32 %v48985_v11, %v20635_v10 }
 0x3f5   : > { %41899 = vmatpush3.bf16.msra.mxu0 %v41896_v57  ;;  %41947 = vmatpush3.bf16.msra.mxu1 %v41896_v57 }
 0x3f6   : > { %41901 = vmatprep.subr.bf16.mxu0 %v48878_v4  ;;  %41949 = vmatprep.subr.bf16.mxu1 %v48878_v4  ;;  %v20637_v59 = vand.u32 4294901760, %v20636_v49  ;;  %v32193_v49 = vld [vmem:[%s53411_s5 + $0x58] sm:$0xff] }
 0x3f7   : > { %v21778_v44 = vand.u32 4294901760, %v32193_v49 }
 0x3f8   : > { %37719 = vmatmul.mubr.msk.f32.vlgmr.msra.gmra.mrb[4].mxu0 %vm19378_vm3, %v48863_v61  ;;  %37785 = vmatmul.mubr.msk.f32.vlgmr.msra.gmra.mrb[4].mxu1 %vm19378_vm3, %v48866_v41  ;;  %v41980_v56 = vpack.c.bf16 %v20637_v59, %v20630_v13 }
 0x3f9   : > { %41903 = vmatpush3.bf16.msra.mxu0 %v48878_v4  ;;  %41951 = vmatpush3.bf16.msra.mxu1 %v48878_v4  ;;  %v32188_v4 = vld [vmem:[%s53410_s4 + $0x88] sm:$0xff] }
 0x3fa   : > { %41905 = vmatprep.subr.bf16.mxu0 %v48891_v35  ;;  %41953 = vmatprep.subr.bf16.mxu1 %v48891_v35  ;;  %v20534_v46 = vand.u32 4294901760, %v32188_v4 }
 0x3fb   : > { %37729 = vmatprep.mubr.msk.f32.mxu0 %vm19378_vm3, %v48841_v29  ;;  %37795 = vmatprep.mubr.msk.f32.mxu1 %vm19378_vm3, %v48844_v40 }
 0x3fc   : > { %v49019_v3 = vsub.f32 %v32188_v4, %v20534_v46  ;;  %v49061_v28 = vpack.c.bf16 %v20537_v34, %v20534_v46  ;;  %v32194_v4 = vld [vmem:[%s53411_s5 + $0x60] sm:$0xff] }
 0x3fd   : > { %41907 = vmatpush3.bf16.msra.mxu0 %v48891_v35  ;;  %41955 = vmatpush3.bf16.msra.mxu1 %v48891_v35  ;;  %v32191_v35 = vld [vmem:[%s53410_s4 + $0xa0] sm:$0xff]  ;;  %v21781_v13 = vand.u32 4294901760, %v32194_v4 }
 0x3fe   : > { %41977 = vmatprep.subr.bf16.mxu0 %v41976_v48  ;;  %41957 = vmatprep.subr.bf16.mxu1 %v48963_v53  ;;  %v20543_v18 = vand.u32 4294901760, %v32191_v35  ;;  %v53430_v2 = vand.u32 4294901760, %v49019_v3  ;;  %v49100_v34 = vpack.c.bf16 %v49021_v20, %v49019_v3 }
 0x3ff   : > { %v49095_v46 = vpack.c.bf16 %v21781_v13, %v21778_v44 }
 0x400   : > { %37730 = vmatmul.mubr.msk.f32.vlgmr.msra.gmra.mrb[4].mxu0 %vm19378_vm3, %v48863_v61  ;;  %37796 = vmatmul.mubr.msk.f32.vlgmr.msra.gmra.mrb[4].mxu1 %vm19378_vm3, %v48866_v41  ;;  %v32186_v61 = vld [vmem:[%s53410_s4 + $0x78] sm:$0xff]  ;;  %v32187_v41 = vld [vmem:[%s53410_s4 + $0x80] sm:$0xff]  ;;  %v49033_v17 = vsub.f32 %v32191_v35, %v20543_v18  ;;  %v20657_v32 = vsub.f32 %v49019_v3, %v53430_v2 }
 0x401   : > { %41979 = vmatpush3.bf16.msra.mxu0 %v41976_v48  ;;  %41959 = vmatpush3.bf16.msra.mxu1 %v48963_v53  ;;  %v20528_v12 = vand.u32 4294901760, %v32186_v61  ;;  %v20531_v52 = vand.u32 4294901760, %v32187_v41  ;;  %v49058_v48 = vand.u32 4294901760, %v20513_v9 }
 0x402   : > { %41981 = vmatprep.subr.bf16.mxu0 %v41980_v56  ;;  %v53425_v57 = vand.u32 4294901760, %v49033_v17  ;;  %v20658_v31 = vand.u32 4294901760, %v20657_v32  ;;  %41961 = vmatprep.subr.bf16.mxu1 %v49047_v15 }
 0x403   : > { %v49001_v5 = vsub.f32 %v32186_v61, %v20528_v12  ;;  %v49003_v6 = vsub.f32 %v32187_v41, %v20531_v52  ;;  %v49055_v22 = vpack.c.bf16 %v20531_v52, %v20528_v12  ;;  %v49065_v0 = vsub.f32 %v20513_v9, %v49058_v48 }
 0x404   : > { %v20678_v26 = vsub.f32 %v49033_v17, %v53425_v57  ;;  %v41988_v36 = vpack.c.bf16 %v20665_v62, %v20658_v31  ;;  %v49071_v61 = vpack.c.bf16 %v20543_v18, %v20540_v45  ;;  %v41996_v52 = vpack.c.bf16 %v48925_v63, %v48923_v42  ;;  %v32181_v31 = vld [vmem:[%s53409_s3] ss:$0 sm:$0xff] }
 0x405   : > { %v53434_v21 = vand.u32 4294901760, %v49001_v5  ;;  %v53431_v37 = vand.u32 4294901760, %v49003_v6  ;;  %41983 = vmatpush3.bf16.msra.mxu0 %v41980_v56  ;;  %41963 = vmatpush3.bf16.msra.mxu1 %v49047_v15  ;;  %v49068_v24 = vand.u32 4294901760, %v49065_v0  ;;  %v49093_v59 = vpack.c.bf16 %v49003_v6, %v49001_v5 }
 0x406   : > { %v20679_v50 = vand.u32 4294901760, %v20678_v26  ;;  %41965 = vmatprep.subr.bf16.mxu1 %v49055_v22  ;;  %v49104_v56 = vpack.c.bf16 %v49033_v17, %v49031_v47  ;;  %v21805_v57 = vand.u32 4294901760, %v32202_v55  ;;  %v53586_v42 = vand.u32 4294901760, %v49001_v5 }
 0x407   : > { %v20643_v16 = vsub.f32 %v49001_v5, %v53434_v21  ;;  %v20650_v43 = vsub.f32 %v49003_v6, %v53431_v37  ;;  %v20685_v41 = vsub.f32 %v49065_v0, %v49068_v24  ;;  %v53587_v63 = vand.u32 4294901760, %v49003_v6 }
 0x408   : > { %v41992_v14 = vpack.c.bf16 %v20679_v50, %v20672_v30  ;;  %v49249_v37 = vsub.f32 %v32202_v55, %v21805_v57  ;;  %v53591_v5 = vand.u32 4294901760, %v49033_v17 }
 0x409   : > { %v20644_v23 = vand.u32 4294901760, %v20643_v16  ;;  %v20651_v7 = vand.u32 4294901760, %v20650_v43  ;;  %41967 = vmatpush3.bf16.msra.mxu1 %v49055_v22  ;;  %v20686_v12 = vand.u32 4294901760, %v20685_v41  ;;  %v49106_v16 = vsub.f32 %v32193_v49, %v21778_v44 }
 0x40a   : > { %41969 = vmatprep.subr.bf16.mxu1 %v49061_v28  ;;  %v49108_v43 = vsub.f32 %v32194_v4, %v21781_v13 }
 0x40b   : > { %v41984_v25 = vpack.c.bf16 %v20651_v7, %v20644_v23  ;;  %v53424_v1 = vand.u32 4294901760, %v49106_v16 }
 0x40c   : > { %v53423_v35 = vand.u32 4294901760, %v49108_v43  ;;  %v49122_v32 = vpack.c.bf16 %v49108_v43, %v49106_v16 }
 0x40d   : > { %41985 = vmatprep.subr.bf16.mxu0 %v41984_v25  ;;  %41971 = vmatpush3.bf16.msra.mxu1 %v49061_v28  ;;  %v21877_v23 = vsub.f32 %v49106_v16, %v53424_v1 }
 0x40e   : > { %41987 = vmatpush3.bf16.msra.mxu0 %v41984_v25  ;;  %41973 = vmatprep.subr.bf16.mxu1 %v49071_v61  ;;  %v21884_v7 = vsub.f32 %v49108_v43, %v53423_v35 }
 0x40f   : > { %41989 = vmatprep.subr.bf16.mxu0 %v41988_v36  ;;  %v21878_v45 = vand.u32 4294901760, %v21877_v23 }
 0x410   : > { %v21885_v18 = vand.u32 4294901760, %v21884_v7 }
 0x411   : > { %41975 = vmatpush3.bf16.msra.mxu1 %v49071_v61 }
 0x412   : > { %41991 = vmatpush3.bf16.msra.mxu0 %v41988_v36  ;;  %37818 = vmatprep.subr.mxu1 %v49058_v48  ;;  %v49118_v25 = vpack.c.bf16 %v21885_v18, %v21878_v45  ;;  %v32195_v18 = vld [vmem:[%s53411_s5 + $0x68] sm:$0xff] }
 0x413   : > { %41993 = vmatprep.subr.bf16.mxu0 %v41992_v14 }
 0x415   : > { %37819 = vmatpush3.msra.mxu1 %v49058_v48 }
 0x416   : > { %41995 = vmatpush3.bf16.msra.mxu0 %v41992_v14  ;;  %42197 = vmatprep.subr.bf16.mxu1 %v49095_v46 }
 0x417   : > { %37843 = vmatprep.subr.mxu0 %v20686_v12 }
 0x41a   : > { %37844 = vmatpush3.msra.mxu0 %v20686_v12 }
 0x41b   : > { %41997 = vmatprep.subr.bf16.mxu0 %v41996_v52 }
 0x4d3   : > { %v37731_v33 = vpop.f32.mrb[4].mxu0  ;;  %v37797_v38 = vpop.f32.mrb[4].mxu1 }
 0x4d4   : > { %v20452_v62 = vmax.f32 %v37731_v33, %v37797_v38  ;;  %v19907_v9 = vpop.f32.mrb[5].mxu0  ;;  %v20441_v19 = vpop.f32.mrb[5].mxu1  ;;  %v32196_v33 = vld [vmem:[%s53411_s5 + $0x70] sm:$0xff] }
 0x4d5   : > { %v20451_v26 = vmax.f32 %v19907_v9, %v20441_v19  ;;  %v21784_v9 = vand.u32 4294901760, %v32195_v18  ;;  %v21787_v19 = vand.u32 4294901760, %v32196_v33 }
 0x4d6   : > { %v20461_v36 = vadd.f32 %v32181_v31, %v20452_v62 }
 0x4d7   : > { %v20460_v30 = vadd.f32 %v32181_v31, %v20451_v26  ;;  %v32197_v26 = vld [vmem:[%s53411_s5 + $0x78] sm:$0xff] }
 0x4d8   : > { %v20463_v50 = vmax.f32 %v20461_v36, 0.0 }
 0x4d9   : > { %v20462_v14 = vmax.f32 %v20460_v30, 0.0 }
 0x4da   : > { %20467 = vst.msk [vmem:[#allocation2 + $0x8] sm:$0x3f] %vm20466_vm7, %v20463_v50  ;;  %v21790_v50 = vand.u32 4294901760, %v32197_v26 }
 0x4db   : > { %20465 = vst.msk [vmem:[#allocation2] sm:$0xff] %vm20464_vm8, %v20462_v14 }
 0x4dc   : > { %v49202_v39 = vsub.f32 %v32197_v26, %v21790_v50 }
 0x4de   : > { %v53432_v26 = vand.u32 4294901760, %v49202_v39 }
 0x4e1   : > { %v20493_v41 = vld [vmem:[#allocation2 + $0x9] sm:$0x3] }
 0x4e2   : > { %v20492_v12 = vld [vmem:[#allocation2 + $0x1] sm:$0xff]  ;;  %v20510_v49 = vsel %vm20464_vm8, %v20493_v41, 0  ;;  %v49168_v41 = vpack.c.bf16 %v21787_v19, %v21784_v9 }
 0x4e3   : > { %v20507_v4 = vsel %vm20464_vm8, %v20492_v12, 0  ;;  %v49130_v44 = vand.u32 4294901760, %v20510_v49  ;;  %v32199_v12 = vld [vmem:[%s53411_s5 + $0x88] sm:$0xff]  ;;  %v20468_v17 = vld [vmem:[#allocation2] sm:$0xff] }
 0x4e4   : > { %v49132_v13 = vand.u32 4294901760, %v20507_v4 }
 0x4e5   : > { %v49135_v23 = vsub.f32 %v20510_v49, %v49130_v44  ;;  %v32200_v49 = vld [vmem:[%s53411_s5 + $0x90] sm:$0xff] }
 0x4e6   : > { %37845 = vmatprep.mubr.f32.mxu0 %v49132_v13  ;;  %v49139_v7 = vsub.f32 %v20507_v4, %v49132_v13  ;;  %v21796_v4 = vand.u32 4294901760, %v32199_v12 }
 0x4e7   : > { %37846 = vmatmul.mubr.f32.vlgmr.msra.gmra.mrb[6].mxu0 %v49130_v44  ;;  %v49143_v45 = vand.u32 4294901760, %v49135_v23 }
 0x4e8   : > { %41999 = vmatpush3.bf16.msra.mxu0 %v41996_v52  ;;  %37870 = vmatprep.mubr.f32.mxu0 %v49139_v7  ;;  %v49153_v38 = vand.u32 4294901760, %v49139_v7  ;;  %v32198_v52 = vld [vmem:[%s53411_s5 + $0x80] sm:$0xff] }
 0x4e9   : > { %42001 = vmatprep.subr.bf16.mxu0 %v42000_v60  ;;  %v20604_v31 = vsub.f32 %v49135_v23, %v49143_v45  ;;  %v21793_v14 = vand.u32 4294901760, %v32198_v52 }
 0x4ea   : > { %v20594_v62 = vsub.f32 %v49139_v7, %v49153_v38 }
 0x4eb   : > { %v49166_v30 = vand.u32 4294901760, %v20604_v31  ;;  %v21799_v31 = vand.u32 4294901760, %v32200_v49 }
 0x4ec   : > { %42003 = vmatpush3.bf16.msra.mxu0 %v42000_v60  ;;  %v20595_v36 = vand.u32 4294901760, %v20594_v62  ;;  %v49180_v60 = vpack.c.bf16 %v21793_v14, %v21790_v50  ;;  %v32201_v62 = vld [vmem:[%s53411_s5 + $0x98] sm:$0xff]  ;;  %v49217_v50 = vsub.f32 %v32199_v12, %v21796_v4 }
 0x4ed   : > { %42005 = vmatprep.subr.bf16.mxu0 %v49093_v59  ;;  %v49197_v35 = vpack.c.bf16 %v21799_v31, %v21796_v4  ;;  %v21802_v1 = vand.u32 4294901760, %v32201_v62 }
 0x4ee   : > { %37820 = vmatprep.mubr.f32.mxu1 %v20595_v36  ;;  %v21918_v4 = vand.u32 4294901760, %v49217_v50 }
 0x4ef   : > { %37821 = vmatmul.mubr.f32.vlgmr.msra.gmra.mrb[6].mxu1 %v49166_v30  ;;  %v49247_v2 = vsub.f32 %v32201_v62, %v21802_v1 }
 0x4f0   : > { %42007 = vmatpush3.bf16.msra.mxu0 %v49093_v59  ;;  %42199 = vmatpush3.bf16.msra.mxu1 %v49095_v46  ;;  %v49191_v59 = vsub.f32 %v32195_v18, %v21784_v9  ;;  %v49212_v9 = vpack.c.bf16 %v21805_v57, %v21802_v1  ;;  %v21919_v21 = vsub.f32 %v49217_v50, %v21918_v4  ;;  %v21939_v57 = vand.u32 4294901760, %v49249_v37 }
 0x4f1   : > { %38120 = vmatprep.mubr.f32.mxu1 %v20595_v36  ;;  %42009 = vmatprep.subr.bf16.mxu0 %v49100_v34  ;;  %v49193_v36 = vsub.f32 %v32196_v33, %v21787_v19  ;;  %v21775_v19 = vsel %vm19385_vm6, %v32203_v27, 0  ;;  %v21932_v55 = vand.u32 4294901760, %v49247_v2 }
 0x4f2   : > { %42201 = vmatprep.subr.bf16.mxu1 %v49168_v41  ;;  %v53429_v18 = vand.u32 4294901760, %v49191_v59  ;;  %v49231_v12 = vand.u32 4294901760, %v21775_v19 }
 0x4f3   : > { %v53428_v33 = vand.u32 4294901760, %v49193_v36 }
 0x4f4   : > { %42011 = vmatpush3.bf16.msra.mxu0 %v49100_v34  ;;  %42203 = vmatpush3.bf16.msra.mxu1 %v49168_v41  ;;  %v49204_v34 = vsub.f32 %v32198_v52, %v21793_v14  ;;  %v21891_v14 = vsub.f32 %v49191_v59, %v53429_v18 }
 0x4f5   : > { %42013 = vmatprep.subr.bf16.mxu0 %v49104_v56  ;;  %42205 = vmatprep.subr.bf16.mxu1 %v49180_v60  ;;  %v21898_v27 = vsub.f32 %v49193_v36, %v53428_v33 }
 0x4f6   : > { %v53433_v52 = vand.u32 4294901760, %v49204_v34  ;;  %v21892_v33 = vand.u32 4294901760, %v21891_v14 }
 0x4f7   : > { %v21899_v18 = vand.u32 4294901760, %v21898_v27  ;;  %v21920_v27 = vand.u32 4294901760, %v21919_v21 }
 0x4f8   : > { %42015 = vmatpush3.bf16.msra.mxu0 %v49104_v56  ;;  %42207 = vmatpush3.bf16.msra.mxu1 %v49180_v60  ;;  %v49219_v56 = vsub.f32 %v32200_v49, %v21799_v31  ;;  %v21912_v49 = vsub.f32 %v49204_v34, %v53433_v52 }
 0x4f9   : > { %37868 = vmatprep.subr.mxu0 %v49065_v0  ;;  %42209 = vmatprep.subr.bf16.mxu1 %v49197_v35  ;;  %v42220_v1 = vpack.c.bf16 %v21899_v18, %v21892_v33  ;;  %v49269_v18 = vsub.f32 %v21775_v19, %v49231_v12  ;;  %v21940_v33 = vsub.f32 %v49249_v37, %v21939_v57 }
 0x4fa   : > { %v21925_v31 = vand.u32 4294901760, %v49219_v56  ;;  %v21913_v52 = vand.u32 4294901760, %v21912_v49  ;;  %v42248_v20 = vpack.c.bf16 %v49219_v56, %v49217_v50 }
 0x4fc   : > { %37869 = vmatpush3.msra.mxu0 %v49065_v0  ;;  %42211 = vmatpush3.bf16.msra.mxu1 %v49197_v35  ;;  %v21905_v0 = vsub.f32 %v49202_v39, %v53432_v26  ;;  %v21926_v14 = vsub.f32 %v49219_v56, %v21925_v31 }
 0x4fd   : > { %37871 = vmatmul.mubr.f32.vlgmr.msra.gmra.mrb[6].mxu0 %v49135_v23  ;;  %42017 = vmatprep.subr.bf16.mxu0 %v48963_v53 }
 0x4fe   : > { %42019 = vmatpush3.bf16.msra.mxu0 %v48963_v53  ;;  %37895 = vmatprep.mubr.f32.mxu0 %v49153_v38  ;;  %v21906_v26 = vand.u32 4294901760, %v21905_v0  ;;  %v21927_v0 = vand.u32 4294901760, %v21926_v14 }
 0x4ff   : > { %42213 = vmatprep.subr.bf16.mxu1 %v49212_v9  ;;  %42021 = vmatprep.subr.bf16.mxu0 %v49047_v15 }
 0x500   : > { %42215 = vmatpush3.bf16.msra.mxu1 %v49212_v9  ;;  %v42224_v62 = vpack.c.bf16 %v21913_v52, %v21906_v26  ;;  %v42228_v21 = vpack.c.bf16 %v21927_v0, %v21920_v27  ;;  %v21941_v26 = vand.u32 4294901760, %v21940_v33  ;;  %v42036_v52 = vpack.c.bf16 %v20621_v8, %v20614_v51  ;;  %v20475_v33 = vld [vmem:[%s53410_s4 + $0x28] sm:$0xff] }
 0x501   : > { %38118 = vmatprep.subr.mxu1 %v49231_v12  ;;  %v42044_v51 = vpack.c.bf16 %v53587_v63, %v53586_v42  ;;  %v53588_v8 = vand.u32 4294901760, %v49019_v3  ;;  %v42244_v3 = vpack.c.bf16 %v49204_v34, %v49202_v39 }
 0x502   : > { %42023 = vmatpush3.bf16.msra.mxu0 %v49047_v15 }
 0x503   : > { %42025 = vmatprep.subr.bf16.mxu0 %v49055_v22  ;;  %v42048_v11 = vpack.c.bf16 %v53589_v54, %v53588_v8  ;;  %v20478_v8 = vld [vmem:[%s53410_s4 + $0x40] sm:$0xff]  ;;  %v20479_v54 = vld [vmem:[%s53410_s4 + $0x48] sm:$0xff] }
 0x504   : > { %38119 = vmatpush3.msra.mxu1 %v49231_v12 }
 0x505   : > { %38121 = vmatmul.mubr.f32.vlgmr.msra.gmra.mrb[8].mxu1 %v49166_v30  ;;  %42217 = vmatprep.subr.bf16.mxu1 %v49118_v25  ;;  %v21933_v30 = vsub.f32 %v49247_v2, %v21932_v55 }
 0x506   : > { %42027 = vmatpush3.bf16.msra.mxu0 %v49055_v22  ;;  %42219 = vmatpush3.bf16.msra.mxu1 %v49118_v25  ;;  %v49280_v25 = vand.u32 4294901760, %v49269_v18 }
 0x507   : > { %38145 = vmatprep.mubr.f32.mxu1 %v49132_v13  ;;  %42029 = vmatprep.subr.bf16.mxu0 %v49061_v28  ;;  %v21934_v19 = vand.u32 4294901760, %v21933_v30  ;;  %v20474_v30 = vld [vmem:[%s53410_s4 + $0x20] sm:$0xff] }
 0x508   : > { %42221 = vmatprep.subr.bf16.mxu1 %v42220_v1  ;;  %v21947_v49 = vsub.f32 %v49269_v18, %v49280_v25 }
 0x509   : > { %v42232_v14 = vpack.c.bf16 %v21941_v26, %v21934_v19  ;;  %v21156_v26 = vand.u32 4294901760, %v20474_v30 }
 0x50a   : > { %42031 = vmatpush3.bf16.msra.mxu0 %v49061_v28  ;;  %42223 = vmatpush3.bf16.msra.mxu1 %v42220_v1  ;;  %v42040_v1 = vpack.c.bf16 %v20635_v10, %v20628_v58  ;;  %v42240_v58 = vpack.c.bf16 %v49193_v36, %v49191_v59  ;;  %v53590_v10 = vand.u32 4294901760, %v49031_v47  ;;  %v42252_v47 = vpack.c.bf16 %v49249_v37, %v49247_v2 }
 0x50b   : > { %42033 = vmatprep.subr.bf16.mxu0 %v49071_v61  ;;  %42225 = vmatprep.subr.bf16.mxu1 %v42224_v62 }
 0x50c   : > { %v42052_v6 = vpack.c.bf16 %v53591_v5, %v53590_v10 }
 0x50e   : > { %42035 = vmatpush3.bf16.msra.mxu0 %v49071_v61  ;;  %42227 = vmatpush3.bf16.msra.mxu1 %v42224_v62  ;;  %v21948_v62 = vand.u32 4294901760, %v21947_v49 }
 0x50f   : > { %37893 = vmatprep.subr.mxu0 %v49058_v48  ;;  %42229 = vmatprep.subr.bf16.mxu1 %v42228_v21 }
 0x512   : > { %37894 = vmatpush3.msra.mxu0 %v49058_v48  ;;  %42231 = vmatpush3.bf16.msra.mxu1 %v42228_v21 }
 0x513   : > { %37896 = vmatmul.mubr.f32.vlgmr.msra.gmra.mrb[6].mxu0 %v49143_v45  ;;  %42037 = vmatprep.subr.bf16.mxu0 %v42036_v52 }
 0x514   : > { %42039 = vmatpush3.bf16.msra.mxu0 %v42036_v52  ;;  %37920 = vmatprep.mubr.f32.mxu0 %v49132_v13  ;;  %v21159_v52 = vand.u32 4294901760, %v20475_v33 }
 0x515   : > { %42233 = vmatprep.subr.bf16.mxu1 %v42232_v14  ;;  %42041 = vmatprep.subr.bf16.mxu0 %v42040_v1 }
 0x516   : > { %42235 = vmatpush3.bf16.msra.mxu1 %v42232_v14  ;;  %v20476_v14 = vld [vmem:[%s53410_s4 + $0x30] sm:$0xff]  ;;  %v49394_v42 = vpack.c.bf16 %v21159_v52, %v21156_v26 }
 0x517   : > { %38143 = vmatprep.subr.mxu1 %v21948_v62  ;;  %v21162_v63 = vand.u32 4294901760, %v20476_v14 }
 0x518   : > { %42043 = vmatpush3.bf16.msra.mxu0 %v42040_v1 }
 0x519   : > { %42045 = vmatprep.subr.bf16.mxu0 %v42044_v51 }
 0x51a   : > { %38144 = vmatpush3.msra.mxu1 %v21948_v62  ;;  %v20477_v62 = vld [vmem:[%s53410_s4 + $0x38] sm:$0xff] }
 0x51b   : > { %38146 = vmatmul.mubr.f32.vlgmr.msra.gmra.mrb[8].mxu1 %v49130_v44  ;;  %42237 = vmatprep.subr.bf16.mxu1 %v49122_v32 }
 0x51c   : > { %42047 = vmatpush3.bf16.msra.mxu0 %v42044_v51  ;;  %42239 = vmatpush3.bf16.msra.mxu1 %v49122_v32  ;;  %v21135_v32 = vsel %vm20464_vm8, %v20468_v17, 0  ;;  %v21165_v51 = vand.u32 4294901760, %v20477_v62  ;;  %v21168_v17 = vand.u32 4294901760, %v20478_v8 }
 0x51d   : > { %38170 = vmatprep.mubr.f32.mxu1 %v49139_v7  ;;  %42049 = vmatprep.subr.bf16.mxu0 %v42048_v11  ;;  %v20472_v7 = vld [vmem:[%s53410_s4 + $0x10] sm:$0xff] }
 0x51e   : > { %42241 = vmatprep.subr.bf16.mxu1 %v42240_v58 }
 0x520   : > { %42051 = vmatpush3.bf16.msra.mxu0 %v42048_v11  ;;  %42243 = vmatpush3.bf16.msra.mxu1 %v42240_v58 }
 0x521   : > { %42053 = vmatprep.subr.bf16.mxu0 %v42052_v6  ;;  %42245 = vmatprep.subr.bf16.mxu1 %v42244_v3 }
 0x524   : > { %42055 = vmatpush3.bf16.msra.mxu0 %v42052_v6  ;;  %42247 = vmatpush3.bf16.msra.mxu1 %v42244_v3  ;;  %v53592_v6 = vand.u32 4294901760, %v49106_v16  ;;  %v53593_v3 = vand.u32 4294901760, %v49108_v43  ;;  %v53594_v16 = vand.u32 4294901760, %v49191_v59  ;;  %v53595_v43 = vand.u32 4294901760, %v49193_v36 }
 0x525   : > { %37918 = vmatprep.subr.mxu0 %v49068_v24  ;;  %42249 = vmatprep.subr.bf16.mxu1 %v42248_v20  ;;  %v53596_v36 = vand.u32 4294901760, %v49202_v39 }
 0x528   : > { %37919 = vmatpush3.msra.mxu0 %v49068_v24  ;;  %42251 = vmatpush3.bf16.msra.mxu1 %v42248_v20  ;;  %v49331_v24 = vand.u32 4294901760, %v21135_v32  ;;  %v42276_v20 = vpack.c.bf16 %v53593_v3, %v53592_v6  ;;  %v53597_v6 = vand.u32 4294901760, %v49204_v34 }
 0x529   : > { %37921 = vmatmul.mubr.f32.vlgmr.msra.gmra.mrb[6].mxu0 %v49130_v44  ;;  %42057 = vmatprep.subr.bf16.mxu0 %v48963_v53 }
 0x52a   : > { %42059 = vmatpush3.bf16.msra.mxu0 %v48963_v53  ;;  %37945 = vmatprep.mubr.f32.mxu0 %v49132_v13  ;;  %v49340_v53 = vsub.f32 %v21135_v32, %v49331_v24  ;;  %v21171_v32 = vand.u32 4294901760, %v20479_v54  ;;  %v42284_v3 = vpack.c.bf16 %v53597_v6, %v53596_v36 }
 0x52b   : > { %42253 = vmatprep.subr.bf16.mxu1 %v42252_v47  ;;  %42061 = vmatprep.subr.bf16.mxu0 %v49047_v15 }
 0x52c   : > { %42255 = vmatpush3.bf16.msra.mxu1 %v42252_v47  ;;  %v49446_v59 = vpack.c.bf16 %v21171_v32, %v21168_v17 }
 0x52d   : > { %38168 = vmatprep.subr.mxu1 %v49269_v18 }
 0x52e   : > { %42063 = vmatpush3.bf16.msra.mxu0 %v49047_v15  ;;  %v20470_v15 = vld [vmem:[%s53410_s4] sm:$0xff] }
 0x52f   : > { %42065 = vmatprep.subr.bf16.mxu0 %v49055_v22  ;;  %v21144_v27 = vand.u32 4294901760, %v20470_v15 }
 0x530   : > { %38169 = vmatpush3.msra.mxu1 %v49269_v18 }
 0x531   : > { %38171 = vmatmul.mubr.f32.vlgmr.msra.gmra.mrb[8].mxu1 %v49135_v23  ;;  %42257 = vmatprep.subr.bf16.mxu1 %v49095_v46  ;;  %v20471_v23 = vld [vmem:[%s53410_s4 + $0x8] sm:$0xff]  ;;  %v49405_v11 = vsub.f32 %v20470_v15, %v21144_v27  ;;  %v49423_v15 = vpack.c.bf16 %v21165_v51, %v21162_v63 }
 0x532   : > { %42067 = vmatpush3.bf16.msra.mxu0 %v49055_v22  ;;  %42259 = vmatpush3.bf16.msra.mxu1 %v49095_v46  ;;  %v49354_v22 = vand.u32 4294901760, %v49340_v53  ;;  %v21147_v0 = vand.u32 4294901760, %v20471_v23 }
 0x533   : > { %38195 = vmatprep.mubr.f32.mxu1 %v49153_v38  ;;  %42069 = vmatprep.subr.bf16.mxu0 %v49061_v28  ;;  %v20473_v38 = vld [vmem:[%s53410_s4 + $0x18] sm:$0xff] }
 0x534   : > { %42261 = vmatprep.subr.bf16.mxu1 %v49168_v41  ;;  %v21153_v18 = vand.u32 4294901760, %v20473_v38  ;;  %v21222_v21 = vsub.f32 %v49340_v53, %v49354_v22  ;;  %v49376_v19 = vpack.c.bf16 %v21147_v0, %v21144_v27  ;;  %v49407_v58 = vsub.f32 %v20471_v23, %v21147_v0  ;;  %v20480_v0 = vld [vmem:[%s53410_s4 + $0x50] sm:$0xf] }
 0x535   : > { %v21242_v23 = vand.u32 4294901760, %v49405_v11  ;;  %v42280_v27 = vpack.c.bf16 %v53595_v43, %v53594_v16  ;;  %v49474_v16 = vsub.f32 %v20477_v62, %v21165_v51  ;;  %v42288_v43 = vpack.c.bf16 %v21925_v31, %v21918_v4 }
 0x536   : > { %42071 = vmatpush3.bf16.msra.mxu0 %v49061_v28  ;;  %42263 = vmatpush3.bf16.msra.mxu1 %v49168_v41  ;;  %v21150_v28 = vand.u32 4294901760, %v20472_v7  ;;  %v49385_v1 = vand.u32 4294901760, %v21222_v21  ;;  %v49412_v5 = vsub.f32 %v20473_v38, %v21153_v18  ;;  %v49439_v21 = vsub.f32 %v20475_v33, %v21159_v52 }
 0x537   : > { %42073 = vmatprep.subr.bf16.mxu0 %v49071_v61  ;;  %42265 = vmatprep.subr.bf16.mxu1 %v49180_v60  ;;  %v53438_v31 = vand.u32 4294901760, %v49474_v16  ;;  %v49494_v51 = vsub.f32 %v20478_v8, %v21168_v17 }
 0x538   : > { %v49378_v49 = vpack.c.bf16 %v21153_v18, %v21150_v28  ;;  %v49409_v10 = vsub.f32 %v20472_v7, %v21150_v28  ;;  %v21249_v7 = vand.u32 4294901760, %v49407_v58  ;;  %v53447_v28 = vand.u32 4294901760, %v49412_v5 }
 0x539   : > { %v49437_v18 = vsub.f32 %v20474_v30, %v21156_v26  ;;  %v21243_v30 = vsub.f32 %v49405_v11, %v21242_v23  ;;  %v53435_v52 = vand.u32 4294901760, %v49439_v21  ;;  %v21292_v17 = vsub.f32 %v49474_v16, %v53438_v31 }
 0x53a   : > { %42075 = vmatpush3.bf16.msra.mxu0 %v49071_v61  ;;  %42267 = vmatpush3.bf16.msra.mxu1 %v49180_v60  ;;  %v20469_v61 = vld [vmem:[#allocation2 + $0x8] sm:$0x3]  ;;  %v21256_v38 = vand.u32 4294901760, %v49409_v10  ;;  %v21250_v33 = vsub.f32 %v49407_v58, %v21249_v7  ;;  %v21264_v34 = vsub.f32 %v49412_v5, %v53447_v28 }
 0x53b   : > { %37943 = vmatprep.subr.mxu0 %v49058_v48  ;;  %42269 = vmatprep.subr.bf16.mxu1 %v49197_v35  ;;  %v53444_v26 = vand.u32 4294901760, %v49437_v18  ;;  %v21278_v50 = vsub.f32 %v49439_v21, %v53435_v52 }
 0x53c   : > { %v21257_v39 = vsub.f32 %v49409_v10, %v21256_v38  ;;  %v21265_v6 = vand.u32 4294901760, %v21264_v34 }
 0x53d   : > { %v21271_v62 = vsub.f32 %v49437_v18, %v53444_v26  ;;  %v21279_v52 = vand.u32 4294901760, %v21278_v50  ;;  %v42120_v50 = vpack.c.bf16 %v49412_v5, %v49409_v10 }
 0x53e   : > { %37944 = vmatpush3.msra.mxu0 %v49058_v48  ;;  %42271 = vmatpush3.bf16.msra.mxu1 %v49197_v35  ;;  %v21138_v48 = vsel %vm20464_vm8, %v20469_v61, 0  ;;  %v21258_v36 = vand.u32 4294901760, %v21257_v39 }
 0x53f   : > { %37946 = vmatmul.mubr.f32.vlgmr.msra.gmra.mrb[6].mxu0 %v49130_v44  ;;  %42077 = vmatprep.subr.bf16.mxu0 %v49376_v19  ;;  %v49419_v47 = vand.u32 4294901760, %v21138_v48  ;;  %v21272_v34 = vand.u32 4294901760, %v21271_v62 }
 0x540   : > { %42079 = vmatpush3.bf16.msra.mxu0 %v49376_v19  ;;  %37970 = vmatprep.mubr.f32.mxu0 %v49385_v1  ;;  %v42100_v39 = vpack.c.bf16 %v21265_v6, %v21258_v36 }
 0x541   : > { %42273 = vmatprep.subr.bf16.mxu1 %v49212_v9  ;;  %42081 = vmatprep.subr.bf16.mxu0 %v49378_v49  ;;  %v49443_v61 = vsub.f32 %v21138_v48, %v49419_v47  ;;  %v49469_v48 = vsub.f32 %v20476_v14, %v21162_v63  ;;  %v21244_v14 = vand.u32 4294901760, %v21243_v30  ;;  %v21251_v63 = vand.u32 4294901760, %v21250_v33 }
 0x542   : > { %42275 = vmatpush3.bf16.msra.mxu1 %v49212_v9  ;;  %v42292_v33 = vpack.c.bf16 %v21939_v57, %v21932_v55  ;;  %v42104_v37 = vpack.c.bf16 %v21279_v52, %v21272_v34  ;;  %v21293_v57 = vand.u32 4294901760, %v21292_v17  ;;  %v20486_v34 = vld [vmem:[%s53411_s5 + $0x28] sm:$0xff] }
 0x543   : > { %38193 = vmatprep.subr.mxu1 %v49231_v12  ;;  %v53443_v56 = vand.u32 4294901760, %v49469_v48  ;;  %v42096_v30 = vpack.c.bf16 %v21251_v63, %v21244_v14 }
 0x544   : > { %42083 = vmatpush3.bf16.msra.mxu0 %v49378_v49 }
 0x545   : > { %42085 = vmatprep.subr.bf16.mxu0 %v49394_v42  ;;  %v21285_v8 = vsub.f32 %v49469_v48, %v53443_v56 }
 0x546   : > { %38194 = vmatpush3.msra.mxu1 %v49231_v12 }
 0x547   : > { %38196 = vmatmul.mubr.f32.vlgmr.msra.gmra.mrb[8].mxu1 %v49143_v45  ;;  %42277 = vmatprep.subr.bf16.mxu1 %v42276_v20  ;;  %v21141_v45 = vsel %vm19385_vm6, %v20480_v0, 0  ;;  %v21286_v55 = vand.u32 4294901760, %v21285_v8 }
 0x548   : > { %42087 = vmatpush3.bf16.msra.mxu0 %v49394_v42  ;;  %42279 = vmatpush3.bf16.msra.mxu1 %v42276_v20  ;;  %v49472_v20 = vand.u32 4294901760, %v49443_v61  ;;  %v49482_v0 = vand.u32 4294901760, %v21141_v45 }
 0x549   : > { %38220 = vmatprep.mubr.f32.mxu1 %v49132_v13  ;;  %42089 = vmatprep.subr.bf16.mxu0 %v49423_v15  ;;  %v42108_v52 = vpack.c.bf16 %v21293_v57, %v21286_v55  ;;  %v22415_v57 = vand.u32 4294901760, %v20486_v34 }
 0x54a   : > { %42281 = vmatprep.subr.bf16.mxu1 %v42280_v27  ;;  %v21232_v4 = vsub.f32 %v49443_v61, %v49472_v20 }
 0x54c   : > { %42091 = vmatpush3.bf16.msra.mxu0 %v49423_v15  ;;  %42283 = vmatpush3.bf16.msra.mxu1 %v42280_v27  ;;  %v49496_v27 = vsub.f32 %v20479_v54, %v21171_v32  ;;  %v49507_v54 = vand.u32 4294901760, %v21232_v4  ;;  %v53437_v32 = vand.u32 4294901760, %v49494_v51 }
 0x54d   : > { %42093 = vmatprep.subr.bf16.mxu0 %v49446_v59  ;;  %42285 = vmatprep.subr.bf16.mxu1 %v42284_v3 }
 0x54e   : > { %v53436_v2 = vand.u32 4294901760, %v49496_v27 }
 0x550   : > { %42095 = vmatpush3.bf16.msra.mxu0 %v49446_v59  ;;  %42287 = vmatpush3.bf16.msra.mxu1 %v42284_v3  ;;  %v21299_v3 = vsub.f32 %v49494_v51, %v53437_v32  ;;  %v21306_v14 = vsub.f32 %v49496_v27, %v53436_v2 }
 0x551   : > { %37968 = vmatprep.subr.mxu0 %v49482_v0  ;;  %42289 = vmatprep.subr.bf16.mxu1 %v42288_v43 }
 0x552   : > { %v21300_v63 = vand.u32 4294901760, %v21299_v3  ;;  %v21307_v36 = vand.u32 4294901760, %v21306_v14  ;;  %v42128_v3 = vpack.c.bf16 %v49474_v16, %v49469_v48 }
 0x554   : > { %37969 = vmatpush3.msra.mxu0 %v49482_v0  ;;  %42291 = vmatpush3.bf16.msra.mxu1 %v42288_v43  ;;  %v49524_v43 = vsub.f32 %v21141_v45, %v49482_v0  ;;  %v42112_v45 = vpack.c.bf16 %v21307_v36, %v21300_v63 }
 0x555   : > { %37971 = vmatmul.mubr.f32.vlgmr.msra.gmra.mrb[6].mxu0 %v49507_v54  ;;  %42097 = vmatprep.subr.bf16.mxu0 %v42096_v30 }
 0x556   : > { %42099 = vmatpush3.bf16.msra.mxu0 %v42096_v30  ;;  %37995 = vmatprep.mubr.f32.mxu0 %v49331_v24  ;;  %v49528_v6 = vand.u32 4294901760, %v49524_v43  ;;  %v20483_v30 = vld [vmem:[%s53411_s5 + $0x10] sm:$0xff] }
 0x557   : > { %42293 = vmatprep.subr.bf16.mxu1 %v42292_v33  ;;  %42101 = vmatprep.subr.bf16.mxu0 %v42100_v39  ;;  %v22406_v8 = vand.u32 4294901760, %v20483_v30 }
 0x558   : > { %42295 = vmatpush3.bf16.msra.mxu1 %v42292_v33  ;;  %v21313_v62 = vsub.f32 %v49524_v43, %v49528_v6  ;;  %v20484_v33 = vld [vmem:[%s53411_s5 + $0x18] sm:$0xff] }
 0x559   : > { %38218 = vmatprep.subr.mxu1 %v49280_v25  ;;  %v22409_v17 = vand.u32 4294901760, %v20484_v33 }
 0x55a   : > { %42103 = vmatpush3.bf16.msra.mxu0 %v42100_v39  ;;  %v20485_v39 = vld [vmem:[%s53411_s5 + $0x20] sm:$0xff] }
 0x55b   : > { %42105 = vmatprep.subr.bf16.mxu0 %v42104_v37  ;;  %v22412_v55 = vand.u32 4294901760, %v20485_v39  ;;  %v49577_v14 = vpack.c.bf16 %v22409_v17, %v22406_v8 }
 0x55c   : > { %38219 = vmatpush3.msra.mxu1 %v49280_v25  ;;  %v21314_v25 = vand.u32 4294901760, %v21313_v62 }
 0x55d   : > { %38221 = vmatmul.mubr.f32.vlgmr.msra.gmra.mrb[8].mxu1 %v49130_v44  ;;  %42297 = vmatprep.subr.bf16.mxu1 %v49095_v46  ;;  %v49590_v63 = vpack.c.bf16 %v22415_v57, %v22412_v55  ;;  %v49617_v2 = vsub.f32 %v20485_v39, %v22412_v55 }
 0x55e   : > { %42107 = vmatpush3.bf16.msra.mxu0 %v42104_v37  ;;  %42299 = vmatpush3.bf16.msra.mxu1 %v49095_v46  ;;  %v42116_v46 = vpack.c.bf16 %v49407_v58, %v49405_v11  ;;  %v53599_v11 = vand.u32 4294901760, %v49437_v18  ;;  %v53600_v58 = vand.u32 4294901760, %v49439_v21 }
 0x55f   : > { %38245 = vmatprep.mubr.f32.mxu1 %v49132_v13  ;;  %42109 = vmatprep.subr.bf16.mxu0 %v42108_v52  ;;  %v20481_v13 = vld [vmem:[%s53411_s5] sm:$0xff] }
 0x560   : > { %42301 = vmatprep.subr.bf16.mxu1 %v49168_v41  ;;  %v42164_v10 = vpack.c.bf16 %v53600_v58, %v53599_v11  ;;  %v32210_v11 = vld [vmem:[%s53410_s4 + $0xe0] sm:$0xff]  ;;  %v32211_v58 = vld [vmem:[%s53410_s4 + $0xe8] sm:$0xff] }
 0x562   : > { %42111 = vmatpush3.bf16.msra.mxu0 %v42108_v52  ;;  %42303 = vmatpush3.bf16.msra.mxu1 %v49168_v41  ;;  %v20482_v41 = vld [vmem:[%s53411_s5 + $0x8] sm:$0xff]  ;;  %v20488_v52 = vld [vmem:[%s53411_s5 + $0x38] sm:$0xff] }
 0x563   : > { %42113 = vmatprep.subr.bf16.mxu0 %v42112_v45  ;;  %42305 = vmatprep.subr.bf16.mxu1 %v49180_v60  ;;  %v22403_v4 = vand.u32 4294901760, %v20482_v41 }
 0x566   : > { %42115 = vmatpush3.bf16.msra.mxu0 %v42112_v45  ;;  %42307 = vmatpush3.bf16.msra.mxu1 %v49180_v60  ;;  %v22400_v60 = vand.u32 4294901760, %v20481_v13  ;;  %v22421_v45 = vand.u32 4294901760, %v20488_v52 }
 0x567   : > { %37993 = vmatprep.subr.mxu0 %v21314_v25  ;;  %42309 = vmatprep.subr.bf16.mxu1 %v49197_v35 }
 0x568   : > { %v49572_v37 = vpack.c.bf16 %v22403_v4, %v22400_v60  ;;  %v49593_v62 = vsub.f32 %v20481_v13, %v22400_v60  ;;  %v49639_v31 = vsub.f32 %v20488_v52, %v22421_v45 }
 0x56a   : > { %37994 = vmatpush3.msra.mxu0 %v21314_v25  ;;  %42311 = vmatpush3.bf16.msra.mxu1 %v49197_v35  ;;  %v42124_v35 = vpack.c.bf16 %v49439_v21, %v49437_v18  ;;  %v49595_v25 = vsub.f32 %v20482_v41, %v22403_v4  ;;  %v53442_v41 = vand.u32 4294901760, %v49593_v62  ;;  %v53603_v18 = vand.u32 4294901760, %v49494_v51 }
 0x56b   : > { %37996 = vmatmul.mubr.f32.vlgmr.msra.gmra.mrb[6].mxu0 %v49419_v47  ;;  %42117 = vmatprep.subr.bf16.mxu0 %v42116_v46  ;;  %v53604_v21 = vand.u32 4294901760, %v49496_v27 }
 0x56c   : > { %42119 = vmatpush3.bf16.msra.mxu0 %v42116_v46  ;;  %38020 = vmatprep.mubr.f32.mxu0 %v49340_v53  ;;  %v20490_v46 = vld [vmem:[%s53411_s5 + $0x48] sm:$0xff]  ;;  %v53439_v60 = vand.u32 4294901760, %v49595_v25 }
 0x56d   : > { %42313 = vmatprep.subr.bf16.mxu1 %v49212_v9  ;;  %42121 = vmatprep.subr.bf16.mxu0 %v42120_v50 }
 0x56e   : > { %42315 = vmatpush3.bf16.msra.mxu1 %v49212_v9  ;;  %v20487_v9 = vld [vmem:[%s53411_s5 + $0x30] sm:$0xff]  ;;  %v22506_v39 = vsub.f32 %v49595_v25, %v53439_v60 }
 0x56f   : > { %38243 = vmatprep.subr.mxu1 %v49231_v12  ;;  %v22418_v36 = vand.u32 4294901760, %v20487_v9 }
 0x570   : > { %42123 = vmatpush3.bf16.msra.mxu0 %v42120_v50  ;;  %v49607_v50 = vsub.f32 %v20484_v33, %v22409_v17  ;;  %v22499_v17 = vsub.f32 %v49593_v62, %v53442_v41 }
 0x571   : > { %42125 = vmatprep.subr.bf16.mxu0 %v42124_v35  ;;  %v49610_v13 = vpack.c.bf16 %v22421_v45, %v22418_v36  ;;  %v49637_v32 = vsub.f32 %v20487_v9, %v22418_v36  ;;  %v22507_v36 = vand.u32 4294901760, %v22506_v39 }
 0x572   : > { %38244 = vmatpush3.msra.mxu1 %v49231_v12  ;;  %v42132_v12 = vpack.c.bf16 %v49496_v27, %v49494_v51  ;;  %v22500_v52 = vand.u32 4294901760, %v22499_v17  ;;  %v22547_v17 = vand.u32 4294901760, %v49639_v31  ;;  %v23018_v51 = vld [vmem:[#allocation2 + $0x2] sm:$0xff] }
 0x573   : > { %38246 = vmatmul.mubr.f32.vlgmr.msra.gmra.mrb[8].mxu1 %v49130_v44  ;;  %42317 = vmatprep.subr.bf16.mxu1 %v49572_v37  ;;  %v20489_v44 = vld [vmem:[%s53411_s5 + $0x40] sm:$0xff]  ;;  %v23033_v27 = vsel %vm20464_vm8, %v23018_v51, 0 }
 0x574   : > { %42127 = vmatpush3.bf16.msra.mxu0 %v42124_v35  ;;  %42319 = vmatpush3.bf16.msra.mxu1 %v49572_v37  ;;  %v22424_v4 = vand.u32 4294901760, %v20489_v44  ;;  %v22427_v35 = vand.u32 4294901760, %v20490_v46  ;;  %v42336_v41 = vpack.c.bf16 %v22507_v36, %v22500_v52 }
 0x575   : > { %38270 = vmatprep.mubr.f32.mxu1 %v49385_v1  ;;  %42129 = vmatprep.subr.bf16.mxu0 %v42128_v3  ;;  %v49605_v1 = vsub.f32 %v20483_v30, %v22406_v8  ;;  %v49619_v30 = vsub.f32 %v20486_v34, %v22415_v57  ;;  %v53440_v8 = vand.u32 4294901760, %v49607_v50  ;;  %v53446_v57 = vand.u32 4294901760, %v49617_v2 }
 0x576   : > { %42321 = vmatprep.subr.bf16.mxu1 %v49577_v14  ;;  %v49632_v34 = vpack.c.bf16 %v22427_v35, %v22424_v4  ;;  %v49667_v56 = vsub.f32 %v20489_v44, %v22424_v4  ;;  %v49669_v26 = vsub.f32 %v20490_v46, %v22427_v35 }
 0x577   : > { %v53441_v33 = vand.u32 4294901760, %v49605_v1 }
 0x578   : > { %42131 = vmatpush3.bf16.msra.mxu0 %v42128_v3  ;;  %42323 = vmatpush3.bf16.msra.mxu1 %v49577_v14  ;;  %v20491_v3 = vld [vmem:[%s53411_s5 + $0x50] sm:$0xf]  ;;  %v22554_v46 = vand.u32 4294901760, %v49667_v56  ;;  %v22561_v4 = vand.u32 4294901760, %v49669_v26 }
 0x579   : > { %42133 = vmatprep.subr.bf16.mxu0 %v42132_v12  ;;  %42325 = vmatprep.subr.bf16.mxu1 %v49590_v63  ;;  %v22397_v55 = vsel %vm19385_vm6, %v20491_v3, 0  ;;  %v22513_v60 = vsub.f32 %v49605_v1, %v53441_v33  ;;  %v22520_v3 = vsub.f32 %v49607_v50, %v53440_v8  ;;  %v22540_v8 = vand.u32 4294901760, %v49637_v32 }
 0x57a   : > { %v49651_v9 = vand.u32 4294901760, %v22397_v55 }
 0x57b   : > { %v22514_v39 = vand.u32 4294901760, %v22513_v60  ;;  %v22521_v33 = vand.u32 4294901760, %v22520_v3  ;;  %v22541_v28 = vsub.f32 %v49637_v32, %v22540_v8  ;;  %v22548_v60 = vsub.f32 %v49639_v31, %v22547_v17 }
 0x57c   : > { %42135 = vmatpush3.bf16.msra.mxu0 %v42132_v12  ;;  %42327 = vmatpush3.bf16.msra.mxu1 %v49590_v63  ;;  %v53445_v12 = vand.u32 4294901760, %v49619_v30  ;;  %v49687_v36 = vsub.f32 %v22397_v55, %v49651_v9 }
 0x57d   : > { %38018 = vmatprep.subr.mxu0 %v49524_v43  ;;  %42329 = vmatprep.subr.bf16.mxu1 %v49610_v13  ;;  %v42340_v44 = vpack.c.bf16 %v22521_v33, %v22514_v39  ;;  %v22542_v3 = vand.u32 4294901760, %v22541_v28  ;;  %v22549_v52 = vand.u32 4294901760, %v22548_v60  ;;  %v22562_v33 = vsub.f32 %v49669_v26, %v22561_v4 }
 0x57e   : > { %v22534_v45 = vsub.f32 %v49619_v30, %v53445_v12  ;;  %v53598_v39 = vand.u32 4294901760, %v49412_v5  ;;  %v42356_v5 = vpack.c.bf16 %v49595_v25, %v49593_v62 }
 0x57f   : > { %v42348_v28 = vpack.c.bf16 %v22549_v52, %v22542_v3  ;;  %v42368_v3 = vpack.c.bf16 %v49639_v31, %v49637_v32  ;;  %v32207_v52 = vld [vmem:[%s53410_s4 + $0xc8] sm:$0xff] }
 0x580   : > { %38019 = vmatpush3.msra.mxu0 %v49524_v43  ;;  %42331 = vmatpush3.bf16.msra.mxu1 %v49610_v13  ;;  %v22527_v43 = vsub.f32 %v49617_v2, %v53446_v57  ;;  %v22535_v57 = vand.u32 4294901760, %v22534_v45  ;;  %v42160_v60 = vpack.c.bf16 %v53598_v39, %v21256_v38 }
 0x581   : > { %38021 = vmatmul.mubr.f32.vlgmr.msra.gmra.mrb[6].mxu0 %v49443_v61  ;;  %42137 = vmatprep.subr.bf16.mxu0 %v49376_v19 }
 0x582   : > { %42139 = vmatpush3.bf16.msra.mxu0 %v49376_v19  ;;  %38045 = vmatprep.mubr.f32.mxu0 %v49354_v22  ;;  %v22528_v12 = vand.u32 4294901760, %v22527_v43 }
 0x583   : > { %42333 = vmatprep.subr.bf16.mxu1 %v49632_v34  ;;  %42141 = vmatprep.subr.bf16.mxu0 %v49378_v49 }
 0x584   : > { %42335 = vmatpush3.bf16.msra.mxu1 %v49632_v34  ;;  %v42344_v35 = vpack.c.bf16 %v22535_v57, %v22528_v12  ;;  %v22563_v57 = vand.u32 4294901760, %v22562_v33  ;;  %v42156_v12 = vpack.c.bf16 %v21249_v7, %v21242_v23  ;;  %v53601_v23 = vand.u32 4294901760, %v49469_v48 }
 0x585   : > { %38268 = vmatprep.subr.mxu1 %v49651_v9  ;;  %v53602_v7 = vand.u32 4294901760, %v49474_v16  ;;  %v42172_v48 = vpack.c.bf16 %v53604_v21, %v53603_v18  ;;  %v42364_v16 = vpack.c.bf16 %v49619_v30, %v49617_v2  ;;  %v23051_v33 = vand.u32 4294901760, %v32207_v52 }
 0x586   : > { %42143 = vmatpush3.bf16.msra.mxu0 %v49378_v49  ;;  %v53607_v21 = vand.u32 4294901760, %v49593_v62  ;;  %v53609_v62 = vand.u32 4294901760, %v49605_v1 }
 0x587   : > { %42145 = vmatprep.subr.bf16.mxu0 %v49394_v42  ;;  %v42168_v38 = vpack.c.bf16 %v53602_v7, %v53601_v23  ;;  %v23060_v23 = vand.u32 4294901760, %v32210_v11  ;;  %v23063_v7 = vand.u32 4294901760, %v32211_v58 }
 0x588   : > { %38269 = vmatpush3.msra.mxu1 %v49651_v9 }
 0x589   : > { %38271 = vmatmul.mubr.f32.vlgmr.msra.gmra.mrb[8].mxu1 %v49507_v54  ;;  %42337 = vmatprep.subr.bf16.mxu1 %v42336_v41  ;;  %v22555_v54 = vsub.f32 %v49667_v56, %v22554_v46 }
 0x58a   : > { %42147 = vmatpush3.bf16.msra.mxu0 %v49394_v42  ;;  %42339 = vmatpush3.bf16.msra.mxu1 %v42336_v41  ;;  %v49698_v41 = vand.u32 4294901760, %v49687_v36 }
 0x58b   : > { %38295 = vmatprep.mubr.f32.mxu1 %v49331_v24  ;;  %42149 = vmatprep.subr.bf16.mxu0 %v49423_v15  ;;  %v22556_v55 = vand.u32 4294901760, %v22555_v54 }
 0x58c   : > { %42341 = vmatprep.subr.bf16.mxu1 %v42340_v44  ;;  %v22569_v43 = vsub.f32 %v49687_v36, %v49698_v41 }
 0x58d   : > { %v42352_v45 = vpack.c.bf16 %v22563_v57, %v22556_v55  ;;  %v32208_v55 = vld [vmem:[%s53410_s4 + $0xd0] sm:$0xff]  ;;  %v32209_v57 = vld [vmem:[%s53410_s4 + $0xd8] sm:$0xff] }
 0x58e   : > { %42151 = vmatpush3.bf16.msra.mxu0 %v49423_v15  ;;  %42343 = vmatpush3.bf16.msra.mxu1 %v42340_v44  ;;  %v22570_v44 = vand.u32 4294901760, %v22569_v43  ;;  %v23057_v39 = vand.u32 4294901760, %v32209_v57 }
 0x58f   : > { %42153 = vmatprep.subr.bf16.mxu0 %v49446_v59  ;;  %42345 = vmatprep.subr.bf16.mxu1 %v42344_v35 }
 0x592   : > { %42155 = vmatpush3.bf16.msra.mxu0 %v49446_v59  ;;  %42347 = vmatpush3.bf16.msra.mxu1 %v42344_v35  ;;  %v42360_v35 = vpack.c.bf16 %v49607_v50, %v49605_v1  ;;  %v32214_v1 = vld [vmem:[%s53410_s4 + $0x100] sm:$0xf] }
 0x593   : > { %38043 = vmatprep.subr.mxu0 %v49482_v0  ;;  %42349 = vmatprep.subr.bf16.mxu1 %v42348_v28 }
 0x596   : > { %38044 = vmatpush3.msra.mxu0 %v49482_v0  ;;  %42351 = vmatpush3.bf16.msra.mxu1 %v42348_v28 }
 0x597   : > { %38046 = vmatmul.mubr.f32.vlgmr.msra.gmra.mrb[6].mxu0 %v49472_v20  ;;  %42157 = vmatprep.subr.bf16.mxu0 %v42156_v12 }
 0x598   : > { %42159 = vmatpush3.bf16.msra.mxu0 %v42156_v12  ;;  %38070 = vmatprep.mubr.f32.mxu0 %v49331_v24 }
 0x599   : > { %42353 = vmatprep.subr.bf16.mxu1 %v42352_v45  ;;  %42161 = vmatprep.subr.bf16.mxu0 %v42160_v60 }
 0x59a   : > { %42355 = vmatpush3.bf16.msra.mxu1 %v42352_v45  ;;  %v23054_v45 = vand.u32 4294901760, %v32208_v55 }
 0x59b   : > { %38293 = vmatprep.subr.mxu1 %v22570_v44 }
 0x59c   : > { %42163 = vmatpush3.bf16.msra.mxu0 %v42160_v60 }
 0x59d   : > { %42165 = vmatprep.subr.bf16.mxu0 %v42164_v10 }
 0x59e   : > { %38294 = vmatpush3.msra.mxu1 %v22570_v44 }
 0x59f   : > { %38296 = vmatmul.mubr.f32.vlgmr.msra.gmra.mrb[8].mxu1 %v49419_v47  ;;  %42357 = vmatprep.subr.bf16.mxu1 %v42356_v5 }
 0x5a0   : > { %42167 = vmatpush3.bf16.msra.mxu0 %v42164_v10  ;;  %42359 = vmatpush3.bf16.msra.mxu1 %v42356_v5  ;;  %v49819_v5 = vpack.c.bf16 %v23057_v39, %v23054_v45 }
 0x5a1   : > { %38320 = vmatprep.mubr.f32.mxu1 %v49340_v53  ;;  %42169 = vmatprep.subr.bf16.mxu0 %v42168_v38  ;;  %v42372_v53 = vpack.c.bf16 %v49669_v26, %v49667_v56 }
 0x5a2   : > { %42361 = vmatprep.subr.bf16.mxu1 %v42360_v35 }
 0x5a4   : > { %42171 = vmatpush3.bf16.msra.mxu0 %v42168_v38  ;;  %42363 = vmatpush3.bf16.msra.mxu1 %v42360_v35 }
 0x5a5   : > { %42173 = vmatprep.subr.bf16.mxu0 %v42172_v48  ;;  %42365 = vmatprep.subr.bf16.mxu1 %v42364_v16 }
 0x5a8   : > { %42175 = vmatpush3.bf16.msra.mxu0 %v42172_v48  ;;  %42367 = vmatpush3.bf16.msra.mxu1 %v42364_v16  ;;  %v53608_v48 = vand.u32 4294901760, %v49595_v25  ;;  %v53610_v25 = vand.u32 4294901760, %v49607_v50 }
 0x5a9   : > { %38068 = vmatprep.subr.mxu0 %v49528_v6  ;;  %42369 = vmatprep.subr.bf16.mxu1 %v42368_v3 }
 0x5aa   : > { %v42396_v16 = vpack.c.bf16 %v53608_v48, %v53607_v21 }
 0x5ac   : > { %38069 = vmatpush3.msra.mxu0 %v49528_v6  ;;  %42371 = vmatpush3.bf16.msra.mxu1 %v42368_v3  ;;  %v49749_v6 = vand.u32 4294901760, %v23033_v27  ;;  %v32212_v3 = vld [vmem:[%s53410_s4 + $0xf0] sm:$0xff] }
 0x5ad   : > { %38071 = vmatmul.mubr.f32.vlgmr.msra.gmra.mrb[6].mxu0 %v49419_v47  ;;  %42177 = vmatprep.subr.bf16.mxu0 %v49376_v19 }
 0x5ae   : > { %42179 = vmatpush3.bf16.msra.mxu0 %v49376_v19  ;;  %38095 = vmatprep.mubr.f32.mxu0 %v49331_v24  ;;  %v49758_v19 = vsub.f32 %v23033_v27, %v49749_v6  ;;  %v49842_v27 = vsub.f32 %v32207_v52, %v23051_v33 }
 0x5af   : > { %42373 = vmatprep.subr.bf16.mxu1 %v42372_v53  ;;  %42181 = vmatprep.subr.bf16.mxu0 %v49378_v49 }
 0x5b0   : > { %42375 = vmatpush3.bf16.msra.mxu1 %v42372_v53  ;;  %v32213_v53 = vld [vmem:[%s53410_s4 + $0xf8] sm:$0xff] }
 0x5b1   : > { %38318 = vmatprep.subr.mxu1 %v49687_v36 }
 0x5b2   : > { %42183 = vmatpush3.bf16.msra.mxu0 %v49378_v49  ;;  %v32204_v49 = vld [vmem:[%s53410_s4 + $0xb0] sm:$0xff] }
 0x5b3   : > { %42185 = vmatprep.subr.bf16.mxu0 %v49394_v42 }
 0x5b4   : > { %38319 = vmatpush3.msra.mxu1 %v49687_v36  ;;  %v23042_v36 = vand.u32 4294901760, %v32204_v49 }
 0x5b5   : > { %38321 = vmatmul.mubr.f32.vlgmr.msra.gmra.mrb[8].mxu1 %v49443_v61  ;;  %42377 = vmatprep.subr.bf16.mxu1 %v49572_v37  ;;  %v32205_v61 = vld [vmem:[%s53410_s4 + $0xb8] sm:$0xff] }
 0x5b6   : > { %42187 = vmatpush3.bf16.msra.mxu0 %v49394_v42  ;;  %42379 = vmatpush3.bf16.msra.mxu1 %v49572_v37  ;;  %v49772_v42 = vand.u32 4294901760, %v49758_v19  ;;  %v23045_v54 = vand.u32 4294901760, %v32205_v61  ;;  %v49824_v35 = vsub.f32 %v32204_v49, %v23042_v36  ;;  %v42400_v49 = vpack.c.bf16 %v53610_v25, %v53609_v62 }
 0x5b7   : > { %38345 = vmatprep.mubr.f32.mxu1 %v49354_v22  ;;  %42189 = vmatprep.subr.bf16.mxu0 %v49423_v15  ;;  %v32206_v22 = vld [vmem:[%s53410_s4 + $0xc0] sm:$0xff]  ;;  %v49891_v62 = vsub.f32 %v32210_v11, %v23060_v23 }
 0x5b8   : > { %42381 = vmatprep.subr.bf16.mxu1 %v49577_v14  ;;  %v23120_v28 = vsub.f32 %v49758_v19, %v49772_v42  ;;  %v49794_v12 = vpack.c.bf16 %v23045_v54, %v23042_v36  ;;  %v49826_v18 = vsub.f32 %v32205_v61, %v23045_v54  ;;  %v49849_v61 = vpack.c.bf16 %v23063_v7, %v23060_v23 }
 0x5b9   : > { %v23069_v54 = vand.u32 4294901760, %v32213_v53  ;;  %v53453_v31 = vand.u32 4294901760, %v49891_v62  ;;  %v53618_v40 = vand.u32 4294901760, %v49891_v62 }
 0x5ba   : > { %42191 = vmatpush3.bf16.msra.mxu0 %v49423_v15  ;;  %42383 = vmatpush3.bf16.msra.mxu1 %v49577_v14  ;;  %v23048_v15 = vand.u32 4294901760, %v32206_v22  ;;  %v49802_v44 = vand.u32 4294901760, %v23120_v28  ;;  %v23147_v52 = vand.u32 4294901760, %v49826_v18  ;;  %v49864_v28 = vsub.f32 %v32209_v57, %v23057_v39 }
 0x5bb   : > { %42193 = vmatprep.subr.bf16.mxu0 %v49446_v59  ;;  %42385 = vmatprep.subr.bf16.mxu1 %v49590_v63  ;;  %v23039_v57 = vsel %vm19385_vm6, %v32214_v1, 0  ;;  %v49896_v1 = vsub.f32 %v32211_v58, %v23063_v7 }
 0x5bc   : > { %v49796_v43 = vpack.c.bf16 %v23051_v33, %v23048_v15  ;;  %v49839_v51 = vsub.f32 %v32206_v22, %v23048_v15  ;;  %v23066_v22 = vand.u32 4294901760, %v32212_v3  ;;  %v23140_v15 = vand.u32 4294901760, %v49824_v35 }
 0x5bd   : > { %v49862_v33 = vsub.f32 %v32208_v55, %v23054_v45 }
 0x5be   : > { %42195 = vmatpush3.bf16.msra.mxu0 %v49446_v59  ;;  %42387 = vmatpush3.bf16.msra.mxu1 %v49590_v63  ;;  %v23019_v59 = vld [vmem:[#allocation2 + $0xa] sm:$0x3]  ;;  %v53449_v50 = vand.u32 4294901760, %v49839_v51  ;;  %v49877_v55 = vpack.c.bf16 %v23069_v54, %v23066_v22  ;;  %v23141_v45 = vsub.f32 %v49824_v35, %v23140_v15  ;;  %v49916_v7 = vsub.f32 %v32212_v3, %v23066_v22 }
 0x5bf   : > { %38093 = vmatprep.subr.mxu0 %v49482_v0  ;;  %42389 = vmatprep.subr.bf16.mxu1 %v49610_v13  ;;  %v23036_v10 = vsel %vm20464_vm8, %v23019_v59, 0  ;;  %v53448_v59 = vand.u32 4294901760, %v49842_v27  ;;  %v53461_v39 = vand.u32 4294901760, %v49862_v33  ;;  %v23183_v3 = vsub.f32 %v49891_v62, %v53453_v31 }
 0x5c0   : > { %v49821_v38 = vand.u32 4294901760, %v23036_v10  ;;  %v23142_v23 = vand.u32 4294901760, %v23141_v45  ;;  %v42412_v45 = vpack.c.bf16 %v22561_v4, %v22554_v46  ;;  %v53451_v26 = vand.u32 4294901760, %v49916_v7 }
 0x5c1   : > { %v23162_v25 = vsub.f32 %v49842_v27, %v53448_v59  ;;  %v23169_v58 = vsub.f32 %v49862_v33, %v53461_v39  ;;  %v23184_v22 = vand.u32 4294901760, %v23183_v3 }
 0x5c2   : > { %38094 = vmatpush3.msra.mxu0 %v49482_v0  ;;  %42391 = vmatpush3.bf16.msra.mxu1 %v49610_v13  ;;  %v49800_v60 = vpop.f32.mrb[6].mxu1  ;;  %v49852_v36 = vsub.f32 %v23036_v10, %v49821_v38  ;;  %v53612_v10 = vand.u32 4294901760, %v49619_v30  ;;  %v23155_v30 = vsub.f32 %v49839_v51, %v53449_v50  ;;  %v49918_v50 = vsub.f32 %v32213_v53, %v23069_v54 }
 0x5c3   : > { %53605 = vst [vmem:[#allocation11_spill] sm:$0xff] %v49800_v60  ;;  %38096 = vmatmul.mubr.f32.vlgmr.msra.gmra.mrb[6].mxu0 %v49419_v47  ;;  %42437 = vmatprep.subr.bf16.mxu0 %v49794_v12  ;;  %v49813_v0 = vpop.f32.mrb[7].mxu1 }
 0x5c4   : > { %53606 = vst [vmem:[#allocation12_spill] sm:$0xff] %v49813_v0  ;;  %42439 = vmatpush3.bf16.msra.mxu0 %v49794_v12  ;;  %38420 = vmatprep.mubr.f32.mxu0 %v49802_v44  ;;  %v49874_v48 = vand.u32 4294901760, %v49852_v36  ;;  %v23156_v59 = vand.u32 4294901760, %v23155_v30  ;;  %v53450_v46 = vand.u32 4294901760, %v49918_v50 }
 0x5c5   : > { %42393 = vmatprep.subr.bf16.mxu1 %v49632_v34  ;;  %42441 = vmatprep.subr.bf16.mxu0 %v49796_v43 }
 0x5c6   : > { %42395 = vmatpush3.bf16.msra.mxu1 %v49632_v34  ;;  %v23130_v11 = vsub.f32 %v49852_v36, %v49874_v48 }
 0x5c7   : > { %38343 = vmatprep.subr.mxu1 %v49651_v9 }
 0x5c8   : > { %42443 = vmatpush3.bf16.msra.mxu0 %v49796_v43  ;;  %v49926_v30 = vand.u32 4294901760, %v23130_v11 }
 0x5c9   : > { %42445 = vmatprep.subr.bf16.mxu0 %v49819_v5 }
 0x5ca   : > { %38344 = vmatpush3.msra.mxu1 %v49651_v9 }
 0x5cb   : > { %38346 = vmatmul.mubr.f32.vlgmr.msra.gmra.mrb[8].mxu1 %v49472_v20  ;;  %42397 = vmatprep.subr.bf16.mxu1 %v42396_v16  ;;  %v53611_v20 = vand.u32 4294901760, %v49617_v2  ;;  %v23148_v2 = vsub.f32 %v49826_v18, %v23147_v52 }
 0x5cc   : > { %42399 = vmatpush3.bf16.msra.mxu1 %v42396_v16  ;;  %38370 = vmatprep.mubr.f32.mxu1 %v49331_v24  ;;  %v53457_v16 = vand.u32 4294901760, %v49864_v28 }
 0x5cd   : > { %42447 = vmatpush3.bf16.msra.mxu0 %v49819_v5  ;;  %42401 = vmatprep.subr.bf16.mxu1 %v42400_v49  ;;  %v42404_v21 = vpack.c.bf16 %v53612_v10, %v53611_v20  ;;  %v42408_v20 = vpack.c.bf16 %v22547_v17, %v22540_v8  ;;  %v49904_v10 = vand.u32 4294901760, %v23039_v57  ;;  %v23163_v8 = vand.u32 4294901760, %v23162_v25 }
 0x5ce   : > { %42449 = vmatprep.subr.bf16.mxu0 %v49849_v61  ;;  %v23176_v32 = vsub.f32 %v49864_v28, %v53457_v16  ;;  %v53452_v17 = vand.u32 4294901760, %v49896_v1 }
 0x5cf   : > { %v42460_v53 = vpack.c.bf16 %v23163_v8, %v23156_v59  ;;  %v23197_v59 = vsub.f32 %v49916_v7, %v53451_v26  ;;  %v49946_v11 = vsub.f32 %v23039_v57, %v49904_v10 }
 0x5d0   : > { %42403 = vmatpush3.bf16.msra.mxu1 %v42400_v49  ;;  %v23149_v49 = vand.u32 4294901760, %v23148_v2  ;;  %v23177_v25 = vand.u32 4294901760, %v23176_v32  ;;  %v23190_v56 = vsub.f32 %v49896_v1, %v53452_v17 }
 0x5d1   : > { %42451 = vmatpush3.bf16.msra.mxu0 %v49849_v61  ;;  %42405 = vmatprep.subr.bf16.mxu1 %v42404_v21  ;;  %v49951_v32 = vand.u32 4294901760, %v49946_v11 }
 0x5d2   : > { %42453 = vmatprep.subr.bf16.mxu0 %v49877_v55  ;;  %v42456_v2 = vpack.c.bf16 %v23149_v49, %v23142_v23  ;;  %v23191_v54 = vand.u32 4294901760, %v23190_v56  ;;  %v23198_v49 = vand.u32 4294901760, %v23197_v59  ;;  %v32219_v56 = vld [vmem:[%s53411_s5 + $0xd0] sm:$0xff] }
 0x5d3   : > { %v23211_v57 = vsub.f32 %v49946_v11, %v49951_v32 }
 0x5d4   : > { %42407 = vmatpush3.bf16.msra.mxu1 %v42404_v21  ;;  %v23170_v21 = vand.u32 4294901760, %v23169_v58  ;;  %v42468_v23 = vpack.c.bf16 %v23191_v54, %v23184_v22 }
 0x5d5   : > { %42455 = vmatpush3.bf16.msra.mxu0 %v49877_v55  ;;  %42409 = vmatprep.subr.bf16.mxu1 %v42408_v20  ;;  %v23212_v8 = vand.u32 4294901760, %v23211_v57 }
 0x5d6   : > { %38418 = vmatprep.subr.mxu0 %v49904_v10  ;;  %v42464_v4 = vpack.c.bf16 %v23177_v25, %v23170_v21 }
 0x5d8   : > { %42411 = vmatpush3.bf16.msra.mxu1 %v42408_v20  ;;  %v23204_v20 = vsub.f32 %v49918_v50, %v53450_v46 }
 0x5d9   : > { %38419 = vmatpush3.msra.mxu0 %v49904_v10  ;;  %42413 = vmatprep.subr.bf16.mxu1 %v42412_v45 }
 0x5da   : > { %38421 = vmatmul.mubr.f32.vlgmr.msra.gmra.mrb[6].mxu0 %v49926_v30  ;;  %42457 = vmatprep.subr.bf16.mxu0 %v42456_v2  ;;  %v23205_v58 = vand.u32 4294901760, %v23204_v20  ;;  %v32221_v20 = vld [vmem:[%s53411_s5 + $0xe0] sm:$0xff] }
 0x5db   : > { %42459 = vmatpush3.bf16.msra.mxu0 %v42456_v2  ;;  %38445 = vmatprep.mubr.f32.mxu0 %v49749_v6  ;;  %v32218_v2 = vld [vmem:[%s53411_s5 + $0xc8] sm:$0xff] }
 0x5dc   : > { %42415 = vmatpush3.bf16.msra.mxu1 %v42412_v45  ;;  %42461 = vmatprep.subr.bf16.mxu0 %v42460_v53  ;;  %v32217_v45 = vld [vmem:[%s53411_s5 + $0xc0] sm:$0xff]  ;;  %v23687_v3 = vand.u32 4294901760, %v32218_v2 }
 0x5dd   : > { %38368 = vmatprep.subr.mxu1 %v49698_v41 }
 0x5df   : > { %42463 = vmatpush3.bf16.msra.mxu0 %v42460_v53  ;;  %v42484_v53 = vpack.c.bf16 %v49864_v28, %v49862_v33 }
 0x5e0   : > { %38369 = vmatpush3.msra.mxu1 %v49698_v41  ;;  %42465 = vmatprep.subr.bf16.mxu0 %v42464_v4  ;;  %v42472_v41 = vpack.c.bf16 %v23205_v58, %v23198_v49  ;;  %v42488_v49 = vpack.c.bf16 %v49896_v1, %v49891_v62  ;;  %v23696_v58 = vand.u32 4294901760, %v32221_v20 }
 0x5e1   : > { %38371 = vmatmul.mubr.f32.vlgmr.msra.gmra.mrb[8].mxu1 %v49419_v47  ;;  %42417 = vmatprep.subr.bf16.mxu1 %v49572_v37 }
 0x5e2   : > { %42419 = vmatpush3.bf16.msra.mxu1 %v49572_v37  ;;  %38395 = vmatprep.mubr.f32.mxu1 %v49331_v24  ;;  %v42476_v24 = vpack.c.bf16 %v49826_v18, %v49824_v35  ;;  %v32215_v37 = vld [vmem:[%s53411_s5 + $0xb0] sm:$0xff] }
 0x5e3   : > { %42467 = vmatpush3.bf16.msra.mxu0 %v42464_v4  ;;  %42421 = vmatprep.subr.bf16.mxu1 %v49577_v14  ;;  %v23678_v21 = vand.u32 4294901760, %v32215_v37  ;;  %v32220_v4 = vld [vmem:[%s53411_s5 + $0xd8] sm:$0xff] }
 0x5e4   : > { %42469 = vmatprep.subr.bf16.mxu0 %v42468_v23  ;;  %v23693_v59 = vand.u32 4294901760, %v32220_v4 }
 0x5e6   : > { %42423 = vmatpush3.bf16.msra.mxu1 %v49577_v14  ;;  %v32216_v14 = vld [vmem:[%s53411_s5 + $0xb8] sm:$0xff] }
 0x5e7   : > { %42471 = vmatpush3.bf16.msra.mxu0 %v42468_v23  ;;  %42425 = vmatprep.subr.bf16.mxu1 %v49590_v63  ;;  %v23681_v25 = vand.u32 4294901760, %v32216_v14  ;;  %v32222_v23 = vld [vmem:[%s53411_s5 + $0xe8] sm:$0xff] }
 0x5e8   : > { %42473 = vmatprep.subr.bf16.mxu0 %v42472_v41 }
 0x5e9   : > { %v49994_v22 = vpack.c.bf16 %v23681_v25, %v23678_v21 }
 0x5ea   : > { %42427 = vmatpush3.bf16.msra.mxu1 %v49590_v63  ;;  %v42480_v63 = vpack.c.bf16 %v49842_v27, %v49839_v51 }
 0x5eb   : > { %42475 = vmatpush3.bf16.msra.mxu0 %v42472_v41  ;;  %42429 = vmatprep.subr.bf16.mxu1 %v49610_v13  ;;  %v23699_v41 = vand.u32 4294901760, %v32222_v23 }
 0x5ec   : > { %38443 = vmatprep.subr.mxu0 %v23212_v8 }
 0x5ee   : > { %42431 = vmatpush3.bf16.msra.mxu1 %v49610_v13  ;;  %v23684_v13 = vand.u32 4294901760, %v32217_v45 }
 0x5ef   : > { %38444 = vmatpush3.msra.mxu0 %v23212_v8  ;;  %42433 = vmatprep.subr.bf16.mxu1 %v49632_v34  ;;  %v50016_v8 = vsub.f32 %v32216_v14, %v23681_v25 }
 0x5f0   : > { %38446 = vmatmul.mubr.f32.vlgmr.msra.gmra.mrb[6].mxu0 %v49821_v38  ;;  %42477 = vmatprep.subr.bf16.mxu0 %v42476_v24  ;;  %v49996_v54 = vpack.c.bf16 %v23687_v3, %v23684_v13 }
 0x5f1   : > { %42479 = vmatpush3.bf16.msra.mxu0 %v42476_v24  ;;  %38470 = vmatprep.mubr.f32.mxu0 %v49758_v19  ;;  %v32223_v24 = vld [vmem:[%s53411_s5 + $0xf0] sm:$0xff]  ;;  %v53455_v46 = vand.u32 4294901760, %v50016_v8 }
 0x5f2   : > { %42435 = vmatpush3.bf16.msra.mxu1 %v49632_v34  ;;  %42481 = vmatprep.subr.bf16.mxu0 %v42480_v63  ;;  %v23690_v34 = vand.u32 4294901760, %v32219_v56  ;;  %v23702_v14 = vand.u32 4294901760, %v32223_v24 }
 0x5f3   : > { %38393 = vmatprep.subr.mxu1 %v49651_v9 }
 0x5f4   : > { %v50012_v57 = vpack.c.bf16 %v23693_v59, %v23690_v34 }
 0x5f5   : > { %42483 = vmatpush3.bf16.msra.mxu0 %v42480_v63  ;;  %v50026_v63 = vsub.f32 %v32217_v45, %v23684_v13  ;;  %v32225_v45 = vld [vmem:[%s53411_s5 + $0x100] sm:$0xf]  ;;  %v50040_v13 = vsub.f32 %v32219_v56, %v23690_v34  ;;  %v23784_v56 = vsub.f32 %v50016_v8, %v53455_v46 }
 0x5f6   : > { %38394 = vmatpush3.msra.mxu1 %v49651_v9  ;;  %42485 = vmatprep.subr.bf16.mxu0 %v42484_v53  ;;  %v50014_v9 = vsub.f32 %v32215_v37, %v23678_v21  ;;  %v50031_v37 = vpack.c.bf16 %v23699_v41, %v23696_v58  ;;  %v23675_v17 = vsel %vm19385_vm6, %v32225_v45, 0 }
 0x5f7   : > { %38396 = vmatmul.mubr.f32.vlgmr.msra.gmra.mrb[8].mxu1 %v49419_v47  ;;  %42557 = vmatprep.subr.bf16.mxu1 %v49994_v22  ;;  %v42492_v47 = vpack.c.bf16 %v49918_v50, %v49916_v7  ;;  %v53459_v34 = vand.u32 4294901760, %v50040_v13  ;;  %v50072_v46 = vand.u32 4294901760, %v23675_v17  ;;  %v23785_v16 = vand.u32 4294901760, %v23784_v56 }
 0x5f8   : > { %42559 = vmatpush3.bf16.msra.mxu1 %v49994_v22  ;;  %38570 = vmatprep.mubr.f32.mxu1 %v49802_v44  ;;  %v32224_v44 = vld [vmem:[%s53411_s5 + $0xf8] sm:$0xff]  ;;  %v53454_v25 = vand.u32 4294901760, %v50014_v9  ;;  %v50086_v56 = vsub.f32 %v32223_v24, %v23702_v14 }
 0x5f9   : > { %42487 = vmatpush3.bf16.msra.mxu0 %v42484_v53  ;;  %42561 = vmatprep.subr.bf16.mxu1 %v49996_v54  ;;  %v50028_v53 = vsub.f32 %v32218_v2, %v23687_v3  ;;  %v23705_v21 = vand.u32 4294901760, %v32224_v44  ;;  %v53456_v2 = vand.u32 4294901760, %v50026_v63  ;;  %v50042_v3 = vsub.f32 %v32220_v4, %v23693_v59 }
 0x5fa   : > { %42489 = vmatprep.subr.bf16.mxu0 %v42488_v49  ;;  %v23777_v31 = vsub.f32 %v50014_v9, %v53454_v25  ;;  %v50067_v25 = vsub.f32 %v32222_v23, %v23699_v41  ;;  %v23805_v23 = vsub.f32 %v50040_v13, %v53459_v34 }
 0x5fb   : > { %v50047_v26 = vpack.c.bf16 %v23705_v21, %v23702_v14  ;;  %v23791_v4 = vsub.f32 %v50026_v63, %v53456_v2  ;;  %v53458_v59 = vand.u32 4294901760, %v50042_v3 }
 0x5fc   : > { %42563 = vmatpush3.bf16.msra.mxu1 %v49996_v54  ;;  %v23778_v2 = vand.u32 4294901760, %v23777_v31  ;;  %v53464_v41 = vand.u32 4294901760, %v50067_v25  ;;  %v23806_v34 = vand.u32 4294901760, %v23805_v23 }
 0x5fd   : > { %42491 = vmatpush3.bf16.msra.mxu0 %v42488_v49  ;;  %42565 = vmatprep.subr.bf16.mxu1 %v50012_v57  ;;  %v53460_v49 = vand.u32 4294901760, %v50028_v53 }
 0x5fe   : > { %42493 = vmatprep.subr.bf16.mxu0 %v42492_v47  ;;  %v23826_v24 = vsub.f32 %v50067_v25, %v53464_v41 }
 0x5ff   : > { %v23798_v45 = vsub.f32 %v50028_v53, %v53460_v49 }
 0x600   : > { %42567 = vmatpush3.bf16.msra.mxu1 %v50012_v57 }
 0x601   : > { %42495 = vmatpush3.bf16.msra.mxu0 %v42492_v47  ;;  %42569 = vmatprep.subr.bf16.mxu1 %v50031_v37  ;;  %v50062_v47 = vsub.f32 %v32221_v20, %v23696_v58  ;;  %v23792_v20 = vand.u32 4294901760, %v23791_v4  ;;  %v23812_v58 = vsub.f32 %v50042_v3, %v53458_v59  ;;  %v23799_v31 = vand.u32 4294901760, %v23798_v45 }
 0x602   : > { %38468 = vmatprep.subr.mxu0 %v49946_v11  ;;  %v50088_v4 = vsub.f32 %v32224_v44, %v23705_v21  ;;  %v42576_v59 = vpack.c.bf16 %v23785_v16, %v23778_v2  ;;  %v53463_v44 = vand.u32 4294901760, %v50086_v56  ;;  %v23827_v2 = vand.u32 4294901760, %v23826_v24 }
 0x603   : > { %v23813_v49 = vand.u32 4294901760, %v23812_v58  ;;  %v42580_v45 = vpack.c.bf16 %v23799_v31, %v23792_v20  ;;  %v50125_v58 = vld [vmem:[%s53410_s4 + $0x108] sm:$0xff]  ;;  %v50135_v31 = vld [vmem:[%s53410_s4 + $0x118] sm:$0xff] }
 0x604   : > { %42571 = vmatpush3.bf16.msra.mxu1 %v50031_v37  ;;  %v53462_v14 = vand.u32 4294901760, %v50088_v4  ;;  %v23833_v20 = vsub.f32 %v50086_v56, %v53463_v44 }
 0x605   : > { %38469 = vmatpush3.msra.mxu0 %v49946_v11  ;;  %42573 = vmatprep.subr.bf16.mxu1 %v50047_v26  ;;  %v53465_v11 = vand.u32 4294901760, %v50062_v47  ;;  %v42584_v16 = vpack.c.bf16 %v23813_v49, %v23806_v34 }
 0x606   : > { %38471 = vmatmul.mubr.f32.vlgmr.msra.gmra.mrb[6].mxu0 %v49852_v36  ;;  %42497 = vmatprep.subr.bf16.mxu0 %v49794_v12  ;;  %v23840_v23 = vsub.f32 %v50088_v4, %v53462_v14  ;;  %v23834_v49 = vand.u32 4294901760, %v23833_v20 }
 0x607   : > { %42499 = vmatpush3.bf16.msra.mxu0 %v49794_v12  ;;  %38495 = vmatprep.mubr.f32.mxu0 %v49772_v42  ;;  %v23819_v39 = vsub.f32 %v50062_v47, %v53465_v11 }
 0x608   : > { %42575 = vmatpush3.bf16.msra.mxu1 %v50047_v26  ;;  %42501 = vmatprep.subr.bf16.mxu0 %v49796_v43  ;;  %v23841_v34 = vand.u32 4294901760, %v23840_v23  ;;  %v53466_v23 = vand.u32 4294901760, %v50135_v31 }
 0x609   : > { %38568 = vmatprep.subr.mxu1 %v50072_v46  ;;  %v23820_v21 = vand.u32 4294901760, %v23819_v39 }
 0x60b   : > { %42503 = vmatpush3.bf16.msra.mxu0 %v49796_v43  ;;  %v42588_v39 = vpack.c.bf16 %v23827_v2, %v23820_v21  ;;  %v50143_v21 = vld [vmem:[%s53410_s4 + $0x120] sm:$0xff]  ;;  %v53469_v2 = vand.u32 4294901760, %v50125_v58 }
 0x60c   : > { %38569 = vmatpush3.msra.mxu1 %v50072_v46  ;;  %42505 = vmatprep.subr.bf16.mxu0 %v49819_v5  ;;  %v53467_v44 = vand.u32 4294901760, %v50143_v21 }
 0x60d   : > { %38571 = vmatmul.mubr.f32.vlgmr.msra.gmra.mrb[8].mxu1 %v49926_v30  ;;  %42577 = vmatprep.subr.bf16.mxu1 %v42576_v59  ;;  %v50114_v30 = vsub.f32 %v23675_v17, %v50072_v46  ;;  %v50130_v17 = vld [vmem:[%s53410_s4 + $0x110] sm:$0xff]  ;;  %v50161_v35 = vsub.f32 %v50125_v58, %v53469_v2 }
 0x60e   : > { %42579 = vmatpush3.bf16.msra.mxu1 %v42576_v59  ;;  %38595 = vmatprep.mubr.f32.mxu1 %v49749_v6  ;;  %v53468_v20 = vand.u32 4294901760, %v50130_v17 }
 0x60f   : > { %42507 = vmatpush3.bf16.msra.mxu0 %v49819_v5  ;;  %42581 = vmatprep.subr.bf16.mxu1 %v42580_v45  ;;  %v50119_v59 = vand.u32 4294901760, %v50114_v30 }
 0x610   : > { %42509 = vmatprep.subr.bf16.mxu0 %v49849_v61  ;;  %v50166_v18 = vsub.f32 %v50130_v17, %v53468_v20 }
 0x611   : > { %v23847_v24 = vsub.f32 %v50114_v30, %v50119_v59 }
 0x612   : > { %42583 = vmatpush3.bf16.msra.mxu1 %v42580_v45  ;;  %v42592_v45 = vpack.c.bf16 %v23841_v34, %v23834_v49  ;;  %v53613_v49 = vand.u32 4294901760, %v49839_v51  ;;  %v53614_v34 = vand.u32 4294901760, %v49842_v27  ;;  %v50172_v51 = vld [vmem:[%s53410_s4 + $0x128] sm:$0xff]  ;;  %v50177_v27 = vld [vmem:[%s53410_s4 + $0x130] sm:$0xff] }
 0x613   : > { %42511 = vmatpush3.bf16.msra.mxu0 %v49849_v61  ;;  %42585 = vmatprep.subr.bf16.mxu1 %v42584_v16  ;;  %v53470_v41 = vand.u32 4294901760, %v50172_v51  ;;  %v53473_v11 = vand.u32 4294901760, %v50177_v27 }
 0x614   : > { %42513 = vmatprep.subr.bf16.mxu0 %v49877_v55  ;;  %v42520_v14 = vpack.c.bf16 %v53614_v34, %v53613_v49  ;;  %v53616_v49 = vand.u32 4294901760, %v49864_v28  ;;  %v53476_v28 = vand.u32 4294901760, %v50166_v18 }
 0x615   : > { %v50221_v20 = vsub.f32 %v50177_v27, %v53473_v11  ;;  %v53619_v11 = vand.u32 4294901760, %v49896_v1 }
 0x616   : > { %42587 = vmatpush3.bf16.msra.mxu1 %v42584_v16  ;;  %v42516_v16 = vpack.c.bf16 %v23147_v52, %v23140_v15  ;;  %v23848_v15 = vand.u32 4294901760, %v23847_v24  ;;  %v50182_v52 = vsub.f32 %v50135_v31, %v53466_v23  ;;  %v53615_v24 = vand.u32 4294901760, %v49862_v33  ;;  %v50200_v23 = vld [vmem:[%s53410_s4 + $0x138] sm:$0xff] }
 0x617   : > { %42515 = vmatpush3.bf16.msra.mxu0 %v49877_v55  ;;  %42589 = vmatprep.subr.bf16.mxu1 %v42588_v39  ;;  %v53477_v33 = vand.u32 4294901760, %v50161_v35  ;;  %v42528_v29 = vpack.c.bf16 %v53619_v11, %v53618_v40 }
 0x618   : > { %38493 = vmatprep.subr.mxu0 %v49904_v10  ;;  %v42524_v34 = vpack.c.bf16 %v53616_v49, %v53615_v24  ;;  %v42600_v49 = vpack.c.bf16 %v50028_v53, %v50026_v63  ;;  %v53478_v24 = vand.u32 4294901760, %v50200_v23 }
 0x619   : > { %v50227_v2 = vpack.c.bf16 %v53476_v28, %v53477_v33  ;;  %v50240_v28 = vld [vmem:[%s53410_s4 + $0x148] sm:$0xff]  ;;  %v53620_v33 = vand.u32 4294901760, %v50182_v52 }
 0x61a   : > { %42591 = vmatpush3.bf16.msra.mxu1 %v42588_v39  ;;  %v50188_v39 = vsub.f32 %v50143_v21, %v53467_v44  ;;  %v50216_v44 = vsub.f32 %v50172_v51, %v53470_v41  ;;  %v50257_v40 = vsub.f32 %v50200_v23, %v53478_v24  ;;  %v24346_v24 = vand.u32 4294901760, %v50240_v28 }
 0x61b   : > { %38494 = vmatpush3.msra.mxu0 %v49904_v10  ;;  %42593 = vmatprep.subr.bf16.mxu1 %v42592_v45  ;;  %53617 = vst [vmem:[#allocation13_spill] sm:$0xff] %v50227_v2 }
 0x61c   : > { %38496 = vmatmul.mubr.f32.vlgmr.msra.gmra.mrb[6].mxu0 %v49874_v48  ;;  %42517 = vmatprep.subr.bf16.mxu0 %v42516_v16  ;;  %v53481_v11 = vand.u32 4294901760, %v50216_v44  ;;  %v50286_v0 = vsub.f32 %v50240_v28, %v24346_v24 }
 0x61d   : > { %42519 = vmatpush3.bf16.msra.mxu0 %v42516_v16  ;;  %38520 = vmatprep.mubr.f32.mxu0 %v49749_v6  ;;  %v50205_v16 = vld [vmem:[%s53410_s4 + $0x140] sm:$0xff] }
 0x61e   : > { %42595 = vmatpush3.bf16.msra.mxu1 %v42592_v45  ;;  %42521 = vmatprep.subr.bf16.mxu0 %v42520_v14  ;;  %v42596_v45 = vpack.c.bf16 %v50016_v8, %v50014_v9  ;;  %v53623_v62 = vand.u32 4294901760, %v50205_v16 }
 0x61f   : > { %38593 = vmatprep.subr.mxu1 %v23848_v15 }
 0x620   : > { %v50262_v1 = vsub.f32 %v50205_v16, %v53623_v62  ;;  %v53624_v62 = vand.u32 4294901760, %v49916_v7 }
 0x621   : > { %42523 = vmatpush3.bf16.msra.mxu0 %v42520_v14  ;;  %v50245_v14 = vld [vmem:[%s53410_s4 + $0x150] sm:$0xff] }
 0x622   : > { %38594 = vmatpush3.msra.mxu1 %v23848_v15  ;;  %42525 = vmatprep.subr.bf16.mxu0 %v42524_v34  ;;  %v53621_v15 = vand.u32 4294901760, %v50188_v39  ;;  %v53627_v7 = vand.u32 4294901760, %v50245_v14 }
 0x623   : > { %38596 = vmatmul.mubr.f32.vlgmr.msra.gmra.mrb[8].mxu1 %v49821_v38  ;;  %42597 = vmatprep.subr.bf16.mxu1 %v42596_v45 }
 0x624   : > { %v50251_v41 = vpack.c.bf16 %v53621_v15, %v53620_v33  ;;  %42599 = vmatpush3.bf16.msra.mxu1 %v42596_v45  ;;  %38620 = vmatprep.mubr.f32.mxu1 %v49758_v19  ;;  %v53480_v33 = vand.u32 4294901760, %v50221_v20  ;;  %v42604_v15 = vpack.c.bf16 %v50042_v3, %v50040_v13  ;;  %v53625_v45 = vand.u32 4294901760, %v49918_v50 }
 0x625   : > { %42527 = vmatpush3.bf16.msra.mxu0 %v42524_v34  ;;  %42601 = vmatprep.subr.bf16.mxu1 %v42600_v49  ;;  %v53489_v34 = vand.u32 4294901760, %v50257_v40  ;;  %v50291_v50 = vsub.f32 %v50245_v14, %v53627_v7  ;;  %v24298_v7 = vld [vmem:[#allocation2 + $0x3] sm:$0xff] }
 0x626   : > { %53622 = vst [vmem:[#allocation14_spill] sm:$0xff] %v50251_v41  ;;  %42529 = vmatprep.subr.bf16.mxu0 %v42528_v29  ;;  %v42532_v60 = vpack.c.bf16 %v53625_v45, %v53624_v62  ;;  %v50279_v19 = vpack.c.bf16 %v53480_v33, %v53481_v11  ;;  %v53488_v41 = vand.u32 4294901760, %v50262_v1  ;;  %v42608_v62 = vpack.c.bf16 %v50067_v25, %v50062_v47 }
 0x627   : > { %v53486_v33 = vand.u32 4294901760, %v50286_v0  ;;  %v53482_v11 = vand.u32 4294901760, %v50291_v50 }
 0x628   : > { %53626 = vst [vmem:[#allocation15_spill] sm:$0xff] %v50279_v19  ;;  %42603 = vmatpush3.bf16.msra.mxu1 %v42600_v49  ;;  %v50299_v45 = vpack.c.bf16 %v53488_v41, %v53489_v34  ;;  %v53656_v41 = vand.u32 4294901760, %v50067_v25  ;;  %v53659_v19 = vand.u32 4294901760, %v50188_v39 }
 0x629   : > { %42531 = vmatpush3.bf16.msra.mxu0 %v42528_v29  ;;  %42605 = vmatprep.subr.bf16.mxu1 %v42604_v15  ;;  %v42612_v29 = vpack.c.bf16 %v50088_v4, %v50086_v56  ;;  %v50309_v49 = vpack.c.bf16 %v53482_v11, %v53486_v33 }
 0x62a   : > { %53628 = vst [vmem:[#allocation16_spill] sm:$0xff] %v50299_v45  ;;  %42533 = vmatprep.subr.bf16.mxu0 %v42532_v60  ;;  %v53658_v45 = vand.u32 4294901760, %v50182_v52  ;;  %v24442_v2 = vsub.f32 %v50188_v39, %v53659_v19 }
 0x62b   : > { %53629 = vst [vmem:[#allocation17_spill] sm:$0xff] %v50309_v49 }
 0x62c   : > { %42607 = vmatpush3.bf16.msra.mxu1 %v42604_v15  ;;  %v53635_v15 = vand.u32 4294901760, %v50143_v21  ;;  %v53637_v21 = vand.u32 4294901760, %v50172_v51 }
 0x62d   : > { %42535 = vmatpush3.bf16.msra.mxu0 %v42532_v60  ;;  %42609 = vmatprep.subr.bf16.mxu1 %v42608_v62  ;;  %v24313_v60 = vsel %vm20464_vm8, %v24298_v7, 0  ;;  %v53638_v7 = vand.u32 4294901760, %v50177_v27 }
 0x62e   : > { %38518 = vmatprep.subr.mxu0 %v49951_v32 }
 0x630   : > { %42611 = vmatpush3.bf16.msra.mxu1 %v42608_v62  ;;  %v24299_v62 = vld [vmem:[#allocation2 + $0xb] sm:$0x3] }
 0x631   : > { %38519 = vmatpush3.msra.mxu0 %v49951_v32  ;;  %42613 = vmatprep.subr.bf16.mxu1 %v42612_v29  ;;  %v50321_v32 = vand.u32 4294901760, %v24313_v60 }
 0x632   : > { %38521 = vmatmul.mubr.f32.vlgmr.msra.gmra.mrb[6].mxu0 %v49821_v38  ;;  %42537 = vmatprep.subr.bf16.mxu0 %v49794_v12 }
 0x633   : > { %42539 = vmatpush3.bf16.msra.mxu0 %v49794_v12  ;;  %38545 = vmatprep.mubr.f32.mxu0 %v49749_v6  ;;  %v50332_v12 = vsub.f32 %v24313_v60, %v50321_v32  ;;  %v50391_v60 = vpack.c.bf16 %v53638_v7, %v53637_v21  ;;  %v53642_v21 = vand.u32 4294901760, %v50026_v63  ;;  %v53643_v7 = vand.u32 4294901760, %v50028_v53 }
 0x634   : > { %42615 = vmatpush3.bf16.msra.mxu1 %v42612_v29  ;;  %42541 = vmatprep.subr.bf16.mxu0 %v49796_v43  ;;  %v53644_v63 = vand.u32 4294901760, %v50200_v23  ;;  %v53645_v53 = vand.u32 4294901760, %v50205_v16  ;;  %v32236_v23 = vld [vmem:[%s53410_s4 + $0x158] sm:$0xf] }
 0x635   : > { %38618 = vmatprep.subr.mxu1 %v50114_v30  ;;  %53639 = vst [vmem:[#allocation21_spill] sm:$0xff] %v50391_v60  ;;  %v42640_v11 = vpack.c.bf16 %v53643_v7, %v53642_v21  ;;  %v50435_v21 = vld [vmem:[%s53411_s5 + $0x128] sm:$0xff]  ;;  %v50440_v7 = vld [vmem:[%s53411_s5 + $0x130] sm:$0xff]  ;;  %v50477_v28 = vsel %vm19385_vm6, %v32236_v23, 0  ;;  %v53655_v23 = vand.u32 4294901760, %v50062_v47 }
 0x637   : > { %42543 = vmatpush3.bf16.msra.mxu0 %v49796_v43  ;;  %v50339_v43 = vand.u32 4294901760, %v50332_v12  ;;  %v42648_v49 = vpack.c.bf16 %v53656_v41, %v53655_v23 }
 0x638   : > { %38619 = vmatpush3.msra.mxu1 %v50114_v30  ;;  %42545 = vmatprep.subr.bf16.mxu0 %v49819_v5  ;;  %v53634_v30 = vand.u32 4294901760, %v50135_v31  ;;  %v50383_v31 = vld [vmem:[%s53411_s5 + $0x118] sm:$0xff] }
 0x639   : > { %38621 = vmatmul.mubr.f32.vlgmr.msra.gmra.mrb[8].mxu1 %v49852_v36  ;;  %42617 = vmatprep.subr.bf16.mxu1 %v49994_v22  ;;  %53630 = vst [vmem:[#allocation18_spill] sm:$0xff] %v50339_v43  ;;  %v53484_v27 = vand.u32 4294901760, %v50383_v31 }
 0x63a   : > { %42619 = vmatpush3.bf16.msra.mxu1 %v49994_v22  ;;  %38645 = vmatprep.mubr.f32.mxu1 %v49772_v42  ;;  %v24400_v42 = vsub.f32 %v50332_v12, %v50339_v43 }
 0x63b   : > { %42547 = vmatpush3.bf16.msra.mxu0 %v49819_v5  ;;  %42621 = vmatprep.subr.bf16.mxu1 %v49996_v54  ;;  %v53631_v5 = vand.u32 4294901760, %v50125_v58  ;;  %v50370_v58 = vld [vmem:[%s53411_s5 + $0x108] sm:$0xff] }
 0x63c   : > { %42549 = vmatprep.subr.bf16.mxu0 %v49849_v61  ;;  %v50362_v29 = vand.u32 4294901760, %v24400_v42  ;;  %v50396_v42 = vld [vmem:[%s53411_s5 + $0x120] sm:$0xff] }
 0x63e   : > { %42623 = vmatpush3.bf16.msra.mxu1 %v49996_v54 }
 0x63f   : > { %42551 = vmatpush3.bf16.msra.mxu0 %v49849_v61  ;;  %42625 = vmatprep.subr.bf16.mxu1 %v50012_v57  ;;  %v53632_v61 = vand.u32 4294901760, %v50130_v17  ;;  %v50375_v17 = vld [vmem:[%s53411_s5 + $0x110] sm:$0xff] }
 0x640   : > { %42553 = vmatprep.subr.bf16.mxu0 %v49877_v55  ;;  %v53483_v51 = vand.u32 4294901760, %v50375_v17 }
 0x641   : > { %v50352_v36 = vpack.c.bf16 %v53632_v61, %v53631_v5  ;;  %v53640_v5 = vand.u32 4294901760, %v50014_v9  ;;  %v53641_v61 = vand.u32 4294901760, %v50016_v8  ;;  %v53487_v9 = vand.u32 4294901760, %v50396_v42 }
 0x642   : > { %42627 = vmatpush3.bf16.msra.mxu1 %v50012_v57 }
 0x643   : > { %42555 = vmatpush3.bf16.msra.mxu0 %v49877_v55  ;;  %42629 = vmatprep.subr.bf16.mxu1 %v50031_v37  ;;  %53633 = vst [vmem:[#allocation19_spill] sm:$0xff] %v50352_v36  ;;  %v50359_v55 = vpack.c.bf16 %v53635_v15, %v53634_v30  ;;  %v42636_v30 = vpack.c.bf16 %v53641_v61, %v53640_v5  ;;  %v53485_v15 = vand.u32 4294901760, %v50370_v58 }
 0x644   : > { %38543 = vmatprep.subr.mxu0 %v49904_v10  ;;  %v50422_v5 = vsub.f32 %v50375_v17, %v53483_v51  ;;  %v50430_v61 = vpack.c.bf16 %v53645_v53, %v53644_v63  ;;  %v50445_v51 = vsub.f32 %v50383_v31, %v53484_v27  ;;  %v50454_v16 = vsub.f32 %v50396_v42, %v53487_v9 }
 0x645   : > { %53636 = vst [vmem:[#allocation20_spill] sm:$0xff] %v50359_v55  ;;  %v50417_v8 = vsub.f32 %v50370_v58, %v53485_v15  ;;  %v53647_v63 = vand.u32 4294901760, %v50040_v13  ;;  %v53648_v53 = vand.u32 4294901760, %v50042_v3  ;;  %v53493_v9 = vand.u32 4294901760, %v50440_v7 }
 0x646   : > { %42631 = vmatpush3.bf16.msra.mxu1 %v50031_v37  ;;  %53646 = vst [vmem:[#allocation22_spill] sm:$0xff] %v50430_v61  ;;  %v53496_v3 = vand.u32 4294901760, %v50422_v5  ;;  %v53660_v41 = vand.u32 4294901760, %v50445_v51  ;;  %v53661_v23 = vand.u32 4294901760, %v50454_v16 }
 0x647   : > { %38544 = vmatpush3.msra.mxu0 %v49904_v10  ;;  %42633 = vmatprep.subr.bf16.mxu1 %v50047_v26  ;;  %v24316_v10 = vsel %vm20464_vm8, %v24299_v62, 0  ;;  %v42644_v27 = vpack.c.bf16 %v53648_v53, %v53647_v63  ;;  %v53497_v13 = vand.u32 4294901760, %v50417_v8  ;;  %v50488_v53 = vld [vmem:[%s53411_s5 + $0x138] sm:$0xff] }
 0x648   : > { %38546 = vmatmul.mubr.f32.vlgmr.msra.gmra.mrb[6].mxu0 %v49821_v38  ;;  %42677 = vmatprep.subr.bf16.mxu0 %v50352_v36  ;;  %v50405_v62 = vand.u32 4294901760, %v24316_v10 }
 0x649   : > { %42679 = vmatpush3.bf16.msra.mxu0 %v50352_v36  ;;  %38720 = vmatprep.mubr.f32.mxu0 %v50362_v29  ;;  %v50511_v34 = vpack.c.bf16 %v53496_v3, %v53497_v13  ;;  %v50536_v3 = vpack.c.bf16 %v53661_v23, %v53660_v41  ;;  %v53663_v13 = vand.u32 4294901760, %v50216_v44 }
 0x64a   : > { %42635 = vmatpush3.bf16.msra.mxu1 %v50047_v26  ;;  %42681 = vmatprep.subr.bf16.mxu0 %v50359_v55  ;;  %v50468_v33 = vsub.f32 %v24316_v10, %v50405_v62  ;;  %v53653_v10 = vand.u32 4294901760, %v50166_v18 }
 0x64b   : > { %38643 = vmatprep.subr.mxu1 %v50072_v46  ;;  %53654 = vst [vmem:[#allocation25_spill] sm:$0xff] %v50511_v34  ;;  %53662 = vst [vmem:[#allocation27_spill] sm:$0xff] %v50536_v3  ;;  %v24449_v34 = vsub.f32 %v50216_v44, %v53663_v13 }
 0x64c   : > { %53651 = vst [vmem:[#allocation24_spill] sm:$0xff] %v50468_v33  ;;  %v24428_v63 = vsub.f32 %v50166_v18, %v53653_v10  ;;  %v50505_v10 = vsub.f32 %v50440_v7, %v53493_v9  ;;  %v24435_v9 = vsub.f32 %v50182_v52, %v53658_v45 }
 0x64d   : > { %42683 = vmatpush3.bf16.msra.mxu0 %v50359_v55  ;;  %v53665_v55 = vand.u32 4294901760, %v50488_v53  ;;  %v24450_v43 = vand.u32 4294901760, %v24449_v34 }
 0x64e   : > { %38644 = vmatpush3.msra.mxu1 %v50072_v46  ;;  %42685 = vmatprep.subr.bf16.mxu0 %v50391_v60  ;;  %v24429_v19 = vand.u32 4294901760, %v24428_v63  ;;  %v24436_v23 = vand.u32 4294901760, %v24435_v9  ;;  %v53670_v9 = vand.u32 4294901760, %v50505_v10 }
 0x64f   : > { %38646 = vmatmul.mubr.f32.vlgmr.msra.gmra.mrb[8].mxu1 %v49874_v48  ;;  %42637 = vmatprep.subr.bf16.mxu1 %v42636_v30  ;;  %v53649_v48 = vand.u32 4294901760, %v50245_v14  ;;  %v50550_v41 = vsub.f32 %v50488_v53, %v53665_v55  ;;  %v50567_v55 = vld [vmem:[%s53411_s5 + $0x150] sm:$0xff] }
 0x650   : > { %42639 = vmatpush3.bf16.msra.mxu1 %v42636_v30  ;;  %38670 = vmatprep.mubr.f32.mxu1 %v49749_v6  ;;  %v53491_v30 = vand.u32 4294901760, %v50435_v21 }
 0x651   : > { %v50465_v15 = vpack.c.bf16 %v53649_v48, %v24346_v24  ;;  %42687 = vmatpush3.bf16.msra.mxu0 %v50391_v60  ;;  %42641 = vmatprep.subr.bf16.mxu1 %v42640_v11  ;;  %v53652_v24 = vand.u32 4294901760, %v50161_v35  ;;  %v50493_v48 = vld [vmem:[%s53411_s5 + $0x140] sm:$0xff]  ;;  %v50562_v60 = vld [vmem:[%s53411_s5 + $0x148] sm:$0xff] }
 0x652   : > { %42689 = vmatprep.subr.bf16.mxu0 %v50430_v61 }
 0x653   : > { %53650 = vst [vmem:[#allocation23_spill] sm:$0xff] %v50465_v15  ;;  %v24421_v14 = vsub.f32 %v50161_v35, %v53652_v24  ;;  %v50500_v24 = vsub.f32 %v50435_v21, %v53491_v30  ;;  %v50518_v30 = vand.u32 4294901760, %v50468_v33 }
 0x654   : > { %42643 = vmatpush3.bf16.msra.mxu1 %v42640_v11  ;;  %v50528_v11 = vand.u32 4294901760, %v50477_v28 }
 0x655   : > { %53657 = vst [vmem:[#allocation26_spill] sm:$0xff] %v50518_v30  ;;  %42691 = vmatpush3.bf16.msra.mxu0 %v50430_v61  ;;  %42645 = vmatprep.subr.bf16.mxu1 %v42644_v27  ;;  %v24422_v45 = vand.u32 4294901760, %v24421_v14  ;;  %v53664_v61 = vand.u32 4294901760, %v50221_v20  ;;  %v53666_v14 = vand.u32 4294901760, %v50493_v48  ;;  %v24410_v13 = vsub.f32 %v50468_v33, %v50518_v30 }
 0x656   : > { %42693 = vmatprep.subr.bf16.mxu0 %v50465_v15  ;;  %v53671_v33 = vand.u32 4294901760, %v50257_v40 }
 0x657   : > { %v24456_v25 = vsub.f32 %v50221_v20, %v53664_v61  ;;  %v50555_v63 = vsub.f32 %v50493_v48, %v53666_v14  ;;  %v24443_v61 = vand.u32 4294901760, %v24442_v2  ;;  %v53668_v14 = vand.u32 4294901760, %v50088_v4 }
 0x658   : > { %42647 = vmatpush3.bf16.msra.mxu1 %v42644_v27  ;;  %v53667_v27 = vand.u32 4294901760, %v50086_v56  ;;  %v53669_v2 = vand.u32 4294901760, %v50500_v24  ;;  %v42696_v30 = vpack.c.bf16 %v24429_v19, %v24422_v45  ;;  %v24982_v56 = vand.u32 4294901760, %v50562_v60 }
 0x659   : > { %42695 = vmatpush3.bf16.msra.mxu0 %v50465_v15  ;;  %42649 = vmatprep.subr.bf16.mxu1 %v42648_v49  ;;  %v24457_v36 = vand.u32 4294901760, %v24456_v25  ;;  %v24463_v15 = vsub.f32 %v50257_v40, %v53671_v33  ;;  %v53516_v4 = vand.u32 4294901760, %v50567_v55  ;;  %v53672_v45 = vand.u32 4294901760, %v50262_v1 }
 0x65a   : > { %v42652_v47 = vpack.c.bf16 %v53668_v14, %v53667_v27  ;;  %v50578_v3 = vpack.c.bf16 %v53670_v9, %v53669_v2  ;;  %38718 = vmatprep.subr.mxu0 %v50528_v11  ;;  %v53518_v27 = vand.u32 4294901760, %v50550_v41  ;;  %v53517_v14 = vand.u32 4294901760, %v50555_v63 }
 0x65b   : > { %v50588_v2 = vand.u32 4294901760, %v24410_v13  ;;  %v42700_v9 = vpack.c.bf16 %v24443_v61, %v24436_v23  ;;  %v24470_v34 = vsub.f32 %v50262_v1, %v53672_v45  ;;  %v50597_v33 = vsub.f32 %v50562_v60, %v24982_v56 }
 0x65c   : > { %42651 = vmatpush3.bf16.msra.mxu1 %v42648_v49  ;;  %v50602_v25 = vsub.f32 %v50567_v55, %v53516_v4  ;;  %v50608_v49 = vpack.c.bf16 %v53517_v14, %v53518_v27  ;;  %v42704_v19 = vpack.c.bf16 %v24457_v36, %v24450_v43  ;;  %v24464_v13 = vand.u32 4294901760, %v24463_v15 }
 0x65d   : > { %38719 = vmatpush3.msra.mxu0 %v50528_v11  ;;  %42653 = vmatprep.subr.bf16.mxu1 %v42652_v47  ;;  %v24471_v23 = vand.u32 4294901760, %v24470_v34  ;;  %v53673_v61 = vand.u32 4294901760, %v50286_v0  ;;  %v53674_v4 = vand.u32 4294901760, %v50291_v50  ;;  %v50620_v27 = vsub.f32 %v50477_v28, %v50528_v11 }
 0x65e   : > { %38721 = vmatmul.mubr.f32.vlgmr.msra.gmra.mrb[6].mxu0 %v50588_v2  ;;  %42697 = vmatprep.subr.bf16.mxu0 %v42696_v30  ;;  %v25112_v43 = vand.u32 4294901760, %v50597_v33  ;;  %v25119_v36 = vand.u32 4294901760, %v50602_v25 }
 0x65f   : > { %42699 = vmatpush3.bf16.msra.mxu0 %v42696_v30  ;;  %38745 = vmatprep.mubr.f32.mxu0 %v50321_v32  ;;  %v24477_v45 = vsub.f32 %v50286_v0, %v53673_v61  ;;  %v24484_v14 = vsub.f32 %v50291_v50, %v53674_v4  ;;  %v42708_v30 = vpack.c.bf16 %v24471_v23, %v24464_v13  ;;  %v50633_v4 = vand.u32 4294901760, %v50620_v27  ;;  %v53688_v13 = vld [vmem:[#allocation24_spill] sm:$0xff]  ;;  %v53689_v23 = vld [vmem:[#allocation19_spill] sm:$0xff] }
 0x660   : > { %42655 = vmatpush3.bf16.msra.mxu1 %v42652_v47  ;;  %42701 = vmatprep.subr.bf16.mxu0 %v42700_v9  ;;  %v50629_v15 = vpack.c.bf16 %v25119_v36, %v25112_v43  ;;  %v53690_v61 = vand.u32 4294901760, %v50500_v24 }
 0x661   : > { %38668 = vmatprep.subr.mxu1 %v50119_v59  ;;  %v24478_v47 = vand.u32 4294901760, %v24477_v45  ;;  %v24485_v28 = vand.u32 4294901760, %v24484_v14 }
 0x662   : > { %v25085_v45 = vsub.f32 %v50500_v24, %v53690_v61 }
 0x663   : > { %42703 = vmatpush3.bf16.msra.mxu0 %v42700_v9  ;;  %v24491_v9 = vsub.f32 %v50620_v27, %v50633_v4 }
 0x664   : > { %38669 = vmatpush3.msra.mxu1 %v50119_v59  ;;  %42705 = vmatprep.subr.bf16.mxu0 %v42704_v19  ;;  %v42712_v59 = vpack.c.bf16 %v24485_v28, %v24478_v47 }
 0x665   : > { %38671 = vmatmul.mubr.f32.vlgmr.msra.gmra.mrb[8].mxu1 %v49821_v38  ;;  %42657 = vmatprep.subr.bf16.mxu1 %v49994_v22  ;;  %v24492_v14 = vand.u32 4294901760, %v24491_v9  ;;  %v53693_v9 = vld [vmem:[#allocation20_spill] sm:$0xff] }
 0x666   : > { %42659 = vmatpush3.bf16.msra.mxu1 %v49994_v22  ;;  %38695 = vmatprep.mubr.f32.mxu1 %v49749_v6  ;;  %v42716_v6 = vpack.c.bf16 %v50166_v18, %v50161_v35  ;;  %v42720_v22 = vpack.c.bf16 %v50188_v39, %v50182_v52  ;;  %v53677_v18 = vand.u32 4294901760, %v50383_v31  ;;  %v53678_v52 = vand.u32 4294901760, %v50396_v42 }
 0x667   : > { %42707 = vmatpush3.bf16.msra.mxu0 %v42704_v19  ;;  %42661 = vmatprep.subr.bf16.mxu1 %v49996_v54  ;;  %v53685_v42 = vand.u32 4294901760, %v50422_v5 }
 0x668   : > { %42709 = vmatprep.subr.bf16.mxu0 %v42708_v30  ;;  %v50668_v39 = vpack.c.bf16 %v53678_v52, %v53677_v18  ;;  %v53695_v18 = vand.u32 4294901760, %v50555_v63 }
 0x66a   : > { %42663 = vmatpush3.bf16.msra.mxu1 %v49996_v54  ;;  %v42724_v54 = vpack.c.bf16 %v50221_v20, %v50216_v44  ;;  %v53679_v44 = vand.u32 4294901760, %v50435_v21  ;;  %v53680_v20 = vand.u32 4294901760, %v50440_v7  ;;  %v25064_v21 = vsub.f32 %v50422_v5, %v53685_v42 }
 0x66b   : > { %42711 = vmatpush3.bf16.msra.mxu0 %v42708_v30  ;;  %42665 = vmatprep.subr.bf16.mxu1 %v50012_v57  ;;  %v53691_v30 = vand.u32 4294901760, %v50505_v10  ;;  %v25106_v52 = vsub.f32 %v50555_v63, %v53695_v18 }
 0x66c   : > { %42713 = vmatprep.subr.bf16.mxu0 %v42712_v59  ;;  %v25065_v19 = vand.u32 4294901760, %v25064_v21  ;;  %v50772_v21 = vld [vmem:[%s53410_s4 + $0x168] sm:$0xff] }
 0x66d   : > { %v25092_v47 = vsub.f32 %v50505_v10, %v53691_v30 }
 0x66e   : > { %42667 = vmatpush3.bf16.msra.mxu1 %v50012_v57  ;;  %v53675_v57 = vand.u32 4294901760, %v50370_v58  ;;  %v32247_v58 = vld [vmem:[%s53411_s5 + $0x158] sm:$0xf] }
 0x66f   : > { %42715 = vmatpush3.bf16.msra.mxu0 %v42712_v59  ;;  %42669 = vmatprep.subr.bf16.mxu1 %v50031_v37  ;;  %v24955_v7 = vsel %vm19385_vm6, %v32247_v58, 0  ;;  %v53697_v58 = vld [vmem:[#allocation22_spill] sm:$0xff] }
 0x670   : > { %38743 = vmatprep.subr.mxu0 %v24492_v14 }
 0x672   : > { %42671 = vmatpush3.bf16.msra.mxu1 %v50031_v37  ;;  %v53676_v37 = vand.u32 4294901760, %v50375_v17  ;;  %v53684_v17 = vand.u32 4294901760, %v50417_v8 }
 0x673   : > { %38744 = vmatpush3.msra.mxu0 %v24492_v14  ;;  %42673 = vmatprep.subr.bf16.mxu1 %v50047_v26 }
 0x674   : > { %38746 = vmatmul.mubr.f32.vlgmr.msra.gmra.mrb[6].mxu0 %v50405_v62  ;;  %42717 = vmatprep.subr.bf16.mxu0 %v42716_v6  ;;  %v50662_v35 = vpack.c.bf16 %v53676_v37, %v53675_v57  ;;  %v25057_v31 = vsub.f32 %v50417_v8, %v53684_v17 }
 0x675   : > { %42719 = vmatpush3.bf16.msra.mxu0 %v42716_v6  ;;  %38770 = vmatprep.mubr.f32.mxu0 %v50332_v12  ;;  %v25086_v6 = vand.u32 4294901760, %v25085_v45 }
 0x676   : > { %42675 = vmatpush3.bf16.msra.mxu1 %v50047_v26  ;;  %42721 = vmatprep.subr.bf16.mxu0 %v42720_v22  ;;  %v42728_v26 = vpack.c.bf16 %v50262_v1, %v50257_v40  ;;  %v42732_v40 = vpack.c.bf16 %v50291_v50, %v50286_v0  ;;  %v53682_v1 = vand.u32 4294901760, %v50493_v48  ;;  %v53683_v0 = vand.u32 4294901760, %v50567_v55 }
 0x677   : > { %38693 = vmatprep.subr.mxu1 %v50072_v46  ;;  %v53687_v48 = vand.u32 4294901760, %v50454_v16  ;;  %v25058_v34 = vand.u32 4294901760, %v25057_v31 }
 0x678   : > { %v50703_v50 = vpack.c.bf16 %v53683_v0, %v24982_v56  ;;  %v50722_v56 = vand.u32 4294901760, %v24955_v7 }
 0x679   : > { %42723 = vmatpush3.bf16.msra.mxu0 %v42720_v22  ;;  %v25078_v55 = vsub.f32 %v50454_v16, %v53687_v48  ;;  %v42816_v14 = vpack.c.bf16 %v25065_v19, %v25058_v34  ;;  %v25093_v22 = vand.u32 4294901760, %v25092_v47  ;;  %v50785_v48 = vld [vmem:[%s53410_s4 + $0x178] sm:$0xff]  ;;  %v25605_v34 = vand.u32 4294901760, %v50772_v21 }
 0x67a   : > { %38694 = vmatpush3.msra.mxu1 %v50072_v46  ;;  %42725 = vmatprep.subr.bf16.mxu0 %v42724_v54  ;;  %v50682_v46 = vpack.c.bf16 %v53680_v20, %v53679_v44  ;;  %v25611_v61 = vand.u32 4294901760, %v50785_v48 }
 0x67b   : > { %38696 = vmatmul.mubr.f32.vlgmr.msra.gmra.mrb[8].mxu1 %v49821_v38  ;;  %42797 = vmatprep.subr.bf16.mxu1 %v50662_v35  ;;  %v53681_v38 = vand.u32 4294901760, %v50488_v53  ;;  %v53686_v53 = vand.u32 4294901760, %v50445_v51  ;;  %v25079_v59 = vand.u32 4294901760, %v25078_v55  ;;  %v42824_v44 = vpack.c.bf16 %v25093_v22, %v25086_v6  ;;  %v53699_v6 = vld [vmem:[#allocation26_spill] sm:$0xff]  ;;  %v53700_v22 = vld [vmem:[#allocation13_spill] sm:$0xff] }
 0x67c   : > { %42799 = vmatpush3.bf16.msra.mxu1 %v50662_v35  ;;  %38870 = vmatprep.mubr.f32.mxu1 %v50362_v29  ;;  %v50800_v30 = vsub.f32 %v50772_v21, %v25605_v34  ;;  %v51020_v21 = vld [vmem:[%s53411_s5 + $0x178] sm:$0xff] }
 0x67d   : > { %42727 = vmatpush3.bf16.msra.mxu0 %v42724_v54  ;;  %42801 = vmatprep.subr.bf16.mxu1 %v50668_v39  ;;  %v50692_v29 = vpack.c.bf16 %v53682_v1, %v53681_v38  ;;  %v25071_v60 = vsub.f32 %v50445_v51, %v53686_v53  ;;  %v53694_v54 = vand.u32 4294901760, %v50550_v41  ;;  %v25113_v38 = vsub.f32 %v50597_v33, %v25112_v43  ;;  %v53698_v43 = vld [vmem:[#allocation23_spill] sm:$0xff] }
 0x67e   : > { %42729 = vmatprep.subr.bf16.mxu0 %v42728_v26  ;;  %v25120_v1 = vsub.f32 %v50602_v25, %v25119_v36  ;;  %v50767_v36 = vld [vmem:[%s53410_s4 + $0x160] sm:$0xff] }
 0x67f   : > { %v25072_v28 = vand.u32 4294901760, %v25071_v60  ;;  %v25099_v57 = vsub.f32 %v50550_v41, %v53694_v54  ;;  %v25114_v17 = vand.u32 4294901760, %v25113_v38  ;;  %v25602_v55 = vand.u32 4294901760, %v50767_v36 }
 0x680   : > { %42803 = vmatpush3.bf16.msra.mxu1 %v50668_v39  ;;  %v25121_v31 = vand.u32 4294901760, %v25120_v1  ;;  %v50823_v54 = vsub.f32 %v50785_v48, %v25611_v61  ;;  %v42836_v38 = vpack.c.bf16 %v50422_v5, %v50417_v8  ;;  %v42840_v8 = vpack.c.bf16 %v50454_v16, %v50445_v51 }
 0x681   : > { %42731 = vmatpush3.bf16.msra.mxu0 %v42728_v26  ;;  %42805 = vmatprep.subr.bf16.mxu1 %v50682_v46  ;;  %v42820_v37 = vpack.c.bf16 %v25079_v59, %v25072_v28  ;;  %v53696_v26 = vld [vmem:[#allocation21_spill] sm:$0xff]  ;;  %v25100_v20 = vand.u32 4294901760, %v25099_v57  ;;  %v50795_v45 = vsub.f32 %v50767_v36, %v25602_v55  ;;  %v50811_v59 = vld [vmem:[%s53410_s4 + $0x188] sm:$0xff] }
 0x682   : > { %42733 = vmatprep.subr.bf16.mxu0 %v42732_v40  ;;  %v42832_v53 = vpack.c.bf16 %v25121_v31, %v25114_v17  ;;  %v50806_v28 = vld [vmem:[%s53410_s4 + $0x180] sm:$0xff]  ;;  %v53519_v18 = vand.u32 4294901760, %v50811_v59  ;;  %v51008_v36 = vld [vmem:[%s53411_s5 + $0x168] sm:$0xff]  ;;  %v53713_v48 = vand.u32 4294901760, %v50811_v59 }
 0x683   : > { %v53701_v57 = vld [vmem:[#allocation14_spill] sm:$0xff] }
 0x684   : > { %42807 = vmatpush3.bf16.msra.mxu1 %v50682_v46  ;;  %v50854_v31 = vsub.f32 %v50811_v59, %v53519_v18  ;;  %v50871_v18 = vld [vmem:[%s53410_s4 + $0x1a0] sm:$0xff] }
 0x685   : > { %42735 = vmatpush3.bf16.msra.mxu0 %v42732_v40  ;;  %42809 = vmatprep.subr.bf16.mxu1 %v50692_v29  ;;  %v25107_v40 = vand.u32 4294901760, %v25106_v52  ;;  %v50833_v52 = vld [vmem:[%s53410_s4 + $0x190] sm:$0xff]  ;;  %v51044_v59 = vld [vmem:[%s53411_s5 + $0x180] sm:$0xff] }
 0x686   : > { %38768 = vmatprep.subr.mxu0 %v50620_v27  ;;  %v53524_v5 = vand.u32 4294901760, %v50833_v52 }
 0x687   : > { %v42828_v0 = vpack.c.bf16 %v25107_v40, %v25100_v20  ;;  %v53523_v20 = vand.u32 4294901760, %v50795_v45  ;;  %v53520_v40 = vand.u32 4294901760, %v50800_v30 }
 0x688   : > { %42811 = vmatpush3.bf16.msra.mxu1 %v50692_v29  ;;  %v50888_v16 = vsub.f32 %v50833_v52, %v53524_v5 }
 0x689   : > { %38769 = vmatpush3.msra.mxu0 %v50620_v27  ;;  %42813 = vmatprep.subr.bf16.mxu1 %v50703_v50  ;;  %v53692_v27 = vld [vmem:[#allocation18_spill] sm:$0xff] }
 0x68a   : > { %38771 = vmatmul.mubr.f32.vlgmr.msra.gmra.mrb[6].mxu0 %v53688_v13  ;;  %42737 = vmatprep.subr.bf16.mxu0 %v53689_v23 }
 0x68b   : > { %42739 = vmatpush3.bf16.msra.mxu0 %v53689_v23  ;;  %38795 = vmatprep.mubr.f32.mxu0 %v53692_v27 }
 0x68c   : > { %42815 = vmatpush3.bf16.msra.mxu1 %v50703_v50  ;;  %42741 = vmatprep.subr.bf16.mxu0 %v53693_v9 }
 0x68d   : > { %38868 = vmatprep.subr.mxu1 %v50722_v56 }
 0x68f   : > { %42743 = vmatpush3.bf16.msra.mxu0 %v53693_v9 }
 0x690   : > { %38869 = vmatpush3.msra.mxu1 %v50722_v56  ;;  %42745 = vmatprep.subr.bf16.mxu0 %v53696_v26 }
 0x691   : > { %38871 = vmatmul.mubr.f32.vlgmr.msra.gmra.mrb[8].mxu1 %v50588_v2  ;;  %42817 = vmatprep.subr.bf16.mxu1 %v42816_v14  ;;  %v50756_v2 = vsub.f32 %v24955_v7, %v50722_v56  ;;  %v50777_v7 = vld [vmem:[%s53410_s4 + $0x170] sm:$0xff] }
 0x692   : > { %42819 = vmatpush3.bf16.msra.mxu1 %v42816_v14  ;;  %38895 = vmatprep.mubr.f32.mxu1 %v50321_v32  ;;  %v25608_v19 = vand.u32 4294901760, %v50777_v7 }
 0x693   : > { %42747 = vmatpush3.bf16.msra.mxu0 %v53696_v26  ;;  %42821 = vmatprep.subr.bf16.mxu1 %v42820_v37  ;;  %v50761_v42 = vand.u32 4294901760, %v50756_v2 }
 0x694   : > { %42749 = vmatprep.subr.bf16.mxu0 %v53697_v58  ;;  %v50816_v14 = vsub.f32 %v50777_v7, %v25608_v19  ;;  %v53712_v7 = vand.u32 4294901760, %v50806_v28 }
 0x695   : > { %v25127_v60 = vsub.f32 %v50756_v2, %v50761_v42 }
 0x696   : > { %42823 = vmatpush3.bf16.msra.mxu1 %v42820_v37  ;;  %v53525_v37 = vand.u32 4294901760, %v50806_v28  ;;  %v53522_v1 = vand.u32 4294901760, %v50816_v14 }
 0x697   : > { %42751 = vmatpush3.bf16.msra.mxu0 %v53697_v58  ;;  %42825 = vmatprep.subr.bf16.mxu1 %v42824_v44  ;;  %v25128_v47 = vand.u32 4294901760, %v25127_v60 }
 0x698   : > { %42753 = vmatprep.subr.bf16.mxu0 %v53698_v43  ;;  %v50849_v17 = vsub.f32 %v50806_v28, %v53525_v37  ;;  %v53705_v37 = vld [vmem:[#allocation16_spill] sm:$0xff] }
 0x699   : > { %v32258_v28 = vld [vmem:[%s53410_s4 + $0x1b0] sm:$0xf] }
 0x69a   : > { %42827 = vmatpush3.bf16.msra.mxu1 %v42824_v44  ;;  %v50838_v44 = vld [vmem:[%s53410_s4 + $0x198] sm:$0xff] }
 0x69b   : > { %42755 = vmatpush3.bf16.msra.mxu0 %v53698_v43  ;;  %42829 = vmatprep.subr.bf16.mxu1 %v42828_v0  ;;  %v53529_v60 = vand.u32 4294901760, %v50838_v44 }
 0x69c   : > { %38793 = vmatprep.subr.mxu0 %v50528_v11 }
 0x69e   : > { %42831 = vmatpush3.bf16.msra.mxu1 %v42828_v0  ;;  %v53521_v0 = vand.u32 4294901760, %v50823_v54 }
 0x69f   : > { %38794 = vmatpush3.msra.mxu0 %v50528_v11  ;;  %42833 = vmatprep.subr.bf16.mxu1 %v42832_v53 }
 0x6a0   : > { %38796 = vmatmul.mubr.f32.vlgmr.msra.gmra.mrb[6].mxu0 %v53699_v6  ;;  %42757 = vmatprep.subr.bf16.mxu0 %v53700_v22  ;;  %v50882_v51 = vpack.c.bf16 %v53521_v0, %v53522_v1  ;;  %v53526_v0 = vand.u32 4294901760, %v50854_v31  ;;  %v42844_v1 = vpack.c.bf16 %v50505_v10, %v50500_v24 }
 0x6a1   : > { %42759 = vmatpush3.bf16.msra.mxu0 %v53700_v22  ;;  %38820 = vmatprep.mubr.f32.mxu0 %v50321_v32  ;;  %v53703_v22 = vld [vmem:[#allocation15_spill] sm:$0xff] }
 0x6a2   : > { %42835 = vmatpush3.bf16.msra.mxu1 %v42832_v53  ;;  %42761 = vmatprep.subr.bf16.mxu0 %v53701_v57  ;;  %v50860_v53 = vpack.c.bf16 %v53520_v40, %v53523_v20  ;;  %v50876_v40 = vld [vmem:[%s53410_s4 + $0x1a8] sm:$0xff]  ;;  %53704 = vst [vmem:[#allocation19_spill] sm:$0xff] %v50882_v51  ;;  %v53528_v20 = vand.u32 4294901760, %v50871_v18 }
 0x6a3   : > { %38893 = vmatprep.subr.mxu1 %v25128_v47  ;;  %v53530_v5 = vand.u32 4294901760, %v50876_v40 }
 0x6a4   : > { %53702 = vst [vmem:[#allocation24_spill] sm:$0xff] %v50860_v53  ;;  %v50915_v24 = vsub.f32 %v50871_v18, %v53528_v20  ;;  %v53708_v20 = vld [vmem:[#allocation17_spill] sm:$0xff] }
 0x6a5   : > { %42763 = vmatpush3.bf16.msra.mxu0 %v53701_v57  ;;  %v53527_v57 = vand.u32 4294901760, %v50849_v17  ;;  %v50920_v10 = vsub.f32 %v50876_v40, %v53530_v5 }
 0x6a6   : > { %38894 = vmatpush3.msra.mxu1 %v25128_v47  ;;  %42765 = vmatprep.subr.bf16.mxu0 %v53703_v22  ;;  %v50893_v47 = vsub.f32 %v50838_v44, %v53529_v60  ;;  %v53536_v60 = vand.u32 4294901760, %v50915_v24 }
 0x6a7   : > { %38896 = vmatmul.mubr.f32.vlgmr.msra.gmra.mrb[8].mxu1 %v50405_v62  ;;  %42837 = vmatprep.subr.bf16.mxu1 %v42836_v38  ;;  %v53535_v5 = vand.u32 4294901760, %v50920_v10 }
 0x6a8   : > { %42839 = vmatpush3.bf16.msra.mxu1 %v42836_v38  ;;  %38920 = vmatprep.mubr.f32.mxu1 %v50332_v12  ;;  %v50908_v12 = vpack.c.bf16 %v53526_v0, %v53527_v57  ;;  %v53538_v38 = vand.u32 4294901760, %v50888_v16  ;;  %v42848_v0 = vpack.c.bf16 %v50555_v63, %v50550_v41  ;;  %v25578_v63 = vld [vmem:[#allocation2 + $0x4] sm:$0xff] }
 0x6a9   : > { %42767 = vmatpush3.bf16.msra.mxu0 %v53703_v22  ;;  %42841 = vmatprep.subr.bf16.mxu1 %v42840_v8  ;;  %v53537_v22 = vand.u32 4294901760, %v50893_v47  ;;  %v50941_v41 = vpack.c.bf16 %v53535_v5, %v53536_v60 }
 0x6aa   : > { %42769 = vmatprep.subr.bf16.mxu0 %v53705_v37  ;;  %53706 = vst [vmem:[#allocation18_spill] sm:$0xff] %v50908_v12 }
 0x6ab   : > { %v50929_v57 = vpack.c.bf16 %v53537_v22, %v53538_v38  ;;  %53709 = vst [vmem:[#allocation21_spill] sm:$0xff] %v50941_v41  ;;  %v53728_v38 = vand.u32 4294901760, %v50816_v14 }
 0x6ac   : > { %42843 = vmatpush3.bf16.msra.mxu1 %v42840_v8 }
 0x6ad   : > { %42771 = vmatpush3.bf16.msra.mxu0 %v53705_v37  ;;  %42845 = vmatprep.subr.bf16.mxu1 %v42844_v1  ;;  %53707 = vst [vmem:[#allocation20_spill] sm:$0xff] %v50929_v57  ;;  %v42852_v37 = vpack.c.bf16 %v50602_v25, %v50597_v33  ;;  %v25593_v33 = vsel %vm20464_vm8, %v25578_v63, 0  ;;  %v53715_v63 = vand.u32 4294901760, %v50833_v52  ;;  %v51167_v57 = vld [vmem:[%s53411_s5 + $0x1a8] sm:$0xff] }
 0x6ae   : > { %42773 = vmatprep.subr.bf16.mxu0 %v53708_v20  ;;  %v50953_v25 = vand.u32 4294901760, %v25593_v33 }
 0x6b0   : > { %42847 = vmatpush3.bf16.msra.mxu1 %v42844_v1  ;;  %v53531_v1 = vand.u32 4294901760, %v51020_v21 }
 0x6b1   : > { %42775 = vmatpush3.bf16.msra.mxu0 %v53708_v20  ;;  %42849 = vmatprep.subr.bf16.mxu1 %v42848_v0 }
 0x6b2   : > { %38818 = vmatprep.subr.mxu0 %v50633_v4 }
 0x6b4   : > { %42851 = vmatpush3.bf16.msra.mxu1 %v42848_v0  ;;  %v51049_v0 = vld [vmem:[%s53411_s5 + $0x188] sm:$0xff] }
 0x6b5   : > { %38819 = vmatpush3.msra.mxu0 %v50633_v4  ;;  %42853 = vmatprep.subr.bf16.mxu1 %v42852_v37  ;;  %v50964_v4 = vsub.f32 %v25593_v33, %v50953_v25  ;;  %v53716_v33 = vand.u32 4294901760, %v50838_v44  ;;  %v53719_v44 = vand.u32 4294901760, %v50871_v18  ;;  %v53724_v18 = vand.u32 4294901760, %v50800_v30 }
 0x6b6   : > { %38821 = vmatmul.mubr.f32.vlgmr.msra.gmra.mrb[6].mxu0 %v50405_v62  ;;  %42777 = vmatprep.subr.bf16.mxu0 %v53689_v23 }
 0x6b7   : > { %42779 = vmatpush3.bf16.msra.mxu0 %v53689_v23  ;;  %38845 = vmatprep.mubr.f32.mxu0 %v50321_v32 }
 0x6b8   : > { %42855 = vmatpush3.bf16.msra.mxu1 %v42852_v37  ;;  %42781 = vmatprep.subr.bf16.mxu0 %v53693_v9 }
 0x6b9   : > { %38918 = vmatprep.subr.mxu1 %v50756_v2 }
 0x6bb   : > { %42783 = vmatpush3.bf16.msra.mxu0 %v53693_v9  ;;  %v25579_v9 = vld [vmem:[#allocation2 + $0xc] sm:$0x3] }
 0x6bc   : > { %38919 = vmatpush3.msra.mxu1 %v50756_v2  ;;  %42785 = vmatprep.subr.bf16.mxu0 %v53696_v26 }
 0x6bd   : > { %38921 = vmatmul.mubr.f32.vlgmr.msra.gmra.mrb[8].mxu1 %v53688_v13  ;;  %42857 = vmatprep.subr.bf16.mxu1 %v50662_v35  ;;  %v50971_v13 = vand.u32 4294901760, %v50964_v4 }
 0x6be   : > { %42859 = vmatpush3.bf16.msra.mxu1 %v50662_v35  ;;  %38945 = vmatprep.mubr.f32.mxu1 %v53692_v27  ;;  %v50984_v27 = vpack.c.bf16 %v25605_v34, %v25602_v55  ;;  %v51028_v55 = vpack.c.bf16 %v53713_v48, %v53712_v7  ;;  %v51077_v7 = vsub.f32 %v51020_v21, %v53531_v1  ;;  %v53718_v48 = vld [vmem:[#allocation25_spill] sm:$0xff]  ;;  %v51093_v1 = vsel %vm19385_vm6, %v32258_v28, 0  ;;  %v51108_v28 = vld [vmem:[%s53411_s5 + $0x190] sm:$0xff] }
 0x6bf   : > { %42787 = vmatpush3.bf16.msra.mxu0 %v53696_v26  ;;  %42861 = vmatprep.subr.bf16.mxu1 %v50668_v39  ;;  %53710 = vst [vmem:[#allocation22_spill] sm:$0xff] %v50971_v13  ;;  %v25680_v23 = vsub.f32 %v50964_v4, %v50971_v13  ;;  %v50991_v26 = vpack.c.bf16 %v25611_v61, %v25608_v19  ;;  %v53533_v61 = vand.u32 4294901760, %v51008_v36  ;;  %v53553_v41 = vand.u32 4294901760, %v51108_v28 }
 0x6c0   : > { %42789 = vmatprep.subr.bf16.mxu0 %v53697_v58  ;;  %53714 = vst [vmem:[#allocation26_spill] sm:$0xff] %v51028_v55 }
 0x6c1   : > { %53711 = vst [vmem:[#allocation23_spill] sm:$0xff] %v50991_v26  ;;  %v50994_v2 = vand.u32 4294901760, %v25680_v23  ;;  %v51059_v37 = vsub.f32 %v51008_v36, %v53533_v61  ;;  %v51067_v23 = vpack.c.bf16 %v53716_v33, %v53715_v63  ;;  %v53720_v63 = vand.u32 4294901760, %v50876_v40 }
 0x6c2   : > { %42863 = vmatpush3.bf16.msra.mxu1 %v50668_v39  ;;  %v25708_v40 = vsub.f32 %v50800_v30, %v53724_v18 }
 0x6c3   : > { %42791 = vmatpush3.bf16.msra.mxu0 %v53697_v58  ;;  %42865 = vmatprep.subr.bf16.mxu1 %v50682_v46  ;;  %v25596_v58 = vsel %vm20464_vm8, %v25579_v9, 0  ;;  %53717 = vst [vmem:[#allocation13_spill] sm:$0xff] %v51067_v23  ;;  %v51090_v33 = vpack.c.bf16 %v53720_v63, %v53719_v44  ;;  %v51113_v44 = vld [vmem:[%s53411_s5 + $0x198] sm:$0xff]  ;;  %v53729_v18 = vand.u32 4294901760, %v51059_v37 }
 0x6c4   : > { %42793 = vmatprep.subr.bf16.mxu0 %v53698_v43  ;;  %v51031_v34 = vand.u32 4294901760, %v25596_v58 }
 0x6c5   : > { %53721 = vst [vmem:[#allocation14_spill] sm:$0xff] %v51090_v33 }
 0x6c6   : > { %42867 = vmatpush3.bf16.msra.mxu1 %v50682_v46  ;;  %v51082_v52 = vsub.f32 %v25596_v58, %v51031_v34  ;;  %v53722_v58 = vld [vmem:[#allocation27_spill] sm:$0xff] }
 0x6c7   : > { %42795 = vmatpush3.bf16.msra.mxu0 %v53698_v43  ;;  %42869 = vmatprep.subr.bf16.mxu1 %v50692_v29  ;;  %v51003_v43 = vld [vmem:[%s53411_s5 + $0x160] sm:$0xff] }
 0x6c8   : > { %38843 = vmatprep.subr.mxu0 %v50528_v11  ;;  %v53534_v19 = vand.u32 4294901760, %v51003_v43  ;;  %v51131_v22 = vand.u32 4294901760, %v51082_v52 }
 0x6ca   : > { %42871 = vmatpush3.bf16.msra.mxu1 %v50692_v29  ;;  %v51054_v8 = vsub.f32 %v51003_v43, %v53534_v19  ;;  %53727 = vst [vmem:[#allocation17_spill] sm:$0xff] %v51131_v22  ;;  %v25715_v19 = vsub.f32 %v50816_v14, %v53728_v38  ;;  %v53733_v38 = vand.u32 4294901760, %v51077_v7 }
 0x6cb   : > { %38844 = vmatpush3.msra.mxu0 %v50528_v11  ;;  %42873 = vmatprep.subr.bf16.mxu1 %v50703_v50  ;;  %v51015_v11 = vld [vmem:[%s53411_s5 + $0x170] sm:$0xff] }
 0x6cc   : > { %38846 = vmatmul.mubr.f32.vlgmr.msra.gmra.mrb[6].mxu0 %v50405_v62  ;;  %42917 = vmatprep.subr.bf16.mxu0 %v50984_v27  ;;  %v53532_v20 = vand.u32 4294901760, %v51015_v11  ;;  %v53545_v63 = vand.u32 4294901760, %v51054_v8  ;;  %v25716_v53 = vand.u32 4294901760, %v25715_v19 }
 0x6cd   : > { %42919 = vmatpush3.bf16.msra.mxu0 %v50984_v27  ;;  %39020 = vmatprep.mubr.f32.mxu0 %v50994_v2 }
 0x6ce   : > { %42875 = vmatpush3.bf16.msra.mxu1 %v50703_v50  ;;  %42921 = vmatprep.subr.bf16.mxu0 %v50991_v26  ;;  %v51072_v9 = vsub.f32 %v51015_v11, %v53532_v20  ;;  %v53540_v20 = vand.u32 4294901760, %v51049_v0 }
 0x6cf   : > { %38943 = vmatprep.subr.mxu1 %v50722_v56 }
 0x6d0   : > { %v51128_v60 = vsub.f32 %v51049_v0, %v53540_v20  ;;  %v53732_v12 = vand.u32 4294901760, %v51072_v9 }
 0x6d1   : > { %42923 = vmatpush3.bf16.msra.mxu0 %v50991_v26 }
 0x6d2   : > { %38944 = vmatpush3.msra.mxu1 %v50722_v56  ;;  %42925 = vmatprep.subr.bf16.mxu0 %v51028_v55  ;;  %53726 = vst [vmem:[#allocation16_spill] sm:$0xff] %v51128_v60  ;;  %v51152_v51 = vpack.c.bf16 %v53733_v38, %v53732_v12  ;;  %v53737_v38 = vand.u32 4294901760, %v50854_v31 }
 0x6d3   : > { %38946 = vmatmul.mubr.f32.vlgmr.msra.gmra.mrb[8].mxu1 %v53699_v6  ;;  %42877 = vmatprep.subr.bf16.mxu1 %v53718_v48  ;;  %v53539_v6 = vand.u32 4294901760, %v51044_v59 }
 0x6d4   : > { %42879 = vmatpush3.bf16.msra.mxu1 %v53718_v48  ;;  %38970 = vmatprep.mubr.f32.mxu1 %v50321_v32  ;;  %v53723_v48 = vand.u32 4294901760, %v50795_v45  ;;  %53734 = vst [vmem:[#allocation27_spill] sm:$0xff] %v51152_v51 }
 0x6d5   : > { %42927 = vmatpush3.bf16.msra.mxu0 %v51028_v55  ;;  %42881 = vmatprep.subr.bf16.mxu1 %v53722_v58  ;;  %v51123_v5 = vsub.f32 %v51044_v59, %v53539_v6  ;;  %v53731_v6 = vand.u32 4294901760, %v50823_v54  ;;  %v25736_v55 = vsub.f32 %v50854_v31, %v53737_v38 }
 0x6d6   : > { %v25701_v61 = vsub.f32 %v50795_v45, %v53723_v48  ;;  %42929 = vmatprep.subr.bf16.mxu0 %v51067_v23  ;;  %v51140_v48 = vpack.c.bf16 %v53729_v18, %v53545_v63  ;;  %v25709_v63 = vand.u32 4294901760, %v25708_v40  ;;  %v53735_v40 = vand.u32 4294901760, %v51113_v44 }
 0x6d7   : > { %53725 = vst [vmem:[#allocation15_spill] sm:$0xff] %v51123_v5  ;;  %v25722_v20 = vsub.f32 %v50823_v54, %v53731_v6  ;;  %v51162_v6 = vld [vmem:[%s53411_s5 + $0x1a0] sm:$0xff]  ;;  %v53738_v13 = vand.u32 4294901760, %v51123_v5 }
 0x6d8   : > { %53730 = vst [vmem:[#allocation25_spill] sm:$0xff] %v51140_v48  ;;  %42883 = vmatpush3.bf16.msra.mxu1 %v53722_v58  ;;  %v51157_v58 = vand.u32 4294901760, %v51093_v1  ;;  %v25702_v18 = vand.u32 4294901760, %v25701_v61  ;;  %v51175_v61 = vsub.f32 %v51108_v28, %v53553_v41  ;;  %v51180_v51 = vsub.f32 %v51113_v44, %v53735_v40 }
 0x6d9   : > { %42931 = vmatpush3.bf16.msra.mxu0 %v51067_v23  ;;  %42885 = vmatprep.subr.bf16.mxu1 %v50578_v3  ;;  %v25690_v48 = vsub.f32 %v51082_v52, %v51131_v22  ;;  %v53736_v23 = vand.u32 4294901760, %v50849_v17  ;;  %v25723_v41 = vand.u32 4294901760, %v25722_v20  ;;  %v53563_v26 = vand.u32 4294901760, %v51162_v6 }
 0x6da   : > { %42933 = vmatprep.subr.bf16.mxu0 %v51090_v33  ;;  %v53566_v40 = vand.u32 4294901760, %v51167_v57  ;;  %v53739_v22 = vand.u32 4294901760, %v51128_v60  ;;  %v53743_v60 = vand.u32 4294901760, %v51175_v61 }
 0x6db   : > { %v25729_v12 = vsub.f32 %v50849_v17, %v53736_v23  ;;  %v42936_v23 = vpack.c.bf16 %v25709_v63, %v25702_v18  ;;  %v51207_v38 = vsub.f32 %v51162_v6, %v53563_v26  ;;  %v53741_v63 = vand.u32 4294901760, %v50888_v16 }
 0x6dc   : > { %42887 = vmatpush3.bf16.msra.mxu1 %v50578_v3  ;;  %v51197_v19 = vpack.c.bf16 %v53739_v22, %v53738_v13  ;;  %v51212_v22 = vsub.f32 %v51167_v57, %v53566_v40  ;;  %v51218_v3 = vand.u32 4294901760, %v25690_v48  ;;  %v42940_v20 = vpack.c.bf16 %v25723_v41, %v25716_v53 }
 0x6dd   : > { %42935 = vmatpush3.bf16.msra.mxu0 %v51090_v33  ;;  %42889 = vmatprep.subr.bf16.mxu1 %v50608_v49  ;;  %v25730_v13 = vand.u32 4294901760, %v25729_v12  ;;  %v25743_v18 = vsub.f32 %v50888_v16, %v53741_v63  ;;  %v53742_v33 = vand.u32 4294901760, %v50893_v47  ;;  %v53744_v40 = vand.u32 4294901760, %v51180_v51 }
 0x6de   : > { %53740 = vst [vmem:[#allocation28_spill] sm:$0xff] %v51197_v19  ;;  %39018 = vmatprep.subr.mxu0 %v51157_v58  ;;  %v25737_v19 = vand.u32 4294901760, %v25736_v55  ;;  %v26399_v53 = vand.u32 4294901760, %v51212_v22  ;;  %v53745_v48 = vand.u32 4294901760, %v50915_v24 }
 0x6df   : > { %v25750_v26 = vsub.f32 %v50893_v47, %v53742_v33  ;;  %v51227_v5 = vpack.c.bf16 %v53744_v40, %v53743_v60  ;;  %v25744_v55 = vand.u32 4294901760, %v25743_v18  ;;  %v51237_v60 = vsub.f32 %v51093_v1, %v51157_v58 }
 0x6e0   : > { %42891 = vmatpush3.bf16.msra.mxu1 %v50608_v49  ;;  %v26392_v49 = vand.u32 4294901760, %v51207_v38  ;;  %v42944_v41 = vpack.c.bf16 %v25737_v19, %v25730_v13  ;;  %v25757_v12 = vsub.f32 %v50915_v24, %v53745_v48  ;;  %v53746_v40 = vand.u32 4294901760, %v50920_v10  ;;  %v53761_v48 = vld [vmem:[#allocation15_spill] sm:$0xff] }
 0x6e1   : > { %39019 = vmatpush3.msra.mxu0 %v51157_v58  ;;  %42893 = vmatprep.subr.bf16.mxu1 %v50629_v15  ;;  %v25751_v33 = vand.u32 4294901760, %v25750_v26  ;;  %v51255_v13 = vand.u32 4294901760, %v51237_v60 }
 0x6e2   : > { %39021 = vmatmul.mubr.f32.vlgmr.msra.gmra.mrb[6].mxu0 %v51218_v3  ;;  %42937 = vmatprep.subr.bf16.mxu0 %v42936_v23  ;;  %v51250_v19 = vpack.c.bf16 %v26399_v53, %v26392_v49  ;;  %v25758_v26 = vand.u32 4294901760, %v25757_v12  ;;  %v53762_v12 = vand.u32 4294901760, %v53761_v48 }
 0x6e3   : > { %42939 = vmatpush3.bf16.msra.mxu0 %v42936_v23  ;;  %39045 = vmatprep.mubr.f32.mxu0 %v50953_v25  ;;  %v25764_v23 = vsub.f32 %v50920_v10, %v53746_v40 }
 0x6e4   : > { %42895 = vmatpush3.bf16.msra.mxu1 %v50629_v15  ;;  %42941 = vmatprep.subr.bf16.mxu0 %v42940_v20  ;;  %v42948_v15 = vpack.c.bf16 %v25751_v33, %v25744_v55  ;;  %v26365_v40 = vsub.f32 %v53761_v48, %v53762_v12 }
 0x6e5   : > { %38968 = vmatprep.subr.mxu1 %v50761_v42  ;;  %v25765_v1 = vand.u32 4294901760, %v25764_v23  ;;  %v53763_v23 = vld [vmem:[#allocation16_spill] sm:$0xff] }
 0x6e7   : > { %42943 = vmatpush3.bf16.msra.mxu0 %v42940_v20  ;;  %v25771_v20 = vsub.f32 %v51237_v60, %v51255_v13 }
 0x6e8   : > { %38969 = vmatpush3.msra.mxu1 %v50761_v42  ;;  %42945 = vmatprep.subr.bf16.mxu0 %v42944_v41  ;;  %v42952_v42 = vpack.c.bf16 %v25765_v1, %v25758_v26 }
 0x6e9   : > { %38971 = vmatmul.mubr.f32.vlgmr.msra.gmra.mrb[8].mxu1 %v50405_v62  ;;  %42897 = vmatprep.subr.bf16.mxu1 %v50662_v35  ;;  %v25772_v63 = vand.u32 4294901760, %v25771_v20  ;;  %v53766_v20 = vld [vmem:[#allocation23_spill] sm:$0xff] }
 0x6ea   : > { %42899 = vmatpush3.bf16.msra.mxu1 %v50662_v35  ;;  %38995 = vmatprep.mubr.f32.mxu1 %v50321_v32  ;;  %v42956_v32 = vpack.c.bf16 %v50800_v30, %v50795_v45  ;;  %v42960_v35 = vpack.c.bf16 %v50823_v54, %v50816_v14  ;;  %v53749_v30 = vand.u32 4294901760, %v51015_v11  ;;  %v53750_v14 = vand.u32 4294901760, %v51020_v21 }
 0x6eb   : > { %42947 = vmatpush3.bf16.msra.mxu0 %v42944_v41  ;;  %42901 = vmatprep.subr.bf16.mxu1 %v50668_v39  ;;  %v53757_v11 = vand.u32 4294901760, %v51054_v8 }
 0x6ec   : > { %42949 = vmatprep.subr.bf16.mxu0 %v42948_v15  ;;  %v51290_v54 = vpack.c.bf16 %v53750_v14, %v53749_v30  ;;  %v53768_v30 = vand.u32 4294901760, %v51180_v51 }
 0x6ed   : > { %v26337_v21 = vsub.f32 %v51054_v8, %v53757_v11 }
 0x6ee   : > { %42903 = vmatpush3.bf16.msra.mxu1 %v50668_v39  ;;  %v42964_v39 = vpack.c.bf16 %v50854_v31, %v50849_v17  ;;  %v53751_v17 = vand.u32 4294901760, %v51044_v59  ;;  %v53752_v31 = vand.u32 4294901760, %v51049_v0  ;;  %v53758_v59 = vand.u32 4294901760, %v51059_v37 }
 0x6ef   : > { %42951 = vmatpush3.bf16.msra.mxu0 %v42948_v15  ;;  %42905 = vmatprep.subr.bf16.mxu1 %v50682_v46  ;;  %v26338_v55 = vand.u32 4294901760, %v26337_v21  ;;  %v53764_v15 = vand.u32 4294901760, %v53763_v23  ;;  %v26386_v14 = vsub.f32 %v51180_v51, %v53768_v30 }
 0x6f0   : > { %42953 = vmatprep.subr.bf16.mxu0 %v42952_v42  ;;  %v26344_v0 = vsub.f32 %v51059_v37, %v53758_v59  ;;  %v53771_v59 = vld [vmem:[#allocation14_spill] sm:$0xff] }
 0x6f1   : > { %v26372_v26 = vsub.f32 %v53763_v23, %v53764_v15 }
 0x6f2   : > { %42907 = vmatpush3.bf16.msra.mxu1 %v50682_v46  ;;  %v53747_v46 = vand.u32 4294901760, %v51003_v43  ;;  %v32269_v43 = vld [vmem:[%s53411_s5 + $0x1b0] sm:$0xf]  ;;  %v26345_v33 = vand.u32 4294901760, %v26344_v0 }
 0x6f3   : > { %42955 = vmatpush3.bf16.msra.mxu0 %v42952_v42  ;;  %42909 = vmatprep.subr.bf16.mxu1 %v50692_v29 }
 0x6f4   : > { %39043 = vmatprep.subr.mxu0 %v25772_v63 }
 0x6f6   : > { %42911 = vmatpush3.bf16.msra.mxu1 %v50692_v29  ;;  %v53748_v29 = vand.u32 4294901760, %v51008_v36 }
 0x6f7   : > { %39044 = vmatpush3.msra.mxu0 %v25772_v63  ;;  %42913 = vmatprep.subr.bf16.mxu1 %v50703_v50  ;;  %v43056_v63 = vpack.c.bf16 %v26345_v33, %v26338_v55  ;;  %v53775_v55 = vld [vmem:[#allocation18_spill] sm:$0xff] }
 0x6f8   : > { %39046 = vmatmul.mubr.f32.vlgmr.msra.gmra.mrb[6].mxu0 %v51031_v34  ;;  %42957 = vmatprep.subr.bf16.mxu0 %v42956_v32  ;;  %v51284_v45 = vpack.c.bf16 %v53748_v29, %v53747_v46 }
 0x6f9   : > { %42959 = vmatpush3.bf16.msra.mxu0 %v42956_v32  ;;  %39070 = vmatprep.mubr.f32.mxu0 %v50964_v4  ;;  %v26366_v32 = vand.u32 4294901760, %v26365_v40 }
 0x6fa   : > { %42915 = vmatpush3.bf16.msra.mxu1 %v50703_v50  ;;  %42961 = vmatprep.subr.bf16.mxu0 %v42960_v35  ;;  %v42968_v50 = vpack.c.bf16 %v50893_v47, %v50888_v16  ;;  %v42972_v16 = vpack.c.bf16 %v50920_v10, %v50915_v24  ;;  %v53754_v47 = vand.u32 4294901760, %v51113_v44  ;;  %v53755_v24 = vand.u32 4294901760, %v51162_v6 }
 0x6fb   : > { %38993 = vmatprep.subr.mxu1 %v50722_v56  ;;  %v53756_v10 = vand.u32 4294901760, %v51167_v57  ;;  %v53759_v44 = vand.u32 4294901760, %v51072_v9  ;;  %v53760_v57 = vand.u32 4294901760, %v51077_v7 }
 0x6fd   : > { %42963 = vmatpush3.bf16.msra.mxu0 %v42960_v35  ;;  %v51325_v36 = vpack.c.bf16 %v53756_v10, %v53755_v24  ;;  %v26351_v6 = vsub.f32 %v51072_v9, %v53759_v44  ;;  %v26358_v18 = vsub.f32 %v51077_v7, %v53760_v57  ;;  %v26373_v35 = vand.u32 4294901760, %v26372_v26  ;;  %v53773_v44 = vld [vmem:[#allocation24_spill] sm:$0xff] }
 0x6fe   : > { %38994 = vmatpush3.msra.mxu1 %v50722_v56  ;;  %42965 = vmatprep.subr.bf16.mxu0 %v42964_v39  ;;  %v51304_v56 = vpack.c.bf16 %v53752_v31, %v53751_v17  ;;  %v43076_v57 = vpack.c.bf16 %v51059_v37, %v51054_v8  ;;  %v43084_v8 = vpack.c.bf16 %v53763_v23, %v53761_v48  ;;  %v53776_v37 = vld [vmem:[#allocation20_spill] sm:$0xff] }
 0x6ff   : > { %38996 = vmatmul.mubr.f32.vlgmr.msra.gmra.mrb[8].mxu1 %v50405_v62  ;;  %43037 = vmatprep.subr.bf16.mxu1 %v51284_v45  ;;  %v53753_v62 = vand.u32 4294901760, %v51108_v28  ;;  %v26235_v28 = vsel %vm19385_vm6, %v32269_v43, 0  ;;  %v26352_v1 = vand.u32 4294901760, %v26351_v6  ;;  %v26359_v42 = vand.u32 4294901760, %v26358_v18  ;;  %v53770_v43 = vld [vmem:[#allocation13_spill] sm:$0xff]  ;;  %v53774_v6 = vld [vmem:[#allocation19_spill] sm:$0xff] }
 0x700   : > { %43039 = vmatpush3.bf16.msra.mxu1 %v51284_v45  ;;  %39170 = vmatprep.mubr.f32.mxu1 %v50994_v2  ;;  %v51344_v41 = vand.u32 4294901760, %v26235_v28  ;;  %v43064_v17 = vpack.c.bf16 %v26373_v35, %v26366_v32  ;;  %v43080_v18 = vpack.c.bf16 %v51077_v7, %v51072_v9  ;;  %v43088_v9 = vpack.c.bf16 %v51180_v51, %v51175_v61  ;;  %v53777_v7 = vld [vmem:[#allocation21_spill] sm:$0xff] }
 0x701   : > { %42967 = vmatpush3.bf16.msra.mxu0 %v42964_v39  ;;  %43041 = vmatprep.subr.bf16.mxu1 %v51290_v54  ;;  %v51314_v2 = vpack.c.bf16 %v53754_v47, %v53753_v62  ;;  %v53767_v39 = vand.u32 4294901760, %v51175_v61  ;;  %v43060_v29 = vpack.c.bf16 %v26359_v42, %v26352_v1  ;;  %v26393_v62 = vsub.f32 %v51207_v38, %v26392_v49  ;;  %v53778_v51 = vld [vmem:[#allocation25_spill] sm:$0xff] }
 0x702   : > { %42969 = vmatprep.subr.bf16.mxu0 %v42968_v50  ;;  %v26400_v47 = vsub.f32 %v51212_v22, %v26399_v53 }
 0x703   : > { %v26379_v46 = vsub.f32 %v51175_v61, %v53767_v39  ;;  %v26394_v10 = vand.u32 4294901760, %v26393_v62  ;;  %v53782_v61 = vld [vmem:[#allocation11_spill] sm:$0xff] }
 0x704   : > { %43043 = vmatpush3.bf16.msra.mxu1 %v51290_v54  ;;  %v26401_v11 = vand.u32 4294901760, %v26400_v47  ;;  %v32277_v47 = vld [vmem:[%s53413_s7 + $0x50] sm:$0xff] }
 0x705   : > { %42971 = vmatpush3.bf16.msra.mxu0 %v42968_v50  ;;  %43045 = vmatprep.subr.bf16.mxu1 %v51304_v56  ;;  %v53769_v50 = vld [vmem:[#allocation26_spill] sm:$0xff]  ;;  %v26380_v31 = vand.u32 4294901760, %v26379_v46 }
 0x706   : > { %42973 = vmatprep.subr.bf16.mxu0 %v42972_v16  ;;  %v43072_v49 = vpack.c.bf16 %v26401_v11, %v26394_v10 }
 0x708   : > { %43047 = vmatpush3.bf16.msra.mxu1 %v51304_v56 }
 0x709   : > { %42975 = vmatpush3.bf16.msra.mxu0 %v42972_v16  ;;  %43049 = vmatprep.subr.bf16.mxu1 %v51314_v2  ;;  %v26387_v16 = vand.u32 4294901760, %v26386_v14 }
 0x70a   : > { %39068 = vmatprep.subr.mxu0 %v51237_v60 }
 0x70b   : > { %v43068_v24 = vpack.c.bf16 %v26387_v16, %v26380_v31 }
 0x70c   : > { %43051 = vmatpush3.bf16.msra.mxu1 %v51314_v2 }
 0x70d   : > { %39069 = vmatpush3.msra.mxu0 %v51237_v60  ;;  %43053 = vmatprep.subr.bf16.mxu1 %v51325_v36  ;;  %v53765_v60 = vld [vmem:[#allocation22_spill] sm:$0xff] }
 0x70e   : > { %39071 = vmatmul.mubr.f32.vlgmr.msra.gmra.mrb[6].mxu0 %v51082_v52  ;;  %42977 = vmatprep.subr.bf16.mxu0 %v50984_v27 }
 0x70f   : > { %42979 = vmatpush3.bf16.msra.mxu0 %v50984_v27  ;;  %39095 = vmatprep.mubr.f32.mxu0 %v53765_v60 }
 0x710   : > { %43055 = vmatpush3.bf16.msra.mxu1 %v51325_v36  ;;  %42981 = vmatprep.subr.bf16.mxu0 %v53766_v20 }
 0x711   : > { %39168 = vmatprep.subr.mxu1 %v51344_v41 }
 0x713   : > { %42983 = vmatpush3.bf16.msra.mxu0 %v53766_v20 }
 0x714   : > { %39169 = vmatpush3.msra.mxu1 %v51344_v41  ;;  %42985 = vmatprep.subr.bf16.mxu0 %v53769_v50 }
 0x715   : > { %39171 = vmatmul.mubr.f32.vlgmr.msra.gmra.mrb[8].mxu1 %v51218_v3  ;;  %43057 = vmatprep.subr.bf16.mxu1 %v43056_v63  ;;  %v26405_v3 = vsub.f32 %v26235_v28, %v51344_v41  ;;  %v53772_v28 = vld [vmem:[#allocation17_spill] sm:$0xff] }
 0x716   : > { %43059 = vmatpush3.bf16.msra.mxu1 %v43056_v63  ;;  %39195 = vmatprep.mubr.f32.mxu1 %v50953_v25 }
 0x717   : > { %42987 = vmatpush3.bf16.msra.mxu0 %v53769_v50  ;;  %43061 = vmatprep.subr.bf16.mxu1 %v43060_v29  ;;  %v51380_v21 = vand.u32 4294901760, %v26405_v3 }
 0x718   : > { %42989 = vmatprep.subr.bf16.mxu0 %v53770_v43 }
 0x719   : > { %v26407_v53 = vsub.f32 %v26405_v3, %v51380_v21 }
 0x71a   : > { %43063 = vmatpush3.bf16.msra.mxu1 %v43060_v29 }
 0x71b   : > { %42991 = vmatpush3.bf16.msra.mxu0 %v53770_v43  ;;  %43065 = vmatprep.subr.bf16.mxu1 %v43064_v17  ;;  %v26408_v0 = vand.u32 4294901760, %v26407_v53 }
 0x71c   : > { %42993 = vmatprep.subr.bf16.mxu0 %v53771_v59 }
 0x71e   : > { %43067 = vmatpush3.bf16.msra.mxu1 %v43064_v17 }
 0x71f   : > { %42995 = vmatpush3.bf16.msra.mxu0 %v53771_v59  ;;  %43069 = vmatprep.subr.bf16.mxu1 %v43068_v24 }
 0x720   : > { %39093 = vmatprep.subr.mxu0 %v51157_v58 }
 0x722   : > { %43071 = vmatpush3.bf16.msra.mxu1 %v43068_v24 }
 0x723   : > { %39094 = vmatpush3.msra.mxu0 %v51157_v58  ;;  %43073 = vmatprep.subr.bf16.mxu1 %v43072_v49 }
 0x724   : > { %39096 = vmatmul.mubr.f32.vlgmr.msra.gmra.mrb[6].mxu0 %v53772_v28  ;;  %42997 = vmatprep.subr.bf16.mxu0 %v53773_v44 }
 0x725   : > { %42999 = vmatpush3.bf16.msra.mxu0 %v53773_v44  ;;  %39120 = vmatprep.mubr.f32.mxu0 %v50953_v25 }
 0x726   : > { %43075 = vmatpush3.bf16.msra.mxu1 %v43072_v49  ;;  %43001 = vmatprep.subr.bf16.mxu0 %v53774_v6 }
 0x727   : > { %39193 = vmatprep.subr.mxu1 %v26408_v0 }
 0x729   : > { %43003 = vmatpush3.bf16.msra.mxu0 %v53774_v6  ;;  %v32279_v6 = vld [vmem:[%s53413_s7 + $0x60] sm:$0xff] }
 0x72a   : > { %39194 = vmatpush3.msra.mxu1 %v26408_v0  ;;  %43005 = vmatprep.subr.bf16.mxu0 %v53775_v55 }
 0x72b   : > { %39196 = vmatmul.mubr.f32.vlgmr.msra.gmra.mrb[8].mxu1 %v51031_v34  ;;  %43077 = vmatprep.subr.bf16.mxu1 %v43076_v57 }
 0x72c   : > { %43079 = vmatpush3.bf16.msra.mxu1 %v43076_v57  ;;  %39220 = vmatprep.mubr.f32.mxu1 %v50964_v4  ;;  %v43092_v4 = vpack.c.bf16 %v51212_v22, %v51207_v38  ;;  %v32280_v57 = vld [vmem:[%s53413_s7 + $0x68] sm:$0xff] }
 0x72d   : > { %43007 = vmatpush3.bf16.msra.mxu0 %v53775_v55  ;;  %43081 = vmatprep.subr.bf16.mxu1 %v43080_v18  ;;  %v27836_v55 = vand.u32 4294901760, %v32280_v57 }
 0x72e   : > { %43009 = vmatprep.subr.bf16.mxu0 %v53776_v37 }
 0x730   : > { %43083 = vmatpush3.bf16.msra.mxu1 %v43080_v18  ;;  %v27833_v18 = vand.u32 4294901760, %v32279_v6 }
 0x731   : > { %43011 = vmatpush3.bf16.msra.mxu0 %v53776_v37  ;;  %43085 = vmatprep.subr.bf16.mxu1 %v43084_v8  ;;  %v51558_v37 = vsub.f32 %v32280_v57, %v27836_v55 }
 0x732   : > { %43013 = vmatprep.subr.bf16.mxu0 %v53777_v7 }
 0x734   : > { %43087 = vmatpush3.bf16.msra.mxu1 %v43084_v8  ;;  %v51556_v8 = vsub.f32 %v32279_v6, %v27833_v18 }
 0x735   : > { %43015 = vmatpush3.bf16.msra.mxu0 %v53777_v7  ;;  %43089 = vmatprep.subr.bf16.mxu1 %v43088_v9  ;;  %v32282_v7 = vld [vmem:[%s53413_s7 + $0x78] sm:$0xff] }
 0x736   : > { %39118 = vmatprep.subr.mxu0 %v51255_v13 }
 0x738   : > { %43091 = vmatpush3.bf16.msra.mxu1 %v43088_v9  ;;  %v32281_v9 = vld [vmem:[%s53413_s7 + $0x70] sm:$0xff] }
 0x739   : > { %39119 = vmatpush3.msra.mxu0 %v51255_v13  ;;  %43093 = vmatprep.subr.bf16.mxu1 %v43092_v4 }
 0x73a   : > { %39121 = vmatmul.mubr.f32.vlgmr.msra.gmra.mrb[6].mxu0 %v51031_v34  ;;  %43017 = vmatprep.subr.bf16.mxu0 %v50984_v27 }
 0x73b   : > { %43019 = vmatpush3.bf16.msra.mxu0 %v50984_v27  ;;  %39145 = vmatprep.mubr.f32.mxu0 %v50953_v25  ;;  %v53779_v27 = vld [vmem:[#allocation27_spill] sm:$0xff] }
 0x73c   : > { %43095 = vmatpush3.bf16.msra.mxu1 %v43092_v4  ;;  %43021 = vmatprep.subr.bf16.mxu0 %v53766_v20  ;;  %v27928_v4 = vand.u32 4294901760, %v51556_v8 }
 0x73d   : > { %39218 = vmatprep.subr.mxu1 %v26405_v3 }
 0x73f   : > { %43023 = vmatpush3.bf16.msra.mxu0 %v53766_v20 }
 0x740   : > { %39219 = vmatpush3.msra.mxu1 %v26405_v3  ;;  %43025 = vmatprep.subr.bf16.mxu0 %v53769_v50  ;;  %v32278_v3 = vld [vmem:[%s53413_s7 + $0x58] sm:$0xff] }
 0x741   : > { %39221 = vmatmul.mubr.f32.vlgmr.msra.gmra.mrb[8].mxu1 %v51082_v52  ;;  %43097 = vmatprep.subr.bf16.mxu1 %v51284_v45  ;;  %v53780_v52 = vld [vmem:[#allocation28_spill] sm:$0xff]  ;;  %v27830_v24 = vand.u32 4294901760, %v32278_v3 }
 0x742   : > { %43099 = vmatpush3.bf16.msra.mxu1 %v51284_v45  ;;  %39245 = vmatprep.mubr.f32.mxu1 %v53765_v60 }
 0x743   : > { %43027 = vmatpush3.bf16.msra.mxu0 %v53769_v50  ;;  %43101 = vmatprep.subr.bf16.mxu1 %v51290_v54  ;;  %v51515_v11 = vsub.f32 %v32278_v3, %v27830_v24 }
 0x744   : > { %43029 = vmatprep.subr.bf16.mxu0 %v53770_v43 }
 0x746   : > { %43103 = vmatpush3.bf16.msra.mxu1 %v51290_v54 }
 0x747   : > { %43031 = vmatpush3.bf16.msra.mxu0 %v53770_v43  ;;  %43105 = vmatprep.subr.bf16.mxu1 %v51304_v56  ;;  %v27827_v43 = vand.u32 4294901760, %v32277_v47 }
 0x748   : > { %43033 = vmatprep.subr.bf16.mxu0 %v53771_v59 }
 0x749   : > { %v51513_v10 = vsub.f32 %v32277_v47, %v27827_v43 }
 0x74a   : > { %43107 = vmatpush3.bf16.msra.mxu1 %v51304_v56 }
 0x74b   : > { %43035 = vmatpush3.bf16.msra.mxu0 %v53771_v59  ;;  %43109 = vmatprep.subr.bf16.mxu1 %v51314_v2  ;;  %v27921_v59 = vand.u32 4294901760, %v51515_v11 }
 0x74c   : > { %39143 = vmatprep.subr.mxu0 %v51157_v58 }
 0x74d   : > { %v27922_v53 = vsub.f32 %v51515_v11, %v27921_v59 }
 0x74e   : > { %43111 = vmatpush3.bf16.msra.mxu1 %v51314_v2 }
 0x74f   : > { %39144 = vmatpush3.msra.mxu0 %v51157_v58  ;;  %43113 = vmatprep.subr.bf16.mxu1 %v51325_v36 }
 0x750   : > { %39146 = vmatmul.mubr.f32.vlgmr.msra.gmra.mrb[6].mxu0 %v51031_v34 }
 0x752   : > { %43115 = vmatpush3.bf16.msra.mxu1 %v51325_v36 }
 0x753   : > { %39243 = vmatprep.subr.mxu1 %v51344_v41 }
 0x756   : > { %39244 = vmatpush3.msra.mxu1 %v51344_v41 }
 0x757   : > { %39246 = vmatmul.mubr.f32.vlgmr.msra.gmra.mrb[8].mxu1 %v53772_v28  ;;  %43117 = vmatprep.subr.bf16.mxu1 %v53778_v51  ;;  %v27923_v28 = vand.u32 4294901760, %v27922_v53 }
 0x758   : > { %43119 = vmatpush3.bf16.msra.mxu1 %v53778_v51  ;;  %39270 = vmatprep.mubr.f32.mxu1 %v50953_v25  ;;  %v27935_v51 = vand.u32 4294901760, %v51558_v37 }
 0x759   : > { %43121 = vmatprep.subr.bf16.mxu1 %v53779_v27 }
 0x75c   : > { %43123 = vmatpush3.bf16.msra.mxu1 %v53779_v27  ;;  %v27839_v27 = vand.u32 4294901760, %v32281_v9 }
 0x75d   : > { %43125 = vmatprep.subr.bf16.mxu1 %v53780_v52 }
 0x760   : > { %43127 = vmatpush3.bf16.msra.mxu1 %v53780_v52  ;;  %v27842_v52 = vand.u32 4294901760, %v32282_v7 }
 0x761   : > { %43129 = vmatprep.subr.bf16.mxu1 %v51227_v5 }
 0x764   : > { %43131 = vmatpush3.bf16.msra.mxu1 %v51227_v5  ;;  %v44856_v5 = vmov 0.0|0.0  }
 0x765   : > { %43133 = vmatprep.subr.bf16.mxu1 %v51250_v19  ;;  %43156 = vmatprep.subr.bf16.mxu0 %v44856_v5 }
 0x768   : > { %43135 = vmatpush3.bf16.msra.mxu1 %v51250_v19  ;;  %v53783_v19 = vld [vmem:[#allocation12_spill] sm:$0xff] }
 0x769   : > { %39268 = vmatprep.subr.mxu1 %v51380_v21 }
 0x76c   : > { %39269 = vmatpush3.msra.mxu1 %v51380_v21  ;;  %v27914_v21 = vand.u32 4294901760, %v51513_v10 }
 0x76d   : > { %39271 = vmatmul.mubr.f32.vlgmr.msra.gmra.mrb[8].mxu1 %v51031_v34  ;;  %43137 = vmatprep.subr.bf16.mxu1 %v51284_v45 }
 0x76e   : > { %43139 = vmatpush3.bf16.msra.mxu1 %v51284_v45  ;;  %39295 = vmatprep.mubr.f32.mxu1 %v50953_v25  ;;  %v53781_v25 = vmov 0.0   ;;  %v27915_v49 = vsub.f32 %v51513_v10, %v27914_v21 }
 0x76f   : > { %43141 = vmatprep.subr.bf16.mxu1 %v51290_v54  ;;  %39302 = vmatprep.mubr.msk.f32.mxu0 %vm44857_vm9, %v53781_v25 }
 0x770   : > { %v27916_v0 = vand.u32 4294901760, %v27915_v49 }
 0x772   : > { %43143 = vmatpush3.bf16.msra.mxu1 %v51290_v54  ;;  %v53785_v54 = vld [vmem:[#allocation10_spill] sm:$0xff]  ;;  %v43208_v44 = vpack.c.bf16 %v27923_v28, %v27916_v0 }
 0x773   : > { %43145 = vmatprep.subr.bf16.mxu1 %v51304_v56 }
 0x776   : > { %43147 = vmatpush3.bf16.msra.mxu1 %v51304_v56  ;;  %v27326_v56 = vsel %vm26860_vm10, %v53785_v54, 0 }
 0x777   : > { %43149 = vmatprep.subr.bf16.mxu1 %v51314_v2 }
 0x77a   : > { %43151 = vmatpush3.bf16.msra.mxu1 %v51314_v2 }
 0x77b   : > { %43153 = vmatprep.subr.bf16.mxu1 %v51325_v36 }
 0x77e   : > { %43155 = vmatpush3.bf16.msra.mxu1 %v51325_v36  ;;  %v27396_v36 = vsub.f32 %v27326_v56, %v27326_v56 }
 0x77f   : > { %39293 = vmatprep.subr.mxu1 %v51344_v41 }
 0x780   : > { %v27397_v33 = vand.u32 4294901760, %v27396_v36 }
 0x782   : > { %39294 = vmatpush3.msra.mxu1 %v51344_v41  ;;  %v27398_v60 = vsub.f32 %v27396_v36, %v27397_v33 }
 0x783   : > { %39296 = vmatmul.mubr.f32.vlgmr.msra.gmra.mrb[8].mxu1 %v51031_v34  ;;  %43174 = vmatprep.subr.bf16.mxu1 %v44856_v5  ;;  %v53784_v34 = vld [vmem:[#allocation9_spill] sm:$0xff] }
 0x784   : > { %39344 = vmatprep.mubr.msk.f32.mxu1 %vm44857_vm9, %v53781_v25  ;;  %v26861_v45 = vsel %vm26860_vm10, %v53784_v34, 0  ;;  %v27399_v39 = vand.u32 4294901760, %v27398_v60 }
 0x785   : > { %v26935_v2 = vsub.f32 %v26861_v45, %v26861_v45  ;;  %v51587_v45 = vsub.f32 %v32282_v7, %v27842_v52 }
 0x787   : > { %v26936_v41 = vand.u32 4294901760, %v26935_v2 }
 0x789   : > { %v26937_v26 = vsub.f32 %v26935_v2, %v26936_v41 }
 0x78b   : > { %v26938_v35 = vand.u32 4294901760, %v26937_v26 }
 0x823   : > { %v39147_v58 = vpop.f32.mrb[6].mxu0 }
 0x824   : > { %v43858_v38 = vadd.f32 %v39147_v58, %v53782_v61  ;;  %v26210_v22 = vpop.f32.mrb[7].mxu0  ;;  %v27929_v58 = vsub.f32 %v51556_v8, %v27928_v4  ;;  %v27936_v61 = vsub.f32 %v51558_v37, %v27935_v51 }
 0x825   : > { %v43859_v13 = vadd.f32 %v26210_v22, %v53783_v19  ;;  %v51576_v22 = vsub.f32 %v32281_v9, %v27839_v27  ;;  %v32283_v19 = vld [vmem:[%s53413_s7 + $0x80] sm:$0xff] }
 0x827   : > { %v43229_v6 = vpack.c.bf16 %v51587_v45, %v51576_v22 }
 0x856   : > { %v39297_v48 = vpop.f32.mrb[8].mxu1 }
 0x857   : > { %v26859_v12 = vmax.f32 %v43858_v38, %v39297_v48  ;;  %v26846_v40 = vpop.f32.mrb[9].mxu1  ;;  %v51574_v38 = vpack.c.bf16 %v27830_v24, %v27827_v43  ;;  %v51594_v48 = vpack.c.bf16 %v27836_v55, %v27833_v18  ;;  %v51646_v55 = vpack.c.bf16 %v27935_v51, %v27928_v4 }
 0x858   : > { %v26858_v23 = vmax.f32 %v43859_v13, %v26846_v40  ;;  %v32284_v13 = vld [vmem:[%s53413_s7 + $0x88] sm:$0xff] }
 0x859   : > { %v26865_v15 = vsel %vm26863_vm11, %v26859_v12, 0  ;;  %v27848_v56 = vand.u32 4294901760, %v32284_v13  ;;  %v27949_v12 = vand.u32 4294901760, %v51587_v45 }
 0x85a   : > { %v26871_v1 = vand.u32 4294901760, %v26865_v15  ;;  %v26868_v42 = vand.u32 4294901760, %v26858_v23 }
 0x85c   : > { %v26953_v20 = vsub.f32 %v26865_v15, %v26871_v1  ;;  %v43157_v63 = vpack.c.bf16 %v26871_v1, %v26868_v42  ;;  %v26946_v32 = vsub.f32 %v26858_v23, %v26868_v42  ;;  %v51600_v23 = vsub.f32 %v32284_v13, %v27848_v56 }
 0x85d   : > { %v27950_v42 = vsub.f32 %v51587_v45, %v27949_v12 }
 0x85e   : > { %v26954_v46 = vand.u32 4294901760, %v26953_v20  ;;  %v26947_v29 = vand.u32 4294901760, %v26946_v32  ;;  %v43163_v30 = vpack.c.bf16 %v26953_v20, %v26946_v32  ;;  %43158 = vmatpush3.bf16.msra.mxu0 %v43157_v63  ;;  %43176 = vmatpush3.bf16.msra.mxu1 %v43157_v63 }
 0x85f   : > { %43159 = vmatprep.subr.bf16.mxu0 %v44856_v5  ;;  %43177 = vmatprep.subr.bf16.mxu1 %v44856_v5 }
 0x860   : > { %v26955_v14 = vsub.f32 %v26953_v20, %v26954_v46  ;;  %v26948_v50 = vsub.f32 %v26946_v32, %v26947_v29  ;;  %v43169_v17 = vpack.c.bf16 %v26954_v46, %v26947_v29  ;;  %v27951_v29 = vand.u32 4294901760, %v27950_v42 }
 0x861   : > { %39303 = vmatmul.mubr.f32.vlgmr.msra.gmra.mrb[8].mxu0 %v26938_v35  ;;  %39345 = vmatmul.mubr.f32.vlgmr.msra.gmra.mrb[10].mxu1 %v27399_v39  ;;  %v51609_v39 = vpack.c.bf16 %v27842_v52, %v27839_v27 }
 0x862   : > { %v26956_v31 = vand.u32 4294901760, %v26955_v14  ;;  %v26949_v16 = vand.u32 4294901760, %v26948_v50  ;;  %39309 = vmatprep.mubr.msk.f32.mxu0 %vm44857_vm9, %v53781_v25  ;;  %39351 = vmatprep.mubr.msk.f32.mxu1 %vm44857_vm9, %v53781_v25 }
 0x864   : > { %v43160_v62 = vpack.c.bf16 %v26956_v31, %v26949_v16 }
 0x866   : > { %43161 = vmatpush3.bf16.msra.mxu0 %v43160_v62  ;;  %43179 = vmatpush3.bf16.msra.mxu1 %v43160_v62 }
 0x867   : > { %43162 = vmatprep.subr.bf16.mxu0 %v44856_v5  ;;  %43180 = vmatprep.subr.bf16.mxu1 %v44856_v5 }
 0x869   : > { %39310 = vmatmul.mubr.msk.f32.vlgmr.msra.gmra.mrb[8].mxu0 %vm26860_vm10, %v53784_v34  ;;  %39352 = vmatmul.mubr.msk.f32.vlgmr.msra.gmra.mrb[10].mxu1 %vm26860_vm10, %v53785_v54 }
 0x86a   : > { %43164 = vmatpush3.bf16.msra.mxu0 %v43163_v30  ;;  %43182 = vmatpush3.bf16.msra.mxu1 %v43163_v30 }
 0x86b   : > { %39316 = vmatprep.mubr.msk.f32.mxu0 %vm44857_vm9, %v53781_v25  ;;  %43165 = vmatprep.subr.bf16.mxu0 %v44856_v5 }
 0x86c   : > { %39358 = vmatprep.mubr.msk.f32.mxu1 %vm44857_vm9, %v53781_v25  ;;  %43183 = vmatprep.subr.bf16.mxu1 %v44856_v5 }
 0x871   : > { %39317 = vmatmul.mubr.f32.vlgmr.msra.gmra.mrb[8].mxu0 %v26935_v2  ;;  %39359 = vmatmul.mubr.f32.vlgmr.msra.gmra.mrb[10].mxu1 %v27396_v36  ;;  %v32286_v2 = vld [vmem:[%s53413_s7 + $0x98] sm:$0xff]  ;;  %v27930_v36 = vand.u32 4294901760, %v27929_v58 }
 0x872   : > { %43167 = vmatpush3.bf16.msra.mxu0 %v43157_v63  ;;  %43185 = vmatpush3.bf16.msra.mxu1 %v43157_v63  ;;  %v27854_v1 = vand.u32 4294901760, %v32286_v2 }
 0x873   : > { %39323 = vmatprep.mubr.msk.f32.mxu0 %vm44857_vm9, %v53781_v25  ;;  %43168 = vmatprep.subr.bf16.mxu0 %v44856_v5 }
 0x874   : > { %39365 = vmatprep.mubr.msk.f32.mxu1 %vm44857_vm9, %v53781_v25  ;;  %43186 = vmatprep.subr.bf16.mxu1 %v44856_v5  ;;  %v51611_v46 = vsub.f32 %v32286_v2, %v27854_v1  ;;  %v43223_v2 = vpack.c.bf16 %v51515_v11, %v51513_v10 }
 0x879   : > { %39324 = vmatmul.mubr.f32.vlgmr.msra.gmra.mrb[8].mxu0 %v26936_v41  ;;  %39366 = vmatmul.mubr.f32.vlgmr.msra.gmra.mrb[10].mxu1 %v27397_v33  ;;  %v27937_v41 = vand.u32 4294901760, %v27936_v61  ;;  %v27942_v33 = vand.u32 4294901760, %v51576_v22  ;;  %v32276_v61 = vld [vmem:[%s53412_s6] ss:$0 sm:$0xff] }
 0x87a   : > { %43170 = vmatpush3.bf16.msra.mxu0 %v43169_v17  ;;  %43188 = vmatpush3.bf16.msra.mxu1 %v43169_v17  ;;  %v27977_v17 = vand.u32 4294901760, %v51611_v46 }
 0x87b   : > { %39330 = vmatprep.mubr.msk.f32.mxu0 %vm44857_vm9, %v53781_v25  ;;  %43171 = vmatprep.subr.bf16.mxu0 %v44856_v5  ;;  %v43211_v26 = vpack.c.bf16 %v27937_v41, %v27930_v36  ;;  %v27943_v60 = vsub.f32 %v51576_v22, %v27942_v33  ;;  %v51648_v9 = vpack.c.bf16 %v27949_v12, %v27942_v33  ;;  %v51678_v41 = vld [vmem:[%s53413_s7] sm:$0xff]  ;;  %v51683_v33 = vld [vmem:[%s53413_s7 + $0x8] sm:$0xff] }
 0x87c   : > { %39372 = vmatprep.mubr.msk.f32.mxu1 %vm44857_vm9, %v53781_v25  ;;  %43189 = vmatprep.subr.bf16.mxu1 %v44856_v5  ;;  %v27978_v3 = vsub.f32 %v51611_v46, %v27977_v17  ;;  %v28393_v12 = vand.u32 4294901760, %v51678_v41 }
 0x87d   : > { %v27944_v35 = vand.u32 4294901760, %v27943_v60 }
 0x87e   : > { %v27979_v53 = vand.u32 4294901760, %v27978_v3  ;;  %v51795_v3 = vld [vmem:[%s53413_s7 + $0x48] sm:$0xff] }
 0x87f   : > { %v43214_v31 = vpack.c.bf16 %v27951_v29, %v27944_v35 }
 0x881   : > { %39331 = vmatmul.mubr.msk.f32.vlgmr.msra.gmra.mrb[8].mxu0 %vm26860_vm10, %v53784_v34  ;;  %39373 = vmatmul.mubr.msk.f32.vlgmr.msra.gmra.mrb[10].mxu1 %vm26860_vm10, %v53785_v54 }
 0x882   : > { %43173 = vmatpush3.bf16.msra.mxu0 %v43157_v63  ;;  %43191 = vmatpush3.bf16.msra.mxu1 %v43157_v63  ;;  %v27963_v63 = vand.u32 4294901760, %v51600_v23 }
 0x883   : > { %39337 = vmatprep.mubr.msk.f32.mxu0 %vm44857_vm9, %v53781_v25  ;;  %39379 = vmatprep.mubr.msk.f32.mxu1 %vm44857_vm9, %v53781_v25 }
 0x884   : > { %43207 = vmatprep.subr.bf16.mxu1 %v44856_v5  ;;  %43192 = vmatprep.subr.bf16.mxu0 %v44856_v5  ;;  %v27964_v14 = vsub.f32 %v51600_v23, %v27963_v63 }
 0x886   : > { %v27965_v62 = vand.u32 4294901760, %v27964_v14 }
 0x889   : > { %39338 = vmatmul.mubr.msk.f32.vlgmr.msra.gmra.mrb[8].mxu0 %vm26860_vm10, %v53784_v34  ;;  %39380 = vmatmul.mubr.msk.f32.vlgmr.msra.gmra.mrb[10].mxu1 %vm26860_vm10, %v53785_v54  ;;  %v32285_v34 = vld [vmem:[%s53413_s7 + $0x90] sm:$0xff]  ;;  %v27845_v54 = vand.u32 4294901760, %v32283_v19 }
 0x88a   : > { %43209 = vmatpush3.bf16.msra.mxu1 %v43208_v44  ;;  %39425 = vmatprep.mubr.msk.f32.mxu1 %vm44857_vm9, %v53781_v25  ;;  %v27851_v15 = vand.u32 4294901760, %v32285_v34  ;;  %v43226_v44 = vpack.c.bf16 %v51558_v37, %v51556_v8 }
 0x88b   : > { %43210 = vmatprep.subr.bf16.mxu1 %v44856_v5  ;;  %39402 = vmatprep.mubr.msk.f32.mxu0 %vm44857_vm9, %v53781_v25  ;;  %v51598_v40 = vsub.f32 %v32283_v19, %v27845_v54  ;;  %v51622_v43 = vpack.c.bf16 %v27848_v56, %v27845_v54 }
 0x88c   : > { %43194 = vmatpush3.bf16.msra.mxu0 %v51574_v38  ;;  %v51606_v32 = vsub.f32 %v32285_v34, %v27851_v15  ;;  %v51627_v0 = vpack.c.bf16 %v27854_v1, %v27851_v15  ;;  %v51699_v15 = vld [vmem:[%s53413_s7 + $0x18] sm:$0xff] }
 0x88d   : > { %43195 = vmatprep.subr.bf16.mxu0 %v44856_v5  ;;  %v27956_v20 = vand.u32 4294901760, %v51598_v40  ;;  %v43232_v57 = vpack.c.bf16 %v51600_v23, %v51598_v40  ;;  %v51694_v23 = vld [vmem:[%s53413_s7 + $0x10] sm:$0xff]  ;;  %v28402_v42 = vand.u32 4294901760, %v51699_v15 }
 0x88e   : > { %43212 = vmatpush3.bf16.msra.mxu1 %v43211_v26  ;;  %v27970_v50 = vand.u32 4294901760, %v51606_v32  ;;  %v43235_v18 = vpack.c.bf16 %v51611_v46, %v51606_v32  ;;  %v51706_v26 = vsub.f32 %v51678_v41, %v28393_v12  ;;  %v28399_v1 = vand.u32 4294901760, %v51694_v23 }
 0x88f   : > { %43213 = vmatprep.subr.bf16.mxu1 %v44856_v5  ;;  %v27957_v30 = vsub.f32 %v51598_v40, %v27956_v20  ;;  %v51650_v7 = vpack.c.bf16 %v27963_v63, %v27956_v20  ;;  %v28396_v40 = vand.u32 4294901760, %v51683_v33  ;;  %v51719_v20 = vld [vmem:[%s53413_s7 + $0x20] sm:$0xff]  ;;  %v51724_v63 = vld [vmem:[%s53413_s7 + $0x28] sm:$0xff] }
 0x890   : > { %43197 = vmatpush3.bf16.msra.mxu0 %v51594_v48  ;;  %v27971_v47 = vsub.f32 %v51606_v32, %v27970_v50  ;;  %v51652_v27 = vpack.c.bf16 %v27977_v17, %v27970_v50  ;;  %v28480_v35 = vand.u32 4294901760, %v51706_v26  ;;  %v51735_v29 = vsub.f32 %v51694_v23, %v28399_v1  ;;  %v51762_v32 = vld [vmem:[%s53413_s7 + $0x38] sm:$0xff] }
 0x891   : > { %43198 = vmatprep.subr.bf16.mxu0 %v44856_v5  ;;  %v27958_v16 = vand.u32 4294901760, %v27957_v30  ;;  %v51711_v60 = vsub.f32 %v51683_v33, %v28396_v40  ;;  %v51740_v30 = vsub.f32 %v51699_v15, %v28402_v42  ;;  %v28405_v14 = vand.u32 4294901760, %v51719_v20 }
 0x892   : > { %43215 = vmatpush3.bf16.msra.mxu1 %v43214_v31  ;;  %v27972_v49 = vand.u32 4294901760, %v27971_v47  ;;  %v28408_v50 = vand.u32 4294901760, %v51724_v63  ;;  %v43253_v17 = vpack.c.bf16 %v27921_v59, %v27914_v21  ;;  %v51757_v31 = vld [vmem:[%s53413_s7 + $0x30] sm:$0xff]  ;;  %v28481_v10 = vsub.f32 %v51706_v26, %v28480_v35  ;;  %v51790_v47 = vld [vmem:[%s53413_s7 + $0x40] sm:$0xff] }
 0x893   : > { %v43217_v24 = vpack.c.bf16 %v27965_v62, %v27958_v16  ;;  %43216 = vmatprep.subr.bf16.mxu1 %v44856_v5  ;;  %v28494_v21 = vand.u32 4294901760, %v51735_v29  ;;  %v28501_v59 = vand.u32 4294901760, %v51740_v30  ;;  %v28411_v16 = vand.u32 4294901760, %v51757_v31 }
 0x894   : > { %43200 = vmatpush3.bf16.msra.mxu0 %v51609_v39  ;;  %v43220_v28 = vpack.c.bf16 %v27979_v53, %v27972_v49  ;;  %v51780_v46 = vsub.f32 %v51724_v63, %v28408_v50  ;;  %v28414_v62 = vand.u32 4294901760, %v51762_v32 }
 0x895   : > { %43201 = vmatprep.subr.bf16.mxu0 %v44856_v5  ;;  %v28495_v49 = vsub.f32 %v51735_v29, %v28494_v21  ;;  %v28502_v53 = vsub.f32 %v51740_v30, %v28501_v59 }
 0x896   : > { %43218 = vmatpush3.bf16.msra.mxu1 %v43217_v24  ;;  %v28482_v24 = vand.u32 4294901760, %v28481_v10 }
 0x897   : > { %43219 = vmatprep.subr.bf16.mxu1 %v44856_v5 }
 0x898   : > { %43203 = vmatpush3.bf16.msra.mxu0 %v51622_v43 }
 0x899   : > { %43204 = vmatprep.subr.bf16.mxu0 %v44856_v5 }
 0x89a   : > { %43221 = vmatpush3.bf16.msra.mxu1 %v43220_v28 }
 0x89b   : > { %43237 = vmatprep.subr.bf16.mxu1 %v44856_v5 }
 0x89c   : > { %43206 = vmatpush3.bf16.msra.mxu0 %v51627_v0 }
 0x89d   : > { %43222 = vmatprep.subr.bf16.mxu0 %v44856_v5 }
 0x95c   : > { %v27322_v52 = vpop.f32.mrb[8].mxu0  ;;  %v27783_v58 = vpop.f32.mrb[10].mxu1 }
 0x95d   : > { %v27787_v22 = vmax.f32 %v27322_v52, %v27783_v58  ;;  %v39339_v19 = vpop.f32.mrb[9].mxu0  ;;  %v39381_v13 = vpop.f32.mrb[11].mxu1  ;;  %v28420_v52 = vand.u32 4294901760, %v51795_v3  ;;  %v28503_v58 = vand.u32 4294901760, %v28502_v53  ;;  %v51961_v53 = vld [vmem:[%s53413_s7 + $0xb0] sm:$0xff] }
 0x95f   : > { %v27795_v8 = vadd.f32 %v32276_v61, %v27787_v22 }
 0x961   : > { %v27796_v37 = vmax.f32 %v27795_v8, 0.0 }
 0x963   : > { %27798 = vst.msk [vmem:[#allocation3] sm:$0x1f] %vm27797_vm12, %v27796_v37  ;;  %v51841_v37 = vsub.f32 %v51795_v3, %v28420_v52 }
 0x96a   : > { %v27810_v4 = vld [vmem:[#allocation3 + $0x1] sm:$0x1] }
 0x96b   : > { %v27824_v51 = vsel %vm27822_vm13, %v27810_v4, 0 }
 0x96c   : > { %v51658_v34 = vand.u32 4294901760, %v27824_v51 }
 0x96e   : > { %v27902_v45 = vsub.f32 %v27824_v51, %v51658_v34  ;;  %39426 = vmatmul.mubr.f32.vlgmr.msra.gmra.mrb[12].mxu1 %v51658_v34 }
 0x96f   : > { %43239 = vmatpush3.bf16.msra.mxu1 %v51574_v38  ;;  %39471 = vmatprep.mubr.msk.f32.mxu1 %vm44857_vm9, %v53781_v25 }
 0x970   : > { %43240 = vmatprep.subr.bf16.mxu1 %v44856_v5  ;;  %v27903_v54 = vand.u32 4294901760, %v27902_v45 }
 0x972   : > { %v27904_v56 = vsub.f32 %v27902_v45, %v27903_v54 }
 0x973   : > { %43242 = vmatpush3.bf16.msra.mxu1 %v51594_v48 }
 0x974   : > { %43243 = vmatprep.subr.bf16.mxu1 %v44856_v5  ;;  %v27905_v36 = vand.u32 4294901760, %v27904_v56  ;;  %v28543_v56 = vand.u32 4294901760, %v51841_v37 }
 0x976   : > { %39403 = vmatmul.mubr.f32.vlgmr.msra.gmra.mrb[10].mxu0 %v27905_v36  ;;  %v27799_v36 = vld [vmem:[#allocation3] sm:$0x1] }
 0x977   : > { %43224 = vmatpush3.bf16.msra.mxu0 %v43223_v2  ;;  %43245 = vmatpush3.bf16.msra.mxu1 %v51609_v39  ;;  %v28390_v41 = vsel %vm27822_vm13, %v27799_v36, 0 }
 0x978   : > { %43225 = vmatprep.subr.bf16.mxu0 %v44856_v5  ;;  %43246 = vmatprep.subr.bf16.mxu1 %v44856_v5 }
 0x979   : > { %39448 = vmatprep.mubr.msk.f32.mxu0 %vm44857_vm9, %v53781_v25 }
 0x97b   : > { %43227 = vmatpush3.bf16.msra.mxu0 %v43226_v44  ;;  %43248 = vmatpush3.bf16.msra.mxu1 %v51622_v43  ;;  %v28515_v44 = vand.u32 4294901760, %v51780_v46 }
 0x97c   : > { %43228 = vmatprep.subr.bf16.mxu0 %v44856_v5  ;;  %43249 = vmatprep.subr.bf16.mxu1 %v44856_v5 }
 0x97d   : > { %v28516_v22 = vsub.f32 %v51780_v46, %v28515_v44 }
 0x97f   : > { %43230 = vmatpush3.bf16.msra.mxu0 %v43229_v6  ;;  %43251 = vmatpush3.bf16.msra.mxu1 %v51627_v0  ;;  %v51812_v6 = vsub.f32 %v51757_v31, %v28411_v16  ;;  %v28517_v4 = vand.u32 4294901760, %v28516_v22  ;;  %v43316_v31 = vpack.c.bf16 %v51740_v30, %v51735_v29  ;;  %v51988_v22 = vld [vmem:[%s53413_s7 + $0xc0] sm:$0xff]  ;;  %v52066_v29 = vld [vmem:[%s53413_s7 + $0xe8] sm:$0xff] }
 0x980   : > { %43231 = vmatprep.subr.bf16.mxu0 %v44856_v5  ;;  %43267 = vmatprep.subr.bf16.mxu1 %v44856_v5 }
 0x981   : > { %v28522_v19 = vand.u32 4294901760, %v51812_v6 }
 0x982   : > { %39472 = vmatmul.mubr.f32.vlgmr.msra.gmra.mrb[14].mxu1 %v27903_v54 }
 0x983   : > { %43233 = vmatpush3.bf16.msra.mxu0 %v43232_v57  ;;  %43269 = vmatpush3.bf16.msra.mxu1 %v51574_v38  ;;  %v28487_v38 = vand.u32 4294901760, %v51711_v60  ;;  %v51817_v57 = vsub.f32 %v51762_v32, %v28414_v62  ;;  %v28523_v51 = vsub.f32 %v51812_v6, %v28522_v19  ;;  %v51941_v32 = vld [vmem:[%s53413_s7 + $0xa0] sm:$0xff] }
 0x984   : > { %43234 = vmatprep.subr.bf16.mxu0 %v44856_v5  ;;  %43270 = vmatprep.subr.bf16.mxu1 %v44856_v5 }
 0x985   : > { %39517 = vmatprep.mubr.msk.f32.mxu1 %vm44857_vm9, %v53781_v25  ;;  %v28488_v11 = vsub.f32 %v51711_v60, %v28487_v38  ;;  %v28529_v13 = vand.u32 4294901760, %v51817_v57  ;;  %v43343_v36 = vpack.c.bf16 %v28487_v38, %v28480_v35 }
 0x987   : > { %43236 = vmatpush3.bf16.msra.mxu0 %v43235_v18  ;;  %43272 = vmatpush3.bf16.msra.mxu1 %v51594_v48  ;;  %v51775_v48 = vsub.f32 %v51719_v20, %v28405_v14  ;;  %v28417_v18 = vand.u32 4294901760, %v51790_v47 }
 0x988   : > { %43252 = vmatprep.subr.bf16.mxu0 %v44856_v5  ;;  %43273 = vmatprep.subr.bf16.mxu1 %v44856_v5 }
 0x989   : > { %v28508_v28 = vand.u32 4294901760, %v51775_v48  ;;  %v51836_v8 = vsub.f32 %v51790_v47, %v28417_v18  ;;  %v51918_v20 = vpack.c.bf16 %v28420_v52, %v28417_v18  ;;  %v28971_v47 = vand.u32 4294901760, %v51941_v32  ;;  %v51966_v18 = vld [vmem:[%s53413_s7 + $0xb8] sm:$0xff] }
 0x98a   : > { %39449 = vmatmul.mubr.f32.vlgmr.msra.gmra.mrb[12].mxu0 %v27902_v45  ;;  %v28530_v45 = vsub.f32 %v51817_v57, %v28529_v13 }
 0x98b   : > { %43254 = vmatpush3.bf16.msra.mxu0 %v43253_v17  ;;  %43275 = vmatpush3.bf16.msra.mxu1 %v51609_v39  ;;  %v28489_v39 = vand.u32 4294901760, %v28488_v11  ;;  %v28509_v61 = vsub.f32 %v51775_v48, %v28508_v28  ;;  %v28536_v54 = vand.u32 4294901760, %v51836_v8  ;;  %v28524_v17 = vand.u32 4294901760, %v28523_v51 }
 0x98c   : > { %43255 = vmatprep.subr.bf16.mxu0 %v44856_v5  ;;  %43276 = vmatprep.subr.bf16.mxu1 %v44856_v5  ;;  %v28531_v10 = vand.u32 4294901760, %v28530_v45  ;;  %v51973_v52 = vsub.f32 %v51941_v32, %v28971_v47  ;;  %v43349_v30 = vpack.c.bf16 %v28515_v44, %v28508_v28 }
 0x98d   : > { %39494 = vmatprep.mubr.msk.f32.mxu0 %vm44857_vm9, %v53781_v25  ;;  %v28537_v11 = vsub.f32 %v51836_v8, %v28536_v54 }
 0x98e   : > { %v43307_v33 = vpack.c.bf16 %v28531_v10, %v28524_v17  ;;  %v52023_v17 = vld [vmem:[%s53413_s7 + $0xd0] sm:$0xff]  ;;  %v52028_v10 = vld [vmem:[%s53413_s7 + $0xd8] sm:$0xff] }
 0x98f   : > { %43257 = vmatpush3.bf16.msra.mxu0 %v51646_v55  ;;  %43278 = vmatpush3.bf16.msra.mxu1 %v51622_v43  ;;  %v43298_v55 = vpack.c.bf16 %v28489_v39, %v28482_v24  ;;  %v28496_v43 = vand.u32 4294901760, %v28495_v49  ;;  %v28544_v24 = vsub.f32 %v51841_v37, %v28543_v56  ;;  %v51885_v39 = vand.u32 4294901760, %v28390_v41 }
 0x990   : > { %43258 = vmatprep.subr.bf16.mxu0 %v44856_v5  ;;  %43279 = vmatprep.subr.bf16.mxu1 %v44856_v5  ;;  %v43322_v49 = vpack.c.bf16 %v51817_v57, %v51812_v6 }
 0x991   : > { %v51899_v15 = vsub.f32 %v28390_v41, %v51885_v39  ;;  %v43346_v41 = vpack.c.bf16 %v28501_v59, %v28494_v21 }
 0x993   : > { %43260 = vmatpush3.bf16.msra.mxu0 %v51648_v9  ;;  %43281 = vmatpush3.bf16.msra.mxu1 %v51627_v0  ;;  %v43301_v0 = vpack.c.bf16 %v28503_v58, %v28496_v43  ;;  %v28510_v9 = vand.u32 4294901760, %v28509_v61  ;;  %v28977_v43 = vand.u32 4294901760, %v51961_v53  ;;  %v28980_v58 = vand.u32 4294901760, %v51966_v18 }
 0x994   : > { %43261 = vmatprep.subr.bf16.mxu0 %v44856_v5  ;;  %43297 = vmatprep.subr.bf16.mxu1 %v44856_v5  ;;  %v43325_v61 = vpack.c.bf16 %v51841_v37, %v51836_v8 }
 0x995   : > { %v43304_v2 = vpack.c.bf16 %v28517_v4, %v28510_v9  ;;  %v29058_v9 = vand.u32 4294901760, %v51973_v52  ;;  %v52004_v51 = vsub.f32 %v51961_v53, %v28977_v43  ;;  %v52009_v45 = vsub.f32 %v51966_v18, %v28980_v58 }
 0x996   : > { %39518 = vmatmul.mubr.f32.vlgmr.msra.gmra.mrb[16].mxu1 %v51658_v34 }
 0x997   : > { %43263 = vmatpush3.bf16.msra.mxu0 %v51650_v7  ;;  %43299 = vmatpush3.bf16.msra.mxu1 %v43298_v55  ;;  %v51863_v7 = vpack.c.bf16 %v28396_v40, %v28393_v12  ;;  %v28538_v12 = vand.u32 4294901760, %v28537_v11  ;;  %v28545_v40 = vand.u32 4294901760, %v28544_v24  ;;  %v29072_v35 = vand.u32 4294901760, %v52004_v51 }
 0x998   : > { %43264 = vmatprep.subr.bf16.mxu0 %v44856_v5  ;;  %43300 = vmatprep.subr.bf16.mxu1 %v44856_v5  ;;  %v29079_v38 = vand.u32 4294901760, %v52009_v45 }
 0x999   : > { %39563 = vmatprep.mubr.msk.f32.mxu1 %vm44857_vm9, %v53781_v25  ;;  %v43310_v23 = vpack.c.bf16 %v28545_v40, %v28538_v12  ;;  %v52061_v12 = vld [vmem:[%s53413_s7 + $0xe0] sm:$0xff]  ;;  %v29073_v40 = vsub.f32 %v52004_v51, %v29072_v35 }
 0x99a   : > { %v28995_v44 = vand.u32 4294901760, %v52061_v12 }
 0x99b   : > { %43266 = vmatpush3.bf16.msra.mxu0 %v51652_v27  ;;  %43302 = vmatpush3.bf16.msra.mxu1 %v43301_v0  ;;  %v51881_v27 = vpack.c.bf16 %v28402_v42, %v28399_v1  ;;  %v51906_v1 = vpack.c.bf16 %v28414_v62, %v28411_v16  ;;  %v28469_v42 = vand.u32 4294901760, %v51899_v15  ;;  %v51946_v16 = vld [vmem:[%s53413_s7 + $0xa8] sm:$0xff]  ;;  %v43319_v62 = vpack.c.bf16 %v51780_v46, %v51775_v48 }
 0x99c   : > { %43282 = vmatprep.subr.bf16.mxu0 %v44856_v5  ;;  %43303 = vmatprep.subr.bf16.mxu1 %v44856_v5  ;;  %v28974_v3 = vand.u32 4294901760, %v51946_v16  ;;  %v51993_v0 = vld [vmem:[%s53413_s7 + $0xc8] sm:$0xff]  ;;  %v52113_v57 = vsub.f32 %v52061_v12, %v28995_v44 }
 0x99d   : > { %v28470_v63 = vsub.f32 %v51899_v15, %v28469_v42 }
 0x99e   : > { %39495 = vmatmul.mubr.f32.vlgmr.msra.gmra.mrb[14].mxu0 %v51658_v34  ;;  %v51894_v34 = vpack.c.bf16 %v28408_v50, %v28405_v14  ;;  %v43313_v14 = vpack.c.bf16 %v51711_v60, %v51706_v26  ;;  %v51978_v55 = vsub.f32 %v51946_v16, %v28974_v3  ;;  %v29059_v26 = vsub.f32 %v51973_v52, %v29058_v9 }
 0x99f   : > { %43284 = vmatpush3.bf16.msra.mxu0 %v51863_v7  ;;  %43305 = vmatpush3.bf16.msra.mxu1 %v43304_v2  ;;  %v28471_v50 = vand.u32 4294901760, %v28470_v63  ;;  %v28986_v2 = vand.u32 4294901760, %v51993_v0  ;;  %v29074_v63 = vand.u32 4294901760, %v29073_v40  ;;  %v52143_v37 = vpack.c.bf16 %v28974_v3, %v28971_v47 }
 0x9a0   : > { %43285 = vmatprep.subr.bf16.mxu0 %v44856_v5  ;;  %43306 = vmatprep.subr.bf16.mxu1 %v44856_v5  ;;  %v29065_v4 = vand.u32 4294901760, %v51978_v55  ;;  %v29060_v21 = vand.u32 4294901760, %v29059_v26  ;;  %v52160_v16 = vpack.c.bf16 %v28980_v58, %v28977_v43 }
 0x9a1   : > { %39540 = vmatprep.mubr.msk.f32.mxu0 %vm44857_vm9, %v53781_v25  ;;  %v52047_v24 = vsub.f32 %v51993_v0, %v28986_v2 }
 0x9a2   : > { %v29066_v60 = vsub.f32 %v51978_v55, %v29065_v4 }
 0x9a3   : > { %43287 = vmatpush3.bf16.msra.mxu0 %v51881_v27  ;;  %43308 = vmatpush3.bf16.msra.mxu1 %v43307_v33  ;;  %v28992_v33 = vand.u32 4294901760, %v52028_v10  ;;  %v29093_v48 = vand.u32 4294901760, %v52047_v24 }
 0x9a4   : > { %43288 = vmatprep.subr.bf16.mxu0 %v44856_v5  ;;  %43309 = vmatprep.subr.bf16.mxu1 %v44856_v5  ;;  %v29067_v59 = vand.u32 4294901760, %v29066_v60  ;;  %v29114_v60 = vand.u32 4294901760, %v52113_v57 }
 0x9a5   : > { %v52091_v28 = vsub.f32 %v52028_v10, %v28992_v33  ;;  %v52220_v10 = vld [vmem:[%s53413_s7 + $0xf0] sm:$0xff] }
 0x9a6   : > { %v29550_v12 = vand.u32 4294901760, %v52220_v10 }
 0x9a7   : > { %43290 = vmatpush3.bf16.msra.mxu0 %v51894_v34  ;;  %43311 = vmatpush3.bf16.msra.mxu1 %v43310_v23  ;;  %v29107_v6 = vand.u32 4294901760, %v52091_v28 }
 0x9a8   : > { %43291 = vmatprep.subr.bf16.mxu0 %v44856_v5  ;;  %43327 = vmatprep.subr.bf16.mxu1 %v44856_v5 }
 0x9a9   : > { %v29108_v26 = vsub.f32 %v52091_v28, %v29107_v6 }
 0x9aa   : > { %39564 = vmatmul.mubr.f32.vlgmr.msra.gmra.mrb[18].mxu1 %v51885_v39 }
 0x9ab   : > { %43293 = vmatpush3.bf16.msra.mxu0 %v51906_v1  ;;  %43329 = vmatpush3.bf16.msra.mxu1 %v51863_v7 }
 0x9ac   : > { %43294 = vmatprep.subr.bf16.mxu0 %v44856_v5  ;;  %43330 = vmatprep.subr.bf16.mxu1 %v44856_v5 }
 0x9ad   : > { %39609 = vmatprep.mubr.msk.f32.mxu1 %vm44857_vm9, %v53781_v25 }
 0x9af   : > { %43296 = vmatpush3.bf16.msra.mxu0 %v51918_v20  ;;  %43332 = vmatpush3.bf16.msra.mxu1 %v51881_v27 }
 0x9b0   : > { %43312 = vmatprep.subr.bf16.mxu0 %v44856_v5  ;;  %43333 = vmatprep.subr.bf16.mxu1 %v44856_v5 }
 0x9b2   : > { %39541 = vmatmul.mubr.f32.vlgmr.msra.gmra.mrb[16].mxu0 %v28471_v50 }
 0x9b3   : > { %43314 = vmatpush3.bf16.msra.mxu0 %v43313_v14  ;;  %43335 = vmatpush3.bf16.msra.mxu1 %v51894_v34 }
 0x9b4   : > { %43315 = vmatprep.subr.bf16.mxu0 %v44856_v5  ;;  %43336 = vmatprep.subr.bf16.mxu1 %v44856_v5 }
 0x9b5   : > { %39586 = vmatprep.mubr.msk.f32.mxu0 %vm44857_vm9, %v53781_v25 }
 0x9b7   : > { %43317 = vmatpush3.bf16.msra.mxu0 %v43316_v31  ;;  %43338 = vmatpush3.bf16.msra.mxu1 %v51906_v1  ;;  %v29094_v31 = vsub.f32 %v52047_v24, %v29093_v48 }
 0x9b8   : > { %43318 = vmatprep.subr.bf16.mxu0 %v44856_v5  ;;  %43339 = vmatprep.subr.bf16.mxu1 %v44856_v5 }
 0x9bb   : > { %43320 = vmatpush3.bf16.msra.mxu0 %v43319_v62  ;;  %43341 = vmatpush3.bf16.msra.mxu1 %v51918_v20 }
 0x9bc   : > { %43321 = vmatprep.subr.bf16.mxu0 %v44856_v5  ;;  %43357 = vmatprep.subr.bf16.mxu1 %v44856_v5 }
 0x9be   : > { %39610 = vmatmul.mubr.f32.vlgmr.msra.gmra.mrb[20].mxu1 %v28469_v42  ;;  %v43388_v42 = vpack.c.bf16 %v29067_v59, %v29060_v21  ;;  %v29115_v21 = vsub.f32 %v52113_v57, %v29114_v60 }
 0x9bf   : > { %43323 = vmatpush3.bf16.msra.mxu0 %v43322_v49  ;;  %43359 = vmatpush3.bf16.msra.mxu1 %v51863_v7  ;;  %v28983_v7 = vand.u32 4294901760, %v51988_v22 }
 0x9c0   : > { %43324 = vmatprep.subr.bf16.mxu0 %v44856_v5  ;;  %43360 = vmatprep.subr.bf16.mxu1 %v44856_v5  ;;  %v29116_v3 = vand.u32 4294901760, %v29115_v21 }
 0x9c1   : > { %39655 = vmatprep.mubr.msk.f32.mxu1 %vm44857_vm9, %v53781_v25  ;;  %v52042_v11 = vsub.f32 %v51988_v22, %v28983_v7 }
 0x9c3   : > { %43326 = vmatpush3.bf16.msra.mxu0 %v43325_v61  ;;  %43362 = vmatpush3.bf16.msra.mxu1 %v51881_v27  ;;  %v28989_v27 = vand.u32 4294901760, %v52023_v17  ;;  %v29086_v23 = vand.u32 4294901760, %v52042_v11  ;;  %v29095_v61 = vand.u32 4294901760, %v29094_v31 }
 0x9c4   : > { %43342 = vmatprep.subr.bf16.mxu0 %v44856_v5  ;;  %43363 = vmatprep.subr.bf16.mxu1 %v44856_v5 }
 0x9c5   : > { %v52086_v46 = vsub.f32 %v52023_v17, %v28989_v27  ;;  %v29087_v50 = vsub.f32 %v52042_v11, %v29086_v23  ;;  %v52185_v43 = vpack.c.bf16 %v28992_v33, %v28989_v27  ;;  %v43406_v17 = vpack.c.bf16 %v52009_v45, %v52004_v51  ;;  %v52225_v27 = vld [vmem:[%s53413_s7 + $0xf8] sm:$0xff] }
 0x9c6   : > { %39587 = vmatmul.mubr.f32.vlgmr.msra.gmra.mrb[18].mxu0 %v51899_v15  ;;  %v28998_v15 = vand.u32 4294901760, %v52066_v29  ;;  %v43409_v33 = vpack.c.bf16 %v52047_v24, %v52042_v11  ;;  %v52345_v51 = vld [vmem:[%s53413_s7 + $0x138] sm:$0xff] }
 0x9c7   : > { %43344 = vmatpush3.bf16.msra.mxu0 %v43343_v36  ;;  %43365 = vmatpush3.bf16.msra.mxu1 %v51894_v34  ;;  %v29080_v34 = vsub.f32 %v52009_v45, %v29079_v38  ;;  %v29100_v62 = vand.u32 4294901760, %v52086_v46  ;;  %v29088_v49 = vand.u32 4294901760, %v29087_v50  ;;  %v43439_v45 = vpack.c.bf16 %v29093_v48, %v29086_v23 }
 0x9c8   : > { %43345 = vmatprep.subr.bf16.mxu0 %v44856_v5  ;;  %43366 = vmatprep.subr.bf16.mxu1 %v44856_v5  ;;  %v52197_v22 = vpack.c.bf16 %v28998_v15, %v28995_v44  ;;  %v43412_v44 = vpack.c.bf16 %v52091_v28, %v52086_v46 }
 0x9c9   : > { %39632 = vmatprep.mubr.msk.f32.mxu0 %vm44857_vm9, %v53781_v25  ;;  %v29081_v14 = vand.u32 4294901760, %v29080_v34  ;;  %v29101_v36 = vsub.f32 %v52086_v46, %v29100_v62 }
 0x9cb   : > { %43347 = vmatpush3.bf16.msra.mxu0 %v43346_v41  ;;  %43368 = vmatpush3.bf16.msra.mxu1 %v51906_v1  ;;  %v43352_v1 = vpack.c.bf16 %v28529_v13, %v28522_v19  ;;  %v52118_v19 = vsub.f32 %v52066_v29, %v28998_v15  ;;  %v43355_v13 = vpack.c.bf16 %v28543_v56, %v28536_v54  ;;  %v28955_v56 = vld [vmem:[#allocation3 + $0x2] sm:$0x1]  ;;  %v29102_v41 = vand.u32 4294901760, %v29101_v36  ;;  %v52240_v15 = vld [vmem:[%s53413_s7 + $0x100] sm:$0xff] }
 0x9cc   : > { %43348 = vmatprep.subr.bf16.mxu0 %v44856_v5  ;;  %43369 = vmatprep.subr.bf16.mxu1 %v44856_v5  ;;  %v43394_v54 = vpack.c.bf16 %v29095_v61, %v29088_v49  ;;  %v28968_v32 = vsel %vm27822_vm13, %v28955_v56, 0  ;;  %v29553_v29 = vand.u32 4294901760, %v52225_v27  ;;  %v43433_v56 = vpack.c.bf16 %v29065_v4, %v29058_v9 }
 0x9cd   : > { %v29121_v8 = vand.u32 4294901760, %v52118_v19  ;;  %v52164_v34 = vand.u32 4294901760, %v28968_v32  ;;  %v43415_v31 = vpack.c.bf16 %v52118_v19, %v52113_v57 }
 0x9cf   : > { %43350 = vmatpush3.bf16.msra.mxu0 %v43349_v30  ;;  %43371 = vmatpush3.bf16.msra.mxu1 %v51918_v20  ;;  %v43391_v20 = vpack.c.bf16 %v29081_v14, %v29074_v63  ;;  %v29109_v30 = vand.u32 4294901760, %v29108_v26  ;;  %v29122_v59 = vsub.f32 %v52118_v19, %v29121_v8  ;;  %v52178_v18 = vsub.f32 %v28968_v32, %v52164_v34 }
 0x9d0   : > { %43351 = vmatprep.subr.bf16.mxu0 %v44856_v5  ;;  %43387 = vmatprep.subr.bf16.mxu1 %v44856_v5  ;;  %v52257_v63 = vsub.f32 %v52225_v27, %v29553_v29  ;;  %v29556_v14 = vand.u32 4294901760, %v52240_v15  ;;  %v43436_v32 = vpack.c.bf16 %v29079_v38, %v29072_v35  ;;  %v52422_v19 = vpack.c.bf16 %v29553_v29, %v29550_v12 }
 0x9d1   : > { %v43397_v47 = vpack.c.bf16 %v29109_v30, %v29102_v41  ;;  %v29123_v40 = vand.u32 4294901760, %v29122_v59  ;;  %v29047_v58 = vand.u32 4294901760, %v52178_v18  ;;  %v52302_v41 = vld [vmem:[%s53413_s7 + $0x120] sm:$0xff]  ;;  %v52307_v30 = vld [vmem:[%s53413_s7 + $0x128] sm:$0xff] }
 0x9d2   : > { %39656 = vmatmul.mubr.f32.vlgmr.msra.gmra.mrb[22].mxu1 %v51885_v39  ;;  %v29644_v61 = vand.u32 4294901760, %v52257_v63  ;;  %v52283_v36 = vsub.f32 %v52240_v15, %v29556_v14 }
 0x9d3   : > { %43353 = vmatpush3.bf16.msra.mxu0 %v43352_v1  ;;  %43389 = vmatpush3.bf16.msra.mxu1 %v43388_v42  ;;  %v43400_v53 = vpack.c.bf16 %v29123_v40, %v29116_v3  ;;  %v29048_v0 = vsub.f32 %v52178_v18, %v29047_v58  ;;  %v52245_v1 = vld [vmem:[%s53413_s7 + $0x108] sm:$0xff]  ;;  %v52252_v42 = vsub.f32 %v52220_v10, %v29550_v12  ;;  %v52340_v3 = vld [vmem:[%s53413_s7 + $0x130] sm:$0xff] }
 0x9d4   : > { %43354 = vmatprep.subr.bf16.mxu0 %v44856_v5  ;;  %43390 = vmatprep.subr.bf16.mxu1 %v44856_v5  ;;  %v29559_v50 = vand.u32 4294901760, %v52245_v1  ;;  %v29651_v9 = vand.u32 4294901760, %v52283_v36  ;;  %v29574_v48 = vand.u32 4294901760, %v52340_v3 }
 0x9d5   : > { %39701 = vmatprep.mubr.msk.f32.mxu1 %vm44857_vm9, %v53781_v25  ;;  %v29637_v49 = vand.u32 4294901760, %v52252_v42 }
 0x9d6   : > { %v52288_v26 = vsub.f32 %v52245_v1, %v29559_v50  ;;  %v29652_v40 = vsub.f32 %v52283_v36, %v29651_v9  ;;  %v52392_v28 = vsub.f32 %v52340_v3, %v29574_v48  ;;  %v52439_v27 = vpack.c.bf16 %v29559_v50, %v29556_v14 }
 0x9d7   : > { %43356 = vmatpush3.bf16.msra.mxu0 %v43355_v13  ;;  %43392 = vmatpush3.bf16.msra.mxu1 %v43391_v20  ;;  %v52267_v13 = vld [vmem:[%s53413_s7 + $0x110] sm:$0xff]  ;;  %v52272_v20 = vld [vmem:[%s53413_s7 + $0x118] sm:$0xff] }
 0x9d8   : > { %43372 = vmatprep.subr.bf16.mxu0 %v44856_v5  ;;  %43393 = vmatprep.subr.bf16.mxu1 %v44856_v5  ;;  %v29658_v4 = vand.u32 4294901760, %v52288_v26 }
 0x9da   : > { %39633 = vmatmul.mubr.f32.vlgmr.msra.gmra.mrb[20].mxu0 %v51885_v39  ;;  %v52173_v39 = vpack.c.bf16 %v28986_v2, %v28983_v7  ;;  %v43403_v7 = vpack.c.bf16 %v51978_v55, %v51973_v52  ;;  %v29049_v2 = vand.u32 4294901760, %v29048_v0  ;;  %v29638_v52 = vsub.f32 %v52252_v42, %v29637_v49 }
 0x9db   : > { %43374 = vmatpush3.bf16.msra.mxu0 %v52143_v37  ;;  %43395 = vmatpush3.bf16.msra.mxu1 %v43394_v54  ;;  %v29565_v54 = vand.u32 4294901760, %v52272_v20  ;;  %v29645_v55 = vsub.f32 %v52257_v63, %v29644_v61  ;;  %v29653_v0 = vand.u32 4294901760, %v29652_v40 }
 0x9dc   : > { %43375 = vmatprep.subr.bf16.mxu0 %v44856_v5  ;;  %43396 = vmatprep.subr.bf16.mxu1 %v44856_v5  ;;  %v29639_v35 = vand.u32 4294901760, %v29638_v52 }
 0x9dd   : > { %39678 = vmatprep.mubr.msk.f32.mxu0 %vm44857_vm9, %v53781_v25  ;;  %v52326_v59 = vsub.f32 %v52272_v20, %v29565_v54  ;;  %v29646_v38 = vand.u32 4294901760, %v29645_v55  ;;  %v29693_v55 = vand.u32 4294901760, %v52392_v28 }
 0x9df   : > { %43377 = vmatpush3.bf16.msra.mxu0 %v52160_v16  ;;  %43398 = vmatpush3.bf16.msra.mxu1 %v43397_v47  ;;  %v29571_v47 = vand.u32 4294901760, %v52307_v30  ;;  %v29672_v11 = vand.u32 4294901760, %v52326_v59 }
 0x9e0   : > { %43378 = vmatprep.subr.bf16.mxu0 %v44856_v5  ;;  %43399 = vmatprep.subr.bf16.mxu1 %v44856_v5 }
 0x9e1   : > { %v52370_v23 = vsub.f32 %v52307_v30, %v29571_v47  ;;  %v52499_v30 = vld [vmem:[%s53413_s7 + $0x140] sm:$0xff] }
 0x9e2   : > { %v30129_v3 = vand.u32 4294901760, %v52499_v30 }
 0x9e3   : > { %43380 = vmatpush3.bf16.msra.mxu0 %v52173_v39  ;;  %43401 = vmatpush3.bf16.msra.mxu1 %v43400_v53  ;;  %v29686_v46 = vand.u32 4294901760, %v52370_v23 }
 0x9e4   : > { %43381 = vmatprep.subr.bf16.mxu0 %v44856_v5  ;;  %43417 = vmatprep.subr.bf16.mxu1 %v44856_v5 }
 0x9e5   : > { %v29687_v52 = vsub.f32 %v52370_v23, %v29686_v46 }
 0x9e6   : > { %39702 = vmatmul.mubr.f32.vlgmr.msra.gmra.mrb[24].mxu1 %v52164_v34 }
 0x9e7   : > { %43383 = vmatpush3.bf16.msra.mxu0 %v52185_v43  ;;  %43419 = vmatpush3.bf16.msra.mxu1 %v52143_v37 }
 0x9e8   : > { %43384 = vmatprep.subr.bf16.mxu0 %v44856_v5  ;;  %43420 = vmatprep.subr.bf16.mxu1 %v44856_v5 }
 0x9e9   : > { %39747 = vmatprep.mubr.msk.f32.mxu1 %vm44857_vm9, %v53781_v25 }
 0x9eb   : > { %43386 = vmatpush3.bf16.msra.mxu0 %v52197_v22  ;;  %43422 = vmatpush3.bf16.msra.mxu1 %v52160_v16 }
 0x9ec   : > { %43402 = vmatprep.subr.bf16.mxu0 %v44856_v5  ;;  %43423 = vmatprep.subr.bf16.mxu1 %v44856_v5 }
 0x9ee   : > { %39679 = vmatmul.mubr.f32.vlgmr.msra.gmra.mrb[22].mxu0 %v29049_v2 }
 0x9ef   : > { %43404 = vmatpush3.bf16.msra.mxu0 %v43403_v7  ;;  %43425 = vmatpush3.bf16.msra.mxu1 %v52173_v39 }
 0x9f0   : > { %43405 = vmatprep.subr.bf16.mxu0 %v44856_v5  ;;  %43426 = vmatprep.subr.bf16.mxu1 %v44856_v5 }
 0x9f1   : > { %39724 = vmatprep.mubr.msk.f32.mxu0 %vm44857_vm9, %v53781_v25 }
 0x9f3   : > { %43407 = vmatpush3.bf16.msra.mxu0 %v43406_v17  ;;  %43428 = vmatpush3.bf16.msra.mxu1 %v52185_v43  ;;  %v29673_v17 = vsub.f32 %v52326_v59, %v29672_v11 }
 0x9f4   : > { %43408 = vmatprep.subr.bf16.mxu0 %v44856_v5  ;;  %43429 = vmatprep.subr.bf16.mxu1 %v44856_v5 }
 0x9f7   : > { %43410 = vmatpush3.bf16.msra.mxu0 %v43409_v33  ;;  %43431 = vmatpush3.bf16.msra.mxu1 %v52197_v22 }
 0x9f8   : > { %43411 = vmatprep.subr.bf16.mxu0 %v44856_v5  ;;  %43447 = vmatprep.subr.bf16.mxu1 %v44856_v5 }
 0x9fa   : > { %39748 = vmatmul.mubr.f32.vlgmr.msra.gmra.mrb[26].mxu1 %v29047_v58  ;;  %v43478_v58 = vpack.c.bf16 %v29646_v38, %v29639_v35  ;;  %v29694_v35 = vsub.f32 %v52392_v28, %v29693_v55 }
 0x9fb   : > { %43413 = vmatpush3.bf16.msra.mxu0 %v43412_v44  ;;  %43449 = vmatpush3.bf16.msra.mxu1 %v52143_v37  ;;  %v29562_v37 = vand.u32 4294901760, %v52267_v13 }
 0x9fc   : > { %43414 = vmatprep.subr.bf16.mxu0 %v44856_v5  ;;  %43450 = vmatprep.subr.bf16.mxu1 %v44856_v5  ;;  %v29695_v29 = vand.u32 4294901760, %v29694_v35 }
 0x9fd   : > { %39793 = vmatprep.mubr.msk.f32.mxu1 %vm44857_vm9, %v53781_v25  ;;  %v52321_v21 = vsub.f32 %v52267_v13, %v29562_v37 }
 0x9ff   : > { %43416 = vmatpush3.bf16.msra.mxu0 %v43415_v31  ;;  %43452 = vmatpush3.bf16.msra.mxu1 %v52160_v16  ;;  %v29568_v16 = vand.u32 4294901760, %v52302_v41  ;;  %v29665_v53 = vand.u32 4294901760, %v52321_v21  ;;  %v29674_v31 = vand.u32 4294901760, %v29673_v17 }
 0xa00   : > { %43432 = vmatprep.subr.bf16.mxu0 %v44856_v5  ;;  %43453 = vmatprep.subr.bf16.mxu1 %v44856_v5 }
 0xa01   : > { %v52365_v24 = vsub.f32 %v52302_v41, %v29568_v16  ;;  %v29666_v2 = vsub.f32 %v52321_v21, %v29665_v53  ;;  %v52464_v14 = vpack.c.bf16 %v29571_v47, %v29568_v16  ;;  %v43496_v41 = vpack.c.bf16 %v52288_v26, %v52283_v36  ;;  %v52504_v16 = vld [vmem:[%s53413_s7 + $0x148] sm:$0xff] }
 0xa02   : > { %39725 = vmatmul.mubr.f32.vlgmr.msra.gmra.mrb[24].mxu0 %v52178_v18  ;;  %v29577_v18 = vand.u32 4294901760, %v52345_v51  ;;  %v43499_v47 = vpack.c.bf16 %v52326_v59, %v52321_v21  ;;  %v52624_v36 = vld [vmem:[%s53413_s7 + $0x188] sm:$0xff] }
 0xa03   : > { %43434 = vmatpush3.bf16.msra.mxu0 %v43433_v56  ;;  %43455 = vmatpush3.bf16.msra.mxu1 %v52173_v39  ;;  %v29659_v39 = vsub.f32 %v52288_v26, %v29658_v4  ;;  %v29679_v33 = vand.u32 4294901760, %v52365_v24  ;;  %v29667_v44 = vand.u32 4294901760, %v29666_v2 }
 0xa04   : > { %43435 = vmatprep.subr.bf16.mxu0 %v44856_v5  ;;  %43456 = vmatprep.subr.bf16.mxu1 %v44856_v5  ;;  %v52476_v13 = vpack.c.bf16 %v29577_v18, %v29574_v48  ;;  %v43502_v48 = vpack.c.bf16 %v52370_v23, %v52365_v24 }
 0xa05   : > { %39770 = vmatprep.mubr.msk.f32.mxu0 %vm44857_vm9, %v53781_v25  ;;  %v29660_v7 = vand.u32 4294901760, %v29659_v39  ;;  %v29680_v56 = vsub.f32 %v52365_v24, %v29679_v33 }
 0xa07   : > { %43437 = vmatpush3.bf16.msra.mxu0 %v43436_v32  ;;  %43458 = vmatpush3.bf16.msra.mxu1 %v52185_v43  ;;  %v43442_v43 = vpack.c.bf16 %v29107_v6, %v29100_v62  ;;  %v52397_v62 = vsub.f32 %v52345_v51, %v29577_v18  ;;  %v43445_v6 = vpack.c.bf16 %v29121_v8, %v29114_v60  ;;  %v29534_v8 = vld [vmem:[#allocation3 + $0x3] sm:$0x1]  ;;  %v29681_v32 = vand.u32 4294901760, %v29680_v56 }
 0xa08   : > { %43438 = vmatprep.subr.bf16.mxu0 %v44856_v5  ;;  %43459 = vmatprep.subr.bf16.mxu1 %v44856_v5  ;;  %v43484_v60 = vpack.c.bf16 %v29674_v31, %v29667_v44  ;;  %v29547_v10 = vsel %vm27822_vm13, %v29534_v8, 0  ;;  %v30132_v51 = vand.u32 4294901760, %v52504_v16  ;;  %v52519_v18 = vld [vmem:[%s53413_s7 + $0x150] sm:$0xff]  ;;  %v43523_v8 = vpack.c.bf16 %v29644_v61, %v29637_v49 }
 0xa09   : > { %v29700_v57 = vand.u32 4294901760, %v52397_v62  ;;  %v52443_v39 = vand.u32 4294901760, %v29547_v10  ;;  %v43505_v17 = vpack.c.bf16 %v52397_v62, %v52392_v28 }
 0xa0b   : > { %43440 = vmatpush3.bf16.msra.mxu0 %v43439_v45  ;;  %43461 = vmatpush3.bf16.msra.mxu1 %v52197_v22  ;;  %v43481_v22 = vpack.c.bf16 %v29660_v7, %v29653_v0  ;;  %v29688_v45 = vand.u32 4294901760, %v29687_v52  ;;  %v29701_v38 = vsub.f32 %v52397_v62, %v29700_v57  ;;  %v52457_v1 = vsub.f32 %v29547_v10, %v52443_v39 }
 0xa0c   : > { %43441 = vmatprep.subr.bf16.mxu0 %v44856_v5  ;;  %43477 = vmatprep.subr.bf16.mxu1 %v44856_v5  ;;  %v52536_v0 = vsub.f32 %v52504_v16, %v30132_v51  ;;  %v30135_v7 = vand.u32 4294901760, %v52519_v18  ;;  %v43526_v10 = vpack.c.bf16 %v29658_v4, %v29651_v9  ;;  %v43529_v9 = vpack.c.bf16 %v29672_v11, %v29665_v53 }
 0xa0d   : > { %v43487_v12 = vpack.c.bf16 %v29688_v45, %v29681_v32  ;;  %v29702_v40 = vand.u32 4294901760, %v29701_v38  ;;  %v29626_v50 = vand.u32 4294901760, %v52457_v1  ;;  %v52581_v32 = vld [vmem:[%s53413_s7 + $0x170] sm:$0xff]  ;;  %v52586_v45 = vld [vmem:[%s53413_s7 + $0x178] sm:$0xff] }
 0xa0e   : > { %39794 = vmatmul.mubr.f32.vlgmr.msra.gmra.mrb[28].mxu1 %v52164_v34  ;;  %v30223_v31 = vand.u32 4294901760, %v52536_v0  ;;  %v52562_v56 = vsub.f32 %v52519_v18, %v30135_v7 }
 0xa0f   : > { %43443 = vmatpush3.bf16.msra.mxu0 %v43442_v43  ;;  %43479 = vmatpush3.bf16.msra.mxu1 %v43478_v58  ;;  %v43490_v15 = vpack.c.bf16 %v29702_v40, %v29695_v29  ;;  %v29627_v20 = vsub.f32 %v52457_v1, %v29626_v50  ;;  %v52524_v43 = vld [vmem:[%s53413_s7 + $0x158] sm:$0xff]  ;;  %v52531_v58 = vsub.f32 %v52499_v30, %v30129_v3  ;;  %v52619_v29 = vld [vmem:[%s53413_s7 + $0x180] sm:$0xff] }
 0xa10   : > { %43444 = vmatprep.subr.bf16.mxu0 %v44856_v5  ;;  %43480 = vmatprep.subr.bf16.mxu1 %v44856_v5  ;;  %v30138_v2 = vand.u32 4294901760, %v52524_v43  ;;  %v30230_v49 = vand.u32 4294901760, %v52562_v56  ;;  %v30153_v11 = vand.u32 4294901760, %v52619_v29 }
 0xa11   : > { %39839 = vmatprep.mubr.msk.f32.mxu1 %vm44857_vm9, %v53781_v25  ;;  %v30216_v44 = vand.u32 4294901760, %v52531_v58 }
 0xa12   : > { %v52567_v52 = vsub.f32 %v52524_v43, %v30138_v2  ;;  %v52671_v23 = vsub.f32 %v52619_v29, %v30153_v11  ;;  %v52718_v16 = vpack.c.bf16 %v30138_v2, %v30135_v7 }
 0xa13   : > { %43446 = vmatpush3.bf16.msra.mxu0 %v43445_v6  ;;  %43482 = vmatpush3.bf16.msra.mxu1 %v43481_v22  ;;  %v52546_v6 = vld [vmem:[%s53413_s7 + $0x160] sm:$0xff]  ;;  %v52551_v22 = vld [vmem:[%s53413_s7 + $0x168] sm:$0xff] }
 0xa14   : > { %43462 = vmatprep.subr.bf16.mxu0 %v44856_v5  ;;  %43483 = vmatprep.subr.bf16.mxu1 %v44856_v5  ;;  %v30237_v61 = vand.u32 4294901760, %v52567_v52  ;;  %v30272_v62 = vand.u32 4294901760, %v52671_v23  ;;  %v43586_v29 = vpack.c.bf16 %v52567_v52, %v52562_v56 }
 0xa16   : > { %39771 = vmatmul.mubr.f32.vlgmr.msra.gmra.mrb[26].mxu0 %v52164_v34  ;;  %v52452_v34 = vpack.c.bf16 %v29565_v54, %v29562_v37  ;;  %v43493_v37 = vpack.c.bf16 %v52257_v63, %v52252_v42  ;;  %v29628_v54 = vand.u32 4294901760, %v29627_v20  ;;  %v30217_v42 = vsub.f32 %v52531_v58, %v30216_v44 }
 0xa17   : > { %43464 = vmatpush3.bf16.msra.mxu0 %v52422_v19  ;;  %43485 = vmatpush3.bf16.msra.mxu1 %v43484_v60  ;;  %v30144_v60 = vand.u32 4294901760, %v52551_v22  ;;  %v30224_v63 = vsub.f32 %v52536_v0, %v30223_v31  ;;  %v30156_v20 = vand.u32 4294901760, %v52624_v36 }
 0xa18   : > { %43465 = vmatprep.subr.bf16.mxu0 %v44856_v5  ;;  %43486 = vmatprep.subr.bf16.mxu1 %v44856_v5  ;;  %v30218_v4 = vand.u32 4294901760, %v30217_v42 }
 0xa19   : > { %39816 = vmatprep.mubr.msk.f32.mxu0 %vm44857_vm9, %v53781_v25  ;;  %v52605_v38 = vsub.f32 %v52551_v22, %v30144_v60  ;;  %v30225_v40 = vand.u32 4294901760, %v30224_v63 }
 0xa1b   : > { %43467 = vmatpush3.bf16.msra.mxu0 %v52439_v27  ;;  %43488 = vmatpush3.bf16.msra.mxu1 %v43487_v12  ;;  %v30150_v12 = vand.u32 4294901760, %v52586_v45  ;;  %v30251_v21 = vand.u32 4294901760, %v52605_v38 }
 0xa1c   : > { %43468 = vmatprep.subr.bf16.mxu0 %v44856_v5  ;;  %43489 = vmatprep.subr.bf16.mxu1 %v44856_v5 }
 0xa1d   : > { %v52649_v53 = vsub.f32 %v52586_v45, %v30150_v12 }
 0xa1f   : > { %43470 = vmatpush3.bf16.msra.mxu0 %v52452_v34  ;;  %43491 = vmatpush3.bf16.msra.mxu1 %v43490_v15  ;;  %v30231_v15 = vsub.f32 %v52562_v56, %v30230_v49  ;;  %v30265_v24 = vand.u32 4294901760, %v52649_v53 }
 0xa20   : > { %43471 = vmatprep.subr.bf16.mxu0 %v44856_v5  ;;  %43507 = vmatprep.subr.bf16.mxu1 %v44856_v5 }
 0xa21   : > { %v30266_v28 = vsub.f32 %v52649_v53, %v30265_v24 }
 0xa22   : > { %39840 = vmatmul.mubr.f32.vlgmr.msra.gmra.mrb[30].mxu1 %v52443_v39 }
 0xa23   : > { %43473 = vmatpush3.bf16.msra.mxu0 %v52464_v14  ;;  %43509 = vmatpush3.bf16.msra.mxu1 %v52422_v19 }
 0xa24   : > { %43474 = vmatprep.subr.bf16.mxu0 %v44856_v5  ;;  %43510 = vmatprep.subr.bf16.mxu1 %v44856_v5 }
 0xa25   : > { %39885 = vmatprep.mubr.msk.f32.mxu1 %vm44857_vm9, %v53781_v25 }
 0xa27   : > { %43476 = vmatpush3.bf16.msra.mxu0 %v52476_v13  ;;  %43512 = vmatpush3.bf16.msra.mxu1 %v52439_v27 }
 0xa28   : > { %43492 = vmatprep.subr.bf16.mxu0 %v44856_v5  ;;  %43513 = vmatprep.subr.bf16.mxu1 %v44856_v5 }
 0xa2a   : > { %39817 = vmatmul.mubr.f32.vlgmr.msra.gmra.mrb[28].mxu0 %v29628_v54  ;;  %v30232_v54 = vand.u32 4294901760, %v30231_v15  ;;  %v30267_v15 = vand.u32 4294901760, %v30266_v28 }
 0xa2b   : > { %43494 = vmatpush3.bf16.msra.mxu0 %v43493_v37  ;;  %43515 = vmatpush3.bf16.msra.mxu1 %v52452_v34  ;;  %v43568_v37 = vpack.c.bf16 %v30225_v40, %v30218_v4  ;;  %v30113_v40 = vld [vmem:[#allocation3 + $0x4] sm:$0x1] }
 0xa2c   : > { %43495 = vmatprep.subr.bf16.mxu0 %v44856_v5  ;;  %43516 = vmatprep.subr.bf16.mxu1 %v44856_v5  ;;  %v30126_v30 = vsel %vm27822_vm13, %v30113_v40, 0 }
 0xa2d   : > { %39862 = vmatprep.mubr.msk.f32.mxu0 %vm44857_vm9, %v53781_v25 }
 0xa2f   : > { %43497 = vmatpush3.bf16.msra.mxu0 %v43496_v41  ;;  %43518 = vmatpush3.bf16.msra.mxu1 %v52464_v14 }
 0xa30   : > { %43498 = vmatprep.subr.bf16.mxu0 %v44856_v5  ;;  %43519 = vmatprep.subr.bf16.mxu1 %v44856_v5 }
 0xa33   : > { %43500 = vmatpush3.bf16.msra.mxu0 %v43499_v47  ;;  %43521 = vmatpush3.bf16.msra.mxu1 %v52476_v13 }
 0xa34   : > { %43501 = vmatprep.subr.bf16.mxu0 %v44856_v5  ;;  %43537 = vmatprep.subr.bf16.mxu1 %v44856_v5 }
 0xa36   : > { %39886 = vmatmul.mubr.f32.vlgmr.msra.gmra.mrb[32].mxu1 %v29626_v50 }
 0xa37   : > { %43503 = vmatpush3.bf16.msra.mxu0 %v43502_v48  ;;  %43539 = vmatpush3.bf16.msra.mxu1 %v52422_v19  ;;  %v30141_v19 = vand.u32 4294901760, %v52546_v6  ;;  %v30252_v48 = vsub.f32 %v52605_v38, %v30251_v21 }
 0xa38   : > { %43504 = vmatprep.subr.bf16.mxu0 %v44856_v5  ;;  %43540 = vmatprep.subr.bf16.mxu1 %v44856_v5 }
 0xa39   : > { %39931 = vmatprep.mubr.msk.f32.mxu1 %vm44857_vm9, %v53781_v25  ;;  %v52600_v35 = vsub.f32 %v52546_v6, %v30141_v19  ;;  %v52731_v18 = vpack.c.bf16 %v30144_v60, %v30141_v19 }
 0xa3b   : > { %43506 = vmatpush3.bf16.msra.mxu0 %v43505_v17  ;;  %43542 = vmatpush3.bf16.msra.mxu1 %v52439_v27  ;;  %v30147_v27 = vand.u32 4294901760, %v52581_v32  ;;  %v30244_v50 = vand.u32 4294901760, %v52600_v35 }
 0xa3c   : > { %43522 = vmatprep.subr.bf16.mxu0 %v44856_v5  ;;  %43543 = vmatprep.subr.bf16.mxu1 %v44856_v5 }
 0xa3d   : > { %v52644_v59 = vsub.f32 %v52581_v32, %v30147_v27  ;;  %v30245_v47 = vsub.f32 %v52600_v35, %v30244_v50  ;;  %v52741_v2 = vpack.c.bf16 %v30150_v12, %v30147_v27  ;;  %v43565_v32 = vpack.c.bf16 %v30156_v20, %v30153_v11 }
 0xa3e   : > { %39863 = vmatmul.mubr.f32.vlgmr.msra.gmra.mrb[30].mxu0 %v52457_v1  ;;  %v30238_v1 = vsub.f32 %v52567_v52, %v30237_v61  ;;  %v43583_v12 = vpack.c.bf16 %v52536_v0, %v52531_v58 }
 0xa3f   : > { %43524 = vmatpush3.bf16.msra.mxu0 %v43523_v8  ;;  %43545 = vmatpush3.bf16.msra.mxu1 %v52452_v34  ;;  %v30258_v17 = vand.u32 4294901760, %v52644_v59 }
 0xa40   : > { %43525 = vmatprep.subr.bf16.mxu0 %v44856_v5  ;;  %43546 = vmatprep.subr.bf16.mxu1 %v44856_v5  ;;  %v30239_v41 = vand.u32 4294901760, %v30238_v1  ;;  %v30273_v1 = vsub.f32 %v52671_v23, %v30272_v62 }
 0xa41   : > { %v28028_v26 = vpop.f32.mrb[12].mxu1  ;;  %39908 = vmatprep.mubr.msk.f32.mxu0 %vm44857_vm9, %v53781_v25  ;;  %v30259_v4 = vsub.f32 %v52644_v59, %v30258_v17 }
 0xa42   : > { %v39427_v34 = vpop.f32.mrb[13].mxu1  ;;  %v43571_v63 = vpack.c.bf16 %v30239_v41, %v30232_v54  ;;  %v52722_v54 = vand.u32 4294901760, %v30126_v30 }
 0xa43   : > { %43527 = vmatpush3.bf16.msra.mxu0 %v43526_v10  ;;  %43548 = vmatpush3.bf16.msra.mxu1 %v52464_v14  ;;  %v43532_v14 = vpack.c.bf16 %v29686_v46, %v29679_v33  ;;  %v52676_v33 = vsub.f32 %v52624_v36, %v30156_v20  ;;  %v30246_v10 = vand.u32 4294901760, %v30245_v47  ;;  %v30260_v34 = vand.u32 4294901760, %v30259_v4 }
 0xa44   : > { %43528 = vmatprep.subr.bf16.mxu0 %v44856_v5  ;;  %43549 = vmatprep.subr.bf16.mxu1 %v44856_v5  ;;  %v30204_v7 = vsub.f32 %v30126_v30, %v52722_v54  ;;  %v43589_v20 = vpack.c.bf16 %v52605_v38, %v52600_v35 }
 0xa46   : > { %v30205_v6 = vand.u32 4294901760, %v30204_v7 }
 0xa47   : > { %43530 = vmatpush3.bf16.msra.mxu0 %v43529_v9  ;;  %43551 = vmatpush3.bf16.msra.mxu1 %v52476_v13  ;;  %v43535_v13 = vpack.c.bf16 %v29700_v57, %v29693_v55  ;;  %v30253_v9 = vand.u32 4294901760, %v30252_v48  ;;  %v30279_v55 = vand.u32 4294901760, %v52676_v33  ;;  %v52701_v57 = vpack.c.bf16 %v30132_v51, %v30129_v3 }
 0xa48   : > { %43531 = vmatprep.subr.bf16.mxu0 %v44856_v5  ;;  %43567 = vmatprep.subr.bf16.mxu1 %v44856_v5  ;;  %v43577_v3 = vpack.c.bf16 %v30267_v15, %v30260_v34  ;;  %v30274_v51 = vand.u32 4294901760, %v30273_v1  ;;  %v30206_v45 = vsub.f32 %v30204_v7, %v30205_v6  ;;  %v43592_v48 = vpack.c.bf16 %v52649_v53, %v52644_v59 }
 0xa49   : > { %v27907_v46 = vpop.f32.mrb[10].mxu0 }
 0xa4a   : > { %v28029_v8 = vadd.f32 %v28028_v26, %v27907_v46  ;;  %39932 = vmatmul.mubr.f32.vlgmr.msra.gmra.mrb[34].mxu1 %v52443_v39  ;;  %v39404_v42 = vpop.f32.mrb[11].mxu0  ;;  %v43574_v26 = vpack.c.bf16 %v30253_v9, %v30246_v10  ;;  %v30207_v47 = vand.u32 4294901760, %v30206_v45  ;;  %v43613_v10 = vpack.c.bf16 %v30223_v31, %v30216_v44 }
 0xa4b   : > { %43533 = vmatpush3.bf16.msra.mxu0 %v43532_v14  ;;  %43569 = vmatpush3.bf16.msra.mxu1 %v43568_v37  ;;  %v30280_v14 = vsub.f32 %v52676_v33, %v30279_v55  ;;  %v43595_v42 = vpack.c.bf16 %v52676_v33, %v52671_v23  ;;  %v43616_v9 = vpack.c.bf16 %v30237_v61, %v30230_v49 }
 0xa4c   : > { %43534 = vmatprep.subr.bf16.mxu0 %v44856_v5  ;;  %43570 = vmatprep.subr.bf16.mxu1 %v44856_v5  ;;  %v43619_v44 = vpack.c.bf16 %v30251_v21, %v30244_v50  ;;  %v43622_v31 = vpack.c.bf16 %v30265_v24, %v30258_v17  ;;  %v43625_v61 = vpack.c.bf16 %v30279_v55, %v30272_v62 }
 0xa4d   : > { %39977 = vmatprep.mubr.msk.f32.mxu1 %vm44857_vm9, %v53781_v25  ;;  %v30281_v37 = vand.u32 4294901760, %v30280_v14 }
 0xa4f   : > { %43536 = vmatpush3.bf16.msra.mxu0 %v43535_v13  ;;  %43572 = vmatpush3.bf16.msra.mxu1 %v43571_v63  ;;  %v43580_v43 = vpack.c.bf16 %v30281_v37, %v30274_v51  ;;  %v30695_v51 = vld [vmem:[%s53415_s9] sm:$0xff]  ;;  %v30696_v37 = vld [vmem:[%s53415_s9 + $0x8] sm:$0xff] }
 0xa50   : > { %43552 = vmatprep.subr.bf16.mxu0 %v44856_v5  ;;  %43573 = vmatprep.subr.bf16.mxu1 %v44856_v5 }
 0xa52   : > { %39909 = vmatmul.mubr.f32.vlgmr.msra.gmra.mrb[32].mxu0 %v52443_v39 }
 0xa53   : > { %43554 = vmatpush3.bf16.msra.mxu0 %v52701_v57  ;;  %43575 = vmatpush3.bf16.msra.mxu1 %v43574_v26 }
 0xa54   : > { %43555 = vmatprep.subr.bf16.mxu0 %v44856_v5  ;;  %43576 = vmatprep.subr.bf16.mxu1 %v44856_v5 }
 0xa55   : > { %v28203_v41 = vpop.f32.mrb[14].mxu1  ;;  %39954 = vmatprep.mubr.msk.f32.mxu0 %vm44857_vm9, %v53781_v25 }
 0xa56   : > { %v39473_v39 = vpop.f32.mrb[15].mxu1 }
 0xa57   : > { %43557 = vmatpush3.bf16.msra.mxu0 %v52718_v16  ;;  %43578 = vmatpush3.bf16.msra.mxu1 %v43577_v3  ;;  %v30697_v39 = vld [vmem:[%s53415_s9 + $0x10] sm:$0xff] }
 0xa58   : > { %43558 = vmatprep.subr.bf16.mxu0 %v44856_v5  ;;  %43579 = vmatprep.subr.bf16.mxu1 %v44856_v5 }
 0xa5b   : > { %43560 = vmatpush3.bf16.msra.mxu0 %v52731_v18  ;;  %43581 = vmatpush3.bf16.msra.mxu1 %v43580_v43  ;;  %v30722_v43 = vand.u32 4294901760, %v30697_v39 }
 0xa5c   : > { %43561 = vmatprep.subr.bf16.mxu0 %v44856_v5  ;;  %43597 = vmatprep.subr.bf16.mxu1 %v44856_v5 }
 0xa5d   : > { %v28120_v22 = vpop.f32.mrb[12].mxu0 }
 0xa5e   : > { %v28121_v19 = vadd.f32 %v28120_v22, %v28029_v8  ;;  %v39450_v60 = vpop.f32.mrb[13].mxu0  ;;  %39978 = vmatmul.mubr.f32.vlgmr.msra.gmra.mrb[36].mxu1 %v52722_v54 }
 0xa5f   : > { %43563 = vmatpush3.bf16.msra.mxu0 %v52741_v2  ;;  %43599 = vmatpush3.bf16.msra.mxu1 %v52701_v57 }
 0xa60   : > { %43564 = vmatprep.subr.bf16.mxu0 %v44856_v5  ;;  %43600 = vmatprep.subr.bf16.mxu1 %v44856_v5  ;;  %v28204_v27 = vadd.f32 %v28203_v41, %v28121_v19  ;;  %v30719_v41 = vand.u32 4294901760, %v30696_v37  ;;  %v52843_v19 = vsub.f32 %v30697_v39, %v30722_v43 }
 0xa61   : > { %40023 = vmatprep.mubr.msk.f32.mxu1 %vm44857_vm9, %v53781_v25 }
 0xa62   : > { %v52841_v22 = vsub.f32 %v30696_v37, %v30719_v41  ;;  %v30822_v37 = vand.u32 4294901760, %v52843_v19 }
 0xa63   : > { %43566 = vmatpush3.bf16.msra.mxu0 %v43565_v32  ;;  %43602 = vmatpush3.bf16.msra.mxu1 %v52718_v16 }
 0xa64   : > { %43582 = vmatprep.subr.bf16.mxu0 %v44856_v5  ;;  %43603 = vmatprep.subr.bf16.mxu1 %v44856_v5 }
 0xa66   : > { %39955 = vmatmul.mubr.f32.vlgmr.msra.gmra.mrb[34].mxu0 %v30207_v47  ;;  %v30700_v47 = vld [vmem:[%s53415_s9 + $0x28] sm:$0xff] }
 0xa67   : > { %43584 = vmatpush3.bf16.msra.mxu0 %v43583_v12  ;;  %43605 = vmatpush3.bf16.msra.mxu1 %v52731_v18  ;;  %v30699_v12 = vld [vmem:[%s53415_s9 + $0x20] sm:$0xff] }
 0xa68   : > { %43585 = vmatprep.subr.bf16.mxu0 %v44856_v5  ;;  %43606 = vmatprep.subr.bf16.mxu1 %v44856_v5 }
 0xa69   : > { %v28385_v36 = vpop.f32.mrb[16].mxu1  ;;  %40000 = vmatprep.mubr.msk.f32.mxu0 %vm44857_vm9, %v53781_v25 }
 0xa6a   : > { %v39519_v11 = vpop.f32.mrb[17].mxu1 }
 0xa6b   : > { %43587 = vmatpush3.bf16.msra.mxu0 %v43586_v29  ;;  %43608 = vmatpush3.bf16.msra.mxu1 %v52741_v2  ;;  %v30728_v29 = vand.u32 4294901760, %v30699_v12 }
 0xa6c   : > { %43588 = vmatprep.subr.bf16.mxu0 %v44856_v5  ;;  %43609 = vmatprep.subr.bf16.mxu1 %v44856_v5 }
 0xa6f   : > { %43590 = vmatpush3.bf16.msra.mxu0 %v43589_v20  ;;  %43611 = vmatpush3.bf16.msra.mxu1 %v43565_v32 }
 0xa70   : > { %43591 = vmatprep.subr.bf16.mxu0 %v44856_v5  ;;  %43627 = vmatprep.subr.bf16.mxu1 %v44856_v5 }
 0xa71   : > { %v28304_v46 = vpop.f32.mrb[14].mxu0 }
 0xa72   : > { %v28305_v13 = vadd.f32 %v28304_v46, %v28204_v27  ;;  %v39496_v8 = vpop.f32.mrb[15].mxu0  ;;  %40024 = vmatmul.mubr.f32.vlgmr.msra.gmra.mrb[38].mxu1 %v30205_v6 }
 0xa73   : > { %43593 = vmatpush3.bf16.msra.mxu0 %v43592_v48  ;;  %43629 = vmatpush3.bf16.msra.mxu1 %v52701_v57  ;;  %v30702_v8 = vld [vmem:[%s53415_s9 + $0x38] sm:$0xff] }
 0xa74   : > { %43594 = vmatprep.subr.bf16.mxu0 %v44856_v5  ;;  %43630 = vmatprep.subr.bf16.mxu1 %v44856_v5  ;;  %v28386_v63 = vadd.f32 %v28385_v36, %v28305_v13  ;;  %v30731_v36 = vand.u32 4294901760, %v30700_v47  ;;  %v30701_v13 = vld [vmem:[%s53415_s9 + $0x30] sm:$0xff] }
 0xa75   : > { %40069 = vmatprep.mubr.msk.f32.mxu1 %vm44857_vm9, %v53781_v25 }
 0xa76   : > { %v52859_v20 = vpack.c.bf16 %v30731_v36, %v30728_v29 }
 0xa77   : > { %43596 = vmatpush3.bf16.msra.mxu0 %v43595_v42  ;;  %43632 = vmatpush3.bf16.msra.mxu1 %v52718_v16  ;;  %v30734_v42 = vand.u32 4294901760, %v30701_v13 }
 0xa78   : > { %43612 = vmatprep.subr.bf16.mxu0 %v44856_v5  ;;  %43633 = vmatprep.subr.bf16.mxu1 %v44856_v5 }
 0xa7a   : > { %40001 = vmatmul.mubr.f32.vlgmr.msra.gmra.mrb[36].mxu0 %v30204_v7 }
 0xa7b   : > { %43614 = vmatpush3.bf16.msra.mxu0 %v43613_v10  ;;  %43635 = vmatpush3.bf16.msra.mxu1 %v52731_v18  ;;  %v30698_v18 = vld [vmem:[%s53415_s9 + $0x18] sm:$0xff] }
 0xa7c   : > { %43615 = vmatprep.subr.bf16.mxu0 %v44856_v5  ;;  %43636 = vmatprep.subr.bf16.mxu1 %v44856_v5  ;;  %v30725_v7 = vand.u32 4294901760, %v30698_v18 }
 0xa7d   : > { %v28594_v58 = vpop.f32.mrb[18].mxu1  ;;  %40046 = vmatprep.mubr.msk.f32.mxu0 %vm44857_vm9, %v53781_v25 }
 0xa7e   : > { %v39565_v0 = vpop.f32.mrb[19].mxu1  ;;  %v52845_v60 = vsub.f32 %v30698_v18, %v30725_v7  ;;  %v30823_v18 = vsub.f32 %v52843_v19, %v30822_v37 }
 0xa7f   : > { %43617 = vmatpush3.bf16.msra.mxu0 %v43616_v9  ;;  %43638 = vmatpush3.bf16.msra.mxu1 %v52741_v2  ;;  %v30703_v0 = vld [vmem:[%s53415_s9 + $0x40] sm:$0xff] }
 0xa80   : > { %43618 = vmatprep.subr.bf16.mxu0 %v44856_v5  ;;  %43639 = vmatprep.subr.bf16.mxu1 %v44856_v5 }
 0xa83   : > { %43620 = vmatpush3.bf16.msra.mxu0 %v43619_v44  ;;  %43641 = vmatpush3.bf16.msra.mxu1 %v43565_v32  ;;  %v52848_v32 = vpack.c.bf16 %v30725_v7, %v30722_v43  ;;  %v30704_v44 = vld [vmem:[%s53415_s9 + $0x48] sm:$0xff] }
 0xa84   : > { %43621 = vmatprep.subr.bf16.mxu0 %v44856_v5  ;;  %43768 = vmatprep.subr.bf16.mxu1 %v44856_v5 }
 0xa85   : > { %v28473_v56 = vpop.f32.mrb[16].mxu0 }
 0xa86   : > { %v28474_v52 = vadd.f32 %v28473_v56, %v28386_v63  ;;  %v39542_v49 = vpop.f32.mrb[17].mxu0  ;;  %40070 = vmatmul.mubr.f32.vlgmr.msra.gmra.mrb[40].mxu1 %v52722_v54  ;;  %v30737_v63 = vand.u32 4294901760, %v30702_v8  ;;  %v52881_v56 = vsub.f32 %v30700_v47, %v30731_v36 }
 0xa87   : > { %43623 = vmatpush3.bf16.msra.mxu0 %v43622_v31  ;;  %40292 = vmatprep.mubr.msk.f32.mxu1 %vm44857_vm9, %v53781_v25  ;;  %v52879_v31 = vsub.f32 %v30699_v12, %v30728_v29  ;;  %v30824_v12 = vand.u32 4294901760, %v30823_v18 }
 0xa88   : > { %43624 = vmatprep.subr.bf16.mxu0 %v44856_v5  ;;  %v28595_v35 = vadd.f32 %v28594_v58, %v28474_v52  ;;  %v52869_v9 = vpack.c.bf16 %v30737_v63, %v30734_v42  ;;  %v52884_v52 = vsub.f32 %v30701_v13, %v30734_v42  ;;  %v52886_v49 = vsub.f32 %v30702_v8, %v30737_v63 }
 0xa89   : > { %v30836_v29 = vand.u32 4294901760, %v52879_v31 }
 0xa8a   : > { %v53576_v63 = vand.u32 4294901760, %v52884_v52 }
 0xa8b   : > { %43626 = vmatpush3.bf16.msra.mxu0 %v43625_v61  ;;  %v30705_v61 = vld [vmem:[%s53415_s9 + $0x50] sm:$0xff]  ;;  %v30837_v13 = vsub.f32 %v52879_v31, %v30836_v29 }
 0xa8c   : > { %43642 = vmatprep.subr.bf16.mxu0 %v44856_v5 }
 0xa8d   : > { %v30838_v42 = vand.u32 4294901760, %v30837_v13 }
 0xa8e   : > { %40047 = vmatmul.mubr.f32.vlgmr.msra.gmra.mrb[38].mxu0 %v52722_v54  ;;  %v30716_v54 = vand.u32 4294901760, %v30695_v51 }
 0xa8f   : > { %40102 = vmatprep.mubr.msk.f32.mxu0 %vm44857_vm9, %v53781_v25 }
 0xa90   : > { %v52837_v2 = vpack.c.bf16 %v30719_v41, %v30716_v54  ;;  %v52839_v6 = vsub.f32 %v30695_v51, %v30716_v54  ;;  %v30829_v54 = vand.u32 4294901760, %v52845_v60 }
 0xa91   : > { %v28769_v38 = vpop.f32.mrb[20].mxu1 }
 0xa92   : > { %v39611_v50 = vpop.f32.mrb[21].mxu1  ;;  %43644 = vmatpush3.bf16.msra.mxu0 %v52837_v2  ;;  %v30830_v43 = vsub.f32 %v52845_v60, %v30829_v54 }
 0xa93   : > { %43645 = vmatprep.subr.bf16.mxu0 %v44856_v5  ;;  %v30740_v50 = vand.u32 4294901760, %v30703_v0 }
 0xa94   : > { %v30831_v47 = vand.u32 4294901760, %v30830_v43 }
 0xa96   : > { %43647 = vmatpush3.bf16.msra.mxu0 %v52848_v32 }
 0xa97   : > { %43648 = vmatprep.subr.bf16.mxu0 %v44856_v5 }
 0xa99   : > { %v28686_v21 = vpop.f32.mrb[18].mxu0 }
 0xa9a   : > { %v28687_v59 = vadd.f32 %v28686_v21, %v28595_v35  ;;  %v39588_v53 = vpop.f32.mrb[19].mxu0  ;;  %43650 = vmatpush3.bf16.msra.mxu0 %v52859_v20  ;;  %v30706_v35 = vld [vmem:[%s53415_s9 + $0x58] sm:$0xff]  ;;  %v30743_v21 = vand.u32 4294901760, %v30704_v44 }
 0xa9b   : > { %43651 = vmatprep.subr.bf16.mxu0 %v44856_v5  ;;  %v30749_v53 = vand.u32 4294901760, %v30706_v35 }
 0xa9c   : > { %v28770_v17 = vadd.f32 %v28769_v38, %v28687_v59  ;;  %v30707_v38 = vld [vmem:[%s53415_s9 + $0x60] sm:$0xff]  ;;  %v30746_v59 = vand.u32 4294901760, %v30705_v61 }
 0xa9e   : > { %43653 = vmatpush3.bf16.msra.mxu0 %v52869_v9 }
 0xa9f   : > { %43654 = vmatprep.subr.bf16.mxu0 %v44856_v5 }
 0xaa5   : > { %v28951_v24 = vpop.f32.mrb[22].mxu1 }
 0xaa6   : > { %v39657_v23 = vpop.f32.mrb[23].mxu1 }
 0xaa7   : > { %v52901_v23 = vpack.c.bf16 %v30743_v21, %v30740_v50 }
 0xaa9   : > { %43656 = vmatpush3.bf16.msra.mxu0 %v52901_v23 }
 0xaaa   : > { %43657 = vmatprep.subr.bf16.mxu0 %v44856_v5 }
 0xaad   : > { %v28870_v33 = vpop.f32.mrb[20].mxu0 }
 0xaae   : > { %v28871_v4 = vadd.f32 %v28870_v33, %v28770_v17  ;;  %v39634_v28 = vpop.f32.mrb[21].mxu0  ;;  %v30708_v17 = vld [vmem:[%s53415_s9 + $0x68] sm:$0xff]  ;;  %v52903_v33 = vsub.f32 %v30703_v0, %v30740_v50 }
 0xaaf   : > { %v30755_v28 = vand.u32 4294901760, %v30708_v17 }
 0xab0   : > { %v28952_v62 = vadd.f32 %v28951_v24, %v28871_v4  ;;  %v30752_v24 = vand.u32 4294901760, %v30707_v38  ;;  %v52905_v4 = vsub.f32 %v30704_v44, %v30743_v21  ;;  %v30851_v44 = vsub.f32 %v52884_v52, %v53576_v63 }
 0xab1   : > { %v53574_v21 = vand.u32 4294901760, %v52903_v33 }
 0xab9   : > { %v29172_v55 = vpop.f32.mrb[24].mxu1 }
 0xaba   : > { %v39703_v57 = vpop.f32.mrb[25].mxu1 }
 0xabb   : > { %v52911_v57 = vsub.f32 %v30707_v38, %v30752_v24  ;;  %v30852_v38 = vand.u32 4294901760, %v30851_v44 }
 0xac1   : > { %v29051_v26 = vpop.f32.mrb[22].mxu0 }
 0xac2   : > { %v29173_v40 = vadd.f32 %v29172_v55, %v29051_v26  ;;  %v39680_v34 = vpop.f32.mrb[23].mxu0  ;;  %v52909_v55 = vsub.f32 %v30706_v35, %v30749_v53  ;;  %v52914_v26 = vpack.c.bf16 %v30749_v53, %v30746_v59 }
 0xac4   : > { %43659 = vmatpush3.bf16.msra.mxu0 %v52914_v26 }
 0xac5   : > { %43660 = vmatprep.subr.bf16.mxu0 %v44856_v5 }
 0xacd   : > { %v29347_v15 = vpop.f32.mrb[26].mxu1 }
 0xace   : > { %v39749_v1 = vpop.f32.mrb[27].mxu1 }
 0xacf   : > { %v30808_v1 = vand.u32 4294901760, %v52839_v6 }
 0xad5   : > { %v29264_v14 = vpop.f32.mrb[24].mxu0 }
 0xad6   : > { %v29265_v30 = vadd.f32 %v29264_v14, %v29173_v40  ;;  %v39726_v16 = vpop.f32.mrb[25].mxu0  ;;  %v52916_v40 = vsub.f32 %v30708_v17, %v30755_v28  ;;  %v30815_v14 = vand.u32 4294901760, %v52841_v22  ;;  %v30865_v17 = vsub.f32 %v52903_v33, %v53574_v21 }
 0xad7   : > { %v52928_v16 = vld [vmem:[%s53415_s9 + $0x70] sm:$0xff] }
 0xad8   : > { %v29348_v3 = vadd.f32 %v29347_v15, %v29265_v30  ;;  %v52922_v30 = vpack.c.bf16 %v30755_v28, %v30752_v24  ;;  %v30816_v51 = vsub.f32 %v52841_v22, %v30815_v14  ;;  %v52946_v7 = vand.u32 4294901760, %v52928_v16 }
 0xada   : > { %v30817_v39 = vand.u32 4294901760, %v30816_v51  ;;  %43662 = vmatpush3.bf16.msra.mxu0 %v52922_v30  ;;  %v53571_v51 = vand.u32 4294901760, %v52909_v55 }
 0xadb   : > { %40100 = vmatprep.subr.mxu0 %v53781_v25 }
 0xadc   : > { %v30886_v43 = vsub.f32 %v52909_v55, %v53571_v51 }
 0xade   : > { %40101 = vmatpush3.msra.mxu0 %v52946_v7 }
 0xadf   : > { %43663 = vmatprep.subr.bf16.mxu0 %v44856_v5 }
 0xae1   : > { %v29529_v45 = vpop.f32.mrb[28].mxu1 }
 0xae2   : > { %v39795_v27 = vpop.f32.mrb[29].mxu1 }
 0xae9   : > { %v29448_v11 = vpop.f32.mrb[26].mxu0 }
 0xaea   : > { %v29449_v48 = vadd.f32 %v29448_v11, %v29348_v3  ;;  %v39772_v46 = vpop.f32.mrb[27].mxu0  ;;  %v30809_v3 = vsub.f32 %v52839_v6, %v30808_v1 }
 0xaeb   : > { %v52953_v46 = vpack.c.bf16 %v30831_v47, %v30824_v12  ;;  %v30887_v12 = vand.u32 4294901760, %v30886_v43  ;;  %v53570_v47 = vand.u32 4294901760, %v52911_v57 }
 0xaec   : > { %v29530_v10 = vadd.f32 %v29529_v45, %v29449_v48  ;;  %v30810_v41 = vand.u32 4294901760, %v30809_v3  ;;  %v53577_v48 = vand.u32 4294901760, %v52881_v56 }
 0xaee   : > { %v52871_v58 = vadd.f32 %v29530_v10, %v28952_v62  ;;  %v52907_v62 = vsub.f32 %v30705_v61, %v30746_v59  ;;  %v52949_v27 = vpack.c.bf16 %v30817_v39, %v30810_v41  ;;  %v30844_v8 = vsub.f32 %v52881_v56, %v53577_v48 }
 0xaef   : > { %v53575_v10 = vand.u32 4294901760, %v52886_v49  ;;  %v53573_v59 = vand.u32 4294901760, %v52905_v4 }
 0xaf0   : > { %v30845_v0 = vand.u32 4294901760, %v30844_v8  ;;  %v53572_v3 = vand.u32 4294901760, %v52907_v62  ;;  %v30893_v8 = vsub.f32 %v52911_v57, %v53570_v47 }
 0xaf1   : > { %v30858_v61 = vsub.f32 %v52886_v49, %v53575_v10  ;;  %v30872_v24 = vsub.f32 %v52905_v4, %v53573_v59 }
 0xaf2   : > { %v52971_v35 = vpack.c.bf16 %v30845_v0, %v30838_v42  ;;  %v30879_v18 = vsub.f32 %v52907_v62, %v53572_v3  ;;  %v30894_v44 = vand.u32 4294901760, %v30893_v8 }
 0xaf3   : > { %v30859_v50 = vand.u32 4294901760, %v30858_v61 }
 0xaf5   : > { %v29751_v34 = vpop.f32.mrb[30].mxu1  ;;  %v52975_v53 = vpack.c.bf16 %v30859_v50, %v30852_v38 }
 0xaf6   : > { %v39841_v15 = vpop.f32.mrb[31].mxu1 }
 0xaf7   : > { %v30873_v15 = vand.u32 4294901760, %v30872_v24 }
 0xafd   : > { %v29630_v45 = vpop.f32.mrb[28].mxu0 }
 0xafe   : > { %v29752_v36 = vadd.f32 %v29751_v34, %v29630_v45  ;;  %v39818_v11 = vpop.f32.mrb[29].mxu0  ;;  %v30866_v34 = vand.u32 4294901760, %v30865_v17  ;;  %v30880_v45 = vand.u32 4294901760, %v30879_v18 }
 0xaff   : > { %v53569_v11 = vand.u32 4294901760, %v52916_v40 }
 0xb00   : > { %v52985_v39 = vpack.c.bf16 %v30873_v15, %v30866_v34  ;;  %v52995_v13 = vpack.c.bf16 %v30887_v12, %v30880_v45  ;;  %v43685_v34 = vpack.c.bf16 %v52841_v22, %v52839_v6  ;;  %v43688_v15 = vpack.c.bf16 %v52845_v60, %v52843_v19 }
 0xb01   : > { %v30900_v42 = vsub.f32 %v52916_v40, %v53569_v11  ;;  %v43694_v45 = vpack.c.bf16 %v52886_v49, %v52884_v52  ;;  %v53786_v6 = vand.u32 4294901760, %v52881_v56  ;;  %v53788_v19 = vand.u32 4294901760, %v52886_v49 }
 0xb02   : > { %v53794_v49 = vand.u32 4294901760, %v52916_v40 }
 0xb03   : > { %v30901_v61 = vand.u32 4294901760, %v30900_v42  ;;  %v43700_v42 = vpack.c.bf16 %v52909_v55, %v52907_v62  ;;  %v43733_v22 = vpack.c.bf16 %v53786_v6, %v30836_v29 }
 0xb05   : > { %v53003_v17 = vpack.c.bf16 %v30901_v61, %v30894_v44  ;;  %v43703_v61 = vpack.c.bf16 %v52916_v40, %v52911_v57 }
 0xb09   : > { %v29926_v28 = vpop.f32.mrb[32].mxu1 }
 0xb0a   : > { %v39887_v41 = vpop.f32.mrb[33].mxu1 }
 0xb0b   : > { %v43691_v41 = vpack.c.bf16 %v52881_v56, %v52879_v31  ;;  %v53791_v31 = vand.u32 4294901760, %v52907_v62  ;;  %v53792_v56 = vand.u32 4294901760, %v52909_v55  ;;  %v31350_v62 = vld [vmem:[%s53417_s11 + $0x30] sm:$0xff]  ;;  %v31351_v55 = vld [vmem:[%s53417_s11 + $0x38] sm:$0xff] }
 0xb0c   : > { %v31384_v40 = vand.u32 4294901760, %v31351_v55 }
 0xb0d   : > { %v43742_v29 = vpack.c.bf16 %v53792_v56, %v53791_v31 }
 0xb11   : > { %v29843_v0 = vpop.f32.mrb[30].mxu0 }
 0xb12   : > { %v29844_v38 = vadd.f32 %v29843_v0, %v29752_v36  ;;  %v39864_v50 = vpop.f32.mrb[31].mxu0  ;;  %v43697_v36 = vpack.c.bf16 %v52905_v4, %v52903_v33 }
 0xb14   : > { %v29927_v24 = vadd.f32 %v29926_v28, %v29844_v38 }
 0xb1d   : > { %v30108_v18 = vpop.f32.mrb[34].mxu1 }
 0xb1e   : > { %v39933_v43 = vpop.f32.mrb[35].mxu1 }
 0xb25   : > { %v30027_v12 = vpop.f32.mrb[32].mxu0 }
 0xb26   : > { %v30028_v8 = vadd.f32 %v30027_v12, %v29927_v24  ;;  %v39910_v28 = vpop.f32.mrb[33].mxu0 }
 0xb28   : > { %v30109_v0 = vadd.f32 %v30108_v18, %v30028_v8 }
 0xb2a   : > { %v30112_v44 = vadd.f32 %v30109_v0, %v52871_v58  ;;  %v30692_v0 = vld [vmem:[%s53414_s8] sm:$0x1] }
 0xb31   : > { %v30330_v38 = vpop.f32.mrb[36].mxu1 }
 0xb32   : > { %v39979_v50 = vpop.f32.mrb[37].mxu1 }
 0xb39   : > { %v30209_v43 = vpop.f32.mrb[34].mxu0 }
 0xb3a   : > { %v30331_v11 = vadd.f32 %v30330_v38, %v30209_v43  ;;  %v39956_v47 = vpop.f32.mrb[35].mxu0 }
 0xb45   : > { %v30505_v51 = vpop.f32.mrb[38].mxu1 }
 0xb46   : > { %v40025_v3 = vpop.f32.mrb[39].mxu1 }
 0xb4d   : > { %v30422_v59 = vpop.f32.mrb[36].mxu0 }
 0xb4e   : > { %v30423_v21 = vadd.f32 %v30422_v59, %v30331_v11  ;;  %v40002_v24 = vpop.f32.mrb[37].mxu0  ;;  %v31347_v11 = vld [vmem:[%s53417_s11 + $0x18] sm:$0xff] }
 0xb4f   : > { %v31372_v43 = vand.u32 4294901760, %v31347_v11 }
 0xb50   : > { %v30506_v12 = vadd.f32 %v30505_v51, %v30423_v21 }
 0xb59   : > { %v30687_v28 = vpop.f32.mrb[40].mxu1 }
 0xb5a   : > { %v40071_v10 = vpop.f32.mrb[41].mxu1 }
 0xb61   : > { %v30606_v63 = vpop.f32.mrb[38].mxu0 }
 0xb62   : > { %v30607_v18 = vadd.f32 %v30606_v63, %v30506_v12  ;;  %v40048_v8 = vpop.f32.mrb[39].mxu0 }
 0xb63   : > { %v53076_v8 = vsub.f32 %v31347_v11, %v31372_v43 }
 0xb64   : > { %v30688_v58 = vadd.f32 %v30687_v28, %v30607_v18 }
 0xb66   : > { %v30691_v50 = vadd.f32 %v30688_v58, %v30112_v44 }
 0xb68   : > { %v30693_v48 = vadd.f32 %v30692_v0, %v30691_v50  ;;  %v31354_v0 = vld [vmem:[%s53417_s11 + $0x50] sm:$0xf] }
 0xb6a   : > { %v30694_v47 = vmax.f32 %v30693_v48, 0.0  ;;  %v53042_v48 = vsub.f32 %v52928_v16, %v52946_v7  ;;  %v31344_v16 = vld [vmem:[%s53417_s11] sm:$0xff] }
 0xb6b   : > { %v31363_v51 = vand.u32 4294901760, %v31344_v16 }
 0xb6c   : > { %v30713_v38 = vsel %vm30711_vm14, %v30694_v47, 0 }
 0xb6d   : > { %v53023_v3 = vand.u32 4294901760, %v30713_v38  ;;  %v53069_v12 = vsub.f32 %v31344_v16, %v31363_v51 }
 0xb6f   : > { %v53026_v59 = vsub.f32 %v30713_v38, %v53023_v3  ;;  %v53242_v38 = vsel %vm19385_vm6, %v31354_v0, 0 }
 0xb71   : > { %v30797_v10 = vand.u32 4294901760, %v53026_v59 }
 0xb73   : > { %v30798_v63 = vsub.f32 %v53026_v59, %v30797_v10 }
 0xb75   : > { %v30799_v21 = vand.u32 4294901760, %v30798_v63 }
 0xb77   : > { %40103 = vmatmul.mubr.f32.vlgmr.msra.gmra.mrb[40].mxu0 %v30799_v21 }
 0xb78   : > { %43665 = vmatpush3.bf16.msra.mxu0 %v52949_v27  ;;  %40135 = vmatprep.mubr.msk.f32.mxu0 %vm44857_vm9, %v53781_v25  ;;  %v30906_v27 = vand.u32 4294901760, %v53042_v48 }
 0xb79   : > { %43666 = vmatprep.subr.bf16.mxu0 %v44856_v5 }
 0xb7c   : > { %43668 = vmatpush3.bf16.msra.mxu0 %v52953_v46  ;;  %v30907_v46 = vsub.f32 %v53042_v48, %v30906_v27 }
 0xb7d   : > { %43669 = vmatprep.subr.bf16.mxu0 %v44856_v5 }
 0xb7e   : > { %v30908_v44 = vand.u32 4294901760, %v30907_v46 }
 0xb80   : > { %43671 = vmatpush3.bf16.msra.mxu0 %v52971_v35  ;;  %v31345_v35 = vld [vmem:[%s53417_s11 + $0x8] sm:$0xff] }
 0xb81   : > { %43672 = vmatprep.subr.bf16.mxu0 %v44856_v5 }
 0xb84   : > { %43674 = vmatpush3.bf16.msra.mxu0 %v52975_v53  ;;  %v31346_v53 = vld [vmem:[%s53417_s11 + $0x10] sm:$0xff] }
 0xb85   : > { %43675 = vmatprep.subr.bf16.mxu0 %v44856_v5 }
 0xb88   : > { %43677 = vmatpush3.bf16.msra.mxu0 %v52985_v39  ;;  %v31366_v39 = vand.u32 4294901760, %v31345_v35 }
 0xb89   : > { %43678 = vmatprep.subr.bf16.mxu0 %v44856_v5 }
 0xb8a   : > { %v53067_v24 = vpack.c.bf16 %v31366_v39, %v31363_v51  ;;  %v53071_v28 = vsub.f32 %v31345_v35, %v31366_v39 }
 0xb8c   : > { %43680 = vmatpush3.bf16.msra.mxu0 %v52995_v13  ;;  %v31369_v13 = vand.u32 4294901760, %v31346_v53  ;;  %43770 = vmatpush3.bf16.msra.mxu1 %v53067_v24 }
 0xb8d   : > { %43681 = vmatprep.subr.bf16.mxu0 %v44856_v5  ;;  %43771 = vmatprep.subr.bf16.mxu1 %v44856_v5 }
 0xb8e   : > { %v53073_v18 = vsub.f32 %v31346_v53, %v31369_v13  ;;  %v53080_v58 = vpack.c.bf16 %v31372_v43, %v31369_v13 }
 0xb90   : > { %43683 = vmatpush3.bf16.msra.mxu0 %v53003_v17  ;;  %43773 = vmatpush3.bf16.msra.mxu1 %v53080_v58  ;;  %v43727_v17 = vpack.c.bf16 %v30815_v14, %v30808_v1  ;;  %v53787_v1 = vand.u32 4294901760, %v52884_v52  ;;  %v53789_v14 = vand.u32 4294901760, %v52903_v33  ;;  %v53793_v52 = vand.u32 4294901760, %v52911_v57  ;;  %v31352_v57 = vld [vmem:[%s53417_s11 + $0x40] sm:$0xff] }
 0xb91   : > { %40133 = vmatprep.subr.mxu0 %v53781_v25  ;;  %43774 = vmatprep.subr.bf16.mxu1 %v44856_v5  ;;  %v31465_v21 = vand.u32 4294901760, %v53073_v18 }
 0xb92   : > { %v43736_v60 = vpack.c.bf16 %v53788_v19, %v53787_v1 }
 0xb93   : > { %v31466_v35 = vsub.f32 %v53073_v18, %v31465_v21 }
 0xb94   : > { %40134 = vmatpush3.msra.mxu0 %v30908_v44 }
 0xb95   : > { %40136 = vmatmul.mubr.f32.vlgmr.msra.gmra.mrb[40].mxu0 %v53023_v3  ;;  %43684 = vmatprep.subr.bf16.mxu0 %v44856_v5  ;;  %v31467_v39 = vand.u32 4294901760, %v31466_v35 }
 0xb96   : > { %43686 = vmatpush3.bf16.msra.mxu0 %v43685_v34  ;;  %40168 = vmatprep.mubr.msk.f32.mxu0 %vm44857_vm9, %v53781_v25  ;;  %v43730_v34 = vpack.c.bf16 %v30829_v54, %v30822_v37  ;;  %v53790_v37 = vand.u32 4294901760, %v52905_v4 }
 0xb97   : > { %43687 = vmatprep.subr.bf16.mxu0 %v44856_v5 }
 0xb98   : > { %v43739_v54 = vpack.c.bf16 %v53790_v37, %v53789_v14 }
 0xb9a   : > { %43689 = vmatpush3.bf16.msra.mxu0 %v43688_v15  ;;  %v43745_v15 = vpack.c.bf16 %v53794_v49, %v53793_v52 }
 0xb9b   : > { %43690 = vmatprep.subr.bf16.mxu0 %v44856_v5 }
 0xb9e   : > { %43692 = vmatpush3.bf16.msra.mxu0 %v43691_v41 }
 0xb9f   : > { %43693 = vmatprep.subr.bf16.mxu0 %v44856_v5 }
 0xba2   : > { %43695 = vmatpush3.bf16.msra.mxu0 %v43694_v45 }
 0xba3   : > { %43696 = vmatprep.subr.bf16.mxu0 %v44856_v5 }
 0xba6   : > { %43698 = vmatpush3.bf16.msra.mxu0 %v43697_v36 }
 0xba7   : > { %43699 = vmatprep.subr.bf16.mxu0 %v44856_v5 }
 0xbaa   : > { %43701 = vmatpush3.bf16.msra.mxu0 %v43700_v42  ;;  %v53228_v42 = vsub.f32 %v31351_v55, %v31384_v40 }
 0xbab   : > { %43702 = vmatprep.subr.bf16.mxu0 %v44856_v5 }
 0xbac   : > { %v31500_v1 = vand.u32 4294901760, %v53228_v42 }
 0xbae   : > { %43704 = vmatpush3.bf16.msra.mxu0 %v43703_v61  ;;  %v31501_v14 = vsub.f32 %v53228_v42, %v31500_v1 }
 0xbaf   : > { %40166 = vmatprep.subr.mxu0 %v53781_v25 }
 0xbb0   : > { %v31502_v31 = vand.u32 4294901760, %v31501_v14 }
 0xbb2   : > { %40167 = vmatpush3.msra.mxu0 %v53042_v48  ;;  %v31472_v48 = vand.u32 4294901760, %v53076_v8 }
 0xbb3   : > { %40169 = vmatmul.mubr.f32.vlgmr.msra.gmra.mrb[40].mxu0 %v53026_v59  ;;  %43705 = vmatprep.subr.bf16.mxu0 %v44856_v5  ;;  %v31458_v59 = vand.u32 4294901760, %v53071_v28 }
 0xbb4   : > { %43707 = vmatpush3.bf16.msra.mxu0 %v52837_v2  ;;  %40201 = vmatprep.mubr.msk.f32.mxu0 %vm44857_vm9, %v53781_v25  ;;  %v31473_v53 = vsub.f32 %v53076_v8, %v31472_v48 }
 0xbb5   : > { %43708 = vmatprep.subr.bf16.mxu0 %v44856_v5  ;;  %v31459_v63 = vsub.f32 %v53071_v28, %v31458_v59 }
 0xbb6   : > { %v31474_v11 = vand.u32 4294901760, %v31473_v53 }
 0xbb7   : > { %v31460_v16 = vand.u32 4294901760, %v31459_v63 }
 0xbb8   : > { %43710 = vmatpush3.bf16.msra.mxu0 %v52848_v32  ;;  %v43787_v43 = vpack.c.bf16 %v31474_v11, %v31467_v39 }
 0xbb9   : > { %43711 = vmatprep.subr.bf16.mxu0 %v44856_v5 }
 0xbbc   : > { %43713 = vmatpush3.bf16.msra.mxu0 %v52859_v20 }
 0xbbd   : > { %43714 = vmatprep.subr.bf16.mxu0 %v44856_v5 }
 0xbc0   : > { %43716 = vmatpush3.bf16.msra.mxu0 %v52869_v9 }
 0xbc1   : > { %43717 = vmatprep.subr.bf16.mxu0 %v44856_v5 }
 0xbc4   : > { %43719 = vmatpush3.bf16.msra.mxu0 %v52901_v23 }
 0xbc5   : > { %43720 = vmatprep.subr.bf16.mxu0 %v44856_v5 }
 0xbc8   : > { %43722 = vmatpush3.bf16.msra.mxu0 %v52914_v26 }
 0xbc9   : > { %43723 = vmatprep.subr.bf16.mxu0 %v44856_v5 }
 0xbcc   : > { %43725 = vmatpush3.bf16.msra.mxu0 %v52922_v30 }
 0xbcd   : > { %40199 = vmatprep.subr.mxu0 %v53781_v25 }
 0xbd0   : > { %40200 = vmatpush3.msra.mxu0 %v52946_v7 }
 0xbd1   : > { %40202 = vmatmul.mubr.f32.vlgmr.msra.gmra.mrb[40].mxu0 %v30797_v10  ;;  %43726 = vmatprep.subr.bf16.mxu0 %v44856_v5 }
 0xbd2   : > { %43728 = vmatpush3.bf16.msra.mxu0 %v43727_v17  ;;  %40234 = vmatprep.mubr.msk.f32.mxu0 %vm44857_vm9, %v53781_v25 }
 0xbd3   : > { %43729 = vmatprep.subr.bf16.mxu0 %v44856_v5 }
 0xbd6   : > { %43731 = vmatpush3.bf16.msra.mxu0 %v43730_v34 }
 0xbd7   : > { %43732 = vmatprep.subr.bf16.mxu0 %v44856_v5 }
 0xbda   : > { %43734 = vmatpush3.bf16.msra.mxu0 %v43733_v22 }
 0xbdb   : > { %43735 = vmatprep.subr.bf16.mxu0 %v44856_v5 }
 0xbde   : > { %43737 = vmatpush3.bf16.msra.mxu0 %v43736_v60 }
 0xbdf   : > { %43738 = vmatprep.subr.bf16.mxu0 %v44856_v5 }
 0xbe2   : > { %43740 = vmatpush3.bf16.msra.mxu0 %v43739_v54 }
 0xbe3   : > { %43741 = vmatprep.subr.bf16.mxu0 %v44856_v5 }
 0xbe6   : > { %43743 = vmatpush3.bf16.msra.mxu0 %v43742_v29 }
 0xbe7   : > { %43744 = vmatprep.subr.bf16.mxu0 %v44856_v5 }
 0xbea   : > { %43746 = vmatpush3.bf16.msra.mxu0 %v43745_v15 }
 0xbeb   : > { %40232 = vmatprep.subr.mxu0 %v53781_v25 }
 0xbee   : > { %40233 = vmatpush3.msra.mxu0 %v30906_v27  ;;  %v53252_v27 = vand.u32 4294901760, %v53242_v38 }
 0xbef   : > { %40235 = vmatmul.mubr.f32.vlgmr.msra.gmra.mrb[40].mxu0 %v53023_v3  ;;  %43747 = vmatprep.subr.bf16.mxu0 %v44856_v5 }
 0xbf0   : > { %43749 = vmatpush3.bf16.msra.mxu0 %v52837_v2  ;;  %40267 = vmatprep.mubr.msk.f32.mxu0 %vm44857_vm9, %v53781_v25  ;;  %v31348_v2 = vld [vmem:[%s53417_s11 + $0x20] sm:$0xff] }
 0xbf1   : > { %43750 = vmatprep.subr.bf16.mxu0 %v44856_v5 }
 0xbf4   : > { %43752 = vmatpush3.bf16.msra.mxu0 %v52848_v32  ;;  %v31349_v32 = vld [vmem:[%s53417_s11 + $0x28] sm:$0xff] }
 0xbf5   : > { %43753 = vmatprep.subr.bf16.mxu0 %v44856_v5 }
 0xbf8   : > { %43755 = vmatpush3.bf16.msra.mxu0 %v52859_v20  ;;  %v31375_v20 = vand.u32 4294901760, %v31348_v2 }
 0xbf9   : > { %43756 = vmatprep.subr.bf16.mxu0 %v44856_v5 }
 0xbfa   : > { %v53206_v33 = vsub.f32 %v31348_v2, %v31375_v20 }
 0xbfc   : > { %43758 = vmatpush3.bf16.msra.mxu0 %v52869_v9  ;;  %v31378_v9 = vand.u32 4294901760, %v31349_v32  ;;  %v31479_v13 = vand.u32 4294901760, %v53206_v33 }
 0xbfd   : > { %43759 = vmatprep.subr.bf16.mxu0 %v44856_v5 }
 0xbfe   : > { %v53208_v4 = vsub.f32 %v31349_v32, %v31378_v9  ;;  %v31480_v17 = vsub.f32 %v53206_v33, %v31479_v13 }
 0xc00   : > { %43761 = vmatpush3.bf16.msra.mxu0 %v52901_v23  ;;  %v53204_v23 = vpack.c.bf16 %v31378_v9, %v31375_v20  ;;  %v31486_v44 = vand.u32 4294901760, %v53208_v4  ;;  %v31481_v6 = vand.u32 4294901760, %v31480_v17  ;;  %v43799_v9 = vpack.c.bf16 %v53071_v28, %v53069_v12  ;;  %v30710_v28 = vld [vmem:[%s53416_s10] sm:$0x1] }
 0xc01   : > { %43762 = vmatprep.subr.bf16.mxu0 %v44856_v5  ;;  %v43805_v55 = vpack.c.bf16 %v53208_v4, %v53206_v33 }
 0xc02   : > { %43776 = vmatpush3.bf16.msra.mxu1 %v53204_v23  ;;  %v31487_v34 = vsub.f32 %v53208_v4, %v31486_v44 }
 0xc03   : > { %43777 = vmatprep.subr.bf16.mxu1 %v44856_v5 }
 0xc04   : > { %43764 = vmatpush3.bf16.msra.mxu0 %v52914_v26  ;;  %v31381_v26 = vand.u32 4294901760, %v31350_v62  ;;  %v31488_v19 = vand.u32 4294901760, %v31487_v34 }
 0xc05   : > { %43765 = vmatprep.subr.bf16.mxu0 %v44856_v5 }
 0xc06   : > { %v53224_v45 = vpack.c.bf16 %v31384_v40, %v31381_v26  ;;  %v53226_v36 = vsub.f32 %v31350_v62, %v31381_v26  ;;  %v43790_v37 = vpack.c.bf16 %v31488_v19, %v31481_v6  ;;  %v43802_v62 = vpack.c.bf16 %v53076_v8, %v53073_v18 }
 0xc08   : > { %43767 = vmatpush3.bf16.msra.mxu0 %v52922_v30  ;;  %v31353_v30 = vld [vmem:[%s53417_s11 + $0x48] sm:$0xff]  ;;  %43779 = vmatpush3.bf16.msra.mxu1 %v53224_v45  ;;  %v31493_v22 = vand.u32 4294901760, %v53226_v36 }
 0xc09   : > { %40265 = vmatprep.subr.mxu0 %v53781_v25  ;;  %v31390_v41 = vand.u32 4294901760, %v31353_v30  ;;  %43780 = vmatprep.subr.bf16.mxu1 %v44856_v5 }
 0xc0a   : > { %v31494_v60 = vsub.f32 %v53226_v36, %v31493_v22 }
 0xc0b   : > { %v53235_v50 = vsub.f32 %v31353_v30, %v31390_v41  ;;  %v53281_v30 = vpack.c.bf16 %v31472_v48, %v31465_v21 }
 0xc0c   : > { %40266 = vmatpush3.msra.mxu0 %v52946_v7  ;;  %v31387_v7 = vand.u32 4294901760, %v31352_v57  ;;  %v31495_v54 = vand.u32 4294901760, %v31494_v60 }
 0xc0d   : > { %40268 = vmatmul.mubr.f32.vlgmr.msra.gmra.mrb[40].mxu0 %v53023_v3  ;;  %v31451_v3 = vand.u32 4294901760, %v53069_v12  ;;  %v31514_v29 = vand.u32 4294901760, %v53235_v50 }
 0xc0e   : > { %v53230_v61 = vsub.f32 %v31352_v57, %v31387_v7  ;;  %v53238_v47 = vpack.c.bf16 %v31390_v41, %v31387_v7  ;;  %v43793_v52 = vpack.c.bf16 %v31502_v31, %v31495_v54  ;;  %v43808_v57 = vpack.c.bf16 %v53228_v42, %v53226_v36 }
 0xc0f   : > { %v31452_v10 = vsub.f32 %v53069_v12, %v31451_v3  ;;  %v31515_v15 = vsub.f32 %v53235_v50, %v31514_v29  ;;  %v43829_v40 = vpack.c.bf16 %v31458_v59, %v31451_v3  ;;  %v53283_v7 = vpack.c.bf16 %v31486_v44, %v31479_v13 }
 0xc10   : > { %43782 = vmatpush3.bf16.msra.mxu1 %v53238_v47  ;;  %v31507_v56 = vand.u32 4294901760, %v53230_v61  ;;  %v43811_v26 = vpack.c.bf16 %v53235_v50, %v53230_v61  ;;  %v53285_v41 = vpack.c.bf16 %v31500_v1, %v31493_v22  ;;  %v31520_v59 = vsub.f32 %v53242_v38, %v53252_v27 }
 0xc11   : > { %40290 = vmatprep.subr.mxu1 %v53781_v25  ;;  %v31453_v46 = vand.u32 4294901760, %v31452_v10  ;;  %v31516_v32 = vand.u32 4294901760, %v31515_v15 }
 0xc12   : > { %v31508_v49 = vsub.f32 %v53230_v61, %v31507_v56  ;;  %v53287_v12 = vpack.c.bf16 %v31514_v29, %v31507_v56  ;;  %v31521_v10 = vand.u32 4294901760, %v31520_v59 }
 0xc13   : > { %v43784_v51 = vpack.c.bf16 %v31460_v16, %v31453_v46 }
 0xc14   : > { %40291 = vmatpush3.msra.mxu1 %v53252_v27  ;;  %v31509_v2 = vand.u32 4294901760, %v31508_v49  ;;  %v31522_v63 = vsub.f32 %v31520_v59, %v31521_v10 }
 0xc15   : > { %43783 = vmatprep.subr.bf16.mxu1 %v44856_v5 }
 0xc16   : > { %v43796_v20 = vpack.c.bf16 %v31516_v32, %v31509_v2  ;;  %v31523_v21 = vand.u32 4294901760, %v31522_v63 }
 0xce0   : > { %v31339_v18 = vpop.f32.mrb[40].mxu0 }
 0xce1   : > { %v43860_v8 = vadd.f32 %v31339_v18, %v30710_v28  ;;  %v40269_v33 = vpop.f32.mrb[41].mxu0 }
 0xce3   : > { %v31343_v4 = vmax.f32 %v43860_v8, 0.0 }
 0xce5   : > { %v31357_v36 = vsel %vm20464_vm8, %v31343_v4, 0 }
 0xce6   : > { %v53293_v42 = vand.u32 4294901760, %v31357_v36 }
 0xce8   : > { %v31439_v61 = vsub.f32 %v31357_v36, %v53293_v42 }
 0xcea   : > { %v31440_v0 = vand.u32 4294901760, %v31439_v61 }
 0xcec   : > { %v31441_v50 = vsub.f32 %v31439_v61, %v31440_v0 }
 0xcee   : > { %v31442_v3 = vand.u32 4294901760, %v31441_v50 }
 0xcf0   : > { %40293 = vmatmul.mubr.f32.vlgmr.msra.gmra.mrb[42].mxu1 %v31442_v3 }
 0xcf1   : > { %43785 = vmatpush3.bf16.msra.mxu1 %v43784_v51  ;;  %40317 = vmatprep.mubr.msk.f32.mxu1 %vm44857_vm9, %v53781_v25 }
 0xcf2   : > { %43786 = vmatprep.subr.bf16.mxu1 %v44856_v5 }
 0xcf5   : > { %43788 = vmatpush3.bf16.msra.mxu1 %v43787_v43 }
 0xcf6   : > { %43789 = vmatprep.subr.bf16.mxu1 %v44856_v5 }
 0xcf9   : > { %43791 = vmatpush3.bf16.msra.mxu1 %v43790_v37 }
 0xcfa   : > { %43792 = vmatprep.subr.bf16.mxu1 %v44856_v5 }
 0xcfd   : > { %43794 = vmatpush3.bf16.msra.mxu1 %v43793_v52 }
 0xcfe   : > { %43795 = vmatprep.subr.bf16.mxu1 %v44856_v5 }
 0xd01   : > { %43797 = vmatpush3.bf16.msra.mxu1 %v43796_v20 }
 0xd02   : > { %40315 = vmatprep.subr.mxu1 %v53781_v25 }
 0xd05   : > { %40316 = vmatpush3.msra.mxu1 %v31523_v21 }
 0xd06   : > { %40318 = vmatmul.mubr.f32.vlgmr.msra.gmra.mrb[42].mxu1 %v53293_v42  ;;  %43798 = vmatprep.subr.bf16.mxu1 %v44856_v5 }
 0xd07   : > { %43800 = vmatpush3.bf16.msra.mxu1 %v43799_v9  ;;  %40342 = vmatprep.mubr.msk.f32.mxu1 %vm44857_vm9, %v53781_v25 }
 0xd08   : > { %43801 = vmatprep.subr.bf16.mxu1 %v44856_v5 }
 0xd0b   : > { %43803 = vmatpush3.bf16.msra.mxu1 %v43802_v62 }
 0xd0c   : > { %43804 = vmatprep.subr.bf16.mxu1 %v44856_v5 }
 0xd0f   : > { %43806 = vmatpush3.bf16.msra.mxu1 %v43805_v55 }
 0xd10   : > { %43807 = vmatprep.subr.bf16.mxu1 %v44856_v5 }
 0xd13   : > { %43809 = vmatpush3.bf16.msra.mxu1 %v43808_v57 }
 0xd14   : > { %43810 = vmatprep.subr.bf16.mxu1 %v44856_v5 }
 0xd17   : > { %43812 = vmatpush3.bf16.msra.mxu1 %v43811_v26 }
 0xd18   : > { %40340 = vmatprep.subr.mxu1 %v53781_v25 }
 0xd1b   : > { %40341 = vmatpush3.msra.mxu1 %v31520_v59 }
 0xd1c   : > { %40343 = vmatmul.mubr.f32.vlgmr.msra.gmra.mrb[42].mxu1 %v31439_v61  ;;  %43813 = vmatprep.subr.bf16.mxu1 %v44856_v5 }
 0xd1d   : > { %43815 = vmatpush3.bf16.msra.mxu1 %v53067_v24  ;;  %40367 = vmatprep.mubr.msk.f32.mxu1 %vm44857_vm9, %v53781_v25 }
 0xd1e   : > { %43816 = vmatprep.subr.bf16.mxu1 %v44856_v5 }
 0xd21   : > { %43818 = vmatpush3.bf16.msra.mxu1 %v53080_v58 }
 0xd22   : > { %43819 = vmatprep.subr.bf16.mxu1 %v44856_v5 }
 0xd25   : > { %43821 = vmatpush3.bf16.msra.mxu1 %v53204_v23 }
 0xd26   : > { %43822 = vmatprep.subr.bf16.mxu1 %v44856_v5 }
 0xd29   : > { %43824 = vmatpush3.bf16.msra.mxu1 %v53224_v45 }
 0xd2a   : > { %43825 = vmatprep.subr.bf16.mxu1 %v44856_v5 }
 0xd2d   : > { %43827 = vmatpush3.bf16.msra.mxu1 %v53238_v47 }
 0xd2e   : > { %40365 = vmatprep.subr.mxu1 %v53781_v25 }
 0xd31   : > { %40366 = vmatpush3.msra.mxu1 %v53252_v27 }
 0xd32   : > { %40368 = vmatmul.mubr.f32.vlgmr.msra.gmra.mrb[42].mxu1 %v31440_v0  ;;  %43828 = vmatprep.subr.bf16.mxu1 %v44856_v5 }
 0xd33   : > { %43830 = vmatpush3.bf16.msra.mxu1 %v43829_v40  ;;  %40392 = vmatprep.mubr.msk.f32.mxu1 %vm44857_vm9, %v53781_v25 }
 0xd34   : > { %43831 = vmatprep.subr.bf16.mxu1 %v44856_v5 }
 0xd37   : > { %43833 = vmatpush3.bf16.msra.mxu1 %v53281_v30 }
 0xd38   : > { %43834 = vmatprep.subr.bf16.mxu1 %v44856_v5 }
 0xd3b   : > { %43836 = vmatpush3.bf16.msra.mxu1 %v53283_v7 }
 0xd3c   : > { %43837 = vmatprep.subr.bf16.mxu1 %v44856_v5 }
 0xd3f   : > { %43839 = vmatpush3.bf16.msra.mxu1 %v53285_v41 }
 0xd40   : > { %43840 = vmatprep.subr.bf16.mxu1 %v44856_v5 }
 0xd43   : > { %43842 = vmatpush3.bf16.msra.mxu1 %v53287_v12 }
 0xd44   : > { %40390 = vmatprep.subr.mxu1 %v53781_v25 }
 0xd47   : > { %40391 = vmatpush3.msra.mxu1 %v31521_v10 }
 0xd48   : > { %40393 = vmatmul.mubr.f32.vlgmr.msra.gmra.mrb[42].mxu1 %v53293_v42  ;;  %43843 = vmatprep.subr.bf16.mxu1 %v44856_v5 }
 0xd49   : > { %43845 = vmatpush3.bf16.msra.mxu1 %v53067_v24  ;;  %40417 = vmatprep.mubr.msk.f32.mxu1 %vm44857_vm9, %v53781_v25  ;;  %v31355_v24 = vld [vmem:[%s53418_s12] sm:$0x1] }
 0xd4a   : > { %43846 = vmatprep.subr.bf16.mxu1 %v44856_v5 }
 0xd4d   : > { %43848 = vmatpush3.bf16.msra.mxu1 %v53080_v58 }
 0xd4e   : > { %43849 = vmatprep.subr.bf16.mxu1 %v44856_v5 }
 0xd51   : > { %43851 = vmatpush3.bf16.msra.mxu1 %v53204_v23 }
 0xd52   : > { %43852 = vmatprep.subr.bf16.mxu1 %v44856_v5 }
 0xd55   : > { %43854 = vmatpush3.bf16.msra.mxu1 %v53224_v45 }
 0xd56   : > { %43855 = vmatprep.subr.bf16.mxu1 %v44856_v5 }
 0xd59   : > { %43857 = vmatpush3.bf16.msra.mxu1 %v53238_v47 }
 0xd5a   : > { %40415 = vmatprep.subr.mxu1 %v53781_v25 }
 0xd5d   : > { %40416 = vmatpush3.msra.mxu1 %v53252_v27 }
 0xd5e   : > { %40418 = vmatmul.mubr.f32.vlgmr.msra.gmra.mrb[42].mxu1 %v53293_v42 }
 0xe31   : > { %v31934_v58 = vpop.f32.mrb[42].mxu1 }
 0xe32   : > { %v43861_v5 = vadd.f32 %v31934_v58, %v31355_v24  ;;  %v40419_v23 = vpop.f32.mrb[43].mxu1 }
 0xe34   : > { %31939 = vst.msk [vmem:[%s432_s23] sm:$0x1] %vm31938_vm15, %v43861_v5 }
 0xe35   : > { %44804 = shalt.err (!%p44801_p3)
}
 0xe36   : > { %s44805_s20 = scalar_lea.hbm %s53364_s16, 16  ;;  %s44809_s30 = scalar_lea.hbm %s53419_s13, 32 }
 0xe37   : > { %p44806_p4 = scmp.ne.s32.totalorder %s53364_s16, %s44805_s20  ;;  %p44810_p9 = scmp.lt.u32.totalorder %s53364_s16, %s53419_s13 }
 0xe38   : > { %p44811_p10 = scmp.lt.u32.totalorder %s44809_s30, %s44805_s20  ;;  %p44813_p12 = scmp.lt.u32.totalorder %s44805_s20, %s53364_s16 }
 0xe39   : > { %p44807_p7 = pnand %p44806_p4, %p44967_p5 }
 0xe3a   : > { %p44812_p11 = por %p44811_p10, %p44810_p9 }
 0xe3b   : > { %p44808_p8 = pneg %p44807_p7 }
 0xe3c   : > { %p44814_p13 = por %p44813_p12, %p44812_p11 }
 0xe3e   : > { %p44815_p0 = pnand %p44814_p13, %p44808_p8 }
 0xe40   : > { %44818 = shalt.err (!%p44815_p0)
}
 0xe41   : > { %44749 = dma.vmem_to_hbm [thread:$0]  (%p44967_p5), %s53366_s24, 16, %s53364_s16, %s31941_s27  }
 0xe42 PF: > { %p44755_p1 = scmp.ge.s32.totalorder %s44853_s28, 2  ;;  %s31965_s0 = sand.u32 1, %s44841_s25  }
 0xe43   : > { %s31966_s17 = scalar_lea.sflag [#allocation5], %s31965_s0 }
 0xe44   : > { %p44752_p2 = pnand %p44755_p1, %p44971_p6 }
 0xe46   : > { %44836 = dma.done.wait (!%p44752_p2), %s31966_s17, 16  }
 0xe47   : > { %44838 = vsyncadd (!%p44752_p2), %s31966_s17, 4294967280  ;;  %s53795_s21 = sld [smem:[#allocation7_spill]]  ;;  %s53796_s27 = sld [smem:[#allocation8_spill]] }
 0xe48   : > { %p23_p3 = scmp.ge.s32.totalorder %s44954_s14, 4   ;;  %s53797_s25 = smov %s44845_s26 }
 0xe49   : > { %s53799_s28 = smov %s44954_s14 }
 0xe4a   :  { %25 = sbr.rel (!%p23_p3) target bundleno = 5 (0x5), region = 149 }
 0xe4d   : > { %s53798_s26 = smov %s53795_s21 }
 0xe51   :  { %31970 = vsyncpa [#allocation5], 1 }
 0xe52   :  { %31972 = vsyncpa [#allocation5 + $0x1], 1 }

</bundles_post_ra>
